<compile_context>
chip_gen: v6e
topology: v6e:2x2x1
jax: 0.10.0
libtpu: 0.0.40
codegen_flags: <defaults>
</compile_context>

<pallas_src>
import jax
import jax.numpy as jnp
from jax import lax
from jax.experimental import pallas as pl
from jax.experimental.pallas import tpu as pltpu

_BN_EPS = 1e-5

# Tap ordering: the 9 "inner" (3x3) taps first, then the remaining 16 of the 5x5.
_TAPS5 = ([(dy, dx) for dy in (-1, 0, 1) for dx in (-1, 0, 1)] +
          [(dy, dx) for dy in (-2, -1, 0, 1, 2) for dx in (-2, -1, 0, 1, 2)
           if abs(dy) > 1 or abs(dx) > 1])
_N_TAPS = len(_TAPS5)        # 25
_N_INNER = 9                 # 3x3 taps (first 9 entries of _TAPS5)


# ----------------------------------------------------------------------------
# Host-side, one-time parameter preparation (fold BN into weights, im2col).
# ----------------------------------------------------------------------------
def _fold_bn_scale_bias(gamma, beta, mean, var, eps=_BN_EPS):
    scale = gamma / jnp.sqrt(var + eps)
    bias = beta - mean * scale
    return scale.astype(jnp.float32), bias.reshape(-1, 1).astype(jnp.float32)


def _im2col_dense(w, scale, ksize):
    """Dense conv weight (Co,Ci,K,K) with folded BN scale -> (Co, n_taps*Ci) bf16."""
    co = w.shape[0]
    pad = ksize // 2
    ws = w * scale.reshape(co, 1, 1, 1)
    taps = _TAPS5[:_N_INNER] if ksize == 3 else _TAPS5
    cols = [ws[:, :, dy + pad, dx + pad] for (dy, dx) in taps]
    return jnp.concatenate(cols, axis=1).astype(jnp.bfloat16)


def _im2col_grouped5(w, scale, c1):
    """Grouped 5x5 weight (Co, Ci/g, 5, 5), groups == Co -> block-diagonal
    densified im2col weight (Co, 25*c1) bf16."""
    co, ci_g = w.shape[:2]
    assert co * ci_g == c1
    ws = w * scale.reshape(co, 1, 1, 1)
    eye = jnp.eye(co, dtype=jnp.float32)
    cols = []
    for (dy, dx) in _TAPS5:
        tap = ws[:, :, dy + 2, dx + 2]                               # (co, ci_g)
        cols.append((eye[:, :, None] * tap[:, None, :]).reshape(co, c1))
    return jnp.concatenate(cols, axis=1).astype(jnp.bfloat16)        # (co, 25*c1)


def _depthwise5_taps(w, scale):
    """Depthwise 5x5 weight (C,1,5,5) -> per-tap per-channel scale (25, C, 1) f32."""
    c = w.shape[0]
    ws = w[:, 0] * scale.reshape(c, 1, 1)
    return jnp.stack([ws[:, dy + 2, dx + 2] for (dy, dx) in _TAPS5]
                     ).reshape(_N_TAPS, c, 1).astype(jnp.float32)


def _boundary_masks(H, W, B):
    """0/1 zero-padding masks per tap, tiled for B lane-packed samples: (25,1,B*HW)."""
    hw = H * W
    idx = jnp.arange(hw, dtype=jnp.int32)
    h, w = idx // W, idx % W
    rows = []
    for (dy, dx) in _TAPS5:
        ok = ((h + dy >= 0) & (h + dy < H) & (w + dx >= 0) & (w + dx < W))
        rows.append(jnp.tile(ok.astype(jnp.float32), B))
    return jnp.stack(rows).reshape(_N_TAPS, 1, B * hw)


# ----------------------------------------------------------------------------
# Fused ghostbottleneck2 kernel (B lane-packed samples per grid step).
# ----------------------------------------------------------------------------
def _make_kernel(W, HW, B, c1, c2):
    ch = c2 // 2                 # output channels of ghost module 1
    L = B * HW                   # lane width of one grid step

    def kernel(x_ref, masks_ref,
               w1a_ref, b1a_ref, w1b_ref, b1b_ref,        # gm1: 3x3 dense / 5x5 grouped
               wse1_ref, bse1_ref, wse2_ref, bse2_ref,    # SE block
               w2a_ref, b2a_ref, w2b_ref, b2b_ref,        # gm2: 3x3 dense / 5x5 depthwise
               out_ref,                                   # (c2, L) output block
               stack1_ref, stack2_ref):                   # bf16 im2col stacks (VMEM)

        def shifted(v, t):
            """v[:, i + dy*W + dx] with zero padding at the H/W borders (masked roll)."""
            dy, dx = _TAPS5[t]
            if dy == 0 and dx == 0:
                return v
            d = dy * W + dx
            r = pltpu.roll(v, (-d) % L, axis=1)            # XLU lane rotation
            return r * masks_ref[t]                        # (C, L) * (1, L)

        def bias_silu(acc, b_ref):
            y = acc + b_ref[...]                           # folded BatchNorm bias
            return y * jax.nn.sigmoid(y)                   # SiLU (EUP)

        # ---- ghost module 1: one shared 25-tap im2col stack of x ------------------
        x = x_ref[...].astype(jnp.float32)                 # (c1, L)
        for t in range(_N_TAPS):
            stack1_ref[t * c1:(t + 1) * c1, :] = shifted(x, t).astype(jnp.bfloat16)
        ya = bias_silu(jnp.dot(w1a_ref[...], stack1_ref[0:_N_INNER * c1, :],
                               preferred_element_type=jnp.float32), b1a_ref)
        yb = bias_silu(jnp.dot(w1b_ref[...], stack1_ref[...],
                               preferred_element_type=jnp.float32), b1b_ref)
        y1 = jnp.concatenate([ya, yb], axis=0)             # (ch, L): concat fused

        # ---- SE block: per-sample squeeze/excite on a single 128-lane tile --------
        segs = []
        for b in range(B):
            seg = y1[:, b * HW:(b + 1) * HW]
            pooled = jnp.broadcast_to(jnp.mean(seg, axis=1, keepdims=True), (ch, 128))
            hid = jnp.maximum(
                jnp.dot(wse1_ref[...], pooled, preferred_element_type=jnp.float32)
                + bse1_ref[...], 0.0)
            gate = jax.nn.sigmoid(
                jnp.dot(wse2_ref[...], hid, preferred_element_type=jnp.float32)
                + bse2_ref[...])
            segs.append(seg * gate[:, 0:1])                # (ch, 1) gate broadcast
        y1 = jnp.concatenate(segs, axis=1) if B > 1 else segs[0]

        # ---- ghost module 2: rolled y1 taps shared by the 3x3 (MXU im2col) and ----
        # ---- the 5x5 depthwise (VPU broadcast-FMA) branches ------------------------
        acc_dw = jnp.zeros((ch, L), jnp.float32)
        for t in range(_N_TAPS):
            yt = shifted(y1, t)
            acc_dw = acc_dw + w2b_ref[t] * yt              # depthwise: per-channel FMA
            if t < _N_INNER:
                stack2_ref[t * ch:(t + 1) * ch, :] = yt.astype(jnp.bfloat16)
        out_a = bias_silu(jnp.dot(w2a_ref[...], stack2_ref[...],
                                  preferred_element_type=jnp.float32), b2a_ref)
        out_b = bias_silu(acc_dw, b2b_ref)
        out_ref[0:ch, :] = out_a.astype(out_ref.dtype)     # concat fused into slabs
        out_ref[ch:c2, :] = out_b.astype(out_ref.dtype)

    return kernel


def ghostbottleneck2_pallas(x, p, samples_per_step=None):
    """Forward pass of ghostbottleneck2 (s = 1) as a single fused Pallas kernel."""
    N, C1, H, W = x.shape
    HW = H * W
    cq = p["w1a"].shape[0]          # c2 // 4
    ch = p["w2a"].shape[0]          # c2 // 2
    c2 = 2 * ch
    cse = p["wse1"].shape[0]
    assert ch == 2 * cq
    assert HW % 128 == 0, "flattened spatial dim must be lane-aligned (multiple of 128)"
    assert C1 == p["w1b"].shape[0] * p["w1b"].shape[1], "need c1 % (c2//4) == 0"

    if samples_per_step is None:
        samples_per_step = max(1, min(N, 2048 // HW))
    while N % samples_per_step:
        samples_per_step -= 1
    B = samples_per_step
    L = B * HW

    # ---- one-time parameter prep: fold BN into weights, im2col / tap-major, bf16 ----
    s1a, b1a = _fold_bn_scale_bias(p["g1a"], p["b1a"], p["m1a"], p["v1a"])
    s1b, b1b = _fold_bn_scale_bias(p["g1b"], p["b1b"], p["m1b"], p["v1b"])
    s2a, b2a = _fold_bn_scale_bias(p["g2a"], p["b2a"], p["m2a"], p["v2a"])
    s2b, b2b = _fold_bn_scale_bias(p["g2b"], p["b2b"], p["m2b"], p["v2b"])
    w1a = _im2col_dense(p["w1a"], s1a, 3)                 # (cq, 9*C1)   bf16
    w1b = _im2col_grouped5(p["w1b"], s1b, C1)             # (cq, 25*C1)  bf16
    w2a = _im2col_dense(p["w2a"], s2a, 3)                 # (ch, 9*ch)   bf16
    w2b = _depthwise5_taps(p["w2b"], s2b)                 # (25, ch, 1)  f32
    wse1 = p["wse1"].reshape(cse, ch).astype(jnp.float32)
    bse1 = p["bse1"].reshape(cse, 1).astype(jnp.float32)
    wse2 = p["wse2"].reshape(ch, cse).astype(jnp.float32)
    bse2 = p["bse2"].reshape(ch, 1).astype(jnp.float32)
    masks = _boundary_masks(H, W, B)                      # (25, 1, L)   f32

    # ---- lane-pack B samples per grid step: (N,C,H,W) -> (C, N*H*W) ------------------
    xt = jnp.transpose(x, (1, 0, 2, 3)).reshape(C1, N * HW)

    operands = [xt, masks,
                w1a, b1a, w1b, b1b,
                wse1, bse1, wse2, bse2,
                w2a, b2a, w2b, b2b]

    def _const_spec(a):
        # Small invariant blocks (constant index_map); total <100 KB, so default
        # double-buffering costs almost nothing (pl.Buffered(1) not needed).
        return pl.BlockSpec(a.shape, lambda i, _r=a.ndim: (0,) * _r)

    in_specs = [pl.BlockSpec((C1, L), lambda i: (0, i))]
    in_specs += [_const_spec(a) for a in operands[1:]]

    scratch_bytes = (_N_TAPS * C1 + _N_INNER * ch) * L * 2          # bf16 im2col stacks
    vmem_limit = min(32 * 1024 * 1024,
                     max(8 * 1024 * 1024, 3 * scratch_bytes + 4 * 1024 * 1024))

    out = pl.pallas_call(
        _make_kernel(W, HW, B, C1, c2),
        grid=(N // B,),
        in_specs=in_specs,
        out_specs=pl.BlockSpec((c2, L), lambda i: (0, i)),
        out_shape=jax.ShapeDtypeStruct((c2, N * HW), x.dtype),
        scratch_shapes=[pltpu.VMEM((_N_TAPS * C1, L), jnp.bfloat16),
                        pltpu.VMEM((_N_INNER * ch, L), jnp.bfloat16)],
        compiler_params=pltpu.CompilerParams(
            dimension_semantics=("parallel",),
            vmem_limit_bytes=vmem_limit),
    )(*operands)
    return jnp.transpose(out.reshape(c2, N, H, W), (1, 0, 2, 3))


# ----------------------------------------------------------------------------
# Parameter construction + pure-JAX reference (independent of the kernel).
# ----------------------------------------------------------------------------
def init_ghostbottleneck2_params(key, c1, c2):
    ch = c2 // 2     # ghost hidden width (output of ghost module 1)
    cq = ch // 2     # per-branch width inside ghost module 1
    cse = ch // 4    # SE bottleneck width
    assert c1 % cq == 0, "grouped 5x5 conv of ghost module 1 needs c1 % (c2//4) == 0"
    assert cse >= 1

    keys = iter(jax.random.split(key, 32))

    def nrm(shape, scale=0.1):
        return scale * jax.random.normal(next(keys), shape, dtype=jnp.float32)

    p = {
        # ghost module 1: cv1 = 3x3 dense conv, cv2 = 5x5 grouped conv (groups=cq)
        "w1a": nrm((cq, c1, 3, 3)),
        "w1b": nrm((cq, c1 // cq, 5, 5)),
        # ghost module 2: cv1 = 3x3 dense conv, cv2 = 5x5 depthwise conv (groups=ch)
        "w2a": nrm((ch, ch, 3, 3)),
        "w2b": nrm((ch, 1, 5, 5)),
        # SE block 1x1 convs (bias=True in PyTorch)
        "wse1": nrm((cse, ch, 1, 1)),
        "bse1": nrm((cse,)),
        "wse2": nrm((ch, cse, 1, 1)),
        "bse2": nrm((ch,)),
    }
    for name, c in (("1a", cq), ("1b", cq), ("2a", ch), ("2b", ch)):
        p["g" + name] = 1.0 + nrm((c,))                         # BN gamma
        p["b" + name] = nrm((c,))                               # BN beta
        p["m" + name] = nrm((c,))                               # BN running mean
        p["v" + name] = jax.random.uniform(next(keys), (c,), jnp.float32, 0.5, 1.5)
    return p


def _conv_bn_silu_ref(x, w, groups, pad, gamma, beta, mean, var):
    y = lax.conv_general_dilated(
        x, w, window_strides=(1, 1), padding=[(pad, pad), (pad, pad)],
        dimension_numbers=("NCHW", "OIHW", "NCHW"), feature_group_count=groups)
    y = (y - mean.reshape(1, -1, 1, 1)) * lax.rsqrt(var.reshape(1, -1, 1, 1) + _BN_EPS)
    y = y * gamma.reshape(1, -1, 1, 1) + beta.reshape(1, -1, 1, 1)
    return y * jax.nn.sigmoid(y)                                # SiLU


def ghostbottleneck2_ref(x, p):
    cq = p["w1a"].shape[0]
    ch = p["w2a"].shape[0]
    dn = ("NCHW", "OIHW", "NCHW")
    # ghost module 1
    a = _conv_bn_silu_ref(x, p["w1a"], 1, 1, p["g1a"], p["b1a"], p["m1a"], p["v1a"])
    b = _conv_bn_silu_ref(x, p["w1b"], cq, 2, p["g1b"], p["b1b"], p["m1b"], p["v1b"])
    y = jnp.concatenate([a, b], axis=1)
    # SE block
    s = jnp.mean(y, axis=(2, 3), keepdims=True)
    h = jnp.maximum(
        lax.conv_general_dilated(s, p["wse1"], (1, 1), "VALID", dimension_numbers=dn)
        + p["bse1"].reshape(1, -1, 1, 1), 0.0)
    g = jax.nn.sigmoid(
        lax.conv_general_dilated(h, p["wse2"], (1, 1), "VALID", dimension_numbers=dn)
        + p["bse2"].reshape(1, -1, 1, 1))
    y = y * g
    # ghost module 2
    a2 = _conv_bn_silu_ref(y, p["w2a"], 1, 1, p["g2a"], p["b2a"], p["m2a"], p["v2a"])
    b2 = _conv_bn_silu_ref(y, p["w2b"], ch, 2, p["g2b"], p["b2b"], p["m2b"], p["v2b"])
    return jnp.concatenate([a2, b2], axis=1)


if __name__ == "__main__":
    root = jax.random.PRNGKey(0)
    kx, kp = jax.random.split(root)

    # ghostbottleneck2(c1=16, c2=32) on a small NCHW feature map (2, 16, 16, 16).
    # (c1 must be divisible by c2 // 4 for the grouped 5x5 conv of ghost module 1.)
    N, C1, C2, H, W = 2, 16, 32, 16, 16
    x = jax.random.normal(kx, (N, C1, H, W), dtype=jnp.float32)
    params = init_ghostbottleneck2_params(kp, C1, C2)

    fwd = jax.jit(ghostbottleneck2_pallas)
    out = jax.block_until_ready(fwd(x, params))

    ref = jax.block_until_ready(jax.jit(ghostbottleneck2_ref)(x, params))
    assert out.shape == (N, C2, H, W), out.shape
    max_err = float(jnp.max(jnp.abs(out - ref)))
    # bf16 MXU operands vs XLA's f32 conv reference -> small absolute differences.
    assert jnp.allclose(out, ref, atol=1e-1, rtol=1e-1), f"max abs err = {max_err}"

    print("KERNEL_OK")
</pallas_src>

<mosaic_0001>
module attributes {stable_mosaic.version = 11 : i64} {
  func.func @kernel(%arg0: i32, %arg1: memref<16x512xf32, #tpu.memory_space<vmem>>, %arg2: memref<25x1x512xf32, #tpu.memory_space<vmem>>, %arg3: memref<8x144xbf16, #tpu.memory_space<vmem>>, %arg4: memref<8x1xf32, #tpu.memory_space<vmem>>, %arg5: memref<8x400xbf16, #tpu.memory_space<vmem>>, %arg6: memref<8x1xf32, #tpu.memory_space<vmem>>, %arg7: memref<4x16xf32, #tpu.memory_space<vmem>>, %arg8: memref<4x1xf32, #tpu.memory_space<vmem>>, %arg9: memref<16x4xf32, #tpu.memory_space<vmem>>, %arg10: memref<16x1xf32, #tpu.memory_space<vmem>>, %arg11: memref<16x144xbf16, #tpu.memory_space<vmem>>, %arg12: memref<16x1xf32, #tpu.memory_space<vmem>>, %arg13: memref<25x16x1xf32, #tpu.memory_space<vmem>>, %arg14: memref<16x1xf32, #tpu.memory_space<vmem>>, %arg15: memref<32x512xf32, #tpu.memory_space<vmem>>, %arg16: memref<400x512xbf16, #tpu.memory_space<vmem>>, %arg17: memref<144x512xbf16, #tpu.memory_space<vmem>>) attributes {dimension_semantics = [#tpu.dimension_semantics<parallel>], iteration_bounds = array<i64: 1>, scalar_prefetch = 0 : i64, scratch_operands = 2 : i64, tpu.core_type = #tpu.core_type<tc>, window_params = [{transform_indices = @transform_0, window_bounds = array<i64: 16, 512>}, {pipeline_mode = #tpu.pipeline_mode<synchronous>, transform_indices = @transform_1, window_bounds = array<i64: 25, 1, 512>}, {pipeline_mode = #tpu.pipeline_mode<synchronous>, transform_indices = @transform_2, window_bounds = array<i64: 8, 144>}, {pipeline_mode = #tpu.pipeline_mode<synchronous>, transform_indices = @transform_3, window_bounds = array<i64: 8, 1>}, {pipeline_mode = #tpu.pipeline_mode<synchronous>, transform_indices = @transform_4, window_bounds = array<i64: 8, 400>}, {pipeline_mode = #tpu.pipeline_mode<synchronous>, transform_indices = @transform_5, window_bounds = array<i64: 8, 1>}, {pipeline_mode = #tpu.pipeline_mode<synchronous>, transform_indices = @transform_6, window_bounds = array<i64: 4, 16>}, {pipeline_mode = #tpu.pipeline_mode<synchronous>, transform_indices = @transform_7, window_bounds = array<i64: 4, 1>}, {pipeline_mode = #tpu.pipeline_mode<synchronous>, transform_indices = @transform_8, window_bounds = array<i64: 16, 4>}, {pipeline_mode = #tpu.pipeline_mode<synchronous>, transform_indices = @transform_9, window_bounds = array<i64: 16, 1>}, {pipeline_mode = #tpu.pipeline_mode<synchronous>, transform_indices = @transform_10, window_bounds = array<i64: 16, 144>}, {pipeline_mode = #tpu.pipeline_mode<synchronous>, transform_indices = @transform_11, window_bounds = array<i64: 16, 1>}, {pipeline_mode = #tpu.pipeline_mode<synchronous>, transform_indices = @transform_12, window_bounds = array<i64: 25, 16, 1>}, {pipeline_mode = #tpu.pipeline_mode<synchronous>, transform_indices = @transform_13, window_bounds = array<i64: 16, 1>}, {transform_indices = @transform_14, window_bounds = array<i64: 32, 512>}]} {
    %c0 = arith.constant 0 : index
    %c0_0 = arith.constant 0 : index
    %0 = vector.load %arg1[%c0, %c0_0] : memref<16x512xf32, #tpu.memory_space<vmem>>, vector<16x512xf32>
    %c17_i32 = arith.constant 17 : i32
    %1 = tpu.dynamic_rotate %0 by %c17_i32 dim 1 : vector<16x512xf32>, i32 -> vector<16x512xf32>
    %c0_1 = arith.constant 0 : index
    %c0_2 = arith.constant 0 : index
    %c0_3 = arith.constant 0 : index
    %2 = vector.load %arg2[%c0_1, %c0_2, %c0_3] : memref<25x1x512xf32, #tpu.memory_space<vmem>>, vector<1x1x512xf32>
    %3 = vector.shape_cast %2 : vector<1x1x512xf32> to vector<1x512xf32>
    %4 = vector.broadcast %3 : vector<1x512xf32> to vector<16x512xf32>
    %5 = arith.mulf %1, %4 : vector<16x512xf32>
    %6 = arith.truncf %5 : vector<16x512xf32> to vector<16x512xbf16>
    %c0_4 = arith.constant 0 : index
    %c0_5 = arith.constant 0 : index
    %7 = vector.load %arg16[%c0_4, %c0_5] : memref<400x512xbf16, #tpu.memory_space<vmem>>, vector<16x512xbf16>
    tpu.vector_store %arg16[%c0_4, %c0_5], %6 {strides = array<i32>} : memref<400x512xbf16, #tpu.memory_space<vmem>>, vector<16x512xbf16>,
    %c16_i32 = arith.constant 16 : i32
    %8 = tpu.dynamic_rotate %0 by %c16_i32 dim 1 : vector<16x512xf32>, i32 -> vector<16x512xf32>
    %c1 = arith.constant 1 : index
    %c0_6 = arith.constant 0 : index
    %c0_7 = arith.constant 0 : index
    %9 = vector.load %arg2[%c1, %c0_6, %c0_7] : memref<25x1x512xf32, #tpu.memory_space<vmem>>, vector<1x1x512xf32>
    %10 = vector.shape_cast %9 : vector<1x1x512xf32> to vector<1x512xf32>
    %11 = vector.broadcast %10 : vector<1x512xf32> to vector<16x512xf32>
    %12 = arith.mulf %8, %11 : vector<16x512xf32>
    %13 = arith.truncf %12 : vector<16x512xf32> to vector<16x512xbf16>
    %c16 = arith.constant 16 : index
    %c0_8 = arith.constant 0 : index
    %14 = vector.load %arg16[%c16, %c0_8] : memref<400x512xbf16, #tpu.memory_space<vmem>>, vector<16x512xbf16>
    tpu.vector_store %arg16[%c16, %c0_8], %13 {strides = array<i32>} : memref<400x512xbf16, #tpu.memory_space<vmem>>, vector<16x512xbf16>,
    %c15_i32 = arith.constant 15 : i32
    %15 = tpu.dynamic_rotate %0 by %c15_i32 dim 1 : vector<16x512xf32>, i32 -> vector<16x512xf32>
    %c2 = arith.constant 2 : index
    %c0_9 = arith.constant 0 : index
    %c0_10 = arith.constant 0 : index
    %16 = vector.load %arg2[%c2, %c0_9, %c0_10] : memref<25x1x512xf32, #tpu.memory_space<vmem>>, vector<1x1x512xf32>
    %17 = vector.shape_cast %16 : vector<1x1x512xf32> to vector<1x512xf32>
    %18 = vector.broadcast %17 : vector<1x512xf32> to vector<16x512xf32>
    %19 = arith.mulf %15, %18 : vector<16x512xf32>
    %20 = arith.truncf %19 : vector<16x512xf32> to vector<16x512xbf16>
    %c32 = arith.constant 32 : index
    %c0_11 = arith.constant 0 : index
    %21 = vector.load %arg16[%c32, %c0_11] : memref<400x512xbf16, #tpu.memory_space<vmem>>, vector<16x512xbf16>
    tpu.vector_store %arg16[%c32, %c0_11], %20 {strides = array<i32>} : memref<400x512xbf16, #tpu.memory_space<vmem>>, vector<16x512xbf16>,
    %c1_i32 = arith.constant 1 : i32
    %22 = tpu.dynamic_rotate %0 by %c1_i32 dim 1 : vector<16x512xf32>, i32 -> vector<16x512xf32>
    %c3 = arith.constant 3 : index
    %c0_12 = arith.constant 0 : index
    %c0_13 = arith.constant 0 : index
    %23 = vector.load %arg2[%c3, %c0_12, %c0_13] : memref<25x1x512xf32, #tpu.memory_space<vmem>>, vector<1x1x512xf32>
    %24 = vector.shape_cast %23 : vector<1x1x512xf32> to vector<1x512xf32>
    %25 = vector.broadcast %24 : vector<1x512xf32> to vector<16x512xf32>
    %26 = arith.mulf %22, %25 : vector<16x512xf32>
    %27 = arith.truncf %26 : vector<16x512xf32> to vector<16x512xbf16>
    %c48 = arith.constant 48 : index
    %c0_14 = arith.constant 0 : index
    %28 = vector.load %arg16[%c48, %c0_14] : memref<400x512xbf16, #tpu.memory_space<vmem>>, vector<16x512xbf16>
    tpu.vector_store %arg16[%c48, %c0_14], %27 {strides = array<i32>} : memref<400x512xbf16, #tpu.memory_space<vmem>>, vector<16x512xbf16>,
    %29 = arith.truncf %0 : vector<16x512xf32> to vector<16x512xbf16>
    %c64 = arith.constant 64 : index
    %c0_15 = arith.constant 0 : index
    %30 = vector.load %arg16[%c64, %c0_15] : memref<400x512xbf16, #tpu.memory_space<vmem>>, vector<16x512xbf16>
    tpu.vector_store %arg16[%c64, %c0_15], %29 {strides = array<i32>} : memref<400x512xbf16, #tpu.memory_space<vmem>>, vector<16x512xbf16>,
    %c511_i32 = arith.constant 511 : i32
    %31 = tpu.dynamic_rotate %0 by %c511_i32 dim 1 : vector<16x512xf32>, i32 -> vector<16x512xf32>
    %c5 = arith.constant 5 : index
    %c0_16 = arith.constant 0 : index
    %c0_17 = arith.constant 0 : index
    %32 = vector.load %arg2[%c5, %c0_16, %c0_17] : memref<25x1x512xf32, #tpu.memory_space<vmem>>, vector<1x1x512xf32>
    %33 = vector.shape_cast %32 : vector<1x1x512xf32> to vector<1x512xf32>
    %34 = vector.broadcast %33 : vector<1x512xf32> to vector<16x512xf32>
    %35 = arith.mulf %31, %34 : vector<16x512xf32>
    %36 = arith.truncf %35 : vector<16x512xf32> to vector<16x512xbf16>
    %c80 = arith.constant 80 : index
    %c0_18 = arith.constant 0 : index
    %37 = vector.load %arg16[%c80, %c0_18] : memref<400x512xbf16, #tpu.memory_space<vmem>>, vector<16x512xbf16>
    tpu.vector_store %arg16[%c80, %c0_18], %36 {strides = array<i32>} : memref<400x512xbf16, #tpu.memory_space<vmem>>, vector<16x512xbf16>,
    %c497_i32 = arith.constant 497 : i32
    %38 = tpu.dynamic_rotate %0 by %c497_i32 dim 1 : vector<16x512xf32>, i32 -> vector<16x512xf32>
    %c6 = arith.constant 6 : index
    %c0_19 = arith.constant 0 : index
    %c0_20 = arith.constant 0 : index
    %39 = vector.load %arg2[%c6, %c0_19, %c0_20] : memref<25x1x512xf32, #tpu.memory_space<vmem>>, vector<1x1x512xf32>
    %40 = vector.shape_cast %39 : vector<1x1x512xf32> to vector<1x512xf32>
    %41 = vector.broadcast %40 : vector<1x512xf32> to vector<16x512xf32>
    %42 = arith.mulf %38, %41 : vector<16x512xf32>
    %43 = arith.truncf %42 : vector<16x512xf32> to vector<16x512xbf16>
    %c96 = arith.constant 96 : index
    %c0_21 = arith.constant 0 : index
    %44 = vector.load %arg16[%c96, %c0_21] : memref<400x512xbf16, #tpu.memory_space<vmem>>, vector<16x512xbf16>
    tpu.vector_store %arg16[%c96, %c0_21], %43 {strides = array<i32>} : memref<400x512xbf16, #tpu.memory_space<vmem>>, vector<16x512xbf16>,
    %c496_i32 = arith.constant 496 : i32
    %45 = tpu.dynamic_rotate %0 by %c496_i32 dim 1 : vector<16x512xf32>, i32 -> vector<16x512xf32>
    %c7 = arith.constant 7 : index
    %c0_22 = arith.constant 0 : index
    %c0_23 = arith.constant 0 : index
    %46 = vector.load %arg2[%c7, %c0_22, %c0_23] : memref<25x1x512xf32, #tpu.memory_space<vmem>>, vector<1x1x512xf32>
    %47 = vector.shape_cast %46 : vector<1x1x512xf32> to vector<1x512xf32>
    %48 = vector.broadcast %47 : vector<1x512xf32> to vector<16x512xf32>
    %49 = arith.mulf %45, %48 : vector<16x512xf32>
    %50 = arith.truncf %49 : vector<16x512xf32> to vector<16x512xbf16>
    %c112 = arith.constant 112 : index
    %c0_24 = arith.constant 0 : index
    %51 = vector.load %arg16[%c112, %c0_24] : memref<400x512xbf16, #tpu.memory_space<vmem>>, vector<16x512xbf16>
    tpu.vector_store %arg16[%c112, %c0_24], %50 {strides = array<i32>} : memref<400x512xbf16, #tpu.memory_space<vmem>>, vector<16x512xbf16>,
    %c495_i32 = arith.constant 495 : i32
    %52 = tpu.dynamic_rotate %0 by %c495_i32 dim 1 : vector<16x512xf32>, i32 -> vector<16x512xf32>
    %c8 = arith.constant 8 : index
    %c0_25 = arith.constant 0 : index
    %c0_26 = arith.constant 0 : index
    %53 = vector.load %arg2[%c8, %c0_25, %c0_26] : memref<25x1x512xf32, #tpu.memory_space<vmem>>, vector<1x1x512xf32>
    %54 = vector.shape_cast %53 : vector<1x1x512xf32> to vector<1x512xf32>
    %55 = vector.broadcast %54 : vector<1x512xf32> to vector<16x512xf32>
    %56 = arith.mulf %52, %55 : vector<16x512xf32>
    %57 = arith.truncf %56 : vector<16x512xf32> to vector<16x512xbf16>
    %c128 = arith.constant 128 : index
    %c0_27 = arith.constant 0 : index
    %58 = vector.load %arg16[%c128, %c0_27] : memref<400x512xbf16, #tpu.memory_space<vmem>>, vector<16x512xbf16>
    tpu.vector_store %arg16[%c128, %c0_27], %57 {strides = array<i32>} : memref<400x512xbf16, #tpu.memory_space<vmem>>, vector<16x512xbf16>,
    %c34_i32 = arith.constant 34 : i32
    %59 = tpu.dynamic_rotate %0 by %c34_i32 dim 1 : vector<16x512xf32>, i32 -> vector<16x512xf32>
    %c9 = arith.constant 9 : index
    %c0_28 = arith.constant 0 : index
    %c0_29 = arith.constant 0 : index
    %60 = vector.load %arg2[%c9, %c0_28, %c0_29] : memref<25x1x512xf32, #tpu.memory_space<vmem>>, vector<1x1x512xf32>
    %61 = vector.shape_cast %60 : vector<1x1x512xf32> to vector<1x512xf32>
    %62 = vector.broadcast %61 : vector<1x512xf32> to vector<16x512xf32>
    %63 = arith.mulf %59, %62 : vector<16x512xf32>
    %64 = arith.truncf %63 : vector<16x512xf32> to vector<16x512xbf16>
    %c144 = arith.constant 144 : index
    %c0_30 = arith.constant 0 : index
    %65 = vector.load %arg16[%c144, %c0_30] : memref<400x512xbf16, #tpu.memory_space<vmem>>, vector<16x512xbf16>
    tpu.vector_store %arg16[%c144, %c0_30], %64 {strides = array<i32>} : memref<400x512xbf16, #tpu.memory_space<vmem>>, vector<16x512xbf16>,
    %c33_i32 = arith.constant 33 : i32
    %66 = tpu.dynamic_rotate %0 by %c33_i32 dim 1 : vector<16x512xf32>, i32 -> vector<16x512xf32>
    %c10 = arith.constant 10 : index
    %c0_31 = arith.constant 0 : index
    %c0_32 = arith.constant 0 : index
    %67 = vector.load %arg2[%c10, %c0_31, %c0_32] : memref<25x1x512xf32, #tpu.memory_space<vmem>>, vector<1x1x512xf32>
    %68 = vector.shape_cast %67 : vector<1x1x512xf32> to vector<1x512xf32>
    %69 = vector.broadcast %68 : vector<1x512xf32> to vector<16x512xf32>
    %70 = arith.mulf %66, %69 : vector<16x512xf32>
    %71 = arith.truncf %70 : vector<16x512xf32> to vector<16x512xbf16>
    %c160 = arith.constant 160 : index
    %c0_33 = arith.constant 0 : index
    %72 = vector.load %arg16[%c160, %c0_33] : memref<400x512xbf16, #tpu.memory_space<vmem>>, vector<16x512xbf16>
    tpu.vector_store %arg16[%c160, %c0_33], %71 {strides = array<i32>} : memref<400x512xbf16, #tpu.memory_space<vmem>>, vector<16x512xbf16>,
    %c32_i32 = arith.constant 32 : i32
    %73 = tpu.dynamic_rotate %0 by %c32_i32 dim 1 : vector<16x512xf32>, i32 -> vector<16x512xf32>
    %c11 = arith.constant 11 : index
    %c0_34 = arith.constant 0 : index
    %c0_35 = arith.constant 0 : index
    %74 = vector.load %arg2[%c11, %c0_34, %c0_35] : memref<25x1x512xf32, #tpu.memory_space<vmem>>, vector<1x1x512xf32>
    %75 = vector.shape_cast %74 : vector<1x1x512xf32> to vector<1x512xf32>
    %76 = vector.broadcast %75 : vector<1x512xf32> to vector<16x512xf32>
    %77 = arith.mulf %73, %76 : vector<16x512xf32>
    %78 = arith.truncf %77 : vector<16x512xf32> to vector<16x512xbf16>
    %c176 = arith.constant 176 : index
    %c0_36 = arith.constant 0 : index
    %79 = vector.load %arg16[%c176, %c0_36] : memref<400x512xbf16, #tpu.memory_space<vmem>>, vector<16x512xbf16>
    tpu.vector_store %arg16[%c176, %c0_36], %78 {strides = array<i32>} : memref<400x512xbf16, #tpu.memory_space<vmem>>, vector<16x512xbf16>,
    %c31_i32 = arith.constant 31 : i32
    %80 = tpu.dynamic_rotate %0 by %c31_i32 dim 1 : vector<16x512xf32>, i32 -> vector<16x512xf32>
    %c12 = arith.constant 12 : index
    %c0_37 = arith.constant 0 : index
    %c0_38 = arith.constant 0 : index
    %81 = vector.load %arg2[%c12, %c0_37, %c0_38] : memref<25x1x512xf32, #tpu.memory_space<vmem>>, vector<1x1x512xf32>
    %82 = vector.shape_cast %81 : vector<1x1x512xf32> to vector<1x512xf32>
    %83 = vector.broadcast %82 : vector<1x512xf32> to vector<16x512xf32>
    %84 = arith.mulf %80, %83 : vector<16x512xf32>
    %85 = arith.truncf %84 : vector<16x512xf32> to vector<16x512xbf16>
    %c192 = arith.constant 192 : index
    %c0_39 = arith.constant 0 : index
    %86 = vector.load %arg16[%c192, %c0_39] : memref<400x512xbf16, #tpu.memory_space<vmem>>, vector<16x512xbf16>
    tpu.vector_store %arg16[%c192, %c0_39], %85 {strides = array<i32>} : memref<400x512xbf16, #tpu.memory_space<vmem>>, vector<16x512xbf16>,
    %c30_i32 = arith.constant 30 : i32
    %87 = tpu.dynamic_rotate %0 by %c30_i32 dim 1 : vector<16x512xf32>, i32 -> vector<16x512xf32>
    %c13 = arith.constant 13 : index
    %c0_40 = arith.constant 0 : index
    %c0_41 = arith.constant 0 : index
    %88 = vector.load %arg2[%c13, %c0_40, %c0_41] : memref<25x1x512xf32, #tpu.memory_space<vmem>>, vector<1x1x512xf32>
    %89 = vector.shape_cast %88 : vector<1x1x512xf32> to vector<1x512xf32>
    %90 = vector.broadcast %89 : vector<1x512xf32> to vector<16x512xf32>
    %91 = arith.mulf %87, %90 : vector<16x512xf32>
    %92 = arith.truncf %91 : vector<16x512xf32> to vector<16x512xbf16>
    %c208 = arith.constant 208 : index
    %c0_42 = arith.constant 0 : index
    %93 = vector.load %arg16[%c208, %c0_42] : memref<400x512xbf16, #tpu.memory_space<vmem>>, vector<16x512xbf16>
    tpu.vector_store %arg16[%c208, %c0_42], %92 {strides = array<i32>} : memref<400x512xbf16, #tpu.memory_space<vmem>>, vector<16x512xbf16>,
    %c18_i32 = arith.constant 18 : i32
    %94 = tpu.dynamic_rotate %0 by %c18_i32 dim 1 : vector<16x512xf32>, i32 -> vector<16x512xf32>
    %c14 = arith.constant 14 : index
    %c0_43 = arith.constant 0 : index
    %c0_44 = arith.constant 0 : index
    %95 = vector.load %arg2[%c14, %c0_43, %c0_44] : memref<25x1x512xf32, #tpu.memory_space<vmem>>, vector<1x1x512xf32>
    %96 = vector.shape_cast %95 : vector<1x1x512xf32> to vector<1x512xf32>
    %97 = vector.broadcast %96 : vector<1x512xf32> to vector<16x512xf32>
    %98 = arith.mulf %94, %97 : vector<16x512xf32>
    %99 = arith.truncf %98 : vector<16x512xf32> to vector<16x512xbf16>
    %c224 = arith.constant 224 : index
    %c0_45 = arith.constant 0 : index
    %100 = vector.load %arg16[%c224, %c0_45] : memref<400x512xbf16, #tpu.memory_space<vmem>>, vector<16x512xbf16>
    tpu.vector_store %arg16[%c224, %c0_45], %99 {strides = array<i32>} : memref<400x512xbf16, #tpu.memory_space<vmem>>, vector<16x512xbf16>,
    %c14_i32 = arith.constant 14 : i32
    %101 = tpu.dynamic_rotate %0 by %c14_i32 dim 1 : vector<16x512xf32>, i32 -> vector<16x512xf32>
    %c15 = arith.constant 15 : index
    %c0_46 = arith.constant 0 : index
    %c0_47 = arith.constant 0 : index
    %102 = vector.load %arg2[%c15, %c0_46, %c0_47] : memref<25x1x512xf32, #tpu.memory_space<vmem>>, vector<1x1x512xf32>
    %103 = vector.shape_cast %102 : vector<1x1x512xf32> to vector<1x512xf32>
    %104 = vector.broadcast %103 : vector<1x512xf32> to vector<16x512xf32>
    %105 = arith.mulf %101, %104 : vector<16x512xf32>
    %106 = arith.truncf %105 : vector<16x512xf32> to vector<16x512xbf16>
    %c240 = arith.constant 240 : index
    %c0_48 = arith.constant 0 : index
    %107 = vector.load %arg16[%c240, %c0_48] : memref<400x512xbf16, #tpu.memory_space<vmem>>, vector<16x512xbf16>
    tpu.vector_store %arg16[%c240, %c0_48], %106 {strides = array<i32>} : memref<400x512xbf16, #tpu.memory_space<vmem>>, vector<16x512xbf16>,
    %c2_i32 = arith.constant 2 : i32
    %108 = tpu.dynamic_rotate %0 by %c2_i32 dim 1 : vector<16x512xf32>, i32 -> vector<16x512xf32>
    %c16_49 = arith.constant 16 : index
    %c0_50 = arith.constant 0 : index
    %c0_51 = arith.constant 0 : index
    %109 = vector.load %arg2[%c16_49, %c0_50, %c0_51] : memref<25x1x512xf32, #tpu.memory_space<vmem>>, vector<1x1x512xf32>
    %110 = vector.shape_cast %109 : vector<1x1x512xf32> to vector<1x512xf32>
    %111 = vector.broadcast %110 : vector<1x512xf32> to vector<16x512xf32>
    %112 = arith.mulf %108, %111 : vector<16x512xf32>
    %113 = arith.truncf %112 : vector<16x512xf32> to vector<16x512xbf16>
    %c256 = arith.constant 256 : index
    %c0_52 = arith.constant 0 : index
    %114 = vector.load %arg16[%c256, %c0_52] : memref<400x512xbf16, #tpu.memory_space<vmem>>, vector<16x512xbf16>
    tpu.vector_store %arg16[%c256, %c0_52], %113 {strides = array<i32>} : memref<400x512xbf16, #tpu.memory_space<vmem>>, vector<16x512xbf16>,
    %c510_i32 = arith.constant 510 : i32
    %115 = tpu.dynamic_rotate %0 by %c510_i32 dim 1 : vector<16x512xf32>, i32 -> vector<16x512xf32>
    %c17 = arith.constant 17 : index
    %c0_53 = arith.constant 0 : index
    %c0_54 = arith.constant 0 : index
    %116 = vector.load %arg2[%c17, %c0_53, %c0_54] : memref<25x1x512xf32, #tpu.memory_space<vmem>>, vector<1x1x512xf32>
    %117 = vector.shape_cast %116 : vector<1x1x512xf32> to vector<1x512xf32>
    %118 = vector.broadcast %117 : vector<1x512xf32> to vector<16x512xf32>
    %119 = arith.mulf %115, %118 : vector<16x512xf32>
    %120 = arith.truncf %119 : vector<16x512xf32> to vector<16x512xbf16>
    %c272 = arith.constant 272 : index
    %c0_55 = arith.constant 0 : index
    %121 = vector.load %arg16[%c272, %c0_55] : memref<400x512xbf16, #tpu.memory_space<vmem>>, vector<16x512xbf16>
    tpu.vector_store %arg16[%c272, %c0_55], %120 {strides = array<i32>} : memref<400x512xbf16, #tpu.memory_space<vmem>>, vector<16x512xbf16>,
    %c498_i32 = arith.constant 498 : i32
    %122 = tpu.dynamic_rotate %0 by %c498_i32 dim 1 : vector<16x512xf32>, i32 -> vector<16x512xf32>
    %c18 = arith.constant 18 : index
    %c0_56 = arith.constant 0 : index
    %c0_57 = arith.constant 0 : index
    %123 = vector.load %arg2[%c18, %c0_56, %c0_57] : memref<25x1x512xf32, #tpu.memory_space<vmem>>, vector<1x1x512xf32>
    %124 = vector.shape_cast %123 : vector<1x1x512xf32> to vector<1x512xf32>
    %125 = vector.broadcast %124 : vector<1x512xf32> to vector<16x512xf32>
    %126 = arith.mulf %122, %125 : vector<16x512xf32>
    %127 = arith.truncf %126 : vector<16x512xf32> to vector<16x512xbf16>
    %c288 = arith.constant 288 : index
    %c0_58 = arith.constant 0 : index
    %128 = vector.load %arg16[%c288, %c0_58] : memref<400x512xbf16, #tpu.memory_space<vmem>>, vector<16x512xbf16>
    tpu.vector_store %arg16[%c288, %c0_58], %127 {strides = array<i32>} : memref<400x512xbf16, #tpu.memory_space<vmem>>, vector<16x512xbf16>,
    %c494_i32 = arith.constant 494 : i32
    %129 = tpu.dynamic_rotate %0 by %c494_i32 dim 1 : vector<16x512xf32>, i32 -> vector<16x512xf32>
    %c19 = arith.constant 19 : index
    %c0_59 = arith.constant 0 : index
    %c0_60 = arith.constant 0 : index
    %130 = vector.load %arg2[%c19, %c0_59, %c0_60] : memref<25x1x512xf32, #tpu.memory_space<vmem>>, vector<1x1x512xf32>
    %131 = vector.shape_cast %130 : vector<1x1x512xf32> to vector<1x512xf32>
    %132 = vector.broadcast %131 : vector<1x512xf32> to vector<16x512xf32>
    %133 = arith.mulf %129, %132 : vector<16x512xf32>
    %134 = arith.truncf %133 : vector<16x512xf32> to vector<16x512xbf16>
    %c304 = arith.constant 304 : index
    %c0_61 = arith.constant 0 : index
    %135 = vector.load %arg16[%c304, %c0_61] : memref<400x512xbf16, #tpu.memory_space<vmem>>, vector<16x512xbf16>
    tpu.vector_store %arg16[%c304, %c0_61], %134 {strides = array<i32>} : memref<400x512xbf16, #tpu.memory_space<vmem>>, vector<16x512xbf16>,
    %c482_i32 = arith.constant 482 : i32
    %136 = tpu.dynamic_rotate %0 by %c482_i32 dim 1 : vector<16x512xf32>, i32 -> vector<16x512xf32>
    %c20 = arith.constant 20 : index
    %c0_62 = arith.constant 0 : index
    %c0_63 = arith.constant 0 : index
    %137 = vector.load %arg2[%c20, %c0_62, %c0_63] : memref<25x1x512xf32, #tpu.memory_space<vmem>>, vector<1x1x512xf32>
    %138 = vector.shape_cast %137 : vector<1x1x512xf32> to vector<1x512xf32>
    %139 = vector.broadcast %138 : vector<1x512xf32> to vector<16x512xf32>
    %140 = arith.mulf %136, %139 : vector<16x512xf32>
    %141 = arith.truncf %140 : vector<16x512xf32> to vector<16x512xbf16>
    %c320 = arith.constant 320 : index
    %c0_64 = arith.constant 0 : index
    %142 = vector.load %arg16[%c320, %c0_64] : memref<400x512xbf16, #tpu.memory_space<vmem>>, vector<16x512xbf16>
    tpu.vector_store %arg16[%c320, %c0_64], %141 {strides = array<i32>} : memref<400x512xbf16, #tpu.memory_space<vmem>>, vector<16x512xbf16>,
    %c481_i32 = arith.constant 481 : i32
    %143 = tpu.dynamic_rotate %0 by %c481_i32 dim 1 : vector<16x512xf32>, i32 -> vector<16x512xf32>
    %c21 = arith.constant 21 : index
    %c0_65 = arith.constant 0 : index
    %c0_66 = arith.constant 0 : index
    %144 = vector.load %arg2[%c21, %c0_65, %c0_66] : memref<25x1x512xf32, #tpu.memory_space<vmem>>, vector<1x1x512xf32>
    %145 = vector.shape_cast %144 : vector<1x1x512xf32> to vector<1x512xf32>
    %146 = vector.broadcast %145 : vector<1x512xf32> to vector<16x512xf32>
    %147 = arith.mulf %143, %146 : vector<16x512xf32>
    %148 = arith.truncf %147 : vector<16x512xf32> to vector<16x512xbf16>
    %c336 = arith.constant 336 : index
    %c0_67 = arith.constant 0 : index
    %149 = vector.load %arg16[%c336, %c0_67] : memref<400x512xbf16, #tpu.memory_space<vmem>>, vector<16x512xbf16>
    tpu.vector_store %arg16[%c336, %c0_67], %148 {strides = array<i32>} : memref<400x512xbf16, #tpu.memory_space<vmem>>, vector<16x512xbf16>,
    %c480_i32 = arith.constant 480 : i32
    %150 = tpu.dynamic_rotate %0 by %c480_i32 dim 1 : vector<16x512xf32>, i32 -> vector<16x512xf32>
    %c22 = arith.constant 22 : index
    %c0_68 = arith.constant 0 : index
    %c0_69 = arith.constant 0 : index
    %151 = vector.load %arg2[%c22, %c0_68, %c0_69] : memref<25x1x512xf32, #tpu.memory_space<vmem>>, vector<1x1x512xf32>
    %152 = vector.shape_cast %151 : vector<1x1x512xf32> to vector<1x512xf32>
    %153 = vector.broadcast %152 : vector<1x512xf32> to vector<16x512xf32>
    %154 = arith.mulf %150, %153 : vector<16x512xf32>
    %155 = arith.truncf %154 : vector<16x512xf32> to vector<16x512xbf16>
    %c352 = arith.constant 352 : index
    %c0_70 = arith.constant 0 : index
    %156 = vector.load %arg16[%c352, %c0_70] : memref<400x512xbf16, #tpu.memory_space<vmem>>, vector<16x512xbf16>
    tpu.vector_store %arg16[%c352, %c0_70], %155 {strides = array<i32>} : memref<400x512xbf16, #tpu.memory_space<vmem>>, vector<16x512xbf16>,
    %c479_i32 = arith.constant 479 : i32
    %157 = tpu.dynamic_rotate %0 by %c479_i32 dim 1 : vector<16x512xf32>, i32 -> vector<16x512xf32>
    %c23 = arith.constant 23 : index
    %c0_71 = arith.constant 0 : index
    %c0_72 = arith.constant 0 : index
    %158 = vector.load %arg2[%c23, %c0_71, %c0_72] : memref<25x1x512xf32, #tpu.memory_space<vmem>>, vector<1x1x512xf32>
    %159 = vector.shape_cast %158 : vector<1x1x512xf32> to vector<1x512xf32>
    %160 = vector.broadcast %159 : vector<1x512xf32> to vector<16x512xf32>
    %161 = arith.mulf %157, %160 : vector<16x512xf32>
    %162 = arith.truncf %161 : vector<16x512xf32> to vector<16x512xbf16>
    %c368 = arith.constant 368 : index
    %c0_73 = arith.constant 0 : index
    %163 = vector.load %arg16[%c368, %c0_73] : memref<400x512xbf16, #tpu.memory_space<vmem>>, vector<16x512xbf16>
    tpu.vector_store %arg16[%c368, %c0_73], %162 {strides = array<i32>} : memref<400x512xbf16, #tpu.memory_space<vmem>>, vector<16x512xbf16>,
    %c478_i32 = arith.constant 478 : i32
    %164 = tpu.dynamic_rotate %0 by %c478_i32 dim 1 : vector<16x512xf32>, i32 -> vector<16x512xf32>
    %c24 = arith.constant 24 : index
    %c0_74 = arith.constant 0 : index
    %c0_75 = arith.constant 0 : index
    %165 = vector.load %arg2[%c24, %c0_74, %c0_75] : memref<25x1x512xf32, #tpu.memory_space<vmem>>, vector<1x1x512xf32>
    %166 = vector.shape_cast %165 : vector<1x1x512xf32> to vector<1x512xf32>
    %167 = vector.broadcast %166 : vector<1x512xf32> to vector<16x512xf32>
    %168 = arith.mulf %164, %167 : vector<16x512xf32>
    %169 = arith.truncf %168 : vector<16x512xf32> to vector<16x512xbf16>
    %c384 = arith.constant 384 : index
    %c0_76 = arith.constant 0 : index
    %170 = vector.load %arg16[%c384, %c0_76] : memref<400x512xbf16, #tpu.memory_space<vmem>>, vector<16x512xbf16>
    tpu.vector_store %arg16[%c384, %c0_76], %169 {strides = array<i32>} : memref<400x512xbf16, #tpu.memory_space<vmem>>, vector<16x512xbf16>,
    %c0_77 = arith.constant 0 : index
    %c0_78 = arith.constant 0 : index
    %171 = vector.load %arg3[%c0_77, %c0_78] : memref<8x144xbf16, #tpu.memory_space<vmem>>, vector<8x144xbf16>
    %c0_79 = arith.constant 0 : index
    %c0_80 = arith.constant 0 : index
    %172 = vector.load %arg16[%c0_79, %c0_80] : memref<400x512xbf16, #tpu.memory_space<vmem>>, vector<144x512xbf16>
    %cst = arith.constant dense<0.000000e+00> : vector<8x512xf32>
    %173 = tpu.matmul %171, %172, %cst {dimension_numbers = #tpu.dot_dimension_numbers<[1], [0], [0], [1], [0, 0, 1, 1], [], []>} : vector<8x144xbf16>, vector<144x512xbf16>, vector<8x512xf32> -> vector<8x512xf32>
    %c0_81 = arith.constant 0 : index
    %c0_82 = arith.constant 0 : index
    %174 = vector.load %arg4[%c0_81, %c0_82] : memref<8x1xf32, #tpu.memory_space<vmem>>, vector<8x1xf32>
    %175 = vector.broadcast %174 : vector<8x1xf32> to vector<8x512xf32>
    %176 = arith.addf %173, %175 : vector<8x512xf32>
    %177 = arith.negf %176 : vector<8x512xf32>
    %178 = math.exp %177 : vector<8x512xf32>
    %cst_83 = arith.constant 1.000000e+00 : f32
    %179 = vector.broadcast %cst_83 : f32 to vector<8x512xf32>
    %180 = arith.addf %179, %178 : vector<8x512xf32>
    %181 = arith.divf %179, %180 : vector<8x512xf32>
    %182 = arith.mulf %176, %181 : vector<8x512xf32>
    %c0_84 = arith.constant 0 : index
    %c0_85 = arith.constant 0 : index
    %183 = vector.load %arg5[%c0_84, %c0_85] : memref<8x400xbf16, #tpu.memory_space<vmem>>, vector<8x400xbf16>
    %c0_86 = arith.constant 0 : index
    %c0_87 = arith.constant 0 : index
    %184 = vector.load %arg16[%c0_86, %c0_87] : memref<400x512xbf16, #tpu.memory_space<vmem>>, vector<400x512xbf16>
    %cst_88 = arith.constant dense<0.000000e+00> : vector<8x512xf32>
    %185 = tpu.matmul %183, %184, %cst_88 {dimension_numbers = #tpu.dot_dimension_numbers<[1], [0], [0], [1], [0, 0, 1, 1], [], []>} : vector<8x400xbf16>, vector<400x512xbf16>, vector<8x512xf32> -> vector<8x512xf32>
    %c0_89 = arith.constant 0 : index
    %c0_90 = arith.constant 0 : index
    %186 = vector.load %arg6[%c0_89, %c0_90] : memref<8x1xf32, #tpu.memory_space<vmem>>, vector<8x1xf32>
    %187 = vector.broadcast %186 : vector<8x1xf32> to vector<8x512xf32>
    %188 = arith.addf %185, %187 : vector<8x512xf32>
    %189 = arith.negf %188 : vector<8x512xf32>
    %190 = math.exp %189 : vector<8x512xf32>
    %cst_91 = arith.constant 1.000000e+00 : f32
    %191 = vector.broadcast %cst_91 : f32 to vector<8x512xf32>
    %192 = arith.addf %191, %190 : vector<8x512xf32>
    %193 = arith.divf %191, %192 : vector<8x512xf32>
    %194 = arith.mulf %188, %193 : vector<8x512xf32>
    %195 = tpu.concatenate %182, %194 in 0 : vector<8x512xf32>, vector<8x512xf32> -> vector<16x512xf32>
    %196 = vector.extract_strided_slice %195 {offsets = [0, 0], sizes = [16, 256], strides = [1, 1]} : vector<16x512xf32> to vector<16x256xf32>
    %cst_92 = arith.constant dense<0.000000e+00> : vector<16xf32>
    %197 = vector.multi_reduction <add>, %196, %cst_92 [1] : vector<16x256xf32> to vector<16xf32>
    %198 = vector.shape_cast %197 : vector<16xf32> to vector<16x1xf32>
    %cst_93 = arith.constant 2.560000e+02 : f32
    %199 = vector.broadcast %cst_93 : f32 to vector<16x1xf32>
    %200 = arith.divf %198, %199 : vector<16x1xf32>
    %201 = vector.shape_cast %200 : vector<16x1xf32> to vector<16x1xf32>
    %202 = vector.broadcast %201 : vector<16x1xf32> to vector<16x128xf32>
    %c0_94 = arith.constant 0 : index
    %c0_95 = arith.constant 0 : index
    %203 = vector.load %arg7[%c0_94, %c0_95] : memref<4x16xf32, #tpu.memory_space<vmem>>, vector<4x16xf32>
    %cst_96 = arith.constant dense<0.000000e+00> : vector<4x128xf32>
    %204 = tpu.matmul %203, %202, %cst_96 {dimension_numbers = #tpu.dot_dimension_numbers<[1], [0], [0], [1], [0, 0, 1, 1], [], []>} : vector<4x16xf32>, vector<16x128xf32>, vector<4x128xf32> -> vector<4x128xf32>
    %c0_97 = arith.constant 0 : index
    %c0_98 = arith.constant 0 : index
    %205 = vector.load %arg8[%c0_97, %c0_98] : memref<4x1xf32, #tpu.memory_space<vmem>>, vector<4x1xf32>
    %206 = vector.broadcast %205 : vector<4x1xf32> to vector<4x128xf32>
    %207 = arith.addf %204, %206 : vector<4x128xf32>
    %cst_99 = arith.constant 0.000000e+00 : f32
    %208 = vector.broadcast %cst_99 : f32 to vector<4x128xf32>
    %209 = arith.maximumf %207, %208 : vector<4x128xf32>
    %c0_100 = arith.constant 0 : index
    %c0_101 = arith.constant 0 : index
    %210 = vector.load %arg9[%c0_100, %c0_101] : memref<16x4xf32, #tpu.memory_space<vmem>>, vector<16x4xf32>
    %cst_102 = arith.constant dense<0.000000e+00> : vector<16x128xf32>
    %211 = tpu.matmul %210, %209, %cst_102 {dimension_numbers = #tpu.dot_dimension_numbers<[1], [0], [0], [1], [0, 0, 1, 1], [], []>} : vector<16x4xf32>, vector<4x128xf32>, vector<16x128xf32> -> vector<16x128xf32>
    %c0_103 = arith.constant 0 : index
    %c0_104 = arith.constant 0 : index
    %212 = vector.load %arg10[%c0_103, %c0_104] : memref<16x1xf32, #tpu.memory_space<vmem>>, vector<16x1xf32>
    %213 = vector.broadcast %212 : vector<16x1xf32> to vector<16x128xf32>
    %214 = arith.addf %211, %213 : vector<16x128xf32>
    %215 = arith.negf %214 : vector<16x128xf32>
    %216 = math.exp %215 : vector<16x128xf32>
    %cst_105 = arith.constant 1.000000e+00 : f32
    %217 = vector.broadcast %cst_105 : f32 to vector<16x128xf32>
    %218 = arith.addf %217, %216 : vector<16x128xf32>
    %219 = arith.divf %217, %218 : vector<16x128xf32>
    %220 = vector.extract_strided_slice %219 {offsets = [0, 0], sizes = [16, 1], strides = [1, 1]} : vector<16x128xf32> to vector<16x1xf32>
    %221 = vector.broadcast %220 : vector<16x1xf32> to vector<16x256xf32>
    %222 = arith.mulf %196, %221 : vector<16x256xf32>
    %223 = vector.extract_strided_slice %195 {offsets = [0, 256], sizes = [16, 256], strides = [1, 1]} : vector<16x512xf32> to vector<16x256xf32>
    %cst_106 = arith.constant dense<0.000000e+00> : vector<16xf32>
    %224 = vector.multi_reduction <add>, %223, %cst_106 [1] : vector<16x256xf32> to vector<16xf32>
    %225 = vector.shape_cast %224 : vector<16xf32> to vector<16x1xf32>
    %cst_107 = arith.constant 2.560000e+02 : f32
    %226 = vector.broadcast %cst_107 : f32 to vector<16x1xf32>
    %227 = arith.divf %225, %226 : vector<16x1xf32>
    %228 = vector.shape_cast %227 : vector<16x1xf32> to vector<16x1xf32>
    %229 = vector.broadcast %228 : vector<16x1xf32> to vector<16x128xf32>
    %c0_108 = arith.constant 0 : index
    %c0_109 = arith.constant 0 : index
    %230 = vector.load %arg7[%c0_108, %c0_109] : memref<4x16xf32, #tpu.memory_space<vmem>>, vector<4x16xf32>
    %cst_110 = arith.constant dense<0.000000e+00> : vector<4x128xf32>
    %231 = tpu.matmul %230, %229, %cst_110 {dimension_numbers = #tpu.dot_dimension_numbers<[1], [0], [0], [1], [0, 0, 1, 1], [], []>} : vector<4x16xf32>, vector<16x128xf32>, vector<4x128xf32> -> vector<4x128xf32>
    %c0_111 = arith.constant 0 : index
    %c0_112 = arith.constant 0 : index
    %232 = vector.load %arg8[%c0_111, %c0_112] : memref<4x1xf32, #tpu.memory_space<vmem>>, vector<4x1xf32>
    %233 = vector.broadcast %232 : vector<4x1xf32> to vector<4x128xf32>
    %234 = arith.addf %231, %233 : vector<4x128xf32>
    %cst_113 = arith.constant 0.000000e+00 : f32
    %235 = vector.broadcast %cst_113 : f32 to vector<4x128xf32>
    %236 = arith.maximumf %234, %235 : vector<4x128xf32>
    %c0_114 = arith.constant 0 : index
    %c0_115 = arith.constant 0 : index
    %237 = vector.load %arg9[%c0_114, %c0_115] : memref<16x4xf32, #tpu.memory_space<vmem>>, vector<16x4xf32>
    %cst_116 = arith.constant dense<0.000000e+00> : vector<16x128xf32>
    %238 = tpu.matmul %237, %236, %cst_116 {dimension_numbers = #tpu.dot_dimension_numbers<[1], [0], [0], [1], [0, 0, 1, 1], [], []>} : vector<16x4xf32>, vector<4x128xf32>, vector<16x128xf32> -> vector<16x128xf32>
    %c0_117 = arith.constant 0 : index
    %c0_118 = arith.constant 0 : index
    %239 = vector.load %arg10[%c0_117, %c0_118] : memref<16x1xf32, #tpu.memory_space<vmem>>, vector<16x1xf32>
    %240 = vector.broadcast %239 : vector<16x1xf32> to vector<16x128xf32>
    %241 = arith.addf %238, %240 : vector<16x128xf32>
    %242 = arith.negf %241 : vector<16x128xf32>
    %243 = math.exp %242 : vector<16x128xf32>
    %cst_119 = arith.constant 1.000000e+00 : f32
    %244 = vector.broadcast %cst_119 : f32 to vector<16x128xf32>
    %245 = arith.addf %244, %243 : vector<16x128xf32>
    %246 = arith.divf %244, %245 : vector<16x128xf32>
    %247 = vector.extract_strided_slice %246 {offsets = [0, 0], sizes = [16, 1], strides = [1, 1]} : vector<16x128xf32> to vector<16x1xf32>
    %248 = vector.broadcast %247 : vector<16x1xf32> to vector<16x256xf32>
    %249 = arith.mulf %223, %248 : vector<16x256xf32>
    %250 = tpu.concatenate %222, %249 in 1 : vector<16x256xf32>, vector<16x256xf32> -> vector<16x512xf32>
    %cst_120 = arith.constant 0.000000e+00 : f32
    %251 = vector.broadcast %cst_120 : f32 to vector<16x512xf32>
    %c17_i32_121 = arith.constant 17 : i32
    %252 = tpu.dynamic_rotate %250 by %c17_i32_121 dim 1 : vector<16x512xf32>, i32 -> vector<16x512xf32>
    %c0_122 = arith.constant 0 : index
    %c0_123 = arith.constant 0 : index
    %c0_124 = arith.constant 0 : index
    %253 = vector.load %arg2[%c0_122, %c0_123, %c0_124] : memref<25x1x512xf32, #tpu.memory_space<vmem>>, vector<1x1x512xf32>
    %254 = vector.shape_cast %253 : vector<1x1x512xf32> to vector<1x512xf32>
    %255 = vector.broadcast %254 : vector<1x512xf32> to vector<16x512xf32>
    %256 = arith.mulf %252, %255 : vector<16x512xf32>
    %c0_125 = arith.constant 0 : index
    %c0_126 = arith.constant 0 : index
    %c0_127 = arith.constant 0 : index
    %257 = vector.load %arg13[%c0_125, %c0_126, %c0_127] : memref<25x16x1xf32, #tpu.memory_space<vmem>>, vector<1x16x1xf32>
    %258 = vector.shape_cast %257 : vector<1x16x1xf32> to vector<16x1xf32>
    %259 = vector.broadcast %258 : vector<16x1xf32> to vector<16x512xf32>
    %260 = arith.mulf %259, %256 : vector<16x512xf32>
    %261 = arith.addf %251, %260 : vector<16x512xf32>
    %262 = arith.truncf %256 : vector<16x512xf32> to vector<16x512xbf16>
    %c0_128 = arith.constant 0 : index
    %c0_129 = arith.constant 0 : index
    %263 = vector.load %arg17[%c0_128, %c0_129] : memref<144x512xbf16, #tpu.memory_space<vmem>>, vector<16x512xbf16>
    tpu.vector_store %arg17[%c0_128, %c0_129], %262 {strides = array<i32>} : memref<144x512xbf16, #tpu.memory_space<vmem>>, vector<16x512xbf16>,
    %c16_i32_130 = arith.constant 16 : i32
    %264 = tpu.dynamic_rotate %250 by %c16_i32_130 dim 1 : vector<16x512xf32>, i32 -> vector<16x512xf32>
    %c1_131 = arith.constant 1 : index
    %c0_132 = arith.constant 0 : index
    %c0_133 = arith.constant 0 : index
    %265 = vector.load %arg2[%c1_131, %c0_132, %c0_133] : memref<25x1x512xf32, #tpu.memory_space<vmem>>, vector<1x1x512xf32>
    %266 = vector.shape_cast %265 : vector<1x1x512xf32> to vector<1x512xf32>
    %267 = vector.broadcast %266 : vector<1x512xf32> to vector<16x512xf32>
    %268 = arith.mulf %264, %267 : vector<16x512xf32>
    %c1_134 = arith.constant 1 : index
    %c0_135 = arith.constant 0 : index
    %c0_136 = arith.constant 0 : index
    %269 = vector.load %arg13[%c1_134, %c0_135, %c0_136] : memref<25x16x1xf32, #tpu.memory_space<vmem>>, vector<1x16x1xf32>
    %270 = vector.shape_cast %269 : vector<1x16x1xf32> to vector<16x1xf32>
    %271 = vector.broadcast %270 : vector<16x1xf32> to vector<16x512xf32>
    %272 = arith.mulf %271, %268 : vector<16x512xf32>
    %273 = arith.addf %261, %272 : vector<16x512xf32>
    %274 = arith.truncf %268 : vector<16x512xf32> to vector<16x512xbf16>
    %c16_137 = arith.constant 16 : index
    %c0_138 = arith.constant 0 : index
    %275 = vector.load %arg17[%c16_137, %c0_138] : memref<144x512xbf16, #tpu.memory_space<vmem>>, vector<16x512xbf16>
    tpu.vector_store %arg17[%c16_137, %c0_138], %274 {strides = array<i32>} : memref<144x512xbf16, #tpu.memory_space<vmem>>, vector<16x512xbf16>,
    %c15_i32_139 = arith.constant 15 : i32
    %276 = tpu.dynamic_rotate %250 by %c15_i32_139 dim 1 : vector<16x512xf32>, i32 -> vector<16x512xf32>
    %c2_140 = arith.constant 2 : index
    %c0_141 = arith.constant 0 : index
    %c0_142 = arith.constant 0 : index
    %277 = vector.load %arg2[%c2_140, %c0_141, %c0_142] : memref<25x1x512xf32, #tpu.memory_space<vmem>>, vector<1x1x512xf32>
    %278 = vector.shape_cast %277 : vector<1x1x512xf32> to vector<1x512xf32>
    %279 = vector.broadcast %278 : vector<1x512xf32> to vector<16x512xf32>
    %280 = arith.mulf %276, %279 : vector<16x512xf32>
    %c2_143 = arith.constant 2 : index
    %c0_144 = arith.constant 0 : index
    %c0_145 = arith.constant 0 : index
    %281 = vector.load %arg13[%c2_143, %c0_144, %c0_145] : memref<25x16x1xf32, #tpu.memory_space<vmem>>, vector<1x16x1xf32>
    %282 = vector.shape_cast %281 : vector<1x16x1xf32> to vector<16x1xf32>
    %283 = vector.broadcast %282 : vector<16x1xf32> to vector<16x512xf32>
    %284 = arith.mulf %283, %280 : vector<16x512xf32>
    %285 = arith.addf %273, %284 : vector<16x512xf32>
    %286 = arith.truncf %280 : vector<16x512xf32> to vector<16x512xbf16>
    %c32_146 = arith.constant 32 : index
    %c0_147 = arith.constant 0 : index
    %287 = vector.load %arg17[%c32_146, %c0_147] : memref<144x512xbf16, #tpu.memory_space<vmem>>, vector<16x512xbf16>
    tpu.vector_store %arg17[%c32_146, %c0_147], %286 {strides = array<i32>} : memref<144x512xbf16, #tpu.memory_space<vmem>>, vector<16x512xbf16>,
    %c1_i32_148 = arith.constant 1 : i32
    %288 = tpu.dynamic_rotate %250 by %c1_i32_148 dim 1 : vector<16x512xf32>, i32 -> vector<16x512xf32>
    %c3_149 = arith.constant 3 : index
    %c0_150 = arith.constant 0 : index
    %c0_151 = arith.constant 0 : index
    %289 = vector.load %arg2[%c3_149, %c0_150, %c0_151] : memref<25x1x512xf32, #tpu.memory_space<vmem>>, vector<1x1x512xf32>
    %290 = vector.shape_cast %289 : vector<1x1x512xf32> to vector<1x512xf32>
    %291 = vector.broadcast %290 : vector<1x512xf32> to vector<16x512xf32>
    %292 = arith.mulf %288, %291 : vector<16x512xf32>
    %c3_152 = arith.constant 3 : index
    %c0_153 = arith.constant 0 : index
    %c0_154 = arith.constant 0 : index
    %293 = vector.load %arg13[%c3_152, %c0_153, %c0_154] : memref<25x16x1xf32, #tpu.memory_space<vmem>>, vector<1x16x1xf32>
    %294 = vector.shape_cast %293 : vector<1x16x1xf32> to vector<16x1xf32>
    %295 = vector.broadcast %294 : vector<16x1xf32> to vector<16x512xf32>
    %296 = arith.mulf %295, %292 : vector<16x512xf32>
    %297 = arith.addf %285, %296 : vector<16x512xf32>
    %298 = arith.truncf %292 : vector<16x512xf32> to vector<16x512xbf16>
    %c48_155 = arith.constant 48 : index
    %c0_156 = arith.constant 0 : index
    %299 = vector.load %arg17[%c48_155, %c0_156] : memref<144x512xbf16, #tpu.memory_space<vmem>>, vector<16x512xbf16>
    tpu.vector_store %arg17[%c48_155, %c0_156], %298 {strides = array<i32>} : memref<144x512xbf16, #tpu.memory_space<vmem>>, vector<16x512xbf16>,
    %c4 = arith.constant 4 : index
    %c0_157 = arith.constant 0 : index
    %c0_158 = arith.constant 0 : index
    %300 = vector.load %arg13[%c4, %c0_157, %c0_158] : memref<25x16x1xf32, #tpu.memory_space<vmem>>, vector<1x16x1xf32>
    %301 = vector.shape_cast %300 : vector<1x16x1xf32> to vector<16x1xf32>
    %302 = vector.broadcast %301 : vector<16x1xf32> to vector<16x512xf32>
    %303 = arith.mulf %302, %250 : vector<16x512xf32>
    %304 = arith.addf %297, %303 : vector<16x512xf32>
    %305 = arith.truncf %250 : vector<16x512xf32> to vector<16x512xbf16>
    %c64_159 = arith.constant 64 : index
    %c0_160 = arith.constant 0 : index
    %306 = vector.load %arg17[%c64_159, %c0_160] : memref<144x512xbf16, #tpu.memory_space<vmem>>, vector<16x512xbf16>
    tpu.vector_store %arg17[%c64_159, %c0_160], %305 {strides = array<i32>} : memref<144x512xbf16, #tpu.memory_space<vmem>>, vector<16x512xbf16>,
    %c511_i32_161 = arith.constant 511 : i32
    %307 = tpu.dynamic_rotate %250 by %c511_i32_161 dim 1 : vector<16x512xf32>, i32 -> vector<16x512xf32>
    %c5_162 = arith.constant 5 : index
    %c0_163 = arith.constant 0 : index
    %c0_164 = arith.constant 0 : index
    %308 = vector.load %arg2[%c5_162, %c0_163, %c0_164] : memref<25x1x512xf32, #tpu.memory_space<vmem>>, vector<1x1x512xf32>
    %309 = vector.shape_cast %308 : vector<1x1x512xf32> to vector<1x512xf32>
    %310 = vector.broadcast %309 : vector<1x512xf32> to vector<16x512xf32>
    %311 = arith.mulf %307, %310 : vector<16x512xf32>
    %c5_165 = arith.constant 5 : index
    %c0_166 = arith.constant 0 : index
    %c0_167 = arith.constant 0 : index
    %312 = vector.load %arg13[%c5_165, %c0_166, %c0_167] : memref<25x16x1xf32, #tpu.memory_space<vmem>>, vector<1x16x1xf32>
    %313 = vector.shape_cast %312 : vector<1x16x1xf32> to vector<16x1xf32>
    %314 = vector.broadcast %313 : vector<16x1xf32> to vector<16x512xf32>
    %315 = arith.mulf %314, %311 : vector<16x512xf32>
    %316 = arith.addf %304, %315 : vector<16x512xf32>
    %317 = arith.truncf %311 : vector<16x512xf32> to vector<16x512xbf16>
    %c80_168 = arith.constant 80 : index
    %c0_169 = arith.constant 0 : index
    %318 = vector.load %arg17[%c80_168, %c0_169] : memref<144x512xbf16, #tpu.memory_space<vmem>>, vector<16x512xbf16>
    tpu.vector_store %arg17[%c80_168, %c0_169], %317 {strides = array<i32>} : memref<144x512xbf16, #tpu.memory_space<vmem>>, vector<16x512xbf16>,
    %c497_i32_170 = arith.constant 497 : i32
    %319 = tpu.dynamic_rotate %250 by %c497_i32_170 dim 1 : vector<16x512xf32>, i32 -> vector<16x512xf32>
    %c6_171 = arith.constant 6 : index
    %c0_172 = arith.constant 0 : index
    %c0_173 = arith.constant 0 : index
    %320 = vector.load %arg2[%c6_171, %c0_172, %c0_173] : memref<25x1x512xf32, #tpu.memory_space<vmem>>, vector<1x1x512xf32>
    %321 = vector.shape_cast %320 : vector<1x1x512xf32> to vector<1x512xf32>
    %322 = vector.broadcast %321 : vector<1x512xf32> to vector<16x512xf32>
    %323 = arith.mulf %319, %322 : vector<16x512xf32>
    %c6_174 = arith.constant 6 : index
    %c0_175 = arith.constant 0 : index
    %c0_176 = arith.constant 0 : index
    %324 = vector.load %arg13[%c6_174, %c0_175, %c0_176] : memref<25x16x1xf32, #tpu.memory_space<vmem>>, vector<1x16x1xf32>
    %325 = vector.shape_cast %324 : vector<1x16x1xf32> to vector<16x1xf32>
    %326 = vector.broadcast %325 : vector<16x1xf32> to vector<16x512xf32>
    %327 = arith.mulf %326, %323 : vector<16x512xf32>
    %328 = arith.addf %316, %327 : vector<16x512xf32>
    %329 = arith.truncf %323 : vector<16x512xf32> to vector<16x512xbf16>
    %c96_177 = arith.constant 96 : index
    %c0_178 = arith.constant 0 : index
    %330 = vector.load %arg17[%c96_177, %c0_178] : memref<144x512xbf16, #tpu.memory_space<vmem>>, vector<16x512xbf16>
    tpu.vector_store %arg17[%c96_177, %c0_178], %329 {strides = array<i32>} : memref<144x512xbf16, #tpu.memory_space<vmem>>, vector<16x512xbf16>,
    %c496_i32_179 = arith.constant 496 : i32
    %331 = tpu.dynamic_rotate %250 by %c496_i32_179 dim 1 : vector<16x512xf32>, i32 -> vector<16x512xf32>
    %c7_180 = arith.constant 7 : index
    %c0_181 = arith.constant 0 : index
    %c0_182 = arith.constant 0 : index
    %332 = vector.load %arg2[%c7_180, %c0_181, %c0_182] : memref<25x1x512xf32, #tpu.memory_space<vmem>>, vector<1x1x512xf32>
    %333 = vector.shape_cast %332 : vector<1x1x512xf32> to vector<1x512xf32>
    %334 = vector.broadcast %333 : vector<1x512xf32> to vector<16x512xf32>
    %335 = arith.mulf %331, %334 : vector<16x512xf32>
    %c7_183 = arith.constant 7 : index
    %c0_184 = arith.constant 0 : index
    %c0_185 = arith.constant 0 : index
    %336 = vector.load %arg13[%c7_183, %c0_184, %c0_185] : memref<25x16x1xf32, #tpu.memory_space<vmem>>, vector<1x16x1xf32>
    %337 = vector.shape_cast %336 : vector<1x16x1xf32> to vector<16x1xf32>
    %338 = vector.broadcast %337 : vector<16x1xf32> to vector<16x512xf32>
    %339 = arith.mulf %338, %335 : vector<16x512xf32>
    %340 = arith.addf %328, %339 : vector<16x512xf32>
    %341 = arith.truncf %335 : vector<16x512xf32> to vector<16x512xbf16>
    %c112_186 = arith.constant 112 : index
    %c0_187 = arith.constant 0 : index
    %342 = vector.load %arg17[%c112_186, %c0_187] : memref<144x512xbf16, #tpu.memory_space<vmem>>, vector<16x512xbf16>
    tpu.vector_store %arg17[%c112_186, %c0_187], %341 {strides = array<i32>} : memref<144x512xbf16, #tpu.memory_space<vmem>>, vector<16x512xbf16>,
    %c495_i32_188 = arith.constant 495 : i32
    %343 = tpu.dynamic_rotate %250 by %c495_i32_188 dim 1 : vector<16x512xf32>, i32 -> vector<16x512xf32>
    %c8_189 = arith.constant 8 : index
    %c0_190 = arith.constant 0 : index
    %c0_191 = arith.constant 0 : index
    %344 = vector.load %arg2[%c8_189, %c0_190, %c0_191] : memref<25x1x512xf32, #tpu.memory_space<vmem>>, vector<1x1x512xf32>
    %345 = vector.shape_cast %344 : vector<1x1x512xf32> to vector<1x512xf32>
    %346 = vector.broadcast %345 : vector<1x512xf32> to vector<16x512xf32>
    %347 = arith.mulf %343, %346 : vector<16x512xf32>
    %c8_192 = arith.constant 8 : index
    %c0_193 = arith.constant 0 : index
    %c0_194 = arith.constant 0 : index
    %348 = vector.load %arg13[%c8_192, %c0_193, %c0_194] : memref<25x16x1xf32, #tpu.memory_space<vmem>>, vector<1x16x1xf32>
    %349 = vector.shape_cast %348 : vector<1x16x1xf32> to vector<16x1xf32>
    %350 = vector.broadcast %349 : vector<16x1xf32> to vector<16x512xf32>
    %351 = arith.mulf %350, %347 : vector<16x512xf32>
    %352 = arith.addf %340, %351 : vector<16x512xf32>
    %353 = arith.truncf %347 : vector<16x512xf32> to vector<16x512xbf16>
    %c128_195 = arith.constant 128 : index
    %c0_196 = arith.constant 0 : index
    %354 = vector.load %arg17[%c128_195, %c0_196] : memref<144x512xbf16, #tpu.memory_space<vmem>>, vector<16x512xbf16>
    tpu.vector_store %arg17[%c128_195, %c0_196], %353 {strides = array<i32>} : memref<144x512xbf16, #tpu.memory_space<vmem>>, vector<16x512xbf16>,
    %c34_i32_197 = arith.constant 34 : i32
    %355 = tpu.dynamic_rotate %250 by %c34_i32_197 dim 1 : vector<16x512xf32>, i32 -> vector<16x512xf32>
    %c9_198 = arith.constant 9 : index
    %c0_199 = arith.constant 0 : index
    %c0_200 = arith.constant 0 : index
    %356 = vector.load %arg2[%c9_198, %c0_199, %c0_200] : memref<25x1x512xf32, #tpu.memory_space<vmem>>, vector<1x1x512xf32>
    %357 = vector.shape_cast %356 : vector<1x1x512xf32> to vector<1x512xf32>
    %358 = vector.broadcast %357 : vector<1x512xf32> to vector<16x512xf32>
    %359 = arith.mulf %355, %358 : vector<16x512xf32>
    %c9_201 = arith.constant 9 : index
    %c0_202 = arith.constant 0 : index
    %c0_203 = arith.constant 0 : index
    %360 = vector.load %arg13[%c9_201, %c0_202, %c0_203] : memref<25x16x1xf32, #tpu.memory_space<vmem>>, vector<1x16x1xf32>
    %361 = vector.shape_cast %360 : vector<1x16x1xf32> to vector<16x1xf32>
    %362 = vector.broadcast %361 : vector<16x1xf32> to vector<16x512xf32>
    %363 = arith.mulf %362, %359 : vector<16x512xf32>
    %364 = arith.addf %352, %363 : vector<16x512xf32>
    %c33_i32_204 = arith.constant 33 : i32
    %365 = tpu.dynamic_rotate %250 by %c33_i32_204 dim 1 : vector<16x512xf32>, i32 -> vector<16x512xf32>
    %c10_205 = arith.constant 10 : index
    %c0_206 = arith.constant 0 : index
    %c0_207 = arith.constant 0 : index
    %366 = vector.load %arg2[%c10_205, %c0_206, %c0_207] : memref<25x1x512xf32, #tpu.memory_space<vmem>>, vector<1x1x512xf32>
    %367 = vector.shape_cast %366 : vector<1x1x512xf32> to vector<1x512xf32>
    %368 = vector.broadcast %367 : vector<1x512xf32> to vector<16x512xf32>
    %369 = arith.mulf %365, %368 : vector<16x512xf32>
    %c10_208 = arith.constant 10 : index
    %c0_209 = arith.constant 0 : index
    %c0_210 = arith.constant 0 : index
    %370 = vector.load %arg13[%c10_208, %c0_209, %c0_210] : memref<25x16x1xf32, #tpu.memory_space<vmem>>, vector<1x16x1xf32>
    %371 = vector.shape_cast %370 : vector<1x16x1xf32> to vector<16x1xf32>
    %372 = vector.broadcast %371 : vector<16x1xf32> to vector<16x512xf32>
    %373 = arith.mulf %372, %369 : vector<16x512xf32>
    %374 = arith.addf %364, %373 : vector<16x512xf32>
    %c32_i32_211 = arith.constant 32 : i32
    %375 = tpu.dynamic_rotate %250 by %c32_i32_211 dim 1 : vector<16x512xf32>, i32 -> vector<16x512xf32>
    %c11_212 = arith.constant 11 : index
    %c0_213 = arith.constant 0 : index
    %c0_214 = arith.constant 0 : index
    %376 = vector.load %arg2[%c11_212, %c0_213, %c0_214] : memref<25x1x512xf32, #tpu.memory_space<vmem>>, vector<1x1x512xf32>
    %377 = vector.shape_cast %376 : vector<1x1x512xf32> to vector<1x512xf32>
    %378 = vector.broadcast %377 : vector<1x512xf32> to vector<16x512xf32>
    %379 = arith.mulf %375, %378 : vector<16x512xf32>
    %c11_215 = arith.constant 11 : index
    %c0_216 = arith.constant 0 : index
    %c0_217 = arith.constant 0 : index
    %380 = vector.load %arg13[%c11_215, %c0_216, %c0_217] : memref<25x16x1xf32, #tpu.memory_space<vmem>>, vector<1x16x1xf32>
    %381 = vector.shape_cast %380 : vector<1x16x1xf32> to vector<16x1xf32>
    %382 = vector.broadcast %381 : vector<16x1xf32> to vector<16x512xf32>
    %383 = arith.mulf %382, %379 : vector<16x512xf32>
    %384 = arith.addf %374, %383 : vector<16x512xf32>
    %c31_i32_218 = arith.constant 31 : i32
    %385 = tpu.dynamic_rotate %250 by %c31_i32_218 dim 1 : vector<16x512xf32>, i32 -> vector<16x512xf32>
    %c12_219 = arith.constant 12 : index
    %c0_220 = arith.constant 0 : index
    %c0_221 = arith.constant 0 : index
    %386 = vector.load %arg2[%c12_219, %c0_220, %c0_221] : memref<25x1x512xf32, #tpu.memory_space<vmem>>, vector<1x1x512xf32>
    %387 = vector.shape_cast %386 : vector<1x1x512xf32> to vector<1x512xf32>
    %388 = vector.broadcast %387 : vector<1x512xf32> to vector<16x512xf32>
    %389 = arith.mulf %385, %388 : vector<16x512xf32>
    %c12_222 = arith.constant 12 : index
    %c0_223 = arith.constant 0 : index
    %c0_224 = arith.constant 0 : index
    %390 = vector.load %arg13[%c12_222, %c0_223, %c0_224] : memref<25x16x1xf32, #tpu.memory_space<vmem>>, vector<1x16x1xf32>
    %391 = vector.shape_cast %390 : vector<1x16x1xf32> to vector<16x1xf32>
    %392 = vector.broadcast %391 : vector<16x1xf32> to vector<16x512xf32>
    %393 = arith.mulf %392, %389 : vector<16x512xf32>
    %394 = arith.addf %384, %393 : vector<16x512xf32>
    %c30_i32_225 = arith.constant 30 : i32
    %395 = tpu.dynamic_rotate %250 by %c30_i32_225 dim 1 : vector<16x512xf32>, i32 -> vector<16x512xf32>
    %c13_226 = arith.constant 13 : index
    %c0_227 = arith.constant 0 : index
    %c0_228 = arith.constant 0 : index
    %396 = vector.load %arg2[%c13_226, %c0_227, %c0_228] : memref<25x1x512xf32, #tpu.memory_space<vmem>>, vector<1x1x512xf32>
    %397 = vector.shape_cast %396 : vector<1x1x512xf32> to vector<1x512xf32>
    %398 = vector.broadcast %397 : vector<1x512xf32> to vector<16x512xf32>
    %399 = arith.mulf %395, %398 : vector<16x512xf32>
    %c13_229 = arith.constant 13 : index
    %c0_230 = arith.constant 0 : index
    %c0_231 = arith.constant 0 : index
    %400 = vector.load %arg13[%c13_229, %c0_230, %c0_231] : memref<25x16x1xf32, #tpu.memory_space<vmem>>, vector<1x16x1xf32>
    %401 = vector.shape_cast %400 : vector<1x16x1xf32> to vector<16x1xf32>
    %402 = vector.broadcast %401 : vector<16x1xf32> to vector<16x512xf32>
    %403 = arith.mulf %402, %399 : vector<16x512xf32>
    %404 = arith.addf %394, %403 : vector<16x512xf32>
    %c18_i32_232 = arith.constant 18 : i32
    %405 = tpu.dynamic_rotate %250 by %c18_i32_232 dim 1 : vector<16x512xf32>, i32 -> vector<16x512xf32>
    %c14_233 = arith.constant 14 : index
    %c0_234 = arith.constant 0 : index
    %c0_235 = arith.constant 0 : index
    %406 = vector.load %arg2[%c14_233, %c0_234, %c0_235] : memref<25x1x512xf32, #tpu.memory_space<vmem>>, vector<1x1x512xf32>
    %407 = vector.shape_cast %406 : vector<1x1x512xf32> to vector<1x512xf32>
    %408 = vector.broadcast %407 : vector<1x512xf32> to vector<16x512xf32>
    %409 = arith.mulf %405, %408 : vector<16x512xf32>
    %c14_236 = arith.constant 14 : index
    %c0_237 = arith.constant 0 : index
    %c0_238 = arith.constant 0 : index
    %410 = vector.load %arg13[%c14_236, %c0_237, %c0_238] : memref<25x16x1xf32, #tpu.memory_space<vmem>>, vector<1x16x1xf32>
    %411 = vector.shape_cast %410 : vector<1x16x1xf32> to vector<16x1xf32>
    %412 = vector.broadcast %411 : vector<16x1xf32> to vector<16x512xf32>
    %413 = arith.mulf %412, %409 : vector<16x512xf32>
    %414 = arith.addf %404, %413 : vector<16x512xf32>
    %c14_i32_239 = arith.constant 14 : i32
    %415 = tpu.dynamic_rotate %250 by %c14_i32_239 dim 1 : vector<16x512xf32>, i32 -> vector<16x512xf32>
    %c15_240 = arith.constant 15 : index
    %c0_241 = arith.constant 0 : index
    %c0_242 = arith.constant 0 : index
    %416 = vector.load %arg2[%c15_240, %c0_241, %c0_242] : memref<25x1x512xf32, #tpu.memory_space<vmem>>, vector<1x1x512xf32>
    %417 = vector.shape_cast %416 : vector<1x1x512xf32> to vector<1x512xf32>
    %418 = vector.broadcast %417 : vector<1x512xf32> to vector<16x512xf32>
    %419 = arith.mulf %415, %418 : vector<16x512xf32>
    %c15_243 = arith.constant 15 : index
    %c0_244 = arith.constant 0 : index
    %c0_245 = arith.constant 0 : index
    %420 = vector.load %arg13[%c15_243, %c0_244, %c0_245] : memref<25x16x1xf32, #tpu.memory_space<vmem>>, vector<1x16x1xf32>
    %421 = vector.shape_cast %420 : vector<1x16x1xf32> to vector<16x1xf32>
    %422 = vector.broadcast %421 : vector<16x1xf32> to vector<16x512xf32>
    %423 = arith.mulf %422, %419 : vector<16x512xf32>
    %424 = arith.addf %414, %423 : vector<16x512xf32>
    %c2_i32_246 = arith.constant 2 : i32
    %425 = tpu.dynamic_rotate %250 by %c2_i32_246 dim 1 : vector<16x512xf32>, i32 -> vector<16x512xf32>
    %c16_247 = arith.constant 16 : index
    %c0_248 = arith.constant 0 : index
    %c0_249 = arith.constant 0 : index
    %426 = vector.load %arg2[%c16_247, %c0_248, %c0_249] : memref<25x1x512xf32, #tpu.memory_space<vmem>>, vector<1x1x512xf32>
    %427 = vector.shape_cast %426 : vector<1x1x512xf32> to vector<1x512xf32>
    %428 = vector.broadcast %427 : vector<1x512xf32> to vector<16x512xf32>
    %429 = arith.mulf %425, %428 : vector<16x512xf32>
    %c16_250 = arith.constant 16 : index
    %c0_251 = arith.constant 0 : index
    %c0_252 = arith.constant 0 : index
    %430 = vector.load %arg13[%c16_250, %c0_251, %c0_252] : memref<25x16x1xf32, #tpu.memory_space<vmem>>, vector<1x16x1xf32>
    %431 = vector.shape_cast %430 : vector<1x16x1xf32> to vector<16x1xf32>
    %432 = vector.broadcast %431 : vector<16x1xf32> to vector<16x512xf32>
    %433 = arith.mulf %432, %429 : vector<16x512xf32>
    %434 = arith.addf %424, %433 : vector<16x512xf32>
    %c510_i32_253 = arith.constant 510 : i32
    %435 = tpu.dynamic_rotate %250 by %c510_i32_253 dim 1 : vector<16x512xf32>, i32 -> vector<16x512xf32>
    %c17_254 = arith.constant 17 : index
    %c0_255 = arith.constant 0 : index
    %c0_256 = arith.constant 0 : index
    %436 = vector.load %arg2[%c17_254, %c0_255, %c0_256] : memref<25x1x512xf32, #tpu.memory_space<vmem>>, vector<1x1x512xf32>
    %437 = vector.shape_cast %436 : vector<1x1x512xf32> to vector<1x512xf32>
    %438 = vector.broadcast %437 : vector<1x512xf32> to vector<16x512xf32>
    %439 = arith.mulf %435, %438 : vector<16x512xf32>
    %c17_257 = arith.constant 17 : index
    %c0_258 = arith.constant 0 : index
    %c0_259 = arith.constant 0 : index
    %440 = vector.load %arg13[%c17_257, %c0_258, %c0_259] : memref<25x16x1xf32, #tpu.memory_space<vmem>>, vector<1x16x1xf32>
    %441 = vector.shape_cast %440 : vector<1x16x1xf32> to vector<16x1xf32>
    %442 = vector.broadcast %441 : vector<16x1xf32> to vector<16x512xf32>
    %443 = arith.mulf %442, %439 : vector<16x512xf32>
    %444 = arith.addf %434, %443 : vector<16x512xf32>
    %c498_i32_260 = arith.constant 498 : i32
    %445 = tpu.dynamic_rotate %250 by %c498_i32_260 dim 1 : vector<16x512xf32>, i32 -> vector<16x512xf32>
    %c18_261 = arith.constant 18 : index
    %c0_262 = arith.constant 0 : index
    %c0_263 = arith.constant 0 : index
    %446 = vector.load %arg2[%c18_261, %c0_262, %c0_263] : memref<25x1x512xf32, #tpu.memory_space<vmem>>, vector<1x1x512xf32>
    %447 = vector.shape_cast %446 : vector<1x1x512xf32> to vector<1x512xf32>
    %448 = vector.broadcast %447 : vector<1x512xf32> to vector<16x512xf32>
    %449 = arith.mulf %445, %448 : vector<16x512xf32>
    %c18_264 = arith.constant 18 : index
    %c0_265 = arith.constant 0 : index
    %c0_266 = arith.constant 0 : index
    %450 = vector.load %arg13[%c18_264, %c0_265, %c0_266] : memref<25x16x1xf32, #tpu.memory_space<vmem>>, vector<1x16x1xf32>
    %451 = vector.shape_cast %450 : vector<1x16x1xf32> to vector<16x1xf32>
    %452 = vector.broadcast %451 : vector<16x1xf32> to vector<16x512xf32>
    %453 = arith.mulf %452, %449 : vector<16x512xf32>
    %454 = arith.addf %444, %453 : vector<16x512xf32>
    %c494_i32_267 = arith.constant 494 : i32
    %455 = tpu.dynamic_rotate %250 by %c494_i32_267 dim 1 : vector<16x512xf32>, i32 -> vector<16x512xf32>
    %c19_268 = arith.constant 19 : index
    %c0_269 = arith.constant 0 : index
    %c0_270 = arith.constant 0 : index
    %456 = vector.load %arg2[%c19_268, %c0_269, %c0_270] : memref<25x1x512xf32, #tpu.memory_space<vmem>>, vector<1x1x512xf32>
    %457 = vector.shape_cast %456 : vector<1x1x512xf32> to vector<1x512xf32>
    %458 = vector.broadcast %457 : vector<1x512xf32> to vector<16x512xf32>
    %459 = arith.mulf %455, %458 : vector<16x512xf32>
    %c19_271 = arith.constant 19 : index
    %c0_272 = arith.constant 0 : index
    %c0_273 = arith.constant 0 : index
    %460 = vector.load %arg13[%c19_271, %c0_272, %c0_273] : memref<25x16x1xf32, #tpu.memory_space<vmem>>, vector<1x16x1xf32>
    %461 = vector.shape_cast %460 : vector<1x16x1xf32> to vector<16x1xf32>
    %462 = vector.broadcast %461 : vector<16x1xf32> to vector<16x512xf32>
    %463 = arith.mulf %462, %459 : vector<16x512xf32>
    %464 = arith.addf %454, %463 : vector<16x512xf32>
    %c482_i32_274 = arith.constant 482 : i32
    %465 = tpu.dynamic_rotate %250 by %c482_i32_274 dim 1 : vector<16x512xf32>, i32 -> vector<16x512xf32>
    %c20_275 = arith.constant 20 : index
    %c0_276 = arith.constant 0 : index
    %c0_277 = arith.constant 0 : index
    %466 = vector.load %arg2[%c20_275, %c0_276, %c0_277] : memref<25x1x512xf32, #tpu.memory_space<vmem>>, vector<1x1x512xf32>
    %467 = vector.shape_cast %466 : vector<1x1x512xf32> to vector<1x512xf32>
    %468 = vector.broadcast %467 : vector<1x512xf32> to vector<16x512xf32>
    %469 = arith.mulf %465, %468 : vector<16x512xf32>
    %c20_278 = arith.constant 20 : index
    %c0_279 = arith.constant 0 : index
    %c0_280 = arith.constant 0 : index
    %470 = vector.load %arg13[%c20_278, %c0_279, %c0_280] : memref<25x16x1xf32, #tpu.memory_space<vmem>>, vector<1x16x1xf32>
    %471 = vector.shape_cast %470 : vector<1x16x1xf32> to vector<16x1xf32>
    %472 = vector.broadcast %471 : vector<16x1xf32> to vector<16x512xf32>
    %473 = arith.mulf %472, %469 : vector<16x512xf32>
    %474 = arith.addf %464, %473 : vector<16x512xf32>
    %c481_i32_281 = arith.constant 481 : i32
    %475 = tpu.dynamic_rotate %250 by %c481_i32_281 dim 1 : vector<16x512xf32>, i32 -> vector<16x512xf32>
    %c21_282 = arith.constant 21 : index
    %c0_283 = arith.constant 0 : index
    %c0_284 = arith.constant 0 : index
    %476 = vector.load %arg2[%c21_282, %c0_283, %c0_284] : memref<25x1x512xf32, #tpu.memory_space<vmem>>, vector<1x1x512xf32>
    %477 = vector.shape_cast %476 : vector<1x1x512xf32> to vector<1x512xf32>
    %478 = vector.broadcast %477 : vector<1x512xf32> to vector<16x512xf32>
    %479 = arith.mulf %475, %478 : vector<16x512xf32>
    %c21_285 = arith.constant 21 : index
    %c0_286 = arith.constant 0 : index
    %c0_287 = arith.constant 0 : index
    %480 = vector.load %arg13[%c21_285, %c0_286, %c0_287] : memref<25x16x1xf32, #tpu.memory_space<vmem>>, vector<1x16x1xf32>
    %481 = vector.shape_cast %480 : vector<1x16x1xf32> to vector<16x1xf32>
    %482 = vector.broadcast %481 : vector<16x1xf32> to vector<16x512xf32>
    %483 = arith.mulf %482, %479 : vector<16x512xf32>
    %484 = arith.addf %474, %483 : vector<16x512xf32>
    %c480_i32_288 = arith.constant 480 : i32
    %485 = tpu.dynamic_rotate %250 by %c480_i32_288 dim 1 : vector<16x512xf32>, i32 -> vector<16x512xf32>
    %c22_289 = arith.constant 22 : index
    %c0_290 = arith.constant 0 : index
    %c0_291 = arith.constant 0 : index
    %486 = vector.load %arg2[%c22_289, %c0_290, %c0_291] : memref<25x1x512xf32, #tpu.memory_space<vmem>>, vector<1x1x512xf32>
    %487 = vector.shape_cast %486 : vector<1x1x512xf32> to vector<1x512xf32>
    %488 = vector.broadcast %487 : vector<1x512xf32> to vector<16x512xf32>
    %489 = arith.mulf %485, %488 : vector<16x512xf32>
    %c22_292 = arith.constant 22 : index
    %c0_293 = arith.constant 0 : index
    %c0_294 = arith.constant 0 : index
    %490 = vector.load %arg13[%c22_292, %c0_293, %c0_294] : memref<25x16x1xf32, #tpu.memory_space<vmem>>, vector<1x16x1xf32>
    %491 = vector.shape_cast %490 : vector<1x16x1xf32> to vector<16x1xf32>
    %492 = vector.broadcast %491 : vector<16x1xf32> to vector<16x512xf32>
    %493 = arith.mulf %492, %489 : vector<16x512xf32>
    %494 = arith.addf %484, %493 : vector<16x512xf32>
    %c479_i32_295 = arith.constant 479 : i32
    %495 = tpu.dynamic_rotate %250 by %c479_i32_295 dim 1 : vector<16x512xf32>, i32 -> vector<16x512xf32>
    %c23_296 = arith.constant 23 : index
    %c0_297 = arith.constant 0 : index
    %c0_298 = arith.constant 0 : index
    %496 = vector.load %arg2[%c23_296, %c0_297, %c0_298] : memref<25x1x512xf32, #tpu.memory_space<vmem>>, vector<1x1x512xf32>
    %497 = vector.shape_cast %496 : vector<1x1x512xf32> to vector<1x512xf32>
    %498 = vector.broadcast %497 : vector<1x512xf32> to vector<16x512xf32>
    %499 = arith.mulf %495, %498 : vector<16x512xf32>
    %c23_299 = arith.constant 23 : index
    %c0_300 = arith.constant 0 : index
    %c0_301 = arith.constant 0 : index
    %500 = vector.load %arg13[%c23_299, %c0_300, %c0_301] : memref<25x16x1xf32, #tpu.memory_space<vmem>>, vector<1x16x1xf32>
    %501 = vector.shape_cast %500 : vector<1x16x1xf32> to vector<16x1xf32>
    %502 = vector.broadcast %501 : vector<16x1xf32> to vector<16x512xf32>
    %503 = arith.mulf %502, %499 : vector<16x512xf32>
    %504 = arith.addf %494, %503 : vector<16x512xf32>
    %c478_i32_302 = arith.constant 478 : i32
    %505 = tpu.dynamic_rotate %250 by %c478_i32_302 dim 1 : vector<16x512xf32>, i32 -> vector<16x512xf32>
    %c24_303 = arith.constant 24 : index
    %c0_304 = arith.constant 0 : index
    %c0_305 = arith.constant 0 : index
    %506 = vector.load %arg2[%c24_303, %c0_304, %c0_305] : memref<25x1x512xf32, #tpu.memory_space<vmem>>, vector<1x1x512xf32>
    %507 = vector.shape_cast %506 : vector<1x1x512xf32> to vector<1x512xf32>
    %508 = vector.broadcast %507 : vector<1x512xf32> to vector<16x512xf32>
    %509 = arith.mulf %505, %508 : vector<16x512xf32>
    %c24_306 = arith.constant 24 : index
    %c0_307 = arith.constant 0 : index
    %c0_308 = arith.constant 0 : index
    %510 = vector.load %arg13[%c24_306, %c0_307, %c0_308] : memref<25x16x1xf32, #tpu.memory_space<vmem>>, vector<1x16x1xf32>
    %511 = vector.shape_cast %510 : vector<1x16x1xf32> to vector<16x1xf32>
    %512 = vector.broadcast %511 : vector<16x1xf32> to vector<16x512xf32>
    %513 = arith.mulf %512, %509 : vector<16x512xf32>
    %514 = arith.addf %504, %513 : vector<16x512xf32>
    %c0_309 = arith.constant 0 : index
    %c0_310 = arith.constant 0 : index
    %515 = vector.load %arg11[%c0_309, %c0_310] : memref<16x144xbf16, #tpu.memory_space<vmem>>, vector<16x144xbf16>
    %c0_311 = arith.constant 0 : index
    %c0_312 = arith.constant 0 : index
    %516 = vector.load %arg17[%c0_311, %c0_312] : memref<144x512xbf16, #tpu.memory_space<vmem>>, vector<144x512xbf16>
    %cst_313 = arith.constant dense<0.000000e+00> : vector<16x512xf32>
    %517 = tpu.matmul %515, %516, %cst_313 {dimension_numbers = #tpu.dot_dimension_numbers<[1], [0], [0], [1], [0, 0, 1, 1], [], []>} : vector<16x144xbf16>, vector<144x512xbf16>, vector<16x512xf32> -> vector<16x512xf32>
    %c0_314 = arith.constant 0 : index
    %c0_315 = arith.constant 0 : index
    %518 = vector.load %arg12[%c0_314, %c0_315] : memref<16x1xf32, #tpu.memory_space<vmem>>, vector<16x1xf32>
    %519 = vector.broadcast %518 : vector<16x1xf32> to vector<16x512xf32>
    %520 = arith.addf %517, %519 : vector<16x512xf32>
    %521 = arith.negf %520 : vector<16x512xf32>
    %522 = math.exp %521 : vector<16x512xf32>
    %cst_316 = arith.constant 1.000000e+00 : f32
    %523 = vector.broadcast %cst_316 : f32 to vector<16x512xf32>
    %524 = arith.addf %523, %522 : vector<16x512xf32>
    %525 = arith.divf %523, %524 : vector<16x512xf32>
    %526 = arith.mulf %520, %525 : vector<16x512xf32>
    %c0_317 = arith.constant 0 : index
    %c0_318 = arith.constant 0 : index
    %527 = vector.load %arg14[%c0_317, %c0_318] : memref<16x1xf32, #tpu.memory_space<vmem>>, vector<16x1xf32>
    %528 = vector.broadcast %527 : vector<16x1xf32> to vector<16x512xf32>
    %529 = arith.addf %514, %528 : vector<16x512xf32>
    %530 = arith.negf %529 : vector<16x512xf32>
    %531 = math.exp %530 : vector<16x512xf32>
    %cst_319 = arith.constant 1.000000e+00 : f32
    %532 = vector.broadcast %cst_319 : f32 to vector<16x512xf32>
    %533 = arith.addf %532, %531 : vector<16x512xf32>
    %534 = arith.divf %532, %533 : vector<16x512xf32>
    %535 = arith.mulf %529, %534 : vector<16x512xf32>
    %c0_320 = arith.constant 0 : index
    %c0_321 = arith.constant 0 : index
    %536 = vector.load %arg15[%c0_320, %c0_321] : memref<32x512xf32, #tpu.memory_space<vmem>>, vector<16x512xf32>
    tpu.vector_store %arg15[%c0_320, %c0_321], %526 {strides = array<i32>} : memref<32x512xf32, #tpu.memory_space<vmem>>, vector<16x512xf32>,
    %c16_322 = arith.constant 16 : index
    %c0_323 = arith.constant 0 : index
    %537 = vector.load %arg15[%c16_322, %c0_323] : memref<32x512xf32, #tpu.memory_space<vmem>>, vector<16x512xf32>
    tpu.vector_store %arg15[%c16_322, %c0_323], %535 {strides = array<i32>} : memref<32x512xf32, #tpu.memory_space<vmem>>, vector<16x512xf32>,
    return
  }
  func.func @transform_0(%arg0: i32) -> (i32, i32) {
    %c0_i32 = arith.constant 0 : i32
    %c0_i32_0 = arith.constant 0 : i32
    return %c0_i32, %arg0 : i32, i32
  }
  func.func @transform_1(%arg0: i32) -> (i32, i32, i32) {
    %c0_i32 = arith.constant 0 : i32
    %c0_i32_0 = arith.constant 0 : i32
    %c0_i32_1 = arith.constant 0 : i32
    %c0_i32_2 = arith.constant 0 : i32
    return %c0_i32, %c0_i32_0, %c0_i32_1 : i32, i32, i32
  }
  func.func @transform_2(%arg0: i32) -> (i32, i32) {
    %c0_i32 = arith.constant 0 : i32
    %c0_i32_0 = arith.constant 0 : i32
    %c0_i32_1 = arith.constant 0 : i32
    return %c0_i32, %c0_i32_0 : i32, i32
  }
  func.func @transform_3(%arg0: i32) -> (i32, i32) {
    %c0_i32 = arith.constant 0 : i32
    %c0_i32_0 = arith.constant 0 : i32
    %c0_i32_1 = arith.constant 0 : i32
    return %c0_i32, %c0_i32_0 : i32, i32
  }
  func.func @transform_4(%arg0: i32) -> (i32, i32) {
    %c0_i32 = arith.constant 0 : i32
    %c0_i32_0 = arith.constant 0 : i32
    %c0_i32_1 = arith.constant 0 : i32
    return %c0_i32, %c0_i32_0 : i32, i32
  }
  func.func @transform_5(%arg0: i32) -> (i32, i32) {
    %c0_i32 = arith.constant 0 : i32
    %c0_i32_0 = arith.constant 0 : i32
    %c0_i32_1 = arith.constant 0 : i32
    return %c0_i32, %c0_i32_0 : i32, i32
  }
  func.func @transform_6(%arg0: i32) -> (i32, i32) {
    %c0_i32 = arith.constant 0 : i32
    %c0_i32_0 = arith.constant 0 : i32
    %c0_i32_1 = arith.constant 0 : i32
    return %c0_i32, %c0_i32_0 : i32, i32
  }
  func.func @transform_7(%arg0: i32) -> (i32, i32) {
    %c0_i32 = arith.constant 0 : i32
    %c0_i32_0 = arith.constant 0 : i32
    %c0_i32_1 = arith.constant 0 : i32
    return %c0_i32, %c0_i32_0 : i32, i32
  }
  func.func @transform_8(%arg0: i32) -> (i32, i32) {
    %c0_i32 = arith.constant 0 : i32
    %c0_i32_0 = arith.constant 0 : i32
    %c0_i32_1 = arith.constant 0 : i32
    return %c0_i32, %c0_i32_0 : i32, i32
  }
  func.func @transform_9(%arg0: i32) -> (i32, i32) {
    %c0_i32 = arith.constant 0 : i32
    %c0_i32_0 = arith.constant 0 : i32
    %c0_i32_1 = arith.constant 0 : i32
    return %c0_i32, %c0_i32_0 : i32, i32
  }
  func.func @transform_10(%arg0: i32) -> (i32, i32) {
    %c0_i32 = arith.constant 0 : i32
    %c0_i32_0 = arith.constant 0 : i32
    %c0_i32_1 = arith.constant 0 : i32
    return %c0_i32, %c0_i32_0 : i32, i32
  }
  func.func @transform_11(%arg0: i32) -> (i32, i32) {
    %c0_i32 = arith.constant 0 : i32
    %c0_i32_0 = arith.constant 0 : i32
    %c0_i32_1 = arith.constant 0 : i32
    return %c0_i32, %c0_i32_0 : i32, i32
  }
  func.func @transform_12(%arg0: i32) -> (i32, i32, i32) {
    %c0_i32 = arith.constant 0 : i32
    %c0_i32_0 = arith.constant 0 : i32
    %c0_i32_1 = arith.constant 0 : i32
    %c0_i32_2 = arith.constant 0 : i32
    return %c0_i32, %c0_i32_0, %c0_i32_1 : i32, i32, i32
  }
  func.func @transform_13(%arg0: i32) -> (i32, i32) {
    %c0_i32 = arith.constant 0 : i32
    %c0_i32_0 = arith.constant 0 : i32
    %c0_i32_1 = arith.constant 0 : i32
    return %c0_i32, %c0_i32_0 : i32, i32
  }
  func.func @transform_14(%arg0: i32) -> (i32, i32) {
    %c0_i32 = arith.constant 0 : i32
    %c0_i32_0 = arith.constant 0 : i32
    return %c0_i32, %arg0 : i32, i32
  }
}

</mosaic_0001>

<bundles_post_ra>
// kernel: ghostbottleneck2_pallas.1
= control target key start
LH: loop header
LB: loop body
LE: loop exit
PB: predicated region body
PF: predicated region fallthrough
CT: control target
= control target key end

     0   :  { %s11853_s17 = smov 112   ;;  %s11855_s30 = smov 113   ;;  %v72_v8 = vlaneseq  ;;  %vm2330_vm1 = vcmask 130048   ;;  %s11836_s0 = inlined_call_operand.vmem [shape: f32[16,512], index: 0, kind: input, shape index: {}]   ;;  %s11837_s1 = inlined_call_operand.vmem [shape: f32[25,1,512], index: 1, kind: input, shape index: {}]   ;;  %s11838_s2 = inlined_call_operand.vmem [shape: bf16[8,144], index: 2, kind: input, shape index: {}]   ;;  %s11839_s4 = inlined_call_operand.vmem [shape: bf16[8,400], index: 4, kind: input, shape index: {}]   ;;  %s11840_s3 = inlined_call_operand.vmem [shape: f32[8,1], index: 3, kind: input, shape index: {}]   ;;  %s11841_s5 = inlined_call_operand.vmem [shape: f32[8,1], index: 5, kind: input, shape index: {}]   ;;  %s11842_s9 = inlined_call_operand.vmem [shape: f32[16,1], index: 9, kind: input, shape index: {}]   ;;  %s11843_s12 = inlined_call_operand.vmem [shape: f32[25,16,1], index: 12, kind: input, shape index: {}]   ;;  %s11844_s7 = inlined_call_operand.vmem [shape: f32[4,1], index: 7, kind: input, shape index: {}]   ;;  %s11845_s6 = inlined_call_operand.vmem [shape: f32[4,16], index: 6, kind: input, shape index: {}]   ;;  %s11846_s8 = inlined_call_operand.vmem [shape: f32[16,4], index: 8, kind: input, shape index: {}]   ;;  %s11847_s10 = inlined_call_operand.vmem [shape: bf16[16,144], index: 10, kind: input, shape index: {}]   ;;  %s11848_s11 = inlined_call_operand.vmem [shape: f32[16,1], index: 11, kind: input, shape index: {}]   ;;  %s11849_s13 = inlined_call_operand.vmem [shape: f32[16,1], index: 13, kind: input, shape index: {}]   ;;  %s11850_s14 = inlined_call_operand.vmem [shape: f32[32,512], index: 14, kind: output, shape index: {}]  }
   0x1   :  { %v7434_v0 = vld [vmem:[%s11836_s0 + $0x18] sm:$0xff]  ;;  %v7439_v1 = vld [vmem:[%s11836_s0] sm:$0xff]  ;;  %v7462_v4 = vld [vmem:[%s11836_s0 + $0x30] sm:$0xff]  ;;  %s11857_s15 = smov 127   ;;  %s11859_s16 = smov 1  }
   0x2   :  { %601 = vrot.lane.b32.xlu1 %v7434_v0, %s11853_s17  ;;  %589 = vrot.lane.b32.xlu0 %v7439_v1, %s11853_s17  ;;  %v7448_v2 = vld [vmem:[%s11836_s0 + $0x38] sm:$0xff]  ;;  %v7453_v3 = vld [vmem:[%s11836_s0 + $0x20] sm:$0xff]  ;;  %s11861_s18 = smov 15   ;;  %s11863_s19 = smov 16   ;;  %v86_v9 = vshrl.u32 %v72_v8, 7  ;;  %v7583_v10 = vand.u32 127, %v72_v8 }
   0x3   :  { %v7467_v5 = vld [vmem:[%s11836_s0 + $0x10] sm:$0xff]  ;;  %v7476_v6 = vld [vmem:[%s11836_s0 + $0x28] sm:$0xff]  ;;  %s11865_s20 = smov 17   ;;  %s11851_s21 = smov 111   ;;  %v6444_v12 = vld [vmem:[%s11837_s1 + $0x1c] sm:$0xf] }
   0x4   :  { %v7481_v7 = vld [vmem:[%s11836_s0 + $0x8] sm:$0xff]  ;;  %v7589_v11 = vsub.s32 3, %v86_v9  ;;  %vm11899_vm0 = vcmp.lt.s32.totalorder %v7583_v10, 112  ;;  %v7599_v15 = vsub.s32 2, %v86_v9  ;;  %v7607_v20 = vld [vmem:[%s11838_s2] sm:$0xff]  ;;  %v7611_v22 = vsub.s32 0, %v86_v9 }
   0x5   :  { %v7613_v23 = vsub.s32 1, %v86_v9  ;;  %v6535_v24 = vcombine.high %v7607_v20, %v7607_v20  ;;  %s11886_s2 = smov 95   ;;  %v6439_v48 = vld [vmem:[%s11837_s1 + $0x18] sm:$0xf]  ;;  %vm11906_vm2 = vcmp.lt.s32.totalorder %v7583_v10, 113  ;;  %s11939_s28 = smov 96  }
   0x6   :  { %603 = vrot.lane.b32.xlu1 %v7448_v2, %s11853_s17  ;;  %591 = vrot.lane.b32.xlu0 %v7453_v3, %s11853_s17  ;;  %v632_v16 = vrot.slane %v6444_v12, %v7589_v11  ;;  %12141 = vst [vmem:[#allocation4_spill] sm:$0xff] %v7611_v22  ;;  %v628_v27 = vrot.slane %v6444_v12, %v7599_v15  ;;  %vm11910_vm3 = vcmp.lt.s32.totalorder %v7583_v10, 127  ;;  %s11941_s23 = smov 97   ;;  %s11943_s26 = smov 98   ;;  %vm11911_vm4 = vcmp.lt.s32.totalorder %v7583_v10, 1 }
   0x7   :  { %12142 = vst [vmem:[#allocation5_spill] sm:$0xff] %v7613_v23  ;;  %6572 = vmatprep.mubr.msk.bf16.mxu0 %vm2330_vm1, %v6535_v24  ;;  %6573 = vmatprep.mubr.msk.bf16.mxu1 %vm2330_vm1, %v6535_v24  ;;  %v624_v33 = vrot.slane %v6444_v12, %v7613_v23  ;;  %v620_v36 = vrot.slane %v6444_v12, %v7611_v22  ;;  %s7341_s27 = smov 110   ;;  %vm11912_vm5 = vcmp.lt.s32.totalorder %v7583_v10, 15  ;;  %s7342_s24 = smov 114   ;;  %vm11913_vm6 = vcmp.lt.s32.totalorder %v7583_v10, 16 }
   0x8   :  { %v548_v53 = vrot.slane %v6439_v48, %v7589_v11  ;;  %v544_v60 = vrot.slane %v6439_v48, %v7599_v15  ;;  %v536_v12 = vrot.slane %v6439_v48, %v7611_v22  ;;  %s11880_s22 = smov 126   ;;  %vm11920_vm7 = vcmp.lt.s32.totalorder %v7583_v10, 17  ;;  %s11867_s25 = smov 94  }
   0x9   :  { %vm11888_vm8 = vcmp.lt.s32.totalorder %v7583_v10, 111  ;;  %vm11935_vm9 = vcmp.lt.s32.totalorder %v7583_v10, 95  ;;  %vm11936_vm10 = vcmp.lt.s32.totalorder %v7583_v10, 96  ;;  %vm11937_vm11 = vcmp.lt.s32.totalorder %v7583_v10, 97  ;;  %s12172_s29 = smov 126  }
   0xa   :  { %599 = vrot.lane.b32.xlu1 %v7462_v4, %s11853_s17  ;;  %597 = vrot.lane.b32.xlu0 %v7467_v5, %s11853_s17  ;;  %vm11938_vm12 = vcmp.lt.s32.totalorder %v7583_v10, 98  ;;  %vm1613_vm13 = vcmp.lt.s32.totalorder %v7583_v10, 110  ;;  %vm1529_vm14 = vcmp.lt.s32.totalorder %v7583_v10, 114  ;;  %vm1445_vm15 = vcmp.lt.s32.totalorder %v7583_v10, 126 }
   0xe   :  { %595 = vrot.lane.b32.xlu1 %v7476_v6, %s11853_s17  ;;  %593 = vrot.lane.b32.xlu0 %v7481_v7, %s11853_s17  ;;  %s7346_s17 = smov 14  }
  0x12   :  { %507 = vrot.lane.b32.xlu1 %v7453_v3, %s11855_s30  ;;  %505 = vrot.lane.b32.xlu0 %v7439_v1, %s11855_s30 }
  0x16   :  { %519 = vrot.lane.b32.xlu1 %v7448_v2, %s11855_s30  ;;  %517 = vrot.lane.b32.xlu0 %v7434_v0, %s11855_s30 }
  0x1a   :  { %515 = vrot.lane.b32.xlu1 %v7462_v4, %s11855_s30  ;;  %513 = vrot.lane.b32.xlu0 %v7467_v5, %s11855_s30 }
  0x1e   :  { %511 = vrot.lane.b32.xlu1 %v7476_v6, %s11855_s30  ;;  %509 = vrot.lane.b32.xlu0 %v7481_v7, %s11855_s30  ;;  %s7347_s30 = smov 18  }
  0x22   :  { %423 = vrot.lane.b32.xlu1 %v7453_v3, %s11857_s15  ;;  %421 = vrot.lane.b32.xlu0 %v7439_v1, %s11857_s15 }
  0x26   :  { %435 = vrot.lane.b32.xlu1 %v7448_v2, %s11857_s15  ;;  %433 = vrot.lane.b32.xlu0 %v7434_v0, %s11857_s15 }
  0x2a   :  { %431 = vrot.lane.b32.xlu1 %v7462_v4, %s11857_s15  ;;  %429 = vrot.lane.b32.xlu0 %v7467_v5, %s11857_s15 }
  0x2e   :  { %427 = vrot.lane.b32.xlu1 %v7476_v6, %s11857_s15  ;;  %425 = vrot.lane.b32.xlu0 %v7481_v7, %s11857_s15  ;;  %s7348_s15 = smov 30  }
  0x32   :  { %319 = vrot.lane.b32.xlu1 %v7462_v4, %s11859_s16  ;;  %317 = vrot.lane.b32.xlu0 %v7467_v5, %s11859_s16 }
  0x36   :  { %323 = vrot.lane.b32.xlu1 %v7448_v2, %s11859_s16  ;;  %321 = vrot.lane.b32.xlu0 %v7434_v0, %s11859_s16 }
  0x3a   :  { %315 = vrot.lane.b32.xlu1 %v7476_v6, %s11859_s16  ;;  %313 = vrot.lane.b32.xlu0 %v7481_v7, %s11859_s16 }
  0x3e   :  { %311 = vrot.lane.b32.xlu1 %v7453_v3, %s11859_s16  ;;  %309 = vrot.lane.b32.xlu0 %v7439_v1, %s11859_s16  ;;  %s7353_s16 = smov 34  }
  0x42   :  { %235 = vrot.lane.b32.xlu1 %v7462_v4, %s11861_s18  ;;  %233 = vrot.lane.b32.xlu0 %v7467_v5, %s11861_s18 }
  0x46   :  { %239 = vrot.lane.b32.xlu1 %v7448_v2, %s11861_s18  ;;  %237 = vrot.lane.b32.xlu0 %v7434_v0, %s11861_s18 }
  0x4a   :  { %231 = vrot.lane.b32.xlu1 %v7476_v6, %s11861_s18  ;;  %229 = vrot.lane.b32.xlu0 %v7481_v7, %s11861_s18 }
  0x4e   :  { %227 = vrot.lane.b32.xlu1 %v7453_v3, %s11861_s18  ;;  %225 = vrot.lane.b32.xlu0 %v7439_v1, %s11861_s18  ;;  %s7350_s18 = smov 32  }
  0x52   :  { %151 = vrot.lane.b32.xlu1 %v7462_v4, %s11863_s19  ;;  %149 = vrot.lane.b32.xlu0 %v7467_v5, %s11863_s19 }
  0x56   :  { %155 = vrot.lane.b32.xlu1 %v7448_v2, %s11863_s19  ;;  %153 = vrot.lane.b32.xlu0 %v7434_v0, %s11863_s19 }
  0x5a   :  { %147 = vrot.lane.b32.xlu1 %v7476_v6, %s11863_s19  ;;  %145 = vrot.lane.b32.xlu0 %v7481_v7, %s11863_s19 }
  0x5e   :  { %143 = vrot.lane.b32.xlu1 %v7453_v3, %s11863_s19  ;;  %141 = vrot.lane.b32.xlu0 %v7439_v1, %s11863_s19  ;;  %s12257_s19 = smov 1  }
  0x62   :  { %66 = vrot.lane.b32.xlu1 %v7462_v4, %s11865_s20  ;;  %64 = vrot.lane.b32.xlu0 %v7467_v5, %s11865_s20 }
  0x66   :  { %70 = vrot.lane.b32.xlu1 %v7448_v2, %s11865_s20  ;;  %68 = vrot.lane.b32.xlu0 %v7434_v0, %s11865_s20 }
  0x6a   :  { %62 = vrot.lane.b32.xlu1 %v7476_v6, %s11865_s20  ;;  %60 = vrot.lane.b32.xlu0 %v7481_v7, %s11865_s20 }
  0x6e   :  { %58 = vrot.lane.b32.xlu1 %v7453_v3, %s11865_s20  ;;  %56 = vrot.lane.b32.xlu0 %v7439_v1, %s11865_s20  ;;  %s7349_s20 = smov 31  }
  0x72   :  { %675 = vrot.lane.b32.xlu1 %v7453_v3, %s11851_s21  ;;  %673 = vrot.lane.b32.xlu0 %v7439_v1, %s11851_s21 }
  0x74   :  { %v602_v13 = vpop.permute.xlu1 %601  ;;  %v590_v14 = vpop.permute.xlu0 %589 }
  0x75   :  { %v612_v17 = vsel %vm11899_vm0, %v602_v13, %v590_v14 }
  0x76   :  { %687 = vrot.lane.b32.xlu1 %v7448_v2, %s11851_s21  ;;  %685 = vrot.lane.b32.xlu0 %v7434_v0, %s11851_s21  ;;  %v640_v25 = vmul.f32 %v632_v16, %v612_v17 }
  0x78   :  { %v604_v18 = vpop.permute.xlu1 %603  ;;  %v592_v19 = vpop.permute.xlu0 %591 }
  0x79   :  { %v613_v21 = vsel %vm11899_vm0, %v604_v18, %v592_v19 }
  0x7a   :  { %683 = vrot.lane.b32.xlu1 %v7462_v4, %s11851_s21  ;;  %681 = vrot.lane.b32.xlu0 %v7467_v5, %s11851_s21  ;;  %v644_v26 = vmul.f32 %v632_v16, %v613_v21  ;;  %v540_v16 = vrot.slane %v6439_v48, %v7613_v23 }
  0x7c   :  { %v600_v28 = vpop.permute.xlu1 %599  ;;  %v598_v29 = vpop.permute.xlu0 %597  ;;  %v7624_v30 = vpack.c.bf16 %v644_v26, %v640_v25 }
  0x7d   :  { %v607_v31 = vsel %vm11899_vm0, %v600_v28, %v604_v18  ;;  %v606_v32 = vsel %vm11899_vm0, %v598_v29, %v602_v13 }
  0x7e   :  { %679 = vrot.lane.b32.xlu1 %v7476_v6, %s11851_s21  ;;  %677 = vrot.lane.b32.xlu0 %v7481_v7, %s11851_s21  ;;  %v639_v34 = vmul.f32 %v628_v27, %v606_v32  ;;  %v643_v35 = vmul.f32 %v628_v27, %v607_v31  ;;  %v6434_v32 = vld [vmem:[%s11837_s1 + $0x14] sm:$0xf]  ;;  %s11878_s21 = smov 2  }
  0x7f   :  { %2375 = vmatprep.subr.bf16.mxu1 %v7624_v30 }
  0x80   :  { %v596_v37 = vpop.permute.xlu1 %595  ;;  %v594_v38 = vpop.permute.xlu0 %593  ;;  %v7637_v39 = vpack.c.bf16 %v643_v35, %v639_v34 }
  0x81   :  { %v609_v40 = vsel %vm11899_vm0, %v596_v37, %v600_v28  ;;  %v611_v41 = vsel %vm11899_vm0, %v592_v19, %v596_v37  ;;  %v608_v42 = vsel %vm11899_vm0, %v594_v38, %v598_v29  ;;  %v610_v43 = vsel %vm11899_vm0, %v590_v14, %v594_v38 }
  0x82   :  { %1939 = vrot.lane.b32.xlu1 %v7476_v6, %s11886_s2  ;;  %1937 = vrot.lane.b32.xlu0 %v7481_v7, %s11886_s2  ;;  %v638_v44 = vmul.f32 %v624_v33, %v608_v42  ;;  %v642_v45 = vmul.f32 %v624_v33, %v609_v40  ;;  %v637_v46 = vmul.f32 %v620_v36, %v610_v43  ;;  %vm11927_vm0 = vcmp.lt.s32.totalorder %v7583_v10, 94 }
  0x83   :  { %2376 = vmatpush1.bf16.msra.mxu1 %v7637_v39  ;;  %v641_v47 = vmul.f32 %v620_v36, %v611_v41  ;;  %v464_v37 = vrot.slane %v6434_v32, %v7589_v11 }
  0x84   :  { %v508_v49 = vpop.permute.xlu1 %507  ;;  %v506_v50 = vpop.permute.xlu0 %505  ;;  %v7655_v51 = vpack.c.bf16 %v642_v45, %v638_v44  ;;  %v460_v45 = vrot.slane %v6434_v32, %v7599_v15 }
  0x85   :  { %v7657_v52 = vpack.c.bf16 %v641_v47, %v637_v46 }
  0x86   :  { %1943 = vrot.lane.b32.xlu1 %v7462_v4, %s11886_s2  ;;  %1941 = vrot.lane.b32.xlu0 %v7467_v5, %s11886_s2 }
  0x87   :  { %2334 = vmatprep.subr.bf16.mxu0 %v7655_v51 }
  0x88   :  { %2335 = vmatpush1.bf16.msra.mxu0 %v7657_v52  ;;  %v520_v54 = vpop.permute.xlu1 %519  ;;  %v518_v55 = vpop.permute.xlu0 %517 }
  0x89   :  { %v529_v56 = vsel %vm11906_vm2, %v520_v54, %v508_v49  ;;  %v528_v57 = vsel %vm11906_vm2, %v518_v55, %v506_v50 }
  0x8a   :  { %v560_v58 = vmul.f32 %v548_v53, %v529_v56  ;;  %v556_v59 = vmul.f32 %v548_v53, %v528_v57  ;;  %1935 = vrot.lane.b32.xlu1 %v7453_v3, %s11886_s2  ;;  %1933 = vrot.lane.b32.xlu0 %v7439_v1, %s11886_s2  ;;  %v452_v53 = vrot.slane %v6434_v32, %v7611_v22 }
  0x8b   :  { %v456_v56 = vrot.slane %v6434_v32, %v7613_v23 }
  0x8c   :  { %v516_v61 = vpop.permute.xlu1 %515  ;;  %v514_v62 = vpop.permute.xlu0 %513  ;;  %v7676_v63 = vpack.c.bf16 %v560_v58, %v556_v59 }
  0x8d   :  { %v523_v8 = vsel %vm11906_vm2, %v516_v61, %v520_v54  ;;  %v522_v9 = vsel %vm11906_vm2, %v514_v62, %v518_v55 }
  0x8e   :  { %v559_v13 = vmul.f32 %v544_v60, %v523_v8  ;;  %v555_v14 = vmul.f32 %v544_v60, %v522_v9  ;;  %1855 = vrot.lane.b32.xlu1 %v7476_v6, %s11939_s28  ;;  %1853 = vrot.lane.b32.xlu0 %v7481_v7, %s11939_s28  ;;  %v7745_v60 = vpack.c.bf16 %v7448_v2, %v7434_v0 }
  0x8f   :  { %2377 = vmatprep.subr.bf16.mxu1 %v7676_v63 }
  0x90   :  { %v512_v17 = vpop.permute.xlu1 %511  ;;  %v510_v18 = vpop.permute.xlu0 %509  ;;  %v7689_v19 = vpack.c.bf16 %v559_v13, %v555_v14 }
  0x91   :  { %v525_v21 = vsel %vm11906_vm2, %v512_v17, %v516_v61  ;;  %v527_v24 = vsel %vm11906_vm2, %v508_v49, %v512_v17  ;;  %v524_v25 = vsel %vm11906_vm2, %v510_v18, %v514_v62  ;;  %v526_v26 = vsel %vm11906_vm2, %v506_v50, %v510_v18  ;;  %v6425_v17 = vld [vmem:[%s11837_s1 + $0xc] sm:$0xf] }
  0x92   :  { %v557_v27 = vmul.f32 %v536_v12, %v527_v24  ;;  %v558_v28 = vmul.f32 %v540_v16, %v525_v21  ;;  %v553_v29 = vmul.f32 %v536_v12, %v526_v26  ;;  %v554_v31 = vmul.f32 %v540_v16, %v524_v25  ;;  %1859 = vrot.lane.b32.xlu1 %v7462_v4, %s11939_s28 }
  0x93   :  { %1857 = vrot.lane.b32.xlu0 %v7467_v5, %s11939_s28  ;;  %2378 = vmatpush1.bf16.msra.mxu1 %v7689_v19  ;;  %v7770_v26 = vpack.c.bf16 %v7462_v4, %v7467_v5  ;;  %vm1277_vm2 = vcmp.lt.s32.totalorder %v7583_v10, 14 }
  0x94   :  { %v424_v33 = vpop.permute.xlu1 %423  ;;  %v422_v34 = vpop.permute.xlu0 %421  ;;  %v7707_v35 = vpack.c.bf16 %v558_v28, %v554_v31  ;;  %v7709_v36 = vpack.c.bf16 %v557_v27, %v553_v29  ;;  %v7774_v27 = vpack.c.bf16 %v7476_v6, %v7481_v7  ;;  %v352_v28 = vrot.slane %v6425_v17, %v7589_v11 }
  0x95   :  { %v7786_v29 = vpack.c.bf16 %v7453_v3, %v7439_v1 }
  0x96   :  { %1851 = vrot.lane.b32.xlu1 %v7453_v3, %s11939_s28  ;;  %2336 = vmatprep.subr.bf16.mxu0 %v7707_v35 }
  0x97   :  { %1849 = vrot.lane.b32.xlu0 %v7439_v1, %s11939_s28  ;;  %2337 = vmatpush1.bf16.msra.mxu0 %v7709_v36 }
  0x98   :  { %v436_v38 = vpop.permute.xlu1 %435  ;;  %v434_v40 = vpop.permute.xlu0 %433 }
  0x99   :  { %v445_v41 = vsel %vm11910_vm3, %v436_v38, %v424_v33  ;;  %v444_v42 = vsel %vm11910_vm3, %v434_v40, %v422_v34 }
  0x9a   :  { %v476_v43 = vmul.f32 %v464_v37, %v445_v41  ;;  %v472_v44 = vmul.f32 %v464_v37, %v444_v42  ;;  %1771 = vrot.lane.b32.xlu1 %v7476_v6, %s11941_s23 }
  0x9b   :  { %1769 = vrot.lane.b32.xlu0 %v7481_v7, %s11941_s23 }
  0x9c   :  { %v432_v46 = vpop.permute.xlu1 %431  ;;  %v430_v47 = vpop.permute.xlu0 %429  ;;  %v7728_v48 = vpack.c.bf16 %v476_v43, %v472_v44 }
  0x9d   :  { %v439_v49 = vsel %vm11910_vm3, %v432_v46, %v436_v38  ;;  %v438_v50 = vsel %vm11910_vm3, %v430_v47, %v434_v40  ;;  %v348_v40 = vrot.slane %v6425_v17, %v7599_v15 }
  0x9e   :  { %v475_v54 = vmul.f32 %v460_v45, %v439_v49  ;;  %v471_v55 = vmul.f32 %v460_v45, %v438_v50  ;;  %1775 = vrot.lane.b32.xlu1 %v7462_v4, %s11941_s23  ;;  %2379 = vmatprep.subr.bf16.mxu1 %v7728_v48  ;;  %v344_v50 = vrot.slane %v6425_v17, %v7613_v23 }
  0x9f   :  { %1773 = vrot.lane.b32.xlu0 %v7467_v5, %s11941_s23 }
  0xa0   :  { %v428_v57 = vpop.permute.xlu1 %427  ;;  %v426_v58 = vpop.permute.xlu0 %425  ;;  %v7741_v59 = vpack.c.bf16 %v475_v54, %v471_v55 }
  0xa1   :  { %v441_v61 = vsel %vm11910_vm3, %v428_v57, %v432_v46  ;;  %v443_v62 = vsel %vm11910_vm3, %v424_v33, %v428_v57  ;;  %v440_v8 = vsel %vm11910_vm3, %v426_v58, %v430_v47  ;;  %v442_v9 = vsel %vm11910_vm3, %v422_v34, %v426_v58 }
  0xa2   :  { %v473_v12 = vmul.f32 %v452_v53, %v443_v62  ;;  %v474_v13 = vmul.f32 %v456_v56, %v441_v61  ;;  %v469_v14 = vmul.f32 %v452_v53, %v442_v9  ;;  %v470_v16 = vmul.f32 %v456_v56, %v440_v8  ;;  %1767 = vrot.lane.b32.xlu1 %v7453_v3, %s11941_s23 }
  0xa3   :  { %1765 = vrot.lane.b32.xlu0 %v7439_v1, %s11941_s23  ;;  %2380 = vmatpush1.bf16.msra.mxu1 %v7741_v59  ;;  %v340_v46 = vrot.slane %v6425_v17, %v7611_v22  ;;  %vm1193_vm3 = vcmp.lt.s32.totalorder %v7583_v10, 18 }
  0xa4   :  { %v320_v18 = vpop.permute.xlu1 %319  ;;  %v318_v21 = vpop.permute.xlu0 %317  ;;  %v7763_v24 = vpack.c.bf16 %v474_v13, %v470_v16  ;;  %v7765_v25 = vpack.c.bf16 %v473_v12, %v469_v14  ;;  %2381 = vmatprep.subr.bf16.mxu1 %v7745_v60  ;;  %v6420_v13 = vld [vmem:[%s11837_s1 + $0x8] sm:$0xf] }
  0xa6   :  { %1687 = vrot.lane.b32.xlu1 %v7476_v6, %s11943_s26  ;;  %2338 = vmatprep.subr.bf16.mxu0 %v7763_v24 }
  0xa7   :  { %1685 = vrot.lane.b32.xlu0 %v7481_v7, %s11943_s26  ;;  %2339 = vmatpush1.bf16.msra.mxu0 %v7765_v25 }
  0xa8   :  { %v324_v31 = vpop.permute.xlu1 %323  ;;  %v322_v32 = vpop.permute.xlu0 %321  ;;  %2382 = vmatpush1.bf16.msra.mxu1 %v7770_v26  ;;  %2340 = vmatprep.subr.bf16.mxu0 %v7774_v27 }
  0xa9   :  { %v327_v33 = vsel %vm11911_vm4, %v320_v18, %v324_v31  ;;  %v326_v34 = vsel %vm11911_vm4, %v318_v21, %v322_v32 }
  0xaa   :  { %v364_v37 = vmul.f32 %v352_v28, %v327_v33  ;;  %v360_v38 = vmul.f32 %v352_v28, %v326_v34  ;;  %1691 = vrot.lane.b32.xlu1 %v7462_v4, %s11943_s26 }
  0xab   :  { %1689 = vrot.lane.b32.xlu0 %v7467_v5, %s11943_s26  ;;  %2341 = vmatpush1.bf16.msra.mxu0 %v7786_v29 }
  0xac   :  { %v316_v41 = vpop.permute.xlu1 %315  ;;  %v314_v42 = vpop.permute.xlu0 %313  ;;  %v7800_v43 = vpack.c.bf16 %v364_v37, %v360_v38  ;;  %v264_v38 = vrot.slane %v6420_v13, %v7599_v15 }
  0xad   :  { %v329_v44 = vsel %vm11911_vm4, %v316_v41, %v320_v18  ;;  %v328_v45 = vsel %vm11911_vm4, %v314_v42, %v318_v21  ;;  %v268_v21 = vrot.slane %v6420_v13, %v7589_v11 }
  0xae   :  { %v363_v47 = vmul.f32 %v348_v40, %v329_v44  ;;  %v359_v49 = vmul.f32 %v348_v40, %v328_v45  ;;  %1683 = vrot.lane.b32.xlu1 %v7453_v3, %s11943_s26  ;;  %2383 = vmatprep.subr.bf16.mxu1 %v7800_v43 }
  0xaf   :  { %1681 = vrot.lane.b32.xlu0 %v7439_v1, %s11943_s26 }
  0xb0   :  { %v312_v53 = vpop.permute.xlu1 %311  ;;  %v310_v54 = vpop.permute.xlu0 %309  ;;  %v7813_v55 = vpack.c.bf16 %v363_v47, %v359_v49 }
  0xb1   :  { %v331_v56 = vsel %vm11911_vm4, %v312_v53, %v316_v41  ;;  %v333_v57 = vsel %vm11911_vm4, %v324_v31, %v312_v53  ;;  %v330_v58 = vsel %vm11911_vm4, %v310_v54, %v314_v42  ;;  %v332_v61 = vsel %vm11911_vm4, %v322_v32, %v310_v54 }
  0xb2   :  { %v361_v62 = vmul.f32 %v340_v46, %v333_v57  ;;  %v362_v8 = vmul.f32 %v344_v50, %v331_v56  ;;  %v357_v9 = vmul.f32 %v340_v46, %v332_v61  ;;  %v358_v12 = vmul.f32 %v344_v50, %v330_v58  ;;  %1603 = vrot.lane.b32.xlu1 %v7476_v6, %s7341_s27 }
  0xb3   :  { %1601 = vrot.lane.b32.xlu0 %v7481_v7, %s7341_s27  ;;  %2384 = vmatpush1.bf16.msra.mxu1 %v7813_v55  ;;  %v256_v46 = vrot.slane %v6420_v13, %v7611_v22  ;;  %v260_v50 = vrot.slane %v6420_v13, %v7613_v23  ;;  %vm1109_vm4 = vcmp.lt.s32.totalorder %v7583_v10, 30 }
  0xb4   :  { %v236_v14 = vpop.permute.xlu1 %235  ;;  %v234_v16 = vpop.permute.xlu0 %233  ;;  %v7831_v17 = vpack.c.bf16 %v362_v8, %v358_v12  ;;  %v7833_v18 = vpack.c.bf16 %v361_v62, %v357_v9 }
  0xb6   :  { %1607 = vrot.lane.b32.xlu1 %v7462_v4, %s7341_s27  ;;  %2342 = vmatprep.subr.bf16.mxu0 %v7831_v17 }
  0xb7   :  { %1605 = vrot.lane.b32.xlu0 %v7467_v5, %s7341_s27  ;;  %2343 = vmatpush1.bf16.msra.mxu0 %v7833_v18 }
  0xb8   :  { %v240_v28 = vpop.permute.xlu1 %239  ;;  %v238_v31 = vpop.permute.xlu0 %237 }
  0xb9   :  { %v243_v32 = vsel %vm11912_vm5, %v236_v14, %v240_v28  ;;  %v242_v33 = vsel %vm11912_vm5, %v234_v16, %v238_v31 }
  0xba   :  { %v280_v34 = vmul.f32 %v268_v21, %v243_v32  ;;  %v276_v37 = vmul.f32 %v268_v21, %v242_v33  ;;  %1599 = vrot.lane.b32.xlu1 %v7453_v3, %s7341_s27 }
  0xbb   :  { %1597 = vrot.lane.b32.xlu0 %v7439_v1, %s7341_s27 }
  0xbc   :  { %v232_v40 = vpop.permute.xlu1 %231  ;;  %v230_v41 = vpop.permute.xlu0 %229  ;;  %v7852_v42 = vpack.c.bf16 %v280_v34, %v276_v37 }
  0xbd   :  { %v245_v44 = vsel %vm11912_vm5, %v232_v40, %v236_v14  ;;  %v244_v45 = vsel %vm11912_vm5, %v230_v41, %v234_v16  ;;  %v6415_v14 = vld [vmem:[%s11837_s1 + $0x4] sm:$0xf] }
  0xbe   :  { %v279_v47 = vmul.f32 %v264_v38, %v245_v44  ;;  %v275_v49 = vmul.f32 %v264_v38, %v244_v45  ;;  %1519 = vrot.lane.b32.xlu1 %v7476_v6, %s7342_s24  ;;  %2385 = vmatprep.subr.bf16.mxu1 %v7852_v42  ;;  %v184_v32 = vrot.slane %v6415_v14, %v7589_v11 }
  0xbf   :  { %1517 = vrot.lane.b32.xlu0 %v7481_v7, %s7342_s24  ;;  %v180_v44 = vrot.slane %v6415_v14, %v7599_v15 }
  0xc0   :  { %v228_v53 = vpop.permute.xlu1 %227  ;;  %v226_v54 = vpop.permute.xlu0 %225  ;;  %v7865_v56 = vpack.c.bf16 %v279_v47, %v275_v49 }
  0xc1   :  { %v247_v57 = vsel %vm11912_vm5, %v228_v53, %v232_v40  ;;  %v249_v58 = vsel %vm11912_vm5, %v240_v28, %v228_v53  ;;  %v246_v61 = vsel %vm11912_vm5, %v226_v54, %v230_v41  ;;  %v248_v62 = vsel %vm11912_vm5, %v238_v31, %v226_v54 }
  0xc2   :  { %v277_v8 = vmul.f32 %v256_v46, %v249_v58  ;;  %v278_v9 = vmul.f32 %v260_v50, %v247_v57  ;;  %v273_v12 = vmul.f32 %v256_v46, %v248_v62  ;;  %v274_v13 = vmul.f32 %v260_v50, %v246_v61  ;;  %1523 = vrot.lane.b32.xlu1 %v7462_v4, %s7342_s24 }
  0xc3   :  { %1521 = vrot.lane.b32.xlu0 %v7467_v5, %s7342_s24  ;;  %2386 = vmatpush1.bf16.msra.mxu1 %v7865_v56  ;;  %v172_v53 = vrot.slane %v6415_v14, %v7611_v22  ;;  %v176_v58 = vrot.slane %v6415_v14, %v7613_v23  ;;  %vm1025_vm5 = vcmp.lt.s32.totalorder %v7583_v10, 31 }
  0xc4   :  { %v152_v16 = vpop.permute.xlu1 %151  ;;  %v150_v21 = vpop.permute.xlu0 %149  ;;  %v7883_v28 = vpack.c.bf16 %v278_v9, %v274_v13  ;;  %v7885_v31 = vpack.c.bf16 %v277_v8, %v273_v12 }
  0xc6   :  { %1515 = vrot.lane.b32.xlu1 %v7453_v3, %s7342_s24  ;;  %2344 = vmatprep.subr.bf16.mxu0 %v7883_v28 }
  0xc7   :  { %1513 = vrot.lane.b32.xlu0 %v7439_v1, %s7342_s24  ;;  %2345 = vmatpush1.bf16.msra.mxu0 %v7885_v31 }
  0xc8   :  { %v156_v33 = vpop.permute.xlu1 %155  ;;  %v154_v34 = vpop.permute.xlu0 %153 }
  0xc9   :  { %v159_v37 = vsel %vm11913_vm6, %v152_v16, %v156_v33  ;;  %v158_v38 = vsel %vm11913_vm6, %v150_v21, %v154_v34 }
  0xca   :  { %v196_v40 = vmul.f32 %v184_v32, %v159_v37  ;;  %v192_v41 = vmul.f32 %v184_v32, %v158_v38  ;;  %1435 = vrot.lane.b32.xlu1 %v7476_v6, %s11880_s22 }
  0xcb   :  { %1433 = vrot.lane.b32.xlu0 %v7481_v7, %s11880_s22 }
  0xcc   :  { %v148_v45 = vpop.permute.xlu1 %147  ;;  %v146_v46 = vpop.permute.xlu0 %145  ;;  %v7904_v47 = vpack.c.bf16 %v196_v40, %v192_v41 }
  0xcd   :  { %v161_v49 = vsel %vm11913_vm6, %v148_v45, %v152_v16  ;;  %v160_v50 = vsel %vm11913_vm6, %v146_v46, %v150_v21 }
  0xce   :  { %v195_v54 = vmul.f32 %v180_v44, %v161_v49  ;;  %v191_v57 = vmul.f32 %v180_v44, %v160_v50  ;;  %1439 = vrot.lane.b32.xlu1 %v7462_v4, %s11880_s22  ;;  %2387 = vmatprep.subr.bf16.mxu1 %v7904_v47 }
  0xcf   :  { %1437 = vrot.lane.b32.xlu0 %v7467_v5, %s11880_s22 }
  0xd0   :  { %v144_v61 = vpop.permute.xlu1 %143  ;;  %v142_v62 = vpop.permute.xlu0 %141  ;;  %v7917_v8 = vpack.c.bf16 %v195_v54, %v191_v57 }
  0xd1   :  { %v163_v9 = vsel %vm11913_vm6, %v144_v61, %v148_v45  ;;  %v165_v12 = vsel %vm11913_vm6, %v156_v33, %v144_v61  ;;  %v162_v13 = vsel %vm11913_vm6, %v142_v62, %v146_v46  ;;  %v164_v16 = vsel %vm11913_vm6, %v154_v34, %v142_v62  ;;  %v83_v33 = vld [vmem:[%s11837_s1] sm:$0xf] }
  0xd2   :  { %v193_v14 = vmul.f32 %v172_v53, %v165_v12  ;;  %v194_v21 = vmul.f32 %v176_v58, %v163_v9  ;;  %v189_v32 = vmul.f32 %v172_v53, %v164_v16  ;;  %v190_v37 = vmul.f32 %v176_v58, %v162_v13  ;;  %1431 = vrot.lane.b32.xlu1 %v7453_v3, %s11880_s22 }
  0xd3   :  { %1429 = vrot.lane.b32.xlu0 %v7439_v1, %s11880_s22  ;;  %2388 = vmatpush1.bf16.msra.mxu1 %v7917_v8  ;;  %v100_v44 = vrot.slane %v83_v33, %v7589_v11  ;;  %v96_v57 = vrot.slane %v83_v33, %v7599_v15  ;;  %v88_v13 = vrot.slane %v83_v33, %v7611_v22  ;;  %vm941_vm6 = vcmp.lt.s32.totalorder %v7583_v10, 32  ;;  %s12325_s22 = smov 98  }
  0xd4   :  { %v67_v38 = vpop.permute.xlu1 %66  ;;  %v65_v40 = vpop.permute.xlu0 %64  ;;  %v7935_v41 = vpack.c.bf16 %v194_v21, %v190_v37  ;;  %v7937_v34 = vpack.c.bf16 %v193_v14, %v189_v32  ;;  %v92_v21 = vrot.slane %v83_v33, %v7613_v23 }
  0xd6   :  { %1347 = vrot.lane.b32.xlu1 %v7453_v3, %s11878_s21  ;;  %2346 = vmatprep.subr.bf16.mxu0 %v7935_v41 }
  0xd7   :  { %1345 = vrot.lane.b32.xlu0 %v7439_v1, %s11878_s21  ;;  %2347 = vmatpush1.bf16.msra.mxu0 %v7937_v34 }
  0xd8   :  { %v71_v45 = vpop.permute.xlu1 %70  ;;  %v69_v46 = vpop.permute.xlu0 %68 }
  0xd9   :  { %v76_v49 = vsel %vm11920_vm7, %v67_v38, %v71_v45  ;;  %v75_v50 = vsel %vm11920_vm7, %v65_v40, %v69_v46 }
  0xda   :  { %v112_v53 = vmul.f32 %v100_v44, %v76_v49  ;;  %v108_v54 = vmul.f32 %v100_v44, %v75_v50  ;;  %1351 = vrot.lane.b32.xlu1 %v7476_v6, %s11878_s21 }
  0xdb   :  { %1349 = vrot.lane.b32.xlu0 %v7481_v7, %s11878_s21 }
  0xdc   :  { %v63_v58 = vpop.permute.xlu1 %62  ;;  %v61_v61 = vpop.permute.xlu0 %60  ;;  %v7956_v62 = vpack.c.bf16 %v112_v53, %v108_v54 }
  0xdd   :  { %v78_v9 = vsel %vm11920_vm7, %v63_v58, %v67_v38  ;;  %v77_v12 = vsel %vm11920_vm7, %v61_v61, %v65_v40 }
  0xde   :  { %v111_v16 = vmul.f32 %v96_v57, %v78_v9  ;;  %v107_v14 = vmul.f32 %v96_v57, %v77_v12  ;;  %1359 = vrot.lane.b32.xlu1 %v7448_v2, %s11878_s21  ;;  %2389 = vmatprep.subr.bf16.mxu1 %v7956_v62 }
  0xdf   :  { %1357 = vrot.lane.b32.xlu0 %v7434_v0, %s11878_s21  ;;  %s12174_s21 = smov 94  }
  0xe0   :  { %v59_v32 = vpop.permute.xlu1 %58  ;;  %v57_v37 = vpop.permute.xlu0 %56  ;;  %v7969_v38 = vpack.c.bf16 %v111_v16, %v107_v14 }
  0xe1   :  { %v80_v40 = vsel %vm11920_vm7, %v59_v32, %v63_v58  ;;  %v82_v44 = vsel %vm11920_vm7, %v71_v45, %v59_v32  ;;  %v79_v49 = vsel %vm11920_vm7, %v57_v37, %v61_v61  ;;  %v81_v50 = vsel %vm11920_vm7, %v69_v46, %v57_v37  ;;  %v6449_v45 = vld [vmem:[%s11837_s1 + $0x20] sm:$0xf] }
  0xe2   :  { %v109_v33 = vmul.f32 %v88_v13, %v82_v44  ;;  %v110_v53 = vmul.f32 %v92_v21, %v80_v40  ;;  %v105_v54 = vmul.f32 %v88_v13, %v81_v50  ;;  %v106_v57 = vmul.f32 %v92_v21, %v79_v49  ;;  %2023 = vrot.lane.b32.xlu1 %v7476_v6, %s11867_s25 }
  0xe3   :  { %2021 = vrot.lane.b32.xlu0 %v7481_v7, %s11867_s25  ;;  %2390 = vmatpush1.bf16.msra.mxu1 %v7969_v38  ;;  %v716_v12 = vrot.slane %v6449_v45, %v7589_v11  ;;  %v712_v37 = vrot.slane %v6449_v45, %v7599_v15  ;;  %vm857_vm7 = vcmp.lt.s32.totalorder %v7583_v10, 33 }
  0xe4   :  { %v676_v58 = vpop.permute.xlu1 %675  ;;  %v674_v61 = vpop.permute.xlu0 %673  ;;  %v7987_v46 = vpack.c.bf16 %v110_v53, %v106_v57  ;;  %v7989_v9 = vpack.c.bf16 %v109_v33, %v105_v54  ;;  %v704_v33 = vrot.slane %v6449_v45, %v7611_v22  ;;  %v708_v57 = vrot.slane %v6449_v45, %v7613_v23 }
  0xe6   :  { %2027 = vrot.lane.b32.xlu1 %v7462_v4, %s11867_s25  ;;  %2348 = vmatprep.subr.bf16.mxu0 %v7987_v46 }
  0xe7   :  { %2025 = vrot.lane.b32.xlu0 %v7467_v5, %s11867_s25  ;;  %2349 = vmatpush1.bf16.msra.mxu0 %v7989_v9 }
  0xe8   :  { %v688_v13 = vpop.permute.xlu1 %687  ;;  %v686_v16 = vpop.permute.xlu0 %685 }
  0xe9   :  { %v697_v14 = vsel %vm11888_vm8, %v688_v13, %v676_v58  ;;  %v696_v21 = vsel %vm11888_vm8, %v686_v16, %v674_v61 }
  0xea   :  { %v728_v4 = vmul.f32 %v716_v12, %v697_v14  ;;  %v724_v32 = vmul.f32 %v716_v12, %v696_v21  ;;  %2019 = vrot.lane.b32.xlu1 %v7453_v3, %s11867_s25 }
  0xeb   :  { %2017 = vrot.lane.b32.xlu0 %v7439_v1, %s11867_s25  ;;  %s7352_s25 = smov 33  }
  0xec   :  { %v684_v5 = vpop.permute.xlu1 %683  ;;  %v682_v40 = vpop.permute.xlu0 %681  ;;  %v8008_v44 = vpack.c.bf16 %v728_v4, %v724_v32 }
  0xed   :  { %v691_v49 = vsel %vm11888_vm8, %v684_v5, %v688_v13  ;;  %v690_v50 = vsel %vm11888_vm8, %v682_v40, %v686_v16 }
  0xee   :  { %12143 = vst [vmem:[#allocation6_spill] sm:$0xff] %v8008_v44  ;;  %v727_v53 = vmul.f32 %v712_v37, %v691_v49  ;;  %v723_v54 = vmul.f32 %v712_v37, %v690_v50  ;;  %1263 = vrot.lane.b32.xlu1 %v7453_v3, %s7346_s17  ;;  %2405 = vmatprep.subr.bf16.mxu1 %v8008_v44 }
  0xef   :  { %1261 = vrot.lane.b32.xlu0 %v7439_v1, %s7346_s17 }
  0xf0   :  { %v680_v12 = vpop.permute.xlu1 %679  ;;  %v678_v13 = vpop.permute.xlu0 %677  ;;  %v8021_v14 = vpack.c.bf16 %v727_v53, %v723_v54 }
  0xf1   :  { %v693_v16 = vsel %vm11888_vm8, %v680_v12, %v684_v5  ;;  %v695_v21 = vsel %vm11888_vm8, %v676_v58, %v680_v12  ;;  %v692_v4 = vsel %vm11888_vm8, %v678_v13, %v682_v40  ;;  %v694_v32 = vsel %vm11888_vm8, %v674_v61, %v678_v13  ;;  %v8036_v5 = vld [vmem:[%s11839_s4 + $0x8] sm:$0xff]  ;;  %v8044_v58 = vld [vmem:[%s11837_s1 + $0x5c] sm:$0xf] }
  0xf2   :  { %12144 = vst [vmem:[#allocation7_spill] sm:$0xff] %v8021_v14  ;;  %v725_v45 = vmul.f32 %v704_v33, %v695_v21  ;;  %v726_v37 = vmul.f32 %v708_v57, %v693_v16  ;;  %v721_v49 = vmul.f32 %v704_v33, %v694_v32  ;;  %v722_v50 = vmul.f32 %v708_v57, %v692_v4 }
  0xf3   :  { %1267 = vrot.lane.b32.xlu1 %v7476_v6, %s7346_s17  ;;  %1265 = vrot.lane.b32.xlu0 %v7481_v7, %s7346_s17  ;;  %v8052_v54 = vcombine.high %v8036_v5, %v8036_v5  ;;  %v1968_v57 = vrot.slane %v8044_v58, %v7613_v23  ;;  %v6534_v12 = vcombine.low %v7607_v20, %v7607_v20  ;;  %vm1361_vm8 = vcmp.lt.s32.totalorder %v7583_v10, 2 }
  0xf4   :  { %2406 = vmatpush2.bf16.msra.mxu1 %v8021_v14  ;;  %v1940_v61 = vpop.permute.xlu1 %1939  ;;  %v1938_v40 = vpop.permute.xlu0 %1937  ;;  %v8046_v33 = vpack.c.bf16 %v726_v37, %v722_v50  ;;  %v8048_v53 = vpack.c.bf16 %v725_v45, %v721_v49 }
  0xf6   :  { %2364 = vmatprep.subr.bf16.mxu0 %v8046_v33 }
  0xf7   :  { %1275 = vrot.lane.b32.xlu1 %v7448_v2, %s7346_s17  ;;  %1273 = vrot.lane.b32.xlu0 %v7434_v0, %s7346_s17 }
  0xf8   :  { %2365 = vmatpush2.bf16.msra.mxu0 %v8048_v53  ;;  %v8065_v13 = vpop.permute.xlu1 %1943  ;;  %v8067_v16 = vpop.permute.xlu0 %1941  ;;  %2408 = vmatmul.mubr.bf16.vlgmr.msra.gmra.mxu1 %v6534_v12 }
  0xf9   :  { %3068 = vmatprep.subr.bf16.mxu0 %v7655_v51  ;;  %v1953_v2 = vsel %vm11935_vm9, %v1940_v61, %v8065_v13  ;;  %v1952_v20 = vsel %vm11935_vm9, %v1938_v40, %v8067_v16  ;;  %6682 = vmatprep.mubr.msk.bf16.mxu1 %vm2330_vm1, %v8052_v54  ;;  %v1964_v51 = vrot.slane %v8044_v58, %v7611_v22 }
  0xfa   :  { %v1986_v0 = vmul.f32 %v1968_v57, %v1953_v2  ;;  %v1982_v21 = vmul.f32 %v1968_v57, %v1952_v20  ;;  %v8139_v20 = vld [vmem:[%s11836_s0 + $0x20] sm:$0xff] }
  0xfb   :  { %1179 = vrot.lane.b32.xlu1 %v7453_v3, %s7347_s30  ;;  %2367 = vmatmul.mubr.bf16.vlgmr.msra.gmra.mxu0 %v6534_v12 }
  0xfc   :  { %1177 = vrot.lane.b32.xlu0 %v7439_v1, %s7347_s30  ;;  %3069 = vmatpush1.bf16.msra.mxu0 %v7657_v52  ;;  %v8085_v4 = vpop.permute.xlu1 %1935  ;;  %v8087_v32 = vpop.permute.xlu0 %1933  ;;  %v7092_v45 = vpack.c.bf16 %v1986_v0, %v1982_v21  ;;  %v8104_v1 = vld [vmem:[%s11837_s1 + $0x58] sm:$0xf]  ;;  %v8148_v0 = vld [vmem:[%s11836_s0] sm:$0xff] }
  0xfd   :  { %3070 = vmatprep.subr.bf16.mxu0 %v7707_v35  ;;  %v1955_v3 = vsel %vm11935_vm9, %v8085_v4, %v1940_v61  ;;  %v1954_v37 = vsel %vm11935_vm9, %v8087_v32, %v1938_v40 }
  0xfe   :  { %v1985_v49 = vmul.f32 %v1964_v51, %v1955_v3  ;;  %v1981_v50 = vmul.f32 %v1964_v51, %v1954_v37  ;;  %3109 = vmatprep.subr.bf16.mxu1 %v7092_v45 }
  0xff   :  { %1183 = vrot.lane.b32.xlu1 %v7476_v6, %s7347_s30  ;;  %v8110_v6 = vld [vmem:[%s11836_s0 + $0x38] sm:$0xff] }
 0x100   :  { %1181 = vrot.lane.b32.xlu0 %v7481_v7, %s7347_s30  ;;  %3071 = vmatpush1.bf16.msra.mxu0 %v7709_v36  ;;  %v7091_v52 = vpack.c.bf16 %v1985_v49, %v1981_v50  ;;  %v1856_v35 = vpop.permute.xlu1 %1855  ;;  %v1854_v61 = vpop.permute.xlu0 %1853  ;;  %v1884_v7 = vrot.slane %v8104_v1, %v7613_v23  ;;  %v8120_v36 = vld [vmem:[%s11836_s0 + $0x18] sm:$0xff]  ;;  %v8174_v50 = vld [vmem:[%s11836_s0 + $0x8] sm:$0xff] }
 0x101   :  { %3072 = vmatprep.subr.bf16.mxu0 %v7763_v24 }
 0x102   :  { %3110 = vmatpush1.bf16.msra.mxu1 %v7091_v52  ;;  %v8181_v52 = vld [vmem:[%s11837_s1 + $0x54] sm:$0xf] }
 0x103   :  { %1191 = vrot.lane.b32.xlu1 %v8110_v6, %s7347_s30 }
 0x104   :  { %1189 = vrot.lane.b32.xlu0 %v8120_v36, %s7347_s30  ;;  %3073 = vmatpush1.bf16.msra.mxu0 %v7765_v25  ;;  %v8125_v24 = vpop.permute.xlu1 %1859  ;;  %v1880_v25 = vrot.slane %v8104_v1, %v7611_v22 }
 0x105   :  { %3074 = vmatprep.subr.bf16.mxu0 %v7774_v27  ;;  %v1869_v40 = vsel %vm11936_vm10, %v1856_v35, %v8125_v24  ;;  %v8131_v57 = vpop.permute.xlu0 %1857 }
 0x106   :  { %v1902_v12 = vmul.f32 %v1884_v7, %v1869_v40  ;;  %v1868_v2 = vsel %vm11936_vm10, %v1854_v61, %v8131_v57  ;;  %v1800_v40 = vrot.slane %v8181_v52, %v7613_v23 }
 0x107   :  { %1095 = vrot.lane.b32.xlu1 %v8139_v20, %s7348_s15  ;;  %v1898_v27 = vmul.f32 %v1884_v7, %v1868_v2 }
 0x108   :  { %1093 = vrot.lane.b32.xlu0 %v8148_v0, %s7348_s15  ;;  %3075 = vmatpush1.bf16.msra.mxu0 %v7786_v29  ;;  %v8153_v21 = vpop.permute.xlu1 %1851  ;;  %v8167_v29 = vld [vmem:[%s11836_s0 + $0x28] sm:$0xff] }
 0x109   :  { %3076 = vmatprep.subr.bf16.mxu0 %v7831_v17  ;;  %v1871_v51 = vsel %vm11936_vm10, %v8153_v21, %v1856_v35  ;;  %v8159_v45 = vpop.permute.xlu0 %1849  ;;  %v7088_v3 = vpack.c.bf16 %v1902_v12, %v1898_v27 }
 0x10a   :  { %v1901_v37 = vmul.f32 %v1880_v25, %v1871_v51  ;;  %v1870_v49 = vsel %vm11936_vm10, %v8159_v45, %v1854_v61 }
 0x10b   :  { %1099 = vrot.lane.b32.xlu1 %v8167_v29, %s7348_s15  ;;  %v1897_v17 = vmul.f32 %v1880_v25, %v1870_v49  ;;  %3111 = vmatprep.subr.bf16.mxu1 %v7088_v3 }
 0x10c   :  { %1097 = vrot.lane.b32.xlu0 %v8174_v50, %s7348_s15  ;;  %3077 = vmatpush1.bf16.msra.mxu0 %v7833_v18  ;;  %v1772_v35 = vpop.permute.xlu1 %1771 }
 0x10d   :  { %v7087_v61 = vpack.c.bf16 %v1901_v37, %v1897_v17  ;;  %v1770_v7 = vpop.permute.xlu0 %1769  ;;  %3078 = vmatprep.subr.bf16.mxu0 %v7883_v28 }
 0x10f   :  { %1107 = vrot.lane.b32.xlu1 %v8110_v6, %s7348_s15  ;;  %3112 = vmatpush1.bf16.msra.mxu1 %v7087_v61 }
 0x110   :  { %1105 = vrot.lane.b32.xlu0 %v8120_v36, %s7348_s15  ;;  %3079 = vmatpush1.bf16.msra.mxu0 %v7885_v31  ;;  %v8193_v18 = vpop.permute.xlu1 %1775  ;;  %v1796_v31 = vrot.slane %v8181_v52, %v7611_v22 }
 0x111   :  { %v1785_v28 = vsel %vm11937_vm11, %v1772_v35, %v8193_v18  ;;  %v8198_v12 = vpop.permute.xlu0 %1773  ;;  %3080 = vmatprep.subr.bf16.mxu0 %v7935_v41 }
 0x112   :  { %v1818_v2 = vmul.f32 %v1800_v40, %v1785_v28  ;;  %v1784_v25 = vsel %vm11937_vm11, %v1770_v7, %v8198_v12 }
 0x113   :  { %1011 = vrot.lane.b32.xlu1 %v8139_v20, %s7349_s20  ;;  %v1814_v27 = vmul.f32 %v1800_v40, %v1784_v25 }
 0x114   :  { %1009 = vrot.lane.b32.xlu0 %v8148_v0, %s7349_s20  ;;  %3081 = vmatpush1.bf16.msra.mxu0 %v7937_v34  ;;  %v8211_v51 = vpop.permute.xlu1 %1767 }
 0x115   :  { %v1787_v41 = vsel %vm11937_vm11, %v8211_v51, %v1772_v35  ;;  %v8216_v3 = vpop.permute.xlu0 %1765  ;;  %3082 = vmatprep.subr.bf16.mxu0 %v7987_v46  ;;  %v7084_v37 = vpack.c.bf16 %v1818_v2, %v1814_v27  ;;  %v8229_v35 = vld [vmem:[%s11837_s1 + $0x50] sm:$0xf] }
 0x116   :  { %v1817_v49 = vmul.f32 %v1796_v31, %v1787_v41  ;;  %v1786_v17 = vsel %vm11937_vm11, %v8216_v3, %v1770_v7  ;;  %v1716_v7 = vrot.slane %v8229_v35, %v7613_v23  ;;  %v1712_v27 = vrot.slane %v8229_v35, %v7611_v22 }
 0x117   :  { %1015 = vrot.lane.b32.xlu1 %v8167_v29, %s7349_s20  ;;  %v1813_v34 = vmul.f32 %v1796_v31, %v1786_v17  ;;  %3113 = vmatprep.subr.bf16.mxu1 %v7084_v37 }
 0x118   :  { %1013 = vrot.lane.b32.xlu0 %v8174_v50, %s7349_s20  ;;  %3083 = vmatpush1.bf16.msra.mxu0 %v7989_v9  ;;  %v1688_v46 = vpop.permute.xlu1 %1687 }
 0x119   :  { %v7083_v61 = vpack.c.bf16 %v1817_v49, %v1813_v34  ;;  %v1686_v40 = vpop.permute.xlu0 %1685 }
 0x11b   :  { %1023 = vrot.lane.b32.xlu1 %v8110_v6, %s7349_s20  ;;  %3114 = vmatpush1.bf16.msra.mxu1 %v7083_v61 }
 0x11c   :  { %1021 = vrot.lane.b32.xlu0 %v8120_v36, %s7349_s20  ;;  %v8239_v28 = vpop.permute.xlu1 %1691 }
 0x11d   :  { %v1701_v9 = vsel %vm11938_vm12, %v1688_v46, %v8239_v28  ;;  %v8244_v2 = vpop.permute.xlu0 %1689 }
 0x11e   :  { %v1734_v25 = vmul.f32 %v1716_v7, %v1701_v9  ;;  %v1700_v31 = vsel %vm11938_vm12, %v1686_v40, %v8244_v2 }
 0x11f   :  { %927 = vrot.lane.b32.xlu1 %v8139_v20, %s7350_s18  ;;  %v1730_v41 = vmul.f32 %v1716_v7, %v1700_v31 }
 0x120   :  { %925 = vrot.lane.b32.xlu0 %v8148_v0, %s7350_s18  ;;  %v8255_v37 = vpop.permute.xlu1 %1683 }
 0x121   :  { %v1703_v49 = vsel %vm11938_vm12, %v8255_v37, %v1688_v46  ;;  %v8260_v17 = vpop.permute.xlu0 %1681  ;;  %v7080_v34 = vpack.c.bf16 %v1734_v25, %v1730_v41  ;;  %v8272_v46 = vld [vmem:[%s11837_s1 + $0x4c] sm:$0xf]  ;;  %v7351_v25 = vmov 0  }
 0x122   :  { %12145 = vst [vmem:[#allocation8_spill] sm:$0xff] %v8260_v17  ;;  %v1733_v61 = vmul.f32 %v1712_v27, %v1703_v49  ;;  %v1702_v9 = vsel %vm11938_vm12, %v8260_v17, %v1686_v40  ;;  %12146 = vst [vmem:[#allocation9_spill] sm:$0xff] %v8272_v46  ;;  %7199 = vset.pattern.permute.xlu1 %v7351_v25  ;;  %7198 = vset.pattern.permute.xlu0 %v7351_v25 }
 0x123   :  { %931 = vrot.lane.b32.xlu1 %v8167_v29, %s7350_s18  ;;  %v1729_v7 = vmul.f32 %v1712_v27, %v1702_v9  ;;  %3115 = vmatprep.subr.bf16.mxu1 %v7080_v34  ;;  %v1632_v40 = vrot.slane %v8272_v46, %v7613_v23  ;;  %v1628_v25 = vrot.slane %v8272_v46, %v7611_v22 }
 0x124   :  { %929 = vrot.lane.b32.xlu0 %v8174_v50, %s7350_s18  ;;  %v1604_v31 = vpop.permute.xlu1 %1603 }
 0x125   :  { %v7079_v41 = vpack.c.bf16 %v1733_v61, %v1729_v7  ;;  %v1602_v49 = vpop.permute.xlu0 %1601 }
 0x127   :  { %939 = vrot.lane.b32.xlu1 %v8110_v6, %s7350_s18  ;;  %3116 = vmatpush1.bf16.msra.mxu1 %v7079_v41 }
 0x128   :  { %937 = vrot.lane.b32.xlu0 %v8120_v36, %s7350_s18  ;;  %v8281_v27 = vpop.permute.xlu1 %1607 }
 0x129   :  { %12147 = vst [vmem:[#allocation10_spill] sm:$0xff] %v8281_v27  ;;  %v1617_v34 = vsel %vm1613_vm13, %v1604_v31, %v8281_v27  ;;  %v8286_v61 = vpop.permute.xlu0 %1605 }
 0x12a   :  { %12148 = vst [vmem:[#allocation11_spill] sm:$0xff] %v8286_v61  ;;  %v1650_v9 = vmul.f32 %v1632_v40, %v1617_v34  ;;  %v1616_v7 = vsel %vm1613_vm13, %v1602_v49, %v8286_v61 }
 0x12b   :  { %843 = vrot.lane.b32.xlu1 %v8139_v20, %s7352_s25  ;;  %v1646_v41 = vmul.f32 %v1632_v40, %v1616_v7 }
 0x12c   :  { %841 = vrot.lane.b32.xlu0 %v8148_v0, %s7352_s25  ;;  %v8297_v14 = vpop.permute.xlu1 %1599 }
 0x12d   :  { %12149 = vst [vmem:[#allocation12_spill] sm:$0xff] %v8297_v14  ;;  %v1619_v34 = vsel %vm1613_vm13, %v8297_v14, %v1604_v31  ;;  %v8302_v44 = vpop.permute.xlu0 %1597  ;;  %v7076_v61 = vpack.c.bf16 %v1650_v9, %v1646_v41  ;;  %v8314_v31 = vld [vmem:[%s11837_s1 + $0x48] sm:$0xf] }
 0x12e   :  { %12150 = vst [vmem:[#allocation13_spill] sm:$0xff] %v8302_v44  ;;  %v1649_v27 = vmul.f32 %v1628_v25, %v1619_v34  ;;  %v1618_v17 = vsel %vm1613_vm13, %v8302_v44, %v1602_v49  ;;  %12151 = vst [vmem:[#allocation14_spill] sm:$0xff] %v8314_v31 }
 0x12f   :  { %847 = vrot.lane.b32.xlu1 %v8167_v29, %s7352_s25  ;;  %v1645_v40 = vmul.f32 %v1628_v25, %v1618_v17  ;;  %3117 = vmatprep.subr.bf16.mxu1 %v7076_v61  ;;  %v1548_v17 = vrot.slane %v8314_v31, %v7613_v23 }
 0x130   :  { %845 = vrot.lane.b32.xlu0 %v8174_v50, %s7352_s25  ;;  %v1520_v7 = vpop.permute.xlu1 %1519 }
 0x131   :  { %v7075_v9 = vpack.c.bf16 %v1649_v27, %v1645_v40  ;;  %v1518_v41 = vpop.permute.xlu0 %1517  ;;  %v1544_v40 = vrot.slane %v8314_v31, %v7611_v22 }
 0x133   :  { %855 = vrot.lane.b32.xlu1 %v8110_v6, %s7352_s25  ;;  %3118 = vmatpush1.bf16.msra.mxu1 %v7075_v9 }
 0x134   :  { %853 = vrot.lane.b32.xlu0 %v8120_v36, %s7352_s25  ;;  %v8323_v49 = vpop.permute.xlu1 %1523 }
 0x135   :  { %12152 = vst [vmem:[#allocation15_spill] sm:$0xff] %v8323_v49  ;;  %v1533_v61 = vsel %vm1529_vm14, %v1520_v7, %v8323_v49  ;;  %v8328_v27 = vpop.permute.xlu0 %1521 }
 0x136   :  { %12153 = vst [vmem:[#allocation16_spill] sm:$0xff] %v8328_v27  ;;  %v1566_v25 = vmul.f32 %v1548_v17, %v1533_v61  ;;  %v1532_v34 = vsel %vm1529_vm14, %v1518_v41, %v8328_v27 }
 0x137   :  { %759 = vrot.lane.b32.xlu1 %v8139_v20, %s7353_s16  ;;  %v1562_v9 = vmul.f32 %v1548_v17, %v1532_v34 }
 0x138   :  { %757 = vrot.lane.b32.xlu0 %v8148_v0, %s7353_s16  ;;  %v8339_v44 = vpop.permute.xlu1 %1515  ;;  %v8356_v0 = vld [vmem:[%s11837_s1 + $0x44] sm:$0xf] }
 0x139   :  { %12154 = vst [vmem:[#allocation17_spill] sm:$0xff] %v8339_v44  ;;  %v1535_v61 = vsel %vm1529_vm14, %v8339_v44, %v1520_v7  ;;  %v8344_v49 = vpop.permute.xlu0 %1513  ;;  %v7072_v27 = vpack.c.bf16 %v1566_v25, %v1562_v9  ;;  %12156 = vst [vmem:[#allocation19_spill] sm:$0xff] %v8356_v0  ;;  %v8361_v7 = vld [vmem:[%s11839_s4] sm:$0xff]  ;;  %s12173_s4 = smov 2  }
 0x13a   :  { %12155 = vst [vmem:[#allocation18_spill] sm:$0xff] %v8344_v49  ;;  %v1565_v14 = vmul.f32 %v1544_v40, %v1535_v61  ;;  %v1534_v20 = vsel %vm1529_vm14, %v8344_v49, %v1518_v41  ;;  %v8365_v41 = vcombine.high %v8361_v7, %v8361_v7 }
 0x13b   :  { %763 = vrot.lane.b32.xlu1 %v8167_v29, %s7353_s16  ;;  %v1561_v17 = vmul.f32 %v1544_v40, %v1534_v20  ;;  %3119 = vmatprep.subr.bf16.mxu1 %v7072_v27  ;;  %v1460_v20 = vrot.slane %v8356_v0, %v7611_v22 }
 0x13c   :  { %761 = vrot.lane.b32.xlu0 %v8174_v50, %s7353_s16  ;;  %v1436_v25 = vpop.permute.xlu1 %1435  ;;  %v1464_v50 = vrot.slane %v8356_v0, %v7613_v23  ;;  %3100 = vmatprep.mubr.bf16.mxu0 %v8365_v41 }
 0x13d   :  { %v7071_v29 = vpack.c.bf16 %v1565_v14, %v1561_v17  ;;  %v1434_v34 = vpop.permute.xlu0 %1433 }
 0x13f   :  { %771 = vrot.lane.b32.xlu1 %v8110_v6, %s7353_s16  ;;  %3120 = vmatpush1.bf16.msra.mxu1 %v7071_v29 }
 0x140   :  { %769 = vrot.lane.b32.xlu0 %v8120_v36, %s7353_s16  ;;  %v8375_v27 = vpop.permute.xlu1 %1439 }
 0x141   :  { %12157 = vst [vmem:[#allocation20_spill] sm:$0xff] %v8375_v27  ;;  %v1449_v14 = vsel %vm1445_vm15, %v1436_v25, %v8375_v27  ;;  %v8380_v40 = vpop.permute.xlu0 %1437 }
 0x142   :  { %12158 = vst [vmem:[#allocation21_spill] sm:$0xff] %v8380_v40  ;;  %v1482_v9 = vmul.f32 %v1464_v50, %v1449_v14  ;;  %v1448_v61 = vsel %vm1445_vm15, %v1434_v34, %v8380_v40 }
 0x143   :  { %1947 = vrot.lane.b32.xlu1 %v8110_v6, %s11886_s2  ;;  %v1478_v17 = vmul.f32 %v1464_v50, %v1448_v61  ;;  %v8404_v50 = vld [vmem:[%s11836_s0 + $0x30] sm:$0xff] }
 0x144   :  { %1945 = vrot.lane.b32.xlu0 %v8120_v36, %s11886_s2  ;;  %v8391_v29 = vpop.permute.xlu1 %1431  ;;  %s12261_s2 = smov 111  }
 0x145   :  { %12159 = vst [vmem:[#allocation22_spill] sm:$0xff] %v8391_v29  ;;  %v1451_v14 = vsel %vm1445_vm15, %v8391_v29, %v1436_v25  ;;  %v8396_v27 = vpop.permute.xlu0 %1429  ;;  %v7068_v49 = vpack.c.bf16 %v1482_v9, %v1478_v17  ;;  %v8411_v25 = vld [vmem:[%s11836_s0 + $0x10] sm:$0xff]  ;;  %s12259_s0 = smov 113  }
 0x146   :  { %12160 = vst [vmem:[#allocation23_spill] sm:$0xff] %v8396_v27  ;;  %v1481_v40 = vmul.f32 %v1460_v20, %v1451_v14  ;;  %v1450_v44 = vsel %vm1445_vm15, %v8396_v27, %v1434_v34  ;;  %v8418_v34 = vld [vmem:[%s11837_s1 + $0x40] sm:$0xf] }
 0x147   :  { %1271 = vrot.lane.b32.xlu1 %v8404_v50, %s7346_s17  ;;  %v1477_v61 = vmul.f32 %v1460_v20, %v1450_v44  ;;  %3121 = vmatprep.subr.bf16.mxu1 %v7068_v49  ;;  %12161 = vst [vmem:[#allocation24_spill] sm:$0xff] %v8418_v34  ;;  %v1380_v44 = vrot.slane %v8418_v34, %v7613_v23 }
 0x148   :  { %1269 = vrot.lane.b32.xlu0 %v8411_v25, %s7346_s17  ;;  %v1348_v9 = vpop.permute.xlu1 %1347  ;;  %v1376_v29 = vrot.slane %v8418_v34, %v7611_v22 }
 0x149   :  { %v7067_v17 = vpack.c.bf16 %v1481_v40, %v1477_v61  ;;  %v1346_v14 = vpop.permute.xlu0 %1345 }
 0x14b   :  { %1863 = vrot.lane.b32.xlu1 %v8110_v6, %s11939_s28  ;;  %3122 = vmatpush1.bf16.msra.mxu1 %v7067_v17 }
 0x14c   :  { %1861 = vrot.lane.b32.xlu0 %v8120_v36, %s11939_s28  ;;  %v8427_v49 = vpop.permute.xlu1 %1351 }
 0x14d   :  { %12162 = vst [vmem:[#allocation25_spill] sm:$0xff] %v8427_v49  ;;  %v1367_v20 = vsel %vm1361_vm8, %v1348_v9, %v8427_v49  ;;  %v8432_v40 = vpop.permute.xlu0 %1349 }
 0x14e   :  { %12163 = vst [vmem:[#allocation26_spill] sm:$0xff] %v8432_v40  ;;  %v1398_v61 = vmul.f32 %v1380_v44, %v1367_v20  ;;  %v1366_v27 = vsel %vm1361_vm8, %v1346_v14, %v8432_v40 }
 0x14f   :  { %1187 = vrot.lane.b32.xlu1 %v8404_v50, %s7347_s30  ;;  %v1394_v17 = vmul.f32 %v1380_v44, %v1366_v27 }
 0x150   :  { %1185 = vrot.lane.b32.xlu0 %v8411_v25, %s7347_s30  ;;  %v8443_v0 = vpop.permute.xlu1 %1359 }
 0x151   :  { %12164 = vst [vmem:[#allocation27_spill] sm:$0xff] %v8443_v0  ;;  %v1369_v20 = vsel %vm1361_vm8, %v8443_v0, %v1348_v9  ;;  %v8448_v49 = vpop.permute.xlu0 %1357  ;;  %v7064_v31 = vpack.c.bf16 %v1398_v61, %v1394_v17  ;;  %v8460_v9 = vld [vmem:[%s11837_s1 + $0x60] sm:$0xf] }
 0x152   :  { %12165 = vst [vmem:[#allocation28_spill] sm:$0xff] %v8448_v49  ;;  %v1397_v40 = vmul.f32 %v1376_v29, %v1369_v20  ;;  %v1368_v46 = vsel %vm1361_vm8, %v8448_v49, %v1346_v14  ;;  %12166 = vst [vmem:[#allocation29_spill] sm:$0xff] %v8460_v9 }
 0x153   :  { %1779 = vrot.lane.b32.xlu1 %v8110_v6, %s11941_s23  ;;  %v1393_v27 = vmul.f32 %v1376_v29, %v1368_v46  ;;  %3123 = vmatprep.subr.bf16.mxu1 %v7064_v31  ;;  %v2052_v46 = vrot.slane %v8460_v9, %v7613_v23 }
 0x154   :  { %1777 = vrot.lane.b32.xlu0 %v8120_v36, %s11941_s23  ;;  %v2024_v44 = vpop.permute.xlu1 %2023  ;;  %s12255_s23 = smov 16  }
 0x155   :  { %v7063_v61 = vpack.c.bf16 %v1397_v40, %v1393_v27  ;;  %v2022_v17 = vpop.permute.xlu0 %2021  ;;  %v2048_v27 = vrot.slane %v8460_v9, %v7611_v22 }
 0x157   :  { %1103 = vrot.lane.b32.xlu1 %v8404_v50, %s7348_s15  ;;  %3124 = vmatpush1.bf16.msra.mxu1 %v7063_v61 }
 0x158   :  { %1101 = vrot.lane.b32.xlu0 %v8411_v25, %s7348_s15  ;;  %v8469_v31 = vpop.permute.xlu1 %2027 }
 0x159   :  { %12167 = vst [vmem:[#allocation30_spill] sm:$0xff] %v8469_v31  ;;  %v2037_v29 = vsel %vm11927_vm0, %v2024_v44, %v8469_v31  ;;  %v8474_v14 = vpop.permute.xlu0 %2025 }
 0x15a   :  { %12168 = vst [vmem:[#allocation31_spill] sm:$0xff] %v8474_v14  ;;  %v2070_v40 = vmul.f32 %v2052_v46, %v2037_v29  ;;  %v2036_v20 = vsel %vm11927_vm0, %v2022_v17, %v8474_v14 }
 0x15b   :  { %1695 = vrot.lane.b32.xlu1 %v8110_v6, %s11943_s26  ;;  %v2066_v61 = vmul.f32 %v2052_v46, %v2036_v20 }
 0x15c   :  { %1693 = vrot.lane.b32.xlu0 %v8120_v36, %s11943_s26  ;;  %v8485_v49 = vpop.permute.xlu1 %2019  ;;  %s12260_s26 = smov 112  }
 0x15d   :  { %12169 = vst [vmem:[#allocation32_spill] sm:$0xff] %v8485_v49  ;;  %v2039_v29 = vsel %vm11927_vm0, %v8485_v49, %v2024_v44  ;;  %v8490_v31 = vpop.permute.xlu0 %2017  ;;  %v7096_v0 = vpack.c.bf16 %v2070_v40, %v2066_v61  ;;  %v8502_v44 = vld [vmem:[%s11837_s1 + $0x3c] sm:$0xf] }
 0x15e   :  { %12170 = vst [vmem:[#allocation33_spill] sm:$0xff] %v8490_v31  ;;  %v2069_v14 = vmul.f32 %v2048_v27, %v2039_v29  ;;  %v2038_v34 = vsel %vm11927_vm0, %v8490_v31, %v2022_v17  ;;  %v8511_v17 = vcombine.low %v8036_v5, %v8036_v5  ;;  %vm773_vm0 = vcmp.lt.s32.totalorder %v7583_v10, 34 }
 0x15f   :  { %1019 = vrot.lane.b32.xlu1 %v8404_v50, %s7349_s20  ;;  %v2065_v46 = vmul.f32 %v2048_v27, %v2038_v34  ;;  %3139 = vmatprep.subr.bf16.mxu1 %v7096_v0  ;;  %v1296_v34 = vrot.slane %v8502_v44, %v7613_v23 }
 0x160   :  { %1017 = vrot.lane.b32.xlu0 %v8411_v25, %s7349_s20  ;;  %v1264_v20 = vpop.permute.xlu1 %1263  ;;  %12171 = vst [vmem:[#allocation34_spill] sm:$0xff] %v8511_v17 }
 0x161   :  { %v7095_v40 = vpack.c.bf16 %v2069_v14, %v2065_v46  ;;  %v1262_v61 = vpop.permute.xlu0 %1261 }
 0x163   :  { %1611 = vrot.lane.b32.xlu1 %v8110_v6, %s7341_s27  ;;  %3140 = vmatpush2.bf16.msra.mxu1 %v7095_v40 }
 0x164   :  { %1609 = vrot.lane.b32.xlu0 %v8120_v36, %s7341_s27  ;;  %3150 = vmatprep.subr.bf16.mxu1 %v7624_v30  ;;  %v1292_v30 = vrot.slane %v8502_v44, %v7611_v22 }
 0x165   :  { %v8516_v0 = vpop.permute.xlu1 %1267  ;;  %v8521_v27 = vpop.permute.xlu0 %1265 }
 0x166   :  { %v1283_v14 = vsel %vm1277_vm2, %v1264_v20, %v8516_v0  ;;  %v1282_v5 = vsel %vm1277_vm2, %v1262_v61, %v8521_v27  ;;  %3142 = vmatmul.mubr.bf16.vlgmr.msra.gmra.mxu1 %v8511_v17 }
 0x167   :  { %v1314_v29 = vmul.f32 %v1296_v34, %v1283_v14  ;;  %935 = vrot.lane.b32.xlu1 %v8404_v50, %s7350_s18  ;;  %v1310_v46 = vmul.f32 %v1296_v34, %v1282_v5  ;;  %3151 = vmatpush1.bf16.msra.mxu1 %v7637_v39 }
 0x168   :  { %933 = vrot.lane.b32.xlu0 %v8411_v25, %s7350_s18  ;;  %3152 = vmatprep.subr.bf16.mxu1 %v7676_v63  ;;  %v8553_v63 = vld [vmem:[%s11837_s1 + $0x38] sm:$0xf] }
 0x169   :  { %v8535_v40 = vpop.permute.xlu1 %1275  ;;  %3182 = vmatprep.mubr.bf16.mxu1 %v8365_v41  ;;  %v8541_v17 = vpop.permute.xlu0 %1273  ;;  %v7060_v31 = vpack.c.bf16 %v1314_v29, %v1310_v46 }
 0x16a   :  { %v1285_v14 = vsel %vm1277_vm2, %v8535_v40, %v1264_v20  ;;  %v1284_v34 = vsel %vm1277_vm2, %v8541_v17, %v1262_v61 }
 0x16b   :  { %v1313_v49 = vmul.f32 %v1292_v30, %v1285_v14  ;;  %1527 = vrot.lane.b32.xlu1 %v8110_v6, %s7342_s24  ;;  %v1309_v39 = vmul.f32 %v1292_v30, %v1284_v34  ;;  %3084 = vmatprep.subr.bf16.mxu0 %v7060_v31  ;;  %v1212_v31 = vrot.slane %v8553_v63, %v7613_v23 }
 0x16c   :  { %1525 = vrot.lane.b32.xlu0 %v8120_v36, %s7342_s24  ;;  %3153 = vmatpush1.bf16.msra.mxu1 %v7689_v19 }
 0x16d   :  { %v1180_v41 = vpop.permute.xlu1 %1179  ;;  %v7059_v20 = vpack.c.bf16 %v1313_v49, %v1309_v39  ;;  %3154 = vmatprep.subr.bf16.mxu1 %v7728_v48 }
 0x16e   :  { %v1178_v61 = vpop.permute.xlu0 %1177 }
 0x16f   :  { %851 = vrot.lane.b32.xlu1 %v8404_v50, %s7352_s25  ;;  %3085 = vmatpush2.bf16.msra.mxu0 %v7059_v20 }
 0x170   :  { %849 = vrot.lane.b32.xlu0 %v8411_v25, %s7352_s25  ;;  %3155 = vmatpush1.bf16.msra.mxu1 %v7741_v59  ;;  %v1208_v59 = vrot.slane %v8553_v63, %v7611_v22 }
 0x171   :  { %v8565_v19 = vpop.permute.xlu1 %1183  ;;  %3156 = vmatprep.subr.bf16.mxu1 %v7745_v60 }
 0x172   :  { %v1199_v48 = vsel %vm1193_vm3, %v1180_v41, %v8565_v19  ;;  %v8570_v49 = vpop.permute.xlu0 %1181 }
 0x173   :  { %v1230_v29 = vmul.f32 %v1212_v31, %v1199_v48  ;;  %v1198_v5 = vsel %vm1193_vm3, %v1178_v61, %v8570_v49  ;;  %1443 = vrot.lane.b32.xlu1 %v8110_v6, %s12172_s29 }
 0x174   :  { %v1226_v30 = vmul.f32 %v1212_v31, %v1198_v5  ;;  %1441 = vrot.lane.b32.xlu0 %v8120_v36, %s12172_s29  ;;  %3157 = vmatpush1.bf16.msra.mxu1 %v7770_v26 }
 0x175   :  { %v8583_v46 = vpop.permute.xlu1 %1191  ;;  %3158 = vmatprep.subr.bf16.mxu1 %v7800_v43  ;;  %v8601_v43 = vld [vmem:[%s11837_s1 + $0x34] sm:$0xf] }
 0x176   :  { %v1201_v60 = vsel %vm1193_vm3, %v8583_v46, %v1180_v41  ;;  %v8589_v14 = vpop.permute.xlu0 %1189  ;;  %v7056_v34 = vpack.c.bf16 %v1230_v29, %v1226_v30  ;;  %v1128_v48 = vrot.slane %v8601_v43, %v7613_v23  ;;  %v2546_v30 = vld [vmem:[%s11841_s5] sm:$0xff]  ;;  %s12256_s5 = smov 15  }
 0x177   :  { %v1229_v39 = vmul.f32 %v1208_v59, %v1201_v60  ;;  %v1200_v20 = vsel %vm1193_vm3, %v8589_v14, %v1178_v61  ;;  %767 = vrot.lane.b32.xlu1 %v8404_v50, %s7353_s16 }
 0x178   :  { %v1225_v26 = vmul.f32 %v1208_v59, %v1200_v20  ;;  %765 = vrot.lane.b32.xlu0 %v8411_v25, %s7353_s16  ;;  %3086 = vmatprep.subr.bf16.mxu0 %v7056_v34  ;;  %v8651_v20 = vld [vmem:[%s11837_s1 + $0x30] sm:$0xf] }
 0x179   :  { %3159 = vmatpush1.bf16.msra.mxu1 %v7813_v55  ;;  %v1096_v41 = vpop.permute.xlu1 %1095 }
 0x17a   :  { %v7055_v31 = vpack.c.bf16 %v1229_v39, %v1225_v26  ;;  %3160 = vmatprep.subr.bf16.mxu1 %v7852_v42  ;;  %v1094_v61 = vpop.permute.xlu0 %1093 }
 0x17b   :  { %1355 = vrot.lane.b32.xlu1 %v8404_v50, %s12173_s4 }
 0x17c   :  { %1353 = vrot.lane.b32.xlu0 %v8411_v25, %s12173_s4  ;;  %3087 = vmatpush2.bf16.msra.mxu0 %v7055_v31  ;;  %v1044_v31 = vrot.slane %v8651_v20, %v7613_v23 }
 0x17d   :  { %3161 = vmatpush1.bf16.msra.mxu1 %v7865_v56  ;;  %v8613_v55 = vpop.permute.xlu1 %1099  ;;  %v1124_v56 = vrot.slane %v8601_v43, %v7611_v22 }
 0x17e   :  { %3162 = vmatprep.subr.bf16.mxu1 %v7904_v47  ;;  %v1115_v42 = vsel %vm1109_vm4, %v1096_v41, %v8613_v55  ;;  %v8619_v50 = vpop.permute.xlu0 %1097  ;;  %v2138_v47 = vld [vmem:[%s11840_s3] sm:$0xff] }
 0x17f   :  { %v1146_v29 = vmul.f32 %v1128_v48, %v1115_v42  ;;  %v1114_v5 = vsel %vm1109_vm4, %v1094_v61, %v8619_v50  ;;  %2031 = vrot.lane.b32.xlu1 %v8110_v6, %s12174_s21 }
 0x180   :  { %v1142_v25 = vmul.f32 %v1128_v48, %v1114_v5  ;;  %2029 = vrot.lane.b32.xlu0 %v8120_v36, %s12174_s21  ;;  %v1040_v5 = vrot.slane %v8651_v20, %v7611_v22 }
 0x181   :  { %3163 = vmatpush1.bf16.msra.mxu1 %v7917_v8  ;;  %v8634_v59 = vpop.permute.xlu1 %1107 }
 0x182   :  { %3164 = vmatprep.subr.bf16.mxu1 %v7956_v62  ;;  %v1117_v6 = vsel %vm1109_vm4, %v8634_v59, %v1096_v41  ;;  %v8643_v60 = vpop.permute.xlu0 %1105  ;;  %v7052_v36 = vpack.c.bf16 %v1146_v29, %v1142_v25 }
 0x183   :  { %v1145_v34 = vmul.f32 %v1124_v56, %v1117_v6  ;;  %v1116_v8 = vsel %vm1109_vm4, %v8643_v60, %v1094_v61  ;;  %2141 = vperm.xlu1 %7199, %v2138_v47  }
 0x184   :  { %v1141_v39 = vmul.f32 %v1124_v56, %v1116_v8  ;;  %3088 = vmatprep.subr.bf16.mxu0 %v7052_v36  ;;  %2549 = vperm.xlu0 %7198, %v2546_v30  }
 0x185   :  { %3165 = vmatpush1.bf16.msra.mxu1 %v7969_v38  ;;  %v1012_v62 = vpop.permute.xlu1 %1011 }
 0x186   :  { %v7051_v26 = vpack.c.bf16 %v1145_v34, %v1141_v39  ;;  %v1010_v41 = vpop.permute.xlu0 %1009  ;;  %v8682_v39 = vld [vmem:[%s11837_s1 + $0x2c] sm:$0xf] }
 0x187   :  { %12175 = vst [vmem:[#allocation35_spill] sm:$0xff] %v8682_v39 }
 0x188   :  { %3089 = vmatpush2.bf16.msra.mxu0 %v7051_v26 }
 0x189   :  { %v8657_v61 = vpop.permute.xlu1 %1015 }
 0x18a   :  { %v1031_v48 = vsel %vm1025_vm5, %v1012_v62, %v8657_v61  ;;  %v8662_v42 = vpop.permute.xlu0 %1013 }
 0x18b   :  { %v1062_v29 = vmul.f32 %v1044_v31, %v1031_v48  ;;  %v1030_v38 = vsel %vm1025_vm5, %v1010_v41, %v8662_v42 }
 0x18c   :  { %v1058_v56 = vmul.f32 %v1044_v31, %v1030_v38 }
 0x18d   :  { %v8669_v25 = vpop.permute.xlu1 %1023 }
 0x18e   :  { %v1033_v47 = vsel %vm1025_vm5, %v8669_v25, %v1012_v62  ;;  %v8674_v30 = vpop.permute.xlu0 %1021  ;;  %v7048_v6 = vpack.c.bf16 %v1062_v29, %v1058_v56  ;;  %v960_v62 = vrot.slane %v8682_v39, %v7613_v23 }
 0x18f   :  { %v1061_v36 = vmul.f32 %v1040_v5, %v1033_v47  ;;  %v1032_v34 = vsel %vm1025_vm5, %v8674_v30, %v1010_v41  ;;  %v956_v47 = vrot.slane %v8682_v39, %v7611_v22 }
 0x190   :  { %v1057_v8 = vmul.f32 %v1040_v5, %v1032_v34  ;;  %3090 = vmatprep.subr.bf16.mxu0 %v7048_v6 }
 0x191   :  { %v928_v26 = vpop.permute.xlu1 %927 }
 0x192   :  { %v7047_v31 = vpack.c.bf16 %v1061_v36, %v1057_v8  ;;  %v926_v48 = vpop.permute.xlu0 %925 }
 0x194   :  { %3091 = vmatpush2.bf16.msra.mxu0 %v7047_v31 }
 0x195   :  { %v8687_v29 = vpop.permute.xlu1 %931 }
 0x196   :  { %12176 = vst [vmem:[#allocation36_spill] sm:$0xff] %v8687_v29  ;;  %v947_v41 = vsel %vm941_vm6, %v928_v26, %v8687_v29  ;;  %v8692_v38 = vpop.permute.xlu0 %929 }
 0x197   :  { %12177 = vst [vmem:[#allocation37_spill] sm:$0xff] %v8692_v38  ;;  %v978_v5 = vmul.f32 %v960_v62, %v947_v41  ;;  %v946_v56 = vsel %vm941_vm6, %v926_v48, %v8692_v38 }
 0x198   :  { %v974_v6 = vmul.f32 %v960_v62, %v946_v56  ;;  %v8712_v62 = vld [vmem:[%s11837_s1 + $0x28] sm:$0xf] }
 0x199   :  { %v8699_v36 = vpop.permute.xlu1 %939  ;;  %12180 = vst [vmem:[#allocation40_spill] sm:$0xff] %v8712_v62 }
 0x19a   :  { %12178 = vst [vmem:[#allocation38_spill] sm:$0xff] %v8699_v36  ;;  %v949_v34 = vsel %vm941_vm6, %v8699_v36, %v928_v26  ;;  %v8704_v8 = vpop.permute.xlu0 %937  ;;  %v7044_v31 = vpack.c.bf16 %v978_v5, %v974_v6  ;;  %v876_v26 = vrot.slane %v8712_v62, %v7613_v23 }
 0x19b   :  { %12179 = vst [vmem:[#allocation39_spill] sm:$0xff] %v8704_v8  ;;  %v977_v9 = vmul.f32 %v956_v47, %v949_v34  ;;  %v948_v41 = vsel %vm941_vm6, %v8704_v8, %v926_v48 }
 0x19c   :  { %v973_v29 = vmul.f32 %v956_v47, %v948_v41  ;;  %3092 = vmatprep.subr.bf16.mxu0 %v7044_v31 }
 0x19d   :  { %v844_v56 = vpop.permute.xlu1 %843 }
 0x19e   :  { %v7043_v38 = vpack.c.bf16 %v977_v9, %v973_v29  ;;  %v842_v39 = vpop.permute.xlu0 %841  ;;  %v872_v29 = vrot.slane %v8712_v62, %v7611_v22 }
 0x1a0   :  { %3093 = vmatpush2.bf16.msra.mxu0 %v7043_v38 }
 0x1a1   :  { %v8717_v5 = vpop.permute.xlu1 %847 }
 0x1a2   :  { %12181 = vst [vmem:[#allocation41_spill] sm:$0xff] %v8717_v5  ;;  %v863_v48 = vsel %vm857_vm7, %v844_v56, %v8717_v5  ;;  %v8722_v47 = vpop.permute.xlu0 %845 }
 0x1a3   :  { %12182 = vst [vmem:[#allocation42_spill] sm:$0xff] %v8722_v47  ;;  %v894_v6 = vmul.f32 %v876_v26, %v863_v48  ;;  %v862_v9 = vsel %vm857_vm7, %v842_v39, %v8722_v47 }
 0x1a4   :  { %v890_v34 = vmul.f32 %v876_v26, %v862_v9  ;;  %v8742_v26 = vld [vmem:[%s11837_s1 + $0x24] sm:$0xf] }
 0x1a5   :  { %v8729_v31 = vpop.permute.xlu1 %855 }
 0x1a6   :  { %v865_v38 = vsel %vm857_vm7, %v8729_v31, %v844_v56  ;;  %v8734_v41 = vpop.permute.xlu0 %853  ;;  %v7040_v5 = vpack.c.bf16 %v894_v6, %v890_v34  ;;  %v792_v56 = vrot.slane %v8742_v26, %v7613_v23 }
 0x1a7   :  { %12183 = vst [vmem:[#allocation43_spill] sm:$0xff] %v8734_v41  ;;  %v893_v8 = vmul.f32 %v872_v29, %v865_v38  ;;  %v864_v48 = vsel %vm857_vm7, %v8734_v41, %v842_v39 }
 0x1a8   :  { %v889_v36 = vmul.f32 %v872_v29, %v864_v48  ;;  %3094 = vmatprep.subr.bf16.mxu0 %v7040_v5 }
 0x1a9   :  { %v760_v9 = vpop.permute.xlu1 %759 }
 0x1aa   :  { %v7039_v47 = vpack.c.bf16 %v893_v8, %v889_v36  ;;  %v758_v62 = vpop.permute.xlu0 %757  ;;  %v788_v8 = vrot.slane %v8742_v26, %v7611_v22 }
 0x1ac   :  { %3095 = vmatpush2.bf16.msra.mxu0 %v7039_v47 }
 0x1ad   :  { %v8747_v6 = vpop.permute.xlu1 %763 }
 0x1ae   :  { %12184 = vst [vmem:[#allocation44_spill] sm:$0xff] %v8747_v6  ;;  %v779_v39 = vsel %vm773_vm0, %v760_v9, %v8747_v6  ;;  %v8752_v5 = vpop.permute.xlu0 %761 }
 0x1af   :  { %12185 = vst [vmem:[#allocation45_spill] sm:$0xff] %v8752_v5  ;;  %v810_v29 = vmul.f32 %v792_v56, %v779_v39  ;;  %v778_v36 = vsel %vm773_vm0, %v758_v62, %v8752_v5  ;;  %v1976_v5 = vrot.slane %v8044_v58, %v7589_v11 }
 0x1b0   :  { %v806_v34 = vmul.f32 %v792_v56, %v778_v36  ;;  %v1972_v56 = vrot.slane %v8044_v58, %v7599_v15 }
 0x1b1   :  { %v8759_v38 = vpop.permute.xlu1 %771 }
 0x1b2   :  { %v781_v47 = vsel %vm773_vm0, %v8759_v38, %v760_v9  ;;  %v8764_v48 = vpop.permute.xlu0 %769  ;;  %v7036_v23 = vpack.c.bf16 %v810_v29, %v806_v34 }
 0x1b3   :  { %v809_v6 = vmul.f32 %v788_v8, %v781_v47  ;;  %v780_v39 = vsel %vm773_vm0, %v8764_v48, %v758_v62  ;;  %v1300_v62 = vrot.slane %v8502_v44, %v7599_v15 }
 0x1b4   :  { %v805_v41 = vmul.f32 %v788_v8, %v780_v39  ;;  %3096 = vmatprep.subr.bf16.mxu0 %v7036_v23  ;;  %v1888_v39 = vrot.slane %v8104_v1, %v7599_v15 }
 0x1b5   :  { %v1948_v36 = vpop.permute.xlu1 %1947 }
 0x1b6   :  { %v7035_v22 = vpack.c.bf16 %v809_v6, %v805_v41  ;;  %v1951_v9 = vsel %vm11935_vm9, %v8065_v13, %v1948_v36  ;;  %v1957_v29 = vsel %vm11935_vm9, %v1948_v36, %v8085_v4  ;;  %v1946_v34 = vpop.permute.xlu0 %1945  ;;  %v1304_v13 = vrot.slane %v8502_v44, %v7589_v11 }
 0x1b7   :  { %v1988_v47 = vmul.f32 %v1976_v5, %v1957_v29  ;;  %v1950_v23 = vsel %vm11935_vm9, %v8067_v16, %v1946_v34  ;;  %v1956_v58 = vsel %vm11935_vm9, %v1946_v34, %v8087_v32  ;;  %v1987_v6 = vmul.f32 %v1972_v56, %v1951_v9 }
 0x1b8   :  { %v1984_v41 = vmul.f32 %v1976_v5, %v1956_v58  ;;  %3097 = vmatpush2.bf16.msra.mxu0 %v7035_v22  ;;  %v1983_v4 = vmul.f32 %v1972_v56, %v1950_v23  ;;  %v1892_v16 = vrot.slane %v8104_v1, %v7589_v11  ;;  %v8794_v36 = vpop.f32.mrf.mxu1  ;;  %v1216_v58 = vrot.slane %v8553_v63, %v7599_v15 }
 0x1b9   :  { %3098 = vmatprep.subr.bf16.mxu0 %v8046_v33  ;;  %v1272_v8 = vpop.permute.xlu1 %1271  ;;  %v8804_v33 = vcombine.low %v8361_v7, %v8361_v7  ;;  %vm12220_vm9 = vcmp.lt.s32.totalorder %v7583_v10, 94 }
 0x1ba   :  { %v1279_v32 = vsel %vm1277_vm2, %v1272_v8, %v8535_v40  ;;  %v1281_v22 = vsel %vm1277_vm2, %v8516_v0, %v1272_v8  ;;  %v1270_v44 = vpop.permute.xlu0 %1269  ;;  %v7094_v5 = vpack.c.bf16 %v1988_v47, %v1984_v41  ;;  %v8815_v47 = vpop.f32.mrf.mxu1  ;;  %v7093_v7 = vpack.c.bf16 %v1987_v6, %v1983_v4 }
 0x1bb   :  { %v1315_v56 = vmul.f32 %v1300_v62, %v1281_v22  ;;  %v1316_v9 = vmul.f32 %v1304_v13, %v1279_v32  ;;  %v1278_v1 = vsel %vm1277_vm2, %v1270_v44, %v8541_v17  ;;  %v1280_v40 = vsel %vm1277_vm2, %v8521_v27, %v1270_v44  ;;  %v8812_v29 = vpop.f32.mrf.mxu0 }
 0x1bc   :  { %v1311_v34 = vmul.f32 %v1300_v62, %v1280_v40  ;;  %v1312_v0 = vmul.f32 %v1304_v13, %v1278_v1  ;;  %3099 = vmatpush2.bf16.msra.mxu0 %v8048_v53  ;;  %v1220_v17 = vrot.slane %v8553_v63, %v7589_v11  ;;  %v2413_v4 = vpop.f32.mrf.mxu1 }
 0x1bd   :  { %3191 = vmatprep.subr.bf16.mxu0 %v7094_v5  ;;  %v1864_v23 = vpop.permute.xlu1 %1863  ;;  %v8821_v41 = vpop.f32.mrf.mxu0 }
 0x1be   :  { %v7061_v27 = vpack.c.bf16 %v1315_v56, %v1311_v34  ;;  %v1867_v62 = vsel %vm11936_vm10, %v8125_v24, %v1864_v23  ;;  %v1873_v53 = vsel %vm11936_vm10, %v1864_v23, %v8153_v21  ;;  %v1862_v13 = vpop.permute.xlu0 %1861  ;;  %v7062_v6 = vpack.c.bf16 %v1316_v9, %v1312_v0  ;;  %v2414_v21 = vpop.f32.mrf.mxu1 }
 0x1bf   :  { %v1903_v8 = vmul.f32 %v1888_v39, %v1867_v62  ;;  %v1904_v32 = vmul.f32 %v1892_v16, %v1873_v53  ;;  %v1866_v63 = vsel %vm11936_vm10, %v8131_v57, %v1862_v13  ;;  %v1872_v22 = vsel %vm11936_vm10, %v1862_v13, %v8159_v45  ;;  %3101 = vmatmul.mubr.bf16.vlgmr.msra.gmra.mxu0 %v8804_v33  ;;  %v2372_v24 = vpop.f32.mrf.mxu0  ;;  %vm12222_vm10 = vmmov %vm12220_vm9 }
 0x1c0   :  { %v1899_v44 = vmul.f32 %v1888_v39, %v1866_v63  ;;  %v1900_v5 = vmul.f32 %v1892_v16, %v1872_v22  ;;  %3166 = vmatprep.subr.bf16.mxu1 %v7062_v6  ;;  %3192 = vmatpush1.bf16.msra.mxu0 %v7093_v7  ;;  %v1804_v9 = vrot.slane %v8181_v52, %v7599_v15 }
 0x1c1   :  { %3167 = vmatpush2.bf16.msra.mxu1 %v7061_v27  ;;  %v1188_v56 = vpop.permute.xlu1 %1187  ;;  %v1808_v57 = vrot.slane %v8181_v52, %v7589_v11  ;;  %6683 = vmatprep.mubr.msk.bf16.mxu0 %vm2330_vm1, %v8052_v54  ;;  %v2373_v45 = vpop.f32.mrf.mxu0  ;;  %v1136_v62 = vrot.slane %v8601_v43, %v7589_v11  ;;  %v1724_v63 = vrot.slane %v8229_v35, %v7589_v11 }
 0x1c2   :  { %v7089_v1 = vpack.c.bf16 %v1903_v8, %v1899_v44  ;;  %v1195_v39 = vsel %vm1193_vm3, %v1188_v56, %v8583_v46  ;;  %v1197_v16 = vsel %vm1193_vm3, %v8565_v19, %v1188_v56  ;;  %v1186_v40 = vpop.permute.xlu0 %1185  ;;  %v7090_v34 = vpack.c.bf16 %v1904_v32, %v1900_v5 }
 0x1c3   :  { %v1231_v0 = vmul.f32 %v1216_v58, %v1197_v16  ;;  %v1232_v7 = vmul.f32 %v1220_v17, %v1195_v39  ;;  %v1194_v52 = vsel %vm1193_vm3, %v1186_v40, %v8589_v14  ;;  %v1196_v54 = vsel %vm1193_vm3, %v8570_v49, %v1186_v40 }
 0x1c4   :  { %v1227_v23 = vmul.f32 %v1216_v58, %v1196_v54  ;;  %v1228_v27 = vmul.f32 %v1220_v17, %v1194_v52  ;;  %3193 = vmatprep.subr.bf16.mxu0 %v7090_v34  ;;  %v1132_v19 = vrot.slane %v8601_v43, %v7599_v15  ;;  %v1052_v45 = vrot.slane %v8651_v20, %v7589_v11 }
 0x1c5   :  { %3194 = vmatpush1.bf16.msra.mxu0 %v7089_v1  ;;  %v1780_v46 = vpop.permute.xlu1 %1779 }
 0x1c6   :  { %v7057_v53 = vpack.c.bf16 %v1231_v0, %v1227_v23  ;;  %v1783_v14 = vsel %vm11937_vm11, %v8193_v18, %v1780_v46  ;;  %v1789_v49 = vsel %vm11937_vm11, %v1780_v46, %v8211_v51  ;;  %v1778_v58 = vpop.permute.xlu0 %1777  ;;  %v7058_v17 = vpack.c.bf16 %v1232_v7, %v1228_v27  ;;  %v12186_v7 = vld [vmem:[#allocation8_spill] sm:$0xff]  ;;  %v12187_v23 = vld [vmem:[#allocation9_spill] sm:$0xff] }
 0x1c7   :  { %v1819_v13 = vmul.f32 %v1804_v9, %v1783_v14  ;;  %v1820_v6 = vmul.f32 %v1808_v57, %v1789_v49  ;;  %v1782_v4 = vsel %vm11937_vm11, %v8198_v12, %v1778_v58  ;;  %v1788_v43 = vsel %vm11937_vm11, %v1778_v58, %v8216_v3  ;;  %vm12225_vm11 = vmmov %vm12220_vm9 }
 0x1c8   :  { %v1815_v8 = vmul.f32 %v1804_v9, %v1782_v4  ;;  %v1816_v32 = vmul.f32 %v1808_v57, %v1788_v43  ;;  %3168 = vmatprep.subr.bf16.mxu1 %v7058_v17  ;;  %v1720_v51 = vrot.slane %v8229_v35, %v7599_v15  ;;  %v1640_v27 = vrot.slane %v12187_v23, %v7589_v11  ;;  %v12188_v4 = vld [vmem:[#allocation35_spill] sm:$0xff] }
 0x1c9   :  { %3169 = vmatpush2.bf16.msra.mxu1 %v7057_v53  ;;  %v1104_v18 = vpop.permute.xlu1 %1103  ;;  %v968_v43 = vrot.slane %v12188_v4, %v7589_v11 }
 0x1ca   :  { %v7085_v22 = vpack.c.bf16 %v1819_v13, %v1815_v8  ;;  %v1111_v12 = vsel %vm1109_vm4, %v1104_v18, %v8634_v59  ;;  %v1113_v3 = vsel %vm1109_vm4, %v8613_v55, %v1104_v18  ;;  %v1102_v24 = vpop.permute.xlu0 %1101  ;;  %v7086_v44 = vpack.c.bf16 %v1820_v6, %v1816_v32  ;;  %v12189_v32 = vld [vmem:[#allocation10_spill] sm:$0xff]  ;;  %v12190_v18 = vld [vmem:[#allocation12_spill] sm:$0xff] }
 0x1cb   :  { %v1147_v5 = vmul.f32 %v1132_v19, %v1113_v3  ;;  %v1148_v21 = vmul.f32 %v1136_v62, %v1111_v12  ;;  %v1110_v56 = vsel %vm1109_vm4, %v1102_v24, %v8643_v60  ;;  %v1112_v35 = vsel %vm1109_vm4, %v8619_v50, %v1102_v24  ;;  %v12191_v3 = vld [vmem:[#allocation11_spill] sm:$0xff] }
 0x1cc   :  { %v1143_v9 = vmul.f32 %v1132_v19, %v1112_v35  ;;  %v1144_v57 = vmul.f32 %v1136_v62, %v1110_v56  ;;  %3195 = vmatprep.subr.bf16.mxu0 %v7086_v44  ;;  %v1048_v55 = vrot.slane %v8651_v20, %v7599_v15  ;;  %v12192_v44 = vld [vmem:[#allocation13_spill] sm:$0xff] }
 0x1cd   :  { %3196 = vmatpush1.bf16.msra.mxu0 %v7085_v22  ;;  %v1696_v59 = vpop.permute.xlu1 %1695 }
 0x1ce   :  { %v7053_v1 = vpack.c.bf16 %v1147_v5, %v1143_v9  ;;  %v1699_v60 = vsel %vm11938_vm12, %v8239_v28, %v1696_v59  ;;  %v1705_v50 = vsel %vm11938_vm12, %v1696_v59, %v8255_v37  ;;  %v1694_v39 = vpop.permute.xlu0 %1693  ;;  %v7054_v16 = vpack.c.bf16 %v1148_v21, %v1144_v57  ;;  %v12193_v9 = vld [vmem:[#allocation14_spill] sm:$0xff] }
 0x1cf   :  { %v1735_v40 = vmul.f32 %v1720_v51, %v1699_v60  ;;  %v1736_v34 = vmul.f32 %v1724_v63, %v1705_v50  ;;  %v1698_v0 = vsel %vm11938_vm12, %v8244_v2, %v1694_v39  ;;  %v1704_v20 = vsel %vm11938_vm12, %v1694_v39, %v12186_v7  ;;  %v12195_v60 = vld [vmem:[#allocation36_spill] sm:$0xff]  ;;  %vm12227_vm12 = vmmov %vm12220_vm9 }
 0x1d0   :  { %v1731_v52 = vmul.f32 %v1720_v51, %v1698_v0  ;;  %v1732_v54 = vmul.f32 %v1724_v63, %v1704_v20  ;;  %3170 = vmatprep.subr.bf16.mxu1 %v7054_v16  ;;  %v1636_v37 = vrot.slane %v12187_v23, %v7599_v15  ;;  %v1552_v57 = vrot.slane %v12193_v9, %v7599_v15  ;;  %v12196_v0 = vld [vmem:[#allocation39_spill] sm:$0xff]  ;;  %v12197_v20 = vld [vmem:[#allocation37_spill] sm:$0xff] }
 0x1d1   :  { %3171 = vmatpush2.bf16.msra.mxu1 %v7053_v1  ;;  %v1020_v28 = vpop.permute.xlu1 %1019  ;;  %v1556_v59 = vrot.slane %v12193_v9, %v7589_v11 }
 0x1d2   :  { %v7081_v46 = vpack.c.bf16 %v1735_v40, %v1731_v52  ;;  %v1027_v2 = vsel %vm1025_vm5, %v1020_v28, %v8669_v25  ;;  %v1029_v19 = vsel %vm1025_vm5, %v8657_v61, %v1020_v28  ;;  %v1018_v62 = vpop.permute.xlu0 %1017  ;;  %v7082_v53 = vpack.c.bf16 %v1736_v34, %v1732_v54 }
 0x1d3   :  { %v1063_v14 = vmul.f32 %v1048_v55, %v1029_v19  ;;  %v1064_v49 = vmul.f32 %v1052_v45, %v1027_v2  ;;  %v1026_v58 = vsel %vm1025_vm5, %v1018_v62, %v8674_v30  ;;  %v1028_v17 = vsel %vm1025_vm5, %v8662_v42, %v1018_v62  ;;  %v12199_v19 = vld [vmem:[#allocation15_spill] sm:$0xff] }
 0x1d4   :  { %v1059_v13 = vmul.f32 %v1048_v55, %v1028_v17  ;;  %v1060_v6 = vmul.f32 %v1052_v45, %v1026_v58  ;;  %3197 = vmatprep.subr.bf16.mxu0 %v7082_v53  ;;  %v964_v61 = vrot.slane %v12188_v4, %v7599_v15  ;;  %v12194_v45 = vld [vmem:[#allocation38_spill] sm:$0xff]  ;;  %v12200_v53 = vld [vmem:[#allocation17_spill] sm:$0xff] }
 0x1d5   :  { %3198 = vmatpush1.bf16.msra.mxu0 %v7081_v46  ;;  %v1612_v25 = vpop.permute.xlu1 %1611  ;;  %v12202_v4 = vld [vmem:[#allocation18_spill] sm:$0xff] }
 0x1d6   :  { %v7049_v8 = vpack.c.bf16 %v1063_v14, %v1059_v13  ;;  %v1615_v30 = vsel %vm1613_vm13, %v12189_v32, %v1612_v25  ;;  %v1621_v42 = vsel %vm1613_vm13, %v1612_v25, %v12190_v18  ;;  %v1610_v51 = vpop.permute.xlu0 %1609  ;;  %v7050_v63 = vpack.c.bf16 %v1064_v49, %v1060_v6  ;;  %v12201_v6 = vld [vmem:[#allocation16_spill] sm:$0xff] }
 0x1d7   :  { %v1651_v22 = vmul.f32 %v1636_v37, %v1615_v30  ;;  %v1652_v12 = vmul.f32 %v1640_v27, %v1621_v42  ;;  %v1614_v24 = vsel %vm1613_vm13, %v12191_v3, %v1610_v51  ;;  %v1620_v5 = vsel %vm1613_vm13, %v1610_v51, %v12192_v44  ;;  %v12203_v30 = vld [vmem:[#allocation19_spill] sm:$0xff] }
 0x1d8   :  { %v1647_v21 = vmul.f32 %v1636_v37, %v1614_v24  ;;  %v1648_v56 = vmul.f32 %v1640_v27, %v1620_v5  ;;  %3172 = vmatprep.subr.bf16.mxu1 %v7050_v63  ;;  %v12198_v37 = vld [vmem:[#allocation40_spill] sm:$0xff]  ;;  %v1468_v18 = vrot.slane %v12203_v30, %v7599_v15  ;;  %v1472_v42 = vrot.slane %v12203_v30, %v7589_v11 }
 0x1d9   :  { %3173 = vmatpush2.bf16.msra.mxu1 %v7049_v8  ;;  %v936_v35 = vpop.permute.xlu1 %935  ;;  %v880_v27 = vrot.slane %v12198_v37, %v7599_v15  ;;  %v884_v46 = vrot.slane %v12198_v37, %v7589_v11 }
 0x1da   :  { %v7077_v55 = vpack.c.bf16 %v1651_v22, %v1647_v21  ;;  %v943_v1 = vsel %vm941_vm6, %v936_v35, %v12194_v45  ;;  %v945_v50 = vsel %vm941_vm6, %v12195_v60, %v936_v35  ;;  %v934_v39 = vpop.permute.xlu0 %933  ;;  %v7078_v16 = vpack.c.bf16 %v1652_v12, %v1648_v56  ;;  %v12204_v22 = vld [vmem:[#allocation41_spill] sm:$0xff]  ;;  %v12205_v21 = vld [vmem:[#allocation43_spill] sm:$0xff]  ;;  %v12206_v35 = vld [vmem:[#allocation42_spill] sm:$0xff] }
 0x1db   :  { %v979_v40 = vmul.f32 %v964_v61, %v945_v50  ;;  %v980_v34 = vmul.f32 %v968_v43, %v943_v1  ;;  %v942_v7 = vsel %vm941_vm6, %v934_v39, %v12196_v0  ;;  %v944_v52 = vsel %vm941_vm6, %v12197_v20, %v934_v39  ;;  %v12207_v60 = vld [vmem:[#allocation20_spill] sm:$0xff]  ;;  %v12208_v39 = vld [vmem:[#allocation22_spill] sm:$0xff]  ;;  %v12209_v20 = vld [vmem:[#allocation21_spill] sm:$0xff] }
 0x1dc   :  { %v975_v54 = vmul.f32 %v964_v61, %v944_v52  ;;  %v976_v28 = vmul.f32 %v968_v43, %v942_v7  ;;  %3199 = vmatprep.subr.bf16.mxu0 %v7078_v16  ;;  %v800_v45 = vrot.slane %v8742_v26, %v7589_v11 }
 0x1dd   :  { %3200 = vmatpush1.bf16.msra.mxu0 %v7077_v55  ;;  %v1528_v23 = vpop.permute.xlu1 %1527  ;;  %v796_v55 = vrot.slane %v8742_v26, %v7599_v15 }
 0x1de   :  { %v7045_v2 = vpack.c.bf16 %v979_v40, %v975_v54  ;;  %v1531_v62 = vsel %vm1529_vm14, %v12199_v19, %v1528_v23  ;;  %v1537_v14 = vsel %vm1529_vm14, %v1528_v23, %v12200_v53  ;;  %v1526_v49 = vpop.permute.xlu0 %1525  ;;  %v7046_v58 = vpack.c.bf16 %v980_v34, %v976_v28  ;;  %v12210_v54 = vld [vmem:[#allocation23_spill] sm:$0xff]  ;;  %v12212_v53 = vld [vmem:[#allocation44_spill] sm:$0xff] }
 0x1df   :  { %v1567_v17 = vmul.f32 %v1552_v57, %v1531_v62  ;;  %v1568_v13 = vmul.f32 %v1556_v59, %v1537_v14  ;;  %v1530_v25 = vsel %vm1529_vm14, %v12201_v6, %v1526_v49  ;;  %v1536_v61 = vsel %vm1529_vm14, %v1526_v49, %v12202_v4 }
 0x1e0   :  { %v1563_v43 = vmul.f32 %v1552_v57, %v1530_v25  ;;  %v1564_v8 = vmul.f32 %v1556_v59, %v1536_v61  ;;  %3174 = vmatprep.subr.bf16.mxu1 %v7046_v58  ;;  %v12213_v25 = vld [vmem:[#allocation45_spill] sm:$0xff] }
 0x1e1   :  { %3175 = vmatpush2.bf16.msra.mxu1 %v7045_v2  ;;  %v852_v32 = vpop.permute.xlu1 %851 }
 0x1e2   :  { %v7073_v51 = vpack.c.bf16 %v1567_v17, %v1563_v43  ;;  %v859_v63 = vsel %vm857_vm7, %v852_v32, %v8729_v31  ;;  %v861_v12 = vsel %vm857_vm7, %v12204_v22, %v852_v32  ;;  %v850_v3 = vpop.permute.xlu0 %849  ;;  %v7074_v24 = vpack.c.bf16 %v1568_v13, %v1564_v8  ;;  %v12214_v8 = vld [vmem:[#allocation29_spill] sm:$0xff] }
 0x1e3   :  { %v895_v44 = vmul.f32 %v880_v27, %v861_v12  ;;  %v896_v5 = vmul.f32 %v884_v46, %v859_v63  ;;  %v858_v56 = vsel %vm857_vm7, %v850_v3, %v12205_v21  ;;  %v860_v9 = vsel %vm857_vm7, %v12206_v35, %v850_v3  ;;  %v12218_v21 = vld [vmem:[#allocation26_spill] sm:$0xff] }
 0x1e4   :  { %v891_v57 = vmul.f32 %v880_v27, %v860_v9  ;;  %v892_v59 = vmul.f32 %v884_v46, %v858_v56  ;;  %3201 = vmatprep.subr.bf16.mxu0 %v7074_v24  ;;  %v12211_v27 = vld [vmem:[#allocation24_spill] sm:$0xff]  ;;  %v2056_v32 = vrot.slane %v12214_v8, %v7599_v15  ;;  %v2060_v30 = vrot.slane %v12214_v8, %v7589_v11 }
 0x1e5   :  { %3202 = vmatpush1.bf16.msra.mxu0 %v7073_v51  ;;  %v1444_v31 = vpop.permute.xlu1 %1443  ;;  %v1384_v46 = vrot.slane %v12211_v27, %v7599_v15  ;;  %v1388_v2 = vrot.slane %v12211_v27, %v7589_v11  ;;  %v12216_v51 = vld [vmem:[#allocation25_spill] sm:$0xff] }
 0x1e6   :  { %v7041_v1 = vpack.c.bf16 %v895_v44, %v891_v57  ;;  %v1447_v50 = vsel %vm1445_vm15, %v12207_v60, %v1444_v31  ;;  %v1453_v16 = vsel %vm1445_vm15, %v1444_v31, %v12208_v39  ;;  %v1442_v40 = vpop.permute.xlu0 %1441  ;;  %v7042_v34 = vpack.c.bf16 %v896_v5, %v892_v59  ;;  %v12217_v44 = vld [vmem:[#allocation28_spill] sm:$0xff]  ;;  %v12219_v31 = vld [vmem:[#allocation30_spill] sm:$0xff] }
 0x1e7   :  { %v1483_v0 = vmul.f32 %v1468_v18, %v1447_v50  ;;  %v1484_v7 = vmul.f32 %v1472_v42, %v1453_v16  ;;  %v1446_v52 = vsel %vm1445_vm15, %v12209_v20, %v1442_v40  ;;  %v1452_v26 = vsel %vm1445_vm15, %v1442_v40, %v12210_v54  ;;  %v12223_v60 = vld [vmem:[#allocation6_spill] sm:$0xff] }
 0x1e8   :  { %v1479_v28 = vmul.f32 %v1468_v18, %v1446_v52  ;;  %v1480_v23 = vmul.f32 %v1472_v42, %v1452_v26  ;;  %3176 = vmatprep.subr.bf16.mxu1 %v7042_v34  ;;  %v12215_v42 = vld [vmem:[#allocation27_spill] sm:$0xff] }
 0x1e9   :  { %3177 = vmatpush2.bf16.msra.mxu1 %v7041_v1  ;;  %v768_v37 = vpop.permute.xlu1 %767  ;;  %v12224_v34 = vld [vmem:[#allocation31_spill] sm:$0xff] }
 0x1ea   :  { %v7069_v19 = vpack.c.bf16 %v1483_v0, %v1479_v28  ;;  %v775_v62 = vsel %vm773_vm0, %v768_v37, %v8759_v38  ;;  %v777_v14 = vsel %vm773_vm0, %v12212_v53, %v768_v37  ;;  %v766_v49 = vpop.permute.xlu0 %765  ;;  %v7070_v58 = vpack.c.bf16 %v1484_v7, %v1480_v23  ;;  %v12226_v7 = vld [vmem:[#allocation33_spill] sm:$0xff]  ;;  %v12228_v26 = vld [vmem:[#allocation7_spill] sm:$0xff]  ;;  %v12229_v37 = vld [vmem:[#allocation34_spill] sm:$0xff] }
 0x1eb   :  { %v811_v17 = vmul.f32 %v796_v55, %v777_v14  ;;  %v812_v13 = vmul.f32 %v800_v45, %v775_v62  ;;  %v774_v6 = vsel %vm773_vm0, %v766_v49, %v8764_v48  ;;  %v776_v4 = vsel %vm773_vm0, %v12213_v25, %v766_v49 }
 0x1ec   :  { %v807_v61 = vmul.f32 %v796_v55, %v776_v4  ;;  %v808_v43 = vmul.f32 %v800_v45, %v774_v6  ;;  %3203 = vmatprep.subr.bf16.mxu0 %v7070_v58  ;;  %v12221_v45 = vld [vmem:[#allocation32_spill] sm:$0xff] }
 0x1ed   :  { %3204 = vmatpush1.bf16.msra.mxu0 %v7069_v19  ;;  %v1356_v38 = vpop.permute.xlu1 %1355 }
 0x1ee   :  { %v7037_v18 = vpack.c.bf16 %v811_v17, %v807_v61  ;;  %v1363_v48 = vsel %vm1361_vm8, %v1356_v38, %v12215_v42  ;;  %v1365_v63 = vsel %vm1361_vm8, %v12216_v51, %v1356_v38  ;;  %v1354_v22 = vpop.permute.xlu0 %1353  ;;  %v7038_v12 = vpack.c.bf16 %v812_v13, %v808_v43 }
 0x1ef   :  { %v1399_v3 = vmul.f32 %v1384_v46, %v1365_v63  ;;  %v1400_v24 = vmul.f32 %v1388_v2, %v1363_v48  ;;  %v1362_v5 = vsel %vm1361_vm8, %v1354_v22, %v12217_v44  ;;  %v1364_v56 = vsel %vm1361_vm8, %v12218_v21, %v1354_v22 }
 0x1f0   :  { %v1395_v35 = vmul.f32 %v1384_v46, %v1364_v56  ;;  %v1396_v9 = vmul.f32 %v1388_v2, %v1362_v5  ;;  %3178 = vmatprep.subr.bf16.mxu1 %v7038_v12 }
 0x1f1   :  { %3179 = vmatpush2.bf16.msra.mxu1 %v7037_v18  ;;  %v2032_v57 = vpop.permute.xlu1 %2031 }
 0x1f2   :  { %v7065_v59 = vpack.c.bf16 %v1399_v3, %v1395_v35  ;;  %v2035_v55 = vsel %vm12220_vm9, %v12219_v31, %v2032_v57  ;;  %v2041_v1 = vsel %vm12222_vm10, %v2032_v57, %v12221_v45  ;;  %3180 = vmatprep.subr.bf16.mxu1 %v12223_v60  ;;  %v2030_v50 = vpop.permute.xlu0 %2029  ;;  %v7066_v39 = vpack.c.bf16 %v1400_v24, %v1396_v9 }
 0x1f3   :  { %v2071_v16 = vmul.f32 %v2056_v32, %v2035_v55  ;;  %v2072_v40 = vmul.f32 %v2060_v30, %v2041_v1  ;;  %v2034_v0 = vsel %vm12225_vm11, %v12224_v34, %v2030_v50  ;;  %v2040_v20 = vsel %vm12227_vm12, %v2030_v50, %v12226_v7 }
 0x1f4   :  { %v2067_v52 = vmul.f32 %v2056_v32, %v2034_v0  ;;  %v2068_v54 = vmul.f32 %v2060_v30, %v2040_v20  ;;  %3205 = vmatprep.subr.bf16.mxu0 %v7066_v39  ;;  %v7354_v34 = vmov 0.0   ;;  %vm7355_vm9 = vmmov 0  }
 0x1f5   :  { %3181 = vmatpush2.bf16.msra.mxu1 %v12228_v26  ;;  %3206 = vmatpush1.bf16.msra.mxu0 %v7065_v59  ;;  %vm3364_vm10 = vcmask 31744   ;;  %vm3371_vm11 = vcmask 1043456   ;;  %vm12263_vm12 = vcmp.lt.s32.totalorder %v7583_v10, 17 }
 0x1f6   :  { %v7097_v28 = vpack.c.bf16 %v2071_v16, %v2067_v52  ;;  %v7098_v23 = vpack.c.bf16 %v2072_v40, %v2068_v54  ;;  %v3352_v54 = vld [vmem:[%s11842_s9] sm:$0xff] }
 0x1f8   :  { %3183 = vmatmul.mubr.bf16.vlgmr.msra.gmra.mxu1 %v8804_v33  ;;  %3221 = vmatprep.subr.bf16.mxu0 %v7098_v23 }
 0x1f9   :  { %3222 = vmatpush2.bf16.msra.mxu0 %v7097_v28 }
 0x1fa   :  { %7147 = vmatprep.subr.mxu0 %v7354_v34 }
 0x1fc   :  { %3224 = vmatmul.mubr.bf16.vlgmr.msra.gmra.mxu0 %v12229_v37 }
 0x1fd   :  { %7151 = vmatprep.mubr.msk.f32.mxu0 %vm7355_vm9, %v7354_v34 }
 0x1fe   :  { %v2142_v27 = vpop.permute.xlu1 %2141 }
 0x1ff   :  { %v2371_v46 = vadd.f32 %v8821_v41, %v2142_v27  ;;  %v2369_v2 = vadd.f32 %v8812_v29, %v2142_v27  ;;  %v2410_v43 = vadd.f32 %v8794_v36, %v2142_v27  ;;  %v2412_v38 = vadd.f32 %v8815_v47, %v2142_v27  ;;  %v2550_v32 = vpop.permute.xlu0 %2549 }
 0x201   :  { %v6575_v19 = vmul.f32 -1.442695, %v2371_v46  ;;  %v6574_v62 = vmul.f32 -1.442695, %v2369_v2  ;;  %v6576_v8 = vmul.f32 -1.442695, %v2410_v43 }
 0x202   :  { %v6577_v30 = vmul.f32 -1.442695, %v2412_v38 }
 0x203   :  { %7209 = vpow2.f32 %v6575_v19  ;;  %v3353_v19 = vld [vmem:[%s11842_s9 + $0x8] sm:$0xff]  ;;  %s12258_s9 = smov 127  }
 0x204   :  { %7211 = vpow2.f32 %v6574_v62 }
 0x210   :  { %v7210_v53 = vpop.eup %7209 }
 0x211   :  { %v2429_v14 = vadd.f32 1.0, %v7210_v53  ;;  %v7212_v49 = vpop.eup %7211 }
 0x212   :  { %v2428_v58 = vadd.f32 1.0, %v7212_v49  ;;  %v3714_v49 = vld [vmem:[%s11843_s12 + $0x8] sm:$0xff] }
 0x213   :  { %7213 = vrcp.f32 %v2429_v14 }
 0x214   :  { %7215 = vrcp.f32 %v2428_v58  ;;  %v6706_v58 = vld [vmem:[%s11843_s12 + $0x18] sm:$0xff] }
 0x215   :  { %7217 = vpow2.f32 %v6576_v8 }
 0x216   :  { %7219 = vpow2.f32 %v6577_v30  ;;  %v6747_v30 = vld [vmem:[%s11843_s12 + $0x78] sm:$0xff] }
 0x220   :  { %v7214_v33 = vpop.eup %7213 }
 0x221   :  { %v9048_v17 = vmul.f32 %v7214_v33, %v2371_v46  ;;  %v7216_v13 = vpop.eup %7215  ;;  %v6713_v33 = vld [vmem:[%s11843_s12 + $0x28] sm:$0xff] }
 0x222   :  { %v9050_v6 = vmul.f32 %v7216_v13, %v2369_v2  ;;  %v7218_v36 = vpop.eup %7217 }
 0x223   :  { %v7220_v5 = vpop.eup %7219  ;;  %v2430_v47 = vadd.f32 1.0, %v7218_v36  ;;  %v6776_v36 = vld [vmem:[%s11843_s12 + $0xe8] sm:$0xff] }
 0x224   :  { %v3260_v41 = vadd.f32 %v9048_v17, %v9050_v6  ;;  %v2431_v56 = vadd.f32 1.0, %v7220_v5  ;;  %v3713_v5 = vld [vmem:[%s11843_s12] sm:$0xff] }
 0x226   :  { %v3143_v29 = vpop.f32.mrf.mxu1  ;;  %3261 = vadd.xlane.f32.xlu0 %v3260_v41 }
 0x228   :  { %v3145_v25 = vpop.f32.mrf.mxu1 }
 0x22a   :  { %v3147_v4 = vpop.f32.mrf.mxu1 }
 0x22c   :  { %v3148_v61 = vpop.f32.mrf.mxu1 }
 0x22d   :  { %v6726_v61 = vld [vmem:[%s11843_s12 + $0x48] sm:$0xff] }
 0x27f   :  { %v3102_v18 = vpop.f32.mrf.mxu0 }
 0x280   :  { %v3103_v42 = vadd.f32 %v3102_v18, %v2550_v32 }
 0x281   :  { %v3104_v48 = vpop.f32.mrf.mxu0 }
 0x282   :  { %v3144_v51 = vadd.f32 %v3143_v29, %v3103_v42  ;;  %v3105_v63 = vadd.f32 %v3104_v48, %v2550_v32 }
 0x283   :  { %v3106_v22 = vpop.f32.mrf.mxu0 }
 0x284   :  { %v6684_v12 = vmul.f32 -1.442695, %v3144_v51  ;;  %v3146_v3 = vadd.f32 %v3145_v25, %v3105_v63  ;;  %v6720_v25 = vld [vmem:[%s11843_s12 + $0x38] sm:$0xff]  ;;  %v6764_v22 = vld [vmem:[%s11843_s12 + $0xa8] sm:$0xff] }
 0x285   :  { %v3107_v24 = vpop.f32.mrf.mxu0  ;;  %v6761_v63 = vld [vmem:[%s11843_s12 + $0x98] sm:$0xff] }
 0x286   :  { %7221 = vpow2.f32 %v6684_v12  ;;  %v6685_v44 = vmul.f32 -1.442695, %v3146_v3  ;;  %v6767_v12 = vld [vmem:[%s11843_s12 + $0xb8] sm:$0xff] }
 0x287   :  { %v6773_v24 = vld [vmem:[%s11843_s12 + $0xd8] sm:$0xff] }
 0x288   :  { %7223 = vpow2.f32 %v6685_v44  ;;  %v3270_v44 = vld [vmem:[%s11844_s7] sm:$0xf]  ;;  %s12358_s7 = smov 96  }
 0x289   :  { %7225 = vrcp.f32 %v2430_v47  ;;  %v6779_v47 = vld [vmem:[%s11843_s12 + $0xf8] sm:$0xff] }
 0x293   :  { %v7222_v21 = vpop.eup %7221 }
 0x294   :  { %v3244_v35 = vadd.f32 1.0, %v7222_v21  ;;  %v6705_v21 = vld [vmem:[%s11843_s12 + $0x10] sm:$0xff] }
 0x295   :  { %v7224_v9 = vpop.eup %7223 }
 0x296   :  { %7227 = vrcp.f32 %v3244_v35  ;;  %v3245_v57 = vadd.f32 1.0, %v7224_v9  ;;  %v7226_v59 = vpop.eup %7225  ;;  %v6712_v35 = vld [vmem:[%s11843_s12 + $0x20] sm:$0xff]  ;;  %v6719_v9 = vld [vmem:[%s11843_s12 + $0x30] sm:$0xff] }
 0x297   :  { %7229 = vrcp.f32 %v2431_v56  ;;  %v9060_v50 = vmul.f32 %v7226_v59, %v2410_v43  ;;  %v6733_v43 = vld [vmem:[%s11843_s12 + $0x58] sm:$0xff]  ;;  %v6782_v56 = vld [vmem:[%s11843_s12 + $0x108] sm:$0xff]  ;;  %v6732_v59 = vld [vmem:[%s11843_s12 + $0x50] sm:$0xff] }
 0x298   :  { %7231 = vrcp.f32 %v3245_v57  ;;  %v6725_v57 = vld [vmem:[%s11843_s12 + $0x40] sm:$0xff] }
 0x2a3   :  { %v7228_v31 = vpop.eup %7227 }
 0x2a4   :  { %v7230_v55 = vpop.eup %7229  ;;  %v9056_v1 = vmul.f32 %v7228_v31, %v3144_v51  ;;  %v6754_v51 = vld [vmem:[%s11843_s12 + $0x88] sm:$0xff]  ;;  %v6739_v31 = vld [vmem:[%s11843_s12 + $0x60] sm:$0xff] }
 0x2a5   :  { %v7232_v45 = vpop.eup %7231  ;;  %v9062_v39 = vmul.f32 %v7230_v55, %v2412_v38  ;;  %v6740_v38 = vld [vmem:[%s11843_s12 + $0x68] sm:$0xff]  ;;  %v6746_v55 = vld [vmem:[%s11843_s12 + $0x70] sm:$0xff] }
 0x2a6   :  { %v9058_v60 = vmul.f32 %v7232_v45, %v3146_v3  ;;  %v6770_v3 = vld [vmem:[%s11843_s12 + $0xc8] sm:$0xff]  ;;  %v6753_v45 = vld [vmem:[%s11843_s12 + $0x80] sm:$0xff] }
 0x2a7   :  { %v3476_v40 = vadd.f32 %v9062_v39, %v9060_v50 }
 0x2a8   :  { %v3263_v16 = vadd.f32 %v9058_v60, %v9056_v1 }
 0x2aa   :  { %3264 = vadd.xlane.f32.xlu1 %v3263_v16  ;;  %v6760_v16 = vld [vmem:[%s11843_s12 + $0x90] sm:$0xff] }
 0x2ae   :  { %3477 = vadd.xlane.f32.xlu1 %v3476_v40  ;;  %v6763_v40 = vld [vmem:[%s11843_s12 + $0xa0] sm:$0xff] }
 0x2b8   :  { %v3184_v0 = vpop.f32.mrf.mxu1 }
 0x2b9   :  { %v3185_v20 = vadd.f32 %v3184_v0, %v2550_v32  ;;  %v6766_v0 = vld [vmem:[%s11843_s12 + $0xb0] sm:$0xff] }
 0x2ba   :  { %v3186_v7 = vpop.f32.mrf.mxu1 }
 0x2bb   :  { %v3187_v28 = vadd.f32 %v3186_v7, %v2550_v32  ;;  %v6769_v7 = vld [vmem:[%s11843_s12 + $0xc0] sm:$0xff] }
 0x2bc   :  { %v3225_v52 = vpop.f32.mrf.mxu0  ;;  %v3188_v26 = vpop.f32.mrf.mxu1 }
 0x2bd   :  { %v3226_v23 = vadd.f32 %v3225_v52, %v3185_v20  ;;  %v6772_v20 = vld [vmem:[%s11843_s12 + $0xd0] sm:$0xff]  ;;  %v3262_v52 = vpop.xlane.xlu0 %3261 }
 0x2be   :  { %v3227_v37 = vpop.f32.mrf.mxu0  ;;  %v3189_v27 = vpop.f32.mrf.mxu1 }
 0x2bf   :  { %v6686_v46 = vmul.f32 -1.442695, %v3226_v23  ;;  %v3228_v2 = vadd.f32 %v3227_v37, %v3187_v28  ;;  %3356 = vperm.xlu1 %7199, %v3352_v54   ;;  %v6775_v28 = vld [vmem:[%s11843_s12 + $0xe0] sm:$0xff]  ;;  %v6778_v27 = vld [vmem:[%s11843_s12 + $0xf0] sm:$0xff] }
 0x2c0   :  { %v3229_v62 = vpop.f32.mrf.mxu0  ;;  %v3269_v37 = vld [vmem:[%s11845_s6] sm:$0xf] }
 0x2c1   :  { %7233 = vpow2.f32 %v6686_v46  ;;  %v6687_v53 = vmul.f32 -1.442695, %v3228_v2  ;;  %v6781_v46 = vld [vmem:[%s11843_s12 + $0x100] sm:$0xff] }
 0x2c2   :  { %v3230_v14 = vpop.f32.mrf.mxu0 }
 0x2c3   :  { %7235 = vpow2.f32 %v6687_v53  ;;  %3361 = vperm.xlu1 %7199, %v3353_v19   ;;  %v3350_v14 = vld [vmem:[%s11846_s8] sm:$0xff] }
 0x2c4   :  { %7156 = vmatprep.mubr.msk.f32.mxu1 %vm3364_vm10, %v3350_v14 }
 0x2c7   :  { %3722 = vperm.xlu1 %7199, %v3714_v49  }
 0x2cb   :  { %3833 = vperm.xlu1 %7199, %v6706_v58  }
 0x2ce   :  { %v7234_v13 = vpop.eup %7233 }
 0x2cf   :  { %v3246_v41 = vadd.f32 1.0, %v7234_v13  ;;  %3944 = vperm.xlu1 %7199, %v6713_v33  }
 0x2d0   :  { %v7236_v29 = vpop.eup %7235 }
 0x2d1   :  { %7237 = vrcp.f32 %v3246_v41  ;;  %v3247_v4 = vadd.f32 1.0, %v7236_v29 }
 0x2d3   :  { %7239 = vrcp.f32 %v3247_v4  ;;  %4055 = vperm.xlu1 %7199, %v6720_v25  }
 0x2d7   :  { %4112 = vperm.xlu1 %7199, %v6726_v61  }
 0x2db   :  { %4223 = vperm.xlu1 %7199, %v6733_v43  }
 0x2de   :  { %v7238_v8 = vpop.eup %7237 }
 0x2df   :  { %4334 = vperm.xlu1 %7199, %v6740_v38   ;;  %v9101_v18 = vmul.f32 %v7238_v8, %v3226_v23  ;;  %v3267_v23 = vmul.f32 0.00390625, %v3262_v52 }
 0x2e0   :  { %v7240_v32 = vpop.eup %7239 }
 0x2e1   :  { %v9103_v42 = vmul.f32 %v7240_v32, %v3228_v2 }
 0x2e3   :  { %4445 = vperm.xlu1 %7199, %v6747_v30   ;;  %v3479_v48 = vadd.f32 %v9103_v42, %v9101_v18 }
 0x2e5   :  { %3480 = vadd.xlane.f32.xlu0 %v3479_v48 }
 0x2e7   :  { %4556 = vperm.xlu1 %7199, %v6754_v51  }
 0x2eb   :  { %4667 = vperm.xlu1 %7199, %v6761_v63  }
 0x2ef   :  { %4750 = vperm.xlu1 %7199, %v6764_v22  }
 0x2f3   :  { %4833 = vperm.xlu1 %7199, %v6767_v12  }
 0x2f7   :  { %4916 = vperm.xlu1 %7199, %v6770_v3  }
 0x2fb   :  { %4999 = vperm.xlu1 %7199, %v6773_v24   ;;  %3273 = vperm.xlu0 %7198, %v3270_v44  }
 0x2ff   :  { %5082 = vperm.xlu1 %7199, %v6776_v36   ;;  %3717 = vperm.xlu0 %7198, %v3713_v5  }
 0x303   :  { %5165 = vperm.xlu1 %7199, %v6779_v47   ;;  %3828 = vperm.xlu0 %7198, %v6705_v21  }
 0x307   :  { %5248 = vperm.xlu1 %7199, %v6782_v56   ;;  %3939 = vperm.xlu0 %7198, %v6712_v35  }
 0x30b   :  { %4050 = vperm.xlu0 %7198, %v6719_v9  }
 0x30f   :  { %4107 = vperm.xlu0 %7198, %v6725_v57  }
 0x313   :  { %4218 = vperm.xlu0 %7198, %v6732_v59  }
 0x317   :  { %4329 = vperm.xlu0 %7198, %v6739_v31  }
 0x31b   :  { %4440 = vperm.xlu0 %7198, %v6746_v55  }
 0x31f   :  { %4551 = vperm.xlu0 %7198, %v6753_v45  }
 0x323   :  { %4662 = vperm.xlu0 %7198, %v6760_v16  }
 0x327   :  { %4745 = vperm.xlu0 %7198, %v6763_v40  }
 0x32b   :  { %4828 = vperm.xlu0 %7198, %v6766_v0  }
 0x32f   :  { %4911 = vperm.xlu0 %7198, %v6769_v7  }
 0x333   :  { %v3265_v54 = vpop.xlane.xlu1 %3264  ;;  %4994 = vperm.xlu0 %7198, %v6772_v20  }
 0x334   :  { %v3268_v26 = vmul.f32 0.00390625, %v3265_v54 }
 0x336   :  { %7148 = vmatpush3.msra.mxu0 %v3268_v26 }
 0x337   :  { %7149 = vmatprep.subr.mxu0 %v7354_v34  ;;  %5077 = vperm.xlu0 %7198, %v6775_v28   ;;  %v3478_v2 = vpop.xlane.xlu1 %3477 }
 0x338   :  { %7150 = vmatpush3.msra.mxu0 %v3267_v23  ;;  %v3482_v53 = vmul.f32 0.00390625, %v3478_v2 }
 0x339   :  { %7152 = vmatmul.mubr.msk.f32.vlgmr.msra.gmra.mxu0 %vm2330_vm1, %v3269_v37  ;;  %7159 = vmatprep.subr.mxu0 %v7354_v34 }
 0x33a   :  { %7163 = vmatprep.mubr.msk.f32.mxu0 %vm7355_vm9, %v7354_v34  ;;  %vm12264_vm9 = vmmov %vm12263_vm12 }
 0x33b   :  { %5160 = vperm.xlu0 %7198, %v6778_v27   ;;  %v3357_v43 = vpop.permute.xlu1 %3356 }
 0x33f   :  { %5243 = vperm.xlu0 %7198, %v6781_v46   ;;  %v3362_v38 = vpop.permute.xlu1 %3361 }
 0x343   :  { %v9208_v5 = vpop.permute.xlu1 %3722 }
 0x347   :  { %v9212_v59 = vpop.permute.xlu1 %3833 }
 0x34b   :  { %v9216_v45 = vpop.permute.xlu1 %3944 }
 0x34f   :  { %v9220_v40 = vpop.permute.xlu1 %4055 }
 0x350   :  { %12230 = vst [vmem:[#allocation8_spill] sm:$0xff] %v9220_v40 }
 0x353   :  { %v9224_v26 = vpop.permute.xlu1 %4112 }
 0x357   :  { %v9228_v23 = vpop.permute.xlu1 %4223 }
 0x35b   :  { %v9232_v46 = vpop.permute.xlu1 %4334 }
 0x36e   :  { %v3481_v19 = vpop.xlane.xlu0 %3480 }
 0x36f   :  { %v3483_v62 = vmul.f32 0.00390625, %v3481_v19 }
 0x371   :  { %7160 = vmatpush3.msra.mxu0 %v3483_v62  ;;  %v9236_v62 = vpop.permute.xlu1 %4445 }
 0x372   :  { %7161 = vmatprep.subr.mxu0 %v7354_v34  ;;  %v3351_v34 = vld [vmem:[%s11846_s8 + $0x8] sm:$0xff]  ;;  %12233 = vst [vmem:[#allocation10_spill] sm:$0xff] %v9236_v62  ;;  %s12254_s8 = smov 17  }
 0x373   :  { %7162 = vmatpush3.msra.mxu0 %v3482_v53 }
 0x374   :  { %7164 = vmatmul.mubr.msk.f32.vlgmr.msra.gmra.mxu0 %vm2330_vm1, %v3269_v37 }
 0x376   :  { %v3274_v49 = vpop.permute.xlu0 %3273 }
 0x37a   :  { %v9210_v21 = vpop.permute.xlu0 %3717 }
 0x37e   :  { %v9214_v55 = vpop.permute.xlu0 %3828 }
 0x382   :  { %v9218_v16 = vpop.permute.xlu0 %3939 }
 0x386   :  { %v9222_v7 = vpop.permute.xlu0 %4050 }
 0x387   :  { %12231 = vst [vmem:[#allocation9_spill] sm:$0xff] %v9222_v7 }
 0x38a   :  { %v9226_v28 = vpop.permute.xlu0 %4107 }
 0x38e   :  { %v9230_v37 = vpop.permute.xlu0 %4218 }
 0x392   :  { %v9234_v19 = vpop.permute.xlu0 %4329 }
 0x393   :  { %12232 = vst [vmem:[#allocation35_spill] sm:$0xff] %v9234_v19 }
 0x396   :  { %v9238_v53 = vpop.permute.xlu0 %4440 }
 0x397   :  { %12234 = vst [vmem:[#allocation12_spill] sm:$0xff] %v9238_v53 }
 0x3f9   :  { %v3345_v58 = vpop.f32.mrf.mxu0 }
 0x3fa   :  { %v3346_v33 = vadd.f32 %v3345_v58, %v3274_v49 }
 0x3fb   :  { %v7153_v13 = vpop.f32.mrf.mxu0 }
 0x3fc   :  { %v3349_v41 = vmax.f32 %v3346_v33, 0.0 }
 0x3fe   :  { %7154 = vmatprep.subr.msk.mxu1 %vm3371_vm11, %v3349_v41 }
 0x3ff   :  { %7155 = vmatpush3.msk.msra.mxu1 %vm3371_vm11, %v3349_v41 }
 0x400   :  { %7157 = vmatmul.mubr.msk.f32.vlgmr.msra.gmra.mxu1 %vm3364_vm10, %v3351_v34 }
 0x401   :  { %7168 = vmatprep.mubr.msk.f32.mxu1 %vm3364_vm10, %v3350_v14  ;;  %v9240_v14 = vpop.permute.xlu1 %4556 }
 0x402   :  { %12235 = vst [vmem:[#allocation11_spill] sm:$0xff] %v9240_v14 }
 0x405   :  { %v9244_v58 = vpop.permute.xlu1 %4667 }
 0x406   :  { %12237 = vst [vmem:[#allocation14_spill] sm:$0xff] %v9244_v58 }
 0x409   :  { %v9248_v13 = vpop.permute.xlu1 %4750 }
 0x40a   :  { %12239 = vst [vmem:[#allocation36_spill] sm:$0xff] %v9248_v13 }
 0x434   :  { %v3550_v29 = vpop.f32.mrf.mxu0 }
 0x435   :  { %v3551_v25 = vadd.f32 %v3550_v29, %v3274_v49  ;;  %v9242_v49 = vpop.permute.xlu0 %4551 }
 0x436   :  { %v7165_v4 = vpop.f32.mrf.mxu0  ;;  %12236 = vst [vmem:[#allocation13_spill] sm:$0xff] %v9242_v49 }
 0x437   :  { %v3554_v61 = vmax.f32 %v3551_v25, 0.0 }
 0x439   :  { %7166 = vmatprep.subr.msk.mxu1 %vm3371_vm11, %v3554_v61  ;;  %v9246_v33 = vpop.permute.xlu0 %4662 }
 0x43a   :  { %7167 = vmatpush3.msk.msra.mxu1 %vm3371_vm11, %v3554_v61  ;;  %12238 = vst [vmem:[#allocation38_spill] sm:$0xff] %v9246_v33 }
 0x43b   :  { %7169 = vmatmul.mubr.msk.f32.vlgmr.msra.gmra.mxu1 %vm3364_vm10, %v3351_v34  ;;  %v9252_v34 = vpop.permute.xlu1 %4833  ;;  %vm12266_vm10 = vcmp.lt.s32.totalorder %v7583_v10, 16 }
 0x43c   :  { %12241 = vst [vmem:[#allocation37_spill] sm:$0xff] %v9252_v34  ;;  %vm12269_vm11 = vmmov %vm12266_vm10 }
 0x43d   :  { %v9250_v41 = vpop.permute.xlu0 %4745 }
 0x43e   :  { %12240 = vst [vmem:[#allocation39_spill] sm:$0xff] %v9250_v41 }
 0x43f   :  { %v9256_v25 = vpop.permute.xlu1 %4916 }
 0x440   :  { %12243 = vst [vmem:[#allocation15_spill] sm:$0xff] %v9256_v25 }
 0x441   :  { %v9254_v29 = vpop.permute.xlu0 %4828 }
 0x442   :  { %12242 = vst [vmem:[#allocation40_spill] sm:$0xff] %v9254_v29 }
 0x443   :  { %v9260_v61 = vpop.permute.xlu1 %4999 }
 0x444   :  { %12245 = vst [vmem:[#allocation16_spill] sm:$0xff] %v9260_v61 }
 0x445   :  { %v9258_v4 = vpop.permute.xlu0 %4911 }
 0x446   :  { %12244 = vst [vmem:[#allocation17_spill] sm:$0xff] %v9258_v4 }
 0x4c0   :  { %v7158_v8 = vpop.f32.mrf.mxu1 }
 0x4c1   :  { %v3447_v32 = vadd.f32 %v7158_v8, %v3362_v38 }
 0x4c2   :  { %v3441_v30 = vpop.f32.mrf.mxu1 }
 0x4c3   :  { %v6693_v48 = vmul.f32 -1.442695, %v3447_v32  ;;  %v3442_v51 = vadd.f32 %v3441_v30, %v3357_v43 }
 0x4c5   :  { %7241 = vpow2.f32 %v6693_v48  ;;  %v6692_v63 = vmul.f32 -1.442695, %v3442_v51 }
 0x4c7   :  { %7243 = vpow2.f32 %v6692_v63 }
 0x4d2   :  { %v7242_v22 = vpop.eup %7241 }
 0x4d3   :  { %v3457_v12 = vadd.f32 1.0, %v7242_v22 }
 0x4d4   :  { %v7244_v3 = vpop.eup %7243 }
 0x4d5   :  { %7245 = vrcp.f32 %v3457_v12  ;;  %v3456_v24 = vadd.f32 1.0, %v7244_v3 }
 0x4d7   :  { %7247 = vrcp.f32 %v3456_v24 }
 0x4e2   :  { %v7246_v44 = vpop.eup %7245 }
 0x4e3   :  { %3469 = vperm.xlu1 %7199, %v7246_v44  }
 0x4e4   :  { %v7248_v36 = vpop.eup %7247 }
 0x4e5   :  { %3464 = vperm.xlu0 %7198, %v7248_v36  }
 0x4fb   :  { %v7170_v47 = vpop.f32.mrf.mxu1 }
 0x4fc   :  { %v3630_v56 = vadd.f32 %v7170_v47, %v3362_v38  ;;  %v9264_v38 = vpop.permute.xlu1 %5082  ;;  %v9417_v47 = vld [vmem:[%s11837_s1] sm:$0xf] }
 0x4fd   :  { %v3624_v35 = vpop.f32.mrf.mxu1  ;;  %12247 = vst [vmem:[#allocation19_spill] sm:$0xff] %v9264_v38 }
 0x4fe   :  { %v6699_v9 = vmul.f32 -1.442695, %v3630_v56  ;;  %v3625_v57 = vadd.f32 %v3624_v35, %v3357_v43  ;;  %v9262_v43 = vpop.permute.xlu0 %4994  ;;  %v9426_v35 = vld [vmem:[%s11837_s1 + $0x4] sm:$0xf] }
 0x4ff   :  { %12246 = vst [vmem:[#allocation18_spill] sm:$0xff] %v9262_v43 }
 0x500   :  { %7249 = vpow2.f32 %v6699_v9  ;;  %v6698_v31 = vmul.f32 -1.442695, %v3625_v57  ;;  %v9268_v32 = vpop.permute.xlu1 %5165  ;;  %v12262_v9 = vld [vmem:[#allocation5_spill] sm:$0xff] }
 0x501   :  { %12249 = vst [vmem:[#allocation43_spill] sm:$0xff] %v9268_v32  ;;  %v3692_v57 = vrot.slane %v9417_v47, %v12262_v9 }
 0x502   :  { %7251 = vpow2.f32 %v6698_v31  ;;  %v9266_v8 = vpop.permute.xlu0 %5077 }
 0x503   :  { %12248 = vst [vmem:[#allocation41_spill] sm:$0xff] %v9266_v8 }
 0x504   :  { %v9272_v48 = vpop.permute.xlu1 %5248 }
 0x505   :  { %12251 = vst [vmem:[#allocation20_spill] sm:$0xff] %v9272_v48 }
 0x506   :  { %v9270_v30 = vpop.permute.xlu0 %5160 }
 0x507   :  { %12250 = vst [vmem:[#allocation42_spill] sm:$0xff] %v9270_v30 }
 0x50a   :  { %v9274_v51 = vpop.permute.xlu0 %5243 }
 0x50b   :  { %12252 = vst [vmem:[#allocation22_spill] sm:$0xff] %v9274_v51 }
 0x50d   :  { %v7250_v0 = vpop.eup %7249 }
 0x50e   :  { %v3640_v20 = vadd.f32 1.0, %v7250_v0 }
 0x50f   :  { %v7252_v52 = vpop.eup %7251 }
 0x510   :  { %7253 = vrcp.f32 %v3640_v20  ;;  %v3639_v54 = vadd.f32 1.0, %v7252_v52  ;;  %v3802_v52 = vrot.slane %v9426_v35, %v12262_v9 }
 0x512   :  { %7255 = vrcp.f32 %v3639_v54 }
 0x51d   :  { %v7254_v27 = vpop.eup %7253 }
 0x51e   :  { %3652 = vperm.xlu1 %7199, %v7254_v27  }
 0x51f   :  { %v7256_v2 = vpop.eup %7255 }
 0x520   :  { %3647 = vperm.xlu0 %7198, %v7256_v2  }
 0x55e   :  { %v3470_v63 = vpop.permute.xlu1 %3469 }
 0x55f   :  { %v9277_v22 = vmul.f32 %v3470_v63, %v9056_v1  ;;  %v9285_v24 = vmul.f32 %v3470_v63, %v9058_v60 }
 0x560   :  { %v3465_v12 = vpop.permute.xlu0 %3464 }
 0x561   :  { %12253 = vst [vmem:[#allocation21_spill] sm:$0xff] %v9277_v22  ;;  %v9280_v3 = vmul.f32 %v3465_v12, %v9050_v6  ;;  %3661 = vrot.lane.b32.xlu1 %v9277_v22, %s12254_s8  ;;  %v9290_v44 = vmul.f32 %v3465_v12, %v9048_v17  ;;  %v9804_v62 = vmul.f32 %v9224_v26, %v9277_v22 }
 0x563   :  { %3659 = vrot.lane.b32.xlu0 %v9280_v3, %s12254_s8  ;;  %12337 = vst [vmem:[#allocation92_spill] sm:$0xff] %v9804_v62  ;;  %v4116_v62 = vmul.f32 %v9226_v28, %v9290_v44 }
 0x565   :  { %3665 = vrot.lane.b32.xlu1 %v9285_v24, %s12254_s8 }
 0x567   :  { %3663 = vrot.lane.b32.xlu0 %v9290_v44, %s12254_s8 }
 0x569   :  { %3771 = vrot.lane.b32.xlu1 %v9277_v22, %s12255_s23 }
 0x56b   :  { %3769 = vrot.lane.b32.xlu0 %v9280_v3, %s12255_s23 }
 0x56d   :  { %3775 = vrot.lane.b32.xlu1 %v9285_v24, %s12255_s23 }
 0x56f   :  { %3773 = vrot.lane.b32.xlu0 %v9290_v44, %s12255_s23 }
 0x571   :  { %3882 = vrot.lane.b32.xlu1 %v9277_v22, %s12256_s5 }
 0x573   :  { %3880 = vrot.lane.b32.xlu0 %v9280_v3, %s12256_s5 }
 0x575   :  { %3886 = vrot.lane.b32.xlu1 %v9285_v24, %s12256_s5 }
 0x577   :  { %3884 = vrot.lane.b32.xlu0 %v9290_v44, %s12256_s5 }
 0x579   :  { %3993 = vrot.lane.b32.xlu1 %v9277_v22, %s12257_s19 }
 0x57b   :  { %3991 = vrot.lane.b32.xlu0 %v9280_v3, %s12257_s19 }
 0x57d   :  { %3997 = vrot.lane.b32.xlu1 %v9285_v24, %s12257_s19 }
 0x57f   :  { %3995 = vrot.lane.b32.xlu0 %v9290_v44, %s12257_s19 }
 0x581   :  { %4161 = vrot.lane.b32.xlu1 %v9277_v22, %s12258_s9 }
 0x583   :  { %4159 = vrot.lane.b32.xlu0 %v9280_v3, %s12258_s9 }
 0x585   :  { %4165 = vrot.lane.b32.xlu1 %v9285_v24, %s12258_s9 }
 0x587   :  { %4163 = vrot.lane.b32.xlu0 %v9290_v44, %s12258_s9 }
 0x589   :  { %4272 = vrot.lane.b32.xlu1 %v9277_v22, %s12259_s0 }
 0x58b   :  { %4270 = vrot.lane.b32.xlu0 %v9280_v3, %s12259_s0 }
 0x58d   :  { %4276 = vrot.lane.b32.xlu1 %v9285_v24, %s12259_s0 }
 0x58f   :  { %4274 = vrot.lane.b32.xlu0 %v9290_v44, %s12259_s0 }
 0x591   :  { %4383 = vrot.lane.b32.xlu1 %v9277_v22, %s12260_s26 }
 0x593   :  { %4381 = vrot.lane.b32.xlu0 %v9280_v3, %s12260_s26 }
 0x595   :  { %4387 = vrot.lane.b32.xlu1 %v9285_v24, %s12260_s26 }
 0x597   :  { %4385 = vrot.lane.b32.xlu0 %v9290_v44, %s12260_s26 }
 0x599   :  { %4494 = vrot.lane.b32.xlu1 %v9277_v22, %s12261_s2  ;;  %v3653_v17 = vpop.permute.xlu1 %3652 }
 0x59b   :  { %4492 = vrot.lane.b32.xlu0 %v9280_v3, %s12261_s2  ;;  %v3648_v6 = vpop.permute.xlu0 %3647 }
 0x59c   :  { %v9491_v41 = vmul.f32 %v3648_v6, %v9060_v50 }
 0x59d   :  { %4498 = vrot.lane.b32.xlu1 %v9285_v24, %s12261_s2 }
 0x59e   :  { %12271 = vst [vmem:[#allocation29_spill] sm:$0xff] %v9491_v41 }
 0x59f   :  { %4496 = vrot.lane.b32.xlu0 %v9290_v44, %s12261_s2 }
 0x5a1   :  { %4605 = vrot.lane.b32.xlu1 %v9277_v22, %s7353_s16 }
 0x5a3   :  { %4603 = vrot.lane.b32.xlu0 %v9280_v3, %s7353_s16 }
 0x5a5   :  { %4609 = vrot.lane.b32.xlu1 %v9285_v24, %s7353_s16 }
 0x5a7   :  { %4607 = vrot.lane.b32.xlu0 %v9290_v44, %s7353_s16 }
 0x5a9   :  { %4688 = vrot.lane.b32.xlu1 %v9277_v22, %s7352_s25 }
 0x5ab   :  { %4686 = vrot.lane.b32.xlu0 %v9280_v3, %s7352_s25 }
 0x5ad   :  { %4692 = vrot.lane.b32.xlu1 %v9285_v24, %s7352_s25 }
 0x5af   :  { %4690 = vrot.lane.b32.xlu0 %v9290_v44, %s7352_s25 }
 0x5b1   :  { %4771 = vrot.lane.b32.xlu1 %v9277_v22, %s7350_s18 }
 0x5b3   :  { %4769 = vrot.lane.b32.xlu0 %v9280_v3, %s7350_s18 }
 0x5b5   :  { %4775 = vrot.lane.b32.xlu1 %v9285_v24, %s7350_s18 }
 0x5b7   :  { %4773 = vrot.lane.b32.xlu0 %v9290_v44, %s7350_s18 }
 0x5b9   :  { %4854 = vrot.lane.b32.xlu1 %v9277_v22, %s7349_s20 }
 0x5bb   :  { %4852 = vrot.lane.b32.xlu0 %v9280_v3, %s7349_s20 }
 0x5bd   :  { %4858 = vrot.lane.b32.xlu1 %v9285_v24, %s7349_s20 }
 0x5bf   :  { %4856 = vrot.lane.b32.xlu0 %v9290_v44, %s7349_s20 }
 0x5c1   :  { %4937 = vrot.lane.b32.xlu1 %v9277_v22, %s7348_s15 }
 0x5c3   :  { %4935 = vrot.lane.b32.xlu0 %v9280_v3, %s7348_s15 }
 0x5c5   :  { %4941 = vrot.lane.b32.xlu1 %v9285_v24, %s7348_s15 }
 0x5c7   :  { %4939 = vrot.lane.b32.xlu0 %v9290_v44, %s7348_s15 }
 0x5c9   :  { %5020 = vrot.lane.b32.xlu1 %v9277_v22, %s7347_s30 }
 0x5cb   :  { %5018 = vrot.lane.b32.xlu0 %v9280_v3, %s7347_s30 }
 0x5cd   :  { %5024 = vrot.lane.b32.xlu1 %v9285_v24, %s7347_s30 }
 0x5cf   :  { %5022 = vrot.lane.b32.xlu0 %v9290_v44, %s7347_s30 }
 0x5d1   :  { %5103 = vrot.lane.b32.xlu1 %v9277_v22, %s7346_s17 }
 0x5d3   :  { %v9402_v1 = vpop.permute.xlu1 %3661  ;;  %5101 = vrot.lane.b32.xlu0 %v9280_v3, %s7346_s17 }
 0x5d5   :  { %5107 = vrot.lane.b32.xlu1 %v9285_v24, %s7346_s17  ;;  %v9408_v60 = vpop.permute.xlu0 %3659 }
 0x5d7   :  { %v9410_v36 = vpop.permute.xlu1 %3665  ;;  %5105 = vrot.lane.b32.xlu0 %v9290_v44, %s7346_s17 }
 0x5d8   :  { %v3680_v0 = vsel %vm12263_vm12, %v9402_v1, %v9410_v36  ;;  %vm12273_vm12 = vcmp.lt.s32.totalorder %v7583_v10, 15 }
 0x5d9   :  { %5186 = vrot.lane.b32.xlu1 %v9277_v22, %s12173_s4  ;;  %v9421_v56 = vpop.permute.xlu0 %3663  ;;  %v9448_v27 = vmul.f32 %v3692_v57, %v3680_v0  ;;  %v9469_v0 = vld [vmem:[%s11837_s1 + $0x8] sm:$0xf] }
 0x5da   :  { %v3679_v54 = vsel %vm12264_vm9, %v9408_v60, %v9421_v56  ;;  %v3913_v29 = vrot.slane %v9469_v0, %v12262_v9  ;;  %vm12276_vm9 = vmmov %vm12273_vm12 }
 0x5db   :  { %v9430_v31 = vpop.permute.xlu1 %3771  ;;  %5184 = vrot.lane.b32.xlu0 %v9280_v3, %s12173_s4  ;;  %12265 = vst [vmem:[#allocation23_spill] sm:$0xff] %v9448_v27  ;;  %v9458_v12 = vmul.f32 %v3692_v57, %v3679_v54  ;;  %v9476_v57 = vmul.f32 %v3653_v17, %v9101_v18  ;;  %v3730_v54 = vmul.f32 %v9208_v5, %v9448_v27 }
 0x5dd   :  { %5190 = vrot.lane.b32.xlu1 %v9285_v24, %s12173_s4  ;;  %v9440_v20 = vpop.permute.xlu0 %3769  ;;  %12267 = vst [vmem:[#allocation24_spill] sm:$0xff] %v9458_v12  ;;  %v3726_v18 = vmul.f32 %v9210_v21, %v9458_v12  ;;  %v9837_v19 = vmul.f32 %v9224_v26, %v9476_v57 }
 0x5df   :  { %v9450_v2 = vpop.permute.xlu1 %3775  ;;  %5188 = vrot.lane.b32.xlu0 %v9290_v44, %s12173_s4  ;;  %12342 = vst [vmem:[#allocation96_spill] sm:$0xff] %v9837_v19  ;;  %v3700_v19 = vrot.slane %v9417_v47, %v7589_v11 }
 0x5e0   :  { %v3790_v63 = vsel %vm12266_vm10, %v9430_v31, %v9450_v2  ;;  %vm12281_vm10 = vcmp.lt.s32.totalorder %v7583_v10, 1 }
 0x5e1   :  { %v9460_v51 = vmul.f32 %v3802_v52, %v3790_v63  ;;  %5269 = vrot.lane.b32.xlu1 %v9277_v22, %s12172_s29  ;;  %v9464_v30 = vpop.permute.xlu0 %3773 }
 0x5e2   :  { %v3789_v8 = vsel %vm12269_vm11, %v9440_v20, %v9464_v30  ;;  %vm12284_vm11 = vmmov %vm12281_vm10 }
 0x5e3   :  { %12268 = vst [vmem:[#allocation44_spill] sm:$0xff] %v9460_v51  ;;  %v3841_v63 = vmul.f32 %v9212_v59, %v9460_v51  ;;  %v9482_v43 = vmul.f32 %v3802_v52, %v3789_v8  ;;  %v9484_v4 = vpop.permute.xlu1 %3882  ;;  %5267 = vrot.lane.b32.xlu0 %v9280_v3, %s12172_s29  ;;  %v9502_v52 = vmul.f32 %v3653_v17, %v9103_v42  ;;  %v9528_v17 = vld [vmem:[%s11837_s1 + $0xc] sm:$0xf] }
 0x5e4   :  { %v4024_v34 = vrot.slane %v9528_v17, %v12262_v9 }
 0x5e5   :  { %12270 = vst [vmem:[#allocation45_spill] sm:$0xff] %v9482_v43  ;;  %v3849_v33 = vadd.f32 %v3841_v63, %v3730_v54  ;;  %v3837_v48 = vmul.f32 %v9214_v55, %v9482_v43  ;;  %3669 = vrot.lane.b32.xlu1 %v9476_v57, %s12254_s8  ;;  %v9499_v8 = vpop.permute.xlu0 %3880  ;;  %v9513_v54 = vmul.f32 %v3648_v6, %v9062_v39 }
 0x5e6   :  { %12272 = vst [vmem:[#allocation27_spill] sm:$0xff] %v9499_v8 }
 0x5e7   :  { %v3845_v32 = vadd.f32 %v3837_v48, %v3726_v18  ;;  %v9504_v38 = vpop.permute.xlu1 %3886  ;;  %3667 = vrot.lane.b32.xlu0 %v9491_v41, %s12254_s8  ;;  %12274 = vst [vmem:[#allocation25_spill] sm:$0xff] %v9513_v54 }
 0x5e8   :  { %v3901_v50 = vsel %vm12273_vm12, %v9484_v4, %v9504_v38 }
 0x5e9   :  { %v9515_v63 = vmul.f32 %v3913_v29, %v3901_v50  ;;  %3673 = vrot.lane.b32.xlu1 %v9502_v52, %s12254_s8  ;;  %v9519_v42 = vpop.permute.xlu0 %3884 }
 0x5ea   :  { %v3900_v48 = vsel %vm12276_vm9, %v9499_v8, %v9519_v42  ;;  %v9853_v8 = vmul.f32 %v9226_v28, %v9491_v41  ;;  %vm12349_vm9 = vcmp.lt.s32.totalorder %v7583_v10, 17 }
 0x5eb   :  { %12275 = vst [vmem:[#allocation28_spill] sm:$0xff] %v9515_v63  ;;  %v3952_v39 = vmul.f32 %v9216_v45, %v9515_v63  ;;  %v9532_v6 = vmul.f32 %v3913_v29, %v3900_v48  ;;  %v9534_v18 = vpop.permute.xlu1 %3993  ;;  %3671 = vrot.lane.b32.xlu0 %v9513_v54, %s12254_s8  ;;  %s12332_s8 = smov 97  }
 0x5ec   :  { %12278 = vst [vmem:[#allocation30_spill] sm:$0xff] %v9534_v18  ;;  %12345 = vst [vmem:[#allocation98_spill] sm:$0xff] %v9853_v8 }
 0x5ed   :  { %12277 = vst [vmem:[#allocation26_spill] sm:$0xff] %v9532_v6  ;;  %v3960_v50 = vadd.f32 %v3952_v39, %v3849_v33  ;;  %v3948_v61 = vmul.f32 %v9218_v16, %v9532_v6  ;;  %3779 = vrot.lane.b32.xlu1 %v9476_v57, %s12255_s23  ;;  %v9542_v25 = vpop.permute.xlu0 %3991 }
 0x5ee   :  { %12279 = vst [vmem:[#allocation32_spill] sm:$0xff] %v9542_v25 }
 0x5ef   :  { %v3956_v13 = vadd.f32 %v3948_v61, %v3845_v32  ;;  %v9546_v29 = vpop.permute.xlu1 %3997  ;;  %3777 = vrot.lane.b32.xlu0 %v9491_v41, %s12255_s23 }
 0x5f0   :  { %12280 = vst [vmem:[#allocation6_spill] sm:$0xff] %v9546_v29  ;;  %v4012_v33 = vsel %vm12281_vm10, %v9534_v18, %v9546_v29  ;;  %vm12350_vm10 = vmmov %vm12349_vm9 }
 0x5f1   :  { %v9554_v48 = vmul.f32 %v4024_v34, %v4012_v33  ;;  %3783 = vrot.lane.b32.xlu1 %v9502_v52, %s12255_s23  ;;  %v9558_v39 = vpop.permute.xlu0 %3995 }
 0x5f2   :  { %12283 = vst [vmem:[#allocation33_spill] sm:$0xff] %v9558_v39  ;;  %v4011_v61 = vsel %vm12284_vm11, %v9542_v25, %v9558_v39  ;;  %v4120_v39 = vmul.f32 %v9224_v26, %v9285_v24  ;;  %vm12354_vm11 = vcmp.lt.s32.totalorder %v7583_v10, 113 }
 0x5f3   :  { %12282 = vst [vmem:[#allocation31_spill] sm:$0xff] %v9554_v48  ;;  %v4063_v32 = vmul.f32 %v9220_v40, %v9554_v48  ;;  %v9566_v58 = vmul.f32 %v4024_v34, %v4011_v61  ;;  %v9568_v27 = vpop.permute.xlu1 %4161  ;;  %3781 = vrot.lane.b32.xlu0 %v9513_v54, %s12255_s23 }
 0x5f4   :  { %12286 = vst [vmem:[#allocation34_spill] sm:$0xff] %v9568_v27 }
 0x5f5   :  { %12285 = vst [vmem:[#allocation7_spill] sm:$0xff] %v9566_v58  ;;  %v9572_v33 = vadd.f32 %v4063_v32, %v3960_v50  ;;  %v4059_v12 = vmul.f32 %v9222_v7, %v9566_v58  ;;  %3890 = vrot.lane.b32.xlu1 %v9476_v57, %s12256_s5  ;;  %v9578_v51 = vpop.permute.xlu0 %4159 }
 0x5f6   :  { %12287 = vst [vmem:[#allocation5_spill] sm:$0xff] %v9578_v51 }
 0x5f7   :  { %v9580_v43 = vadd.f32 %v4059_v12, %v3956_v13  ;;  %v9582_v63 = vpop.permute.xlu1 %4165  ;;  %3888 = vrot.lane.b32.xlu0 %v9491_v41, %s12256_s5 }
 0x5f8   :  { %12288 = vst [vmem:[#allocation46_spill] sm:$0xff] %v9582_v63 }
 0x5f9   :  { %3894 = vrot.lane.b32.xlu1 %v9502_v52, %s12256_s5  ;;  %v9588_v34 = vpop.permute.xlu0 %4163 }
 0x5fa   :  { %12289 = vst [vmem:[#allocation47_spill] sm:$0xff] %v9588_v34 }
 0x5fb   :  { %v9590_v50 = vpop.permute.xlu1 %4272  ;;  %3892 = vrot.lane.b32.xlu0 %v9513_v54, %s12256_s5 }
 0x5fc   :  { %12290 = vst [vmem:[#allocation48_spill] sm:$0xff] %v9590_v50 }
 0x5fd   :  { %4001 = vrot.lane.b32.xlu1 %v9476_v57, %s12257_s19  ;;  %v9596_v13 = vpop.permute.xlu0 %4270 }
 0x5ff   :  { %v9598_v12 = vpop.permute.xlu1 %4276  ;;  %3999 = vrot.lane.b32.xlu0 %v9491_v41, %s12257_s19 }
 0x600   :  { %12291 = vst [vmem:[#allocation49_spill] sm:$0xff] %v9598_v12 }
 0x601   :  { %4005 = vrot.lane.b32.xlu1 %v9502_v52, %s12257_s19  ;;  %v9604_v61 = vpop.permute.xlu0 %4274 }
 0x603   :  { %v9606_v32 = vpop.permute.xlu1 %4383  ;;  %4003 = vrot.lane.b32.xlu0 %v9513_v54, %s12257_s19 }
 0x605   :  { %4169 = vrot.lane.b32.xlu1 %v9476_v57, %s12258_s9  ;;  %v9612_v6 = vpop.permute.xlu0 %4381 }
 0x606   :  { %12292 = vst [vmem:[#allocation50_spill] sm:$0xff] %v9612_v6 }
 0x607   :  { %v9614_v48 = vpop.permute.xlu1 %4387  ;;  %4167 = vrot.lane.b32.xlu0 %v9491_v41, %s12258_s9 }
 0x609   :  { %4173 = vrot.lane.b32.xlu1 %v9502_v52, %s12258_s9  ;;  %v9620_v58 = vpop.permute.xlu0 %4385 }
 0x60a   :  { %12293 = vst [vmem:[#allocation51_spill] sm:$0xff] %v9620_v58 }
 0x60b   :  { %v9622_v49 = vpop.permute.xlu1 %4494  ;;  %4171 = vrot.lane.b32.xlu0 %v9513_v54, %s12258_s9 }
 0x60c   :  { %12294 = vst [vmem:[#allocation52_spill] sm:$0xff] %v9622_v49 }
 0x60d   :  { %4280 = vrot.lane.b32.xlu1 %v9476_v57, %s12259_s0  ;;  %v9628_v53 = vpop.permute.xlu0 %4492 }
 0x60e   :  { %12295 = vst [vmem:[#allocation53_spill] sm:$0xff] %v9628_v53 }
 0x60f   :  { %v9630_v14 = vpop.permute.xlu1 %4498  ;;  %4278 = vrot.lane.b32.xlu0 %v9491_v41, %s12259_s0 }
 0x610   :  { %12296 = vst [vmem:[#allocation54_spill] sm:$0xff] %v9630_v14 }
 0x611   :  { %4284 = vrot.lane.b32.xlu1 %v9502_v52, %s12259_s0  ;;  %v9636_v25 = vpop.permute.xlu0 %4496 }
 0x612   :  { %12297 = vst [vmem:[#allocation55_spill] sm:$0xff] %v9636_v25 }
 0x613   :  { %v9638_v7 = vpop.permute.xlu1 %4605  ;;  %4282 = vrot.lane.b32.xlu0 %v9513_v54, %s12259_s0  ;;  %s12394_s0 = smov 95  }
 0x614   :  { %12298 = vst [vmem:[#allocation56_spill] sm:$0xff] %v9638_v7 }
 0x615   :  { %4391 = vrot.lane.b32.xlu1 %v9476_v57, %s12260_s26  ;;  %v9644_v49 = vpop.permute.xlu0 %4603 }
 0x616   :  { %12299 = vst [vmem:[#allocation57_spill] sm:$0xff] %v9644_v49 }
 0x617   :  { %v9646_v53 = vpop.permute.xlu1 %4609  ;;  %4389 = vrot.lane.b32.xlu0 %v9491_v41, %s12260_s26 }
 0x618   :  { %12300 = vst [vmem:[#allocation58_spill] sm:$0xff] %v9646_v53  ;;  %v6784_v53 = vld [vmem:[%s11843_s12 + $0x110] sm:$0xff] }
 0x619   :  { %4395 = vrot.lane.b32.xlu1 %v9502_v52, %s12260_s26  ;;  %v9652_v14 = vpop.permute.xlu0 %4607 }
 0x61a   :  { %12301 = vst [vmem:[#allocation59_spill] sm:$0xff] %v9652_v14 }
 0x61b   :  { %v9654_v25 = vpop.permute.xlu1 %4688  ;;  %4393 = vrot.lane.b32.xlu0 %v9513_v54, %s12260_s26 }
 0x61c   :  { %12302 = vst [vmem:[#allocation60_spill] sm:$0xff] %v9654_v25 }
 0x61d   :  { %4502 = vrot.lane.b32.xlu1 %v9476_v57, %s12261_s2  ;;  %v9660_v7 = vpop.permute.xlu0 %4686 }
 0x61e   :  { %12303 = vst [vmem:[#allocation61_spill] sm:$0xff] %v9660_v7 }
 0x61f   :  { %v9662_v49 = vpop.permute.xlu1 %4692  ;;  %5271 = vrot.lane.b32.xlu0 %v9290_v44, %s12172_s29 }
 0x620   :  { %12304 = vst [vmem:[#allocation62_spill] sm:$0xff] %v9662_v49 }
 0x621   :  { %4506 = vrot.lane.b32.xlu1 %v9502_v52, %s12261_s2  ;;  %v9671_v14 = vpop.permute.xlu0 %4690 }
 0x622   :  { %12305 = vst [vmem:[#allocation63_spill] sm:$0xff] %v9671_v14 }
 0x623   :  { %v9673_v25 = vpop.permute.xlu1 %4771  ;;  %5326 = vperm.xlu0 %7198, %v6784_v53   ;;  %v6787_v53 = vld [vmem:[%s11843_s12 + $0x120] sm:$0xff] }
 0x624   :  { %12306 = vst [vmem:[#allocation64_spill] sm:$0xff] %v9673_v25 }
 0x625   :  { %4613 = vrot.lane.b32.xlu1 %v9476_v57, %s7353_s16  ;;  %v9677_v7 = vpop.permute.xlu0 %4769 }
 0x626   :  { %12307 = vst [vmem:[#allocation65_spill] sm:$0xff] %v9677_v7 }
 0x627   :  { %v9679_v49 = vpop.permute.xlu1 %4775  ;;  %5350 = vrot.lane.b32.xlu0 %v9280_v3, %s7342_s24 }
 0x628   :  { %12308 = vst [vmem:[#allocation66_spill] sm:$0xff] %v9679_v49 }
 0x629   :  { %4617 = vrot.lane.b32.xlu1 %v9502_v52, %s7353_s16  ;;  %v9685_v18 = vpop.permute.xlu0 %4773 }
 0x62a   :  { %12309 = vst [vmem:[#allocation67_spill] sm:$0xff] %v9685_v18 }
 0x62b   :  { %v9687_v40 = vpop.permute.xlu1 %4854  ;;  %5354 = vrot.lane.b32.xlu0 %v9290_v44, %s7342_s24 }
 0x62c   :  { %12310 = vst [vmem:[#allocation68_spill] sm:$0xff] %v9687_v40 }
 0x62d   :  { %4696 = vrot.lane.b32.xlu1 %v9476_v57, %s7352_s25  ;;  %v9696_v7 = vpop.permute.xlu0 %4852 }
 0x62e   :  { %12311 = vst [vmem:[#allocation69_spill] sm:$0xff] %v9696_v7 }
 0x62f   :  { %v9698_v14 = vpop.permute.xlu1 %4858  ;;  %5409 = vperm.xlu0 %7198, %v6787_v53  }
 0x630   :  { %12312 = vst [vmem:[#allocation70_spill] sm:$0xff] %v9698_v14 }
 0x631   :  { %4700 = vrot.lane.b32.xlu1 %v9502_v52, %s7352_s25  ;;  %v9702_v18 = vpop.permute.xlu0 %4856 }
 0x632   :  { %12313 = vst [vmem:[#allocation71_spill] sm:$0xff] %v9702_v18 }
 0x633   :  { %v9704_v40 = vpop.permute.xlu1 %4937  ;;  %5433 = vrot.lane.b32.xlu0 %v9280_v3, %s7341_s27 }
 0x634   :  { %12314 = vst [vmem:[#allocation72_spill] sm:$0xff] %v9704_v40  ;;  %v6790_v40 = vld [vmem:[%s11843_s12 + $0x130] sm:$0xff] }
 0x635   :  { %4779 = vrot.lane.b32.xlu1 %v9476_v57, %s7350_s18  ;;  %v9710_v25 = vpop.permute.xlu0 %4935 }
 0x636   :  { %12315 = vst [vmem:[#allocation73_spill] sm:$0xff] %v9710_v25 }
 0x637   :  { %v9712_v49 = vpop.permute.xlu1 %4941  ;;  %4500 = vrot.lane.b32.xlu0 %v9491_v41, %s12261_s2 }
 0x638   :  { %12316 = vst [vmem:[#allocation74_spill] sm:$0xff] %v9712_v49 }
 0x639   :  { %4783 = vrot.lane.b32.xlu1 %v9502_v52, %s7350_s18  ;;  %v9718_v53 = vpop.permute.xlu0 %4939 }
 0x63a   :  { %12317 = vst [vmem:[#allocation75_spill] sm:$0xff] %v9718_v53 }
 0x63b   :  { %v9720_v7 = vpop.permute.xlu1 %5020  ;;  %4504 = vrot.lane.b32.xlu0 %v9513_v54, %s12261_s2 }
 0x63c   :  { %12318 = vst [vmem:[#allocation76_spill] sm:$0xff] %v9720_v7  ;;  %v7206_v7 = vld [vmem:[%s11847_s10 + $0x4] ss:$8 sps:$4 sm:$0xff]  }
 0x63d   :  { %4862 = vrot.lane.b32.xlu1 %v9476_v57, %s7349_s20  ;;  %v9726_v18 = vpop.permute.xlu0 %5018  ;;  %6845 = vmatprep.mubr.msk.bf16.mxu0 %vm2330_vm1, %v7206_v7 }
 0x63e   :  { %12319 = vst [vmem:[#allocation77_spill] sm:$0xff] %v9726_v18  ;;  %6846 = vmatprep.mubr.msk.bf16.mxu1 %vm2330_vm1, %v7206_v7  ;;  %v6793_v7 = vld [vmem:[%s11843_s12 + $0x140] sm:$0xff]  ;;  %vm12338_vm1 = vcmp.lt.s32.totalorder %v7583_v10, 127 }
 0x63f   :  { %v9728_v25 = vpop.permute.xlu1 %5024  ;;  %5437 = vrot.lane.b32.xlu0 %v9290_v44, %s7341_s27  ;;  %v4180_v6 = vsel %vm12338_vm1, %v9568_v27, %v9582_v63  ;;  %v6796_v63 = vld [vmem:[%s11843_s12 + $0x150] sm:$0xff]  ;;  %vm12344_vm12 = vmmov %vm12338_vm1 }
 0x640   :  { %12320 = vst [vmem:[#allocation78_spill] sm:$0xff] %v9728_v25  ;;  %vm12357_vm1 = vmmov %vm12349_vm9 }
 0x641   :  { %4866 = vrot.lane.b32.xlu1 %v9502_v52, %s7349_s20  ;;  %v9737_v53 = vpop.permute.xlu0 %5022 }
 0x642   :  { %12321 = vst [vmem:[#allocation79_spill] sm:$0xff] %v9737_v53 }
 0x643   :  { %v9742_v49 = vpop.permute.xlu1 %5103  ;;  %5492 = vperm.xlu0 %7198, %v6790_v40  }
 0x644   :  { %12322 = vst [vmem:[#allocation80_spill] sm:$0xff] %v9742_v49 }
 0x645   :  { %4945 = vrot.lane.b32.xlu1 %v9476_v57, %s7348_s15  ;;  %v9748_v18 = vpop.permute.xlu0 %5101 }
 0x646   :  { %12323 = vst [vmem:[#allocation81_spill] sm:$0xff] %v9748_v18 }
 0x647   :  { %v9750_v25 = vpop.permute.xlu1 %5107  ;;  %5516 = vrot.lane.b32.xlu0 %v9280_v3, %s12325_s22 }
 0x648   :  { %12324 = vst [vmem:[#allocation82_spill] sm:$0xff] %v9750_v25 }
 0x649   :  { %4949 = vrot.lane.b32.xlu1 %v9502_v52, %s7348_s15  ;;  %v9756_v53 = vpop.permute.xlu0 %5105 }
 0x64a   :  { %12326 = vst [vmem:[#allocation83_spill] sm:$0xff] %v9756_v53 }
 0x64b   :  { %v9758_v40 = vpop.permute.xlu1 %5186  ;;  %5520 = vrot.lane.b32.xlu0 %v9290_v44, %s12325_s22 }
 0x64c   :  { %12327 = vst [vmem:[#allocation84_spill] sm:$0xff] %v9758_v40  ;;  %v6731_v40 = vld [vmem:[%s11837_s1 + $0x14] sm:$0xf] }
 0x64d   :  { %5028 = vrot.lane.b32.xlu1 %v9476_v57, %s7347_s30  ;;  %v9767_v18 = vpop.permute.xlu0 %5184 }
 0x64e   :  { %12328 = vst [vmem:[#allocation85_spill] sm:$0xff] %v9767_v18  ;;  %v9785_v18 = vld [vmem:[%s11837_s1 + $0x18] sm:$0xf] }
 0x64f   :  { %v9769_v49 = vpop.permute.xlu1 %5190  ;;  %5575 = vperm.xlu0 %7198, %v6793_v7   ;;  %v9790_v7 = vld [vmem:[%s11837_s1 + $0x1c] sm:$0xf] }
 0x650   :  { %12329 = vst [vmem:[#allocation86_spill] sm:$0xff] %v9769_v49  ;;  %12333 = vst [vmem:[#allocation89_spill] sm:$0xff] %v9790_v7  ;;  %v12336_v49 = vld [vmem:[#allocation4_spill] sm:$0xff] }
 0x651   :  { %5032 = vrot.lane.b32.xlu1 %v9502_v52, %s7347_s30  ;;  %v9773_v53 = vpop.permute.xlu0 %5188  ;;  %v4188_v14 = vrot.slane %v6731_v40, %v12336_v49  ;;  %v9814_v58 = vrot.slane %v9785_v18, %v12336_v49  ;;  %v9826_v22 = vrot.slane %v9790_v7, %v12336_v49  ;;  %v4179_v7 = vsel %vm12344_vm12, %v9578_v51, %v9588_v34 }
 0x652   :  { %12330 = vst [vmem:[#allocation87_spill] sm:$0xff] %v9773_v53  ;;  %v9795_v53 = vld [vmem:[%s11837_s1 + $0x20] sm:$0xf]  ;;  %v3688_v51 = vrot.slane %v9417_v47, %v12336_v49  ;;  %v3806_v34 = vrot.slane %v9426_v35, %v7599_v15  ;;  %v3798_v41 = vrot.slane %v9426_v35, %v12336_v49  ;;  %vm12359_vm12 = vcmp.lt.s32.totalorder %v7583_v10, 16 }
 0x653   :  { %v9778_v25 = vpop.permute.xlu1 %5269  ;;  %5599 = vrot.lane.b32.xlu0 %v9280_v3, %s12332_s8  ;;  %12334 = vst [vmem:[#allocation90_spill] sm:$0xff] %v9795_v53  ;;  %12340 = vst [vmem:[#allocation94_spill] sm:$0xff] %v9826_v22  ;;  %v9830_v27 = vrot.slane %v9795_v53, %v12336_v49  ;;  %v3696_v53 = vrot.slane %v9417_v47, %v7599_v15  ;;  %v9879_v47 = vmul.f32 %v4188_v14, %v4179_v7 }
 0x654   :  { %12331 = vst [vmem:[#allocation88_spill] sm:$0xff] %v9778_v25  ;;  %v9899_v7 = vrot.slane %v9528_v17, %v12336_v49 }
 0x655   :  { %5111 = vrot.lane.b32.xlu1 %v9476_v57, %s7346_s17  ;;  %v9799_v25 = vpop.permute.xlu0 %5267  ;;  %12341 = vst [vmem:[#allocation95_spill] sm:$0xff] %v9830_v27  ;;  %12348 = vst [vmem:[#allocation101_spill] sm:$0xff] %v9879_v47 }
 0x656   :  { %12335 = vst [vmem:[#allocation91_spill] sm:$0xff] %v9799_v25  ;;  %v9820_v25 = vmul.f32 %v9226_v28, %v9280_v3 }
 0x657   :  { %v3670_v29 = vpop.permute.xlu1 %3669  ;;  %5603 = vrot.lane.b32.xlu0 %v9290_v44, %s12332_s8 }
 0x658   :  { %12339 = vst [vmem:[#allocation93_spill] sm:$0xff] %v9820_v25  ;;  %v9841_v25 = vmul.f32 %v9224_v26, %v9502_v52  ;;  %v9857_v26 = vmul.f32 %v9226_v28, %v9513_v54  ;;  %v3810_v28 = vrot.slane %v9426_v35, %v7589_v11  ;;  %v9877_v54 = vrot.slane %v9469_v0, %v12336_v49 }
 0x659   :  { %5115 = vrot.lane.b32.xlu1 %v9502_v52, %s7346_s17  ;;  %v3668_v27 = vpop.permute.xlu0 %3667  ;;  %v9889_v35 = vrot.slane %v9469_v0, %v7589_v11  ;;  %v9920_v49 = vadd.f32 %v4116_v62, %v9580_v43  ;;  %v9942_v43 = vrot.slane %v6731_v40, %v7589_v11 }
 0x65a   :  { %12343 = vst [vmem:[#allocation97_spill] sm:$0xff] %v9841_v25  ;;  %12346 = vst [vmem:[#allocation99_spill] sm:$0xff] %v9857_v26  ;;  %v9859_v25 = vmul.f32 %v4188_v14, %v4180_v6  ;;  %v9873_v6 = vrot.slane %v9469_v0, %v7599_v15  ;;  %v3677_v26 = vsel %vm12350_vm10, %v9421_v56, %v3668_v27 }
 0x65b   :  { %v3674_v22 = vpop.permute.xlu1 %3673  ;;  %5658 = vperm.xlu0 %7198, %v6796_v63   ;;  %v3678_v63 = vsel %vm12349_vm9, %v9410_v36, %v3670_v29  ;;  %12351 = vst [vmem:[#allocation102_spill] sm:$0xff] %v9889_v35  ;;  %v9895_v14 = vrot.slane %v9528_v17, %v7599_v15  ;;  %v9903_v36 = vrot.slane %v9528_v17, %v7589_v11  ;;  %vm12362_vm9 = vmmov %vm12357_vm1 }
 0x65c   :  { %12347 = vst [vmem:[#allocation100_spill] sm:$0xff] %v9859_v25  ;;  %v9906_v56 = vadd.f32 %v4120_v39, %v9572_v33  ;;  %v9910_v0 = vmul.f32 %v9228_v23, %v9859_v25  ;;  %v9917_v35 = vrot.slane %v6731_v40, %v12262_v9  ;;  %v9922_v17 = vmul.f32 %v3696_v53, %v3678_v63  ;;  %vm12363_vm10 = vmmov %vm12357_vm1 }
 0x65d   :  { %5194 = vrot.lane.b32.xlu1 %v9476_v57, %s12173_s4  ;;  %v3672_v8 = vpop.permute.xlu0 %3671  ;;  %12352 = vst [vmem:[#allocation103_spill] sm:$0xff] %v9895_v14  ;;  %12353 = vst [vmem:[#allocation104_spill] sm:$0xff] %v9903_v36  ;;  %v4291_v14 = vsel %vm12354_vm11, %v9590_v50, %v9598_v12  ;;  %v9924_v36 = vmul.f32 %v3696_v53, %v3677_v26  ;;  %v3682_v39 = vsel %vm12357_vm1, %v3674_v22, %v9402_v1 }
 0x65e   :  { %12355 = vst [vmem:[#allocation105_spill] sm:$0xff] %v9922_v17  ;;  %v9932_v25 = vrot.slane %v6731_v40, %v7599_v15  ;;  %v9936_v50 = vmul.f32 %v9230_v37, %v9879_v47  ;;  %v9946_v1 = vrot.slane %v9785_v18, %v12262_v9  ;;  %v9949_v53 = vmul.f32 %v9814_v58, %v4291_v14 }
 0x65f   :  { %12356 = vst [vmem:[#allocation106_spill] sm:$0xff] %v9924_v36  ;;  %v3780_v33 = vpop.permute.xlu1 %3779  ;;  %5682 = vrot.lane.b32.xlu0 %v9280_v3, %s12358_s7  ;;  %v3676_v26 = vsel %vm12362_vm9, %v3670_v29, %v3674_v22  ;;  %v3681_v63 = vsel %vm12363_vm10, %v3672_v8, %v9408_v60  ;;  %v4290_v40 = vsel %vm12354_vm11, %v9596_v13, %v9604_v61  ;;  %vm12369_vm9 = vmmov %vm12359_vm12 }
 0x660   :  { %v3788_v62 = vsel %vm12359_vm12, %v9450_v2, %v3780_v33  ;;  %12360 = vst [vmem:[#allocation107_spill] sm:$0xff] %v9946_v1  ;;  %12361 = vst [vmem:[#allocation108_spill] sm:$0xff] %v9949_v53  ;;  %v9964_v14 = vmul.f32 %v3688_v51, %v3682_v39  ;;  %v3675_v22 = vsel %vm12357_vm1, %v3668_v27, %v3672_v8 }
 0x661   :  { %v9956_v47 = vmul.f32 %v3806_v34, %v3788_v62  ;;  %5198 = vrot.lane.b32.xlu1 %v9502_v52, %s12173_s4  ;;  %v3778_v2 = vpop.permute.xlu0 %3777  ;;  %v3731_v29 = vmul.f32 %v9208_v5, %v9922_v17  ;;  %v3727_v62 = vmul.f32 %v9210_v21, %v9924_v36  ;;  %v9981_v27 = vmul.f32 %v3700_v19, %v3676_v26  ;;  %vm12370_vm10 = vmmov %vm12369_vm9 }
 0x662   :  { %12365 = vst [vmem:[#allocation110_spill] sm:$0xff] %v9964_v14  ;;  %v3787_v60 = vsel %vm12359_vm12, %v9464_v30, %v3778_v2  ;;  %v9983_v8 = vmul.f32 %v3688_v51, %v3681_v63  ;;  %vm12374_vm11 = vmmov %vm12369_vm9  ;;  %vm12378_vm12 = vcmp.lt.s32.totalorder %v7583_v10, 15 }
 0x663   :  { %12364 = vst [vmem:[#allocation109_spill] sm:$0xff] %v9956_v47  ;;  %v3842_v1 = vmul.f32 %v9212_v59, %v9956_v47  ;;  %v9977_v12 = vmul.f32 %v3806_v34, %v3787_v60  ;;  %v3784_v39 = vpop.permute.xlu1 %3783  ;;  %5686 = vrot.lane.b32.xlu0 %v9290_v44, %s12358_s7  ;;  %12367 = vst [vmem:[#allocation112_spill] sm:$0xff] %v9981_v27  ;;  %v6800_v34 = vld [vmem:[%s11843_s12 + $0x168] sm:$0xff]  ;;  %v9993_v60 = vmul.f32 %v3700_v19, %v3675_v22 }
 0x664   :  { %12368 = vst [vmem:[#allocation113_spill] sm:$0xff] %v9983_v8  ;;  %v3786_v30 = vsel %vm12369_vm9, %v3780_v33, %v3784_v39  ;;  %v3792_v17 = vsel %vm12370_vm10, %v3784_v39, %v9430_v31  ;;  %v3729_v33 = vmul.f32 %v9208_v5, %v9964_v14  ;;  %vm12375_vm1 = vmmov %vm12369_vm9  ;;  %vm12381_vm10 = vcmp.lt.s32.totalorder %v7583_v10, 112 }
 0x665   :  { %12366 = vst [vmem:[#allocation111_spill] sm:$0xff] %v9977_v12  ;;  %12371 = vst [vmem:[#allocation114_spill] sm:$0xff] %v9993_v60  ;;  %v3850_v36 = vadd.f32 %v3842_v1, %v3731_v29  ;;  %v3838_v26 = vmul.f32 %v9214_v55, %v9977_v12  ;;  %v9997_v47 = vmul.f32 %v3798_v41, %v3792_v17  ;;  %5273 = vrot.lane.b32.xlu1 %v9285_v24, %s12172_s29  ;;  %v3782_v51 = vpop.permute.xlu0 %3781 }
 0x666   :  { %v10003_v31 = vmul.f32 %v3810_v28, %v3786_v30  ;;  %v3785_v63 = vsel %vm12374_vm11, %v3778_v2, %v3782_v51  ;;  %v3791_v19 = vsel %vm12375_vm1, %v3782_v51, %v9440_v20  ;;  %v3732_v30 = vmul.f32 %v9208_v5, %v9981_v27  ;;  %vm12380_vm9 = vmmov %vm12378_vm12 }
 0x667   :  { %12372 = vst [vmem:[#allocation115_spill] sm:$0xff] %v9997_v47  ;;  %v3846_v1 = vadd.f32 %v3838_v26, %v3727_v62  ;;  %v3840_v17 = vmul.f32 %v9212_v59, %v9997_v47  ;;  %v10012_v22 = vmul.f32 %v3798_v41, %v3791_v19  ;;  %v10014_v29 = vmul.f32 %v3810_v28, %v3785_v63  ;;  %v3891_v39 = vpop.permute.xlu1 %3890  ;;  %v6802_v41 = vld [vmem:[%s11843_s12 + $0x170] sm:$0xff]  ;;  %vm12384_vm11 = vmmov %vm12380_vm9  ;;  %v12410_v47 = vld [vmem:[#allocation8_spill] sm:$0xff] }
 0x668   :  { %12373 = vst [vmem:[#allocation116_spill] sm:$0xff] %v10003_v31  ;;  %5746 = vperm.xlu0 %7198, %v6800_v34   ;;  %v3725_v2 = vmul.f32 %v9210_v21, %v9983_v8  ;;  %v3843_v12 = vmul.f32 %v9212_v59, %v10003_v31  ;;  %v3899_v20 = vsel %vm12378_vm12, %v9504_v38, %v3891_v39  ;;  %vm12385_vm1 = vmmov %vm12380_vm9 }
 0x669   :  { %12376 = vst [vmem:[#allocation117_spill] sm:$0xff] %v10012_v22  ;;  %12377 = vst [vmem:[#allocation118_spill] sm:$0xff] %v10014_v29  ;;  %v3728_v28 = vmul.f32 %v9210_v21, %v9993_v60  ;;  %v3848_v62 = vadd.f32 %v3840_v17, %v3729_v33  ;;  %v3836_v5 = vmul.f32 %v9214_v55, %v10012_v22  ;;  %5277 = vrot.lane.b32.xlu1 %v9476_v57, %s12172_s29  ;;  %v3889_v59 = vpop.permute.xlu0 %3888 }
 0x66a   :  { %v3839_v34 = vmul.f32 %v9214_v55, %v10014_v29  ;;  %v10038_v38 = vmul.f32 %v9232_v46, %v9949_v53  ;;  %v3851_v26 = vadd.f32 %v3843_v12, %v3732_v30  ;;  %v10041_v51 = vmul.f32 %v9873_v6, %v3899_v20  ;;  %vm12390_vm12 = vmmov %vm12385_vm1 }
 0x66b   :  { %v3898_v21 = vsel %vm12380_vm9, %v9519_v42, %v3889_v59  ;;  %v4402_v55 = vsel %vm12381_vm10, %v9606_v32, %v9614_v48  ;;  %v3844_v33 = vadd.f32 %v3836_v5, %v3725_v2  ;;  %v3895_v17 = vpop.permute.xlu1 %3894  ;;  %v10054_v12 = vmul.f32 %v9814_v58, %v4290_v40  ;;  %vm12392_vm9 = vmmov %vm12385_vm1 }
 0x66c   :  { %12379 = vst [vmem:[#allocation119_spill] sm:$0xff] %v10041_v51  ;;  %v3847_v63 = vadd.f32 %v3839_v34, %v3728_v28  ;;  %v10051_v19 = vmul.f32 %v9873_v6, %v3898_v21  ;;  %5824 = vperm.xlu0 %7198, %v6802_v41   ;;  %v3953_v30 = vmul.f32 %v9216_v45, %v10041_v51  ;;  %v12387_v41 = vld [vmem:[#allocation102_spill] sm:$0xff]  ;;  %v12391_v21 = vld [vmem:[#allocation27_spill] sm:$0xff]  ;;  %vm12399_vm10 = vcmp.lt.s32.totalorder %v7583_v10, 1  ;;  %v12405_v51 = vld [vmem:[#allocation33_spill] sm:$0xff] }
 0x66d   :  { %12383 = vst [vmem:[#allocation121_spill] sm:$0xff] %v10054_v12  ;;  %v3897_v42 = vsel %vm12384_vm11, %v3891_v39, %v3895_v17  ;;  %v3903_v20 = vsel %vm12385_vm1, %v3895_v17, %v9484_v4  ;;  %5281 = vrot.lane.b32.xlu1 %v9502_v52, %s12172_s29  ;;  %v3893_v58 = vpop.permute.xlu0 %3892  ;;  %v10075_v40 = vrot.slane %v9785_v18, %v7599_v15  ;;  %v12389_v39 = vld [vmem:[#allocation94_spill] sm:$0xff]  ;;  %vm12402_vm11 = vcmp.lt.s32.totalorder %v7583_v10, 112  ;;  %vm12406_vm1 = vmmov %vm12399_vm10 }
 0x66e   :  { %12382 = vst [vmem:[#allocation120_spill] sm:$0xff] %v10051_v19  ;;  %v3949_v2 = vmul.f32 %v9218_v16, %v10051_v19  ;;  %v10066_v6 = vmul.f32 %v9877_v54, %v3903_v20  ;;  %v10069_v28 = vmul.f32 %v12387_v41, %v3897_v42  ;;  %v10078_v5 = vmul.f32 %v12389_v39, %v4402_v55  ;;  %v6785_v42 = vld [vmem:[%s11843_s12 + $0x118] sm:$0xff] }
 0x66f   :  { %v3961_v4 = vadd.f32 %v3953_v30, %v3850_v36  ;;  %v3896_v34 = vsel %vm12390_vm12, %v3889_v59, %v3893_v58  ;;  %v3902_v17 = vsel %vm12392_vm9, %v3893_v58, %v12391_v21  ;;  %v4002_v30 = vpop.permute.xlu1 %4001  ;;  %v12395_v59 = vld [vmem:[#allocation35_spill] sm:$0xff]  ;;  %vm12411_vm12 = vmmov %vm12406_vm1 }
 0x670   :  { %12386 = vst [vmem:[#allocation122_spill] sm:$0xff] %v10066_v6  ;;  %12388 = vst [vmem:[#allocation102_spill] sm:$0xff] %v10069_v28  ;;  %v3957_v20 = vadd.f32 %v3949_v2, %v3846_v1  ;;  %v3951_v27 = vmul.f32 %v9216_v45, %v10066_v6  ;;  %v3954_v55 = vmul.f32 %v9216_v45, %v10069_v28  ;;  %5765 = vrot.lane.b32.xlu0 %v9280_v3, %s12394_s0  ;;  %v12398_v1 = vld [vmem:[#allocation6_spill] sm:$0xff]  ;;  %v12420_v6 = vld [vmem:[#allocation52_spill] sm:$0xff] }
 0x671   :  { %v10093_v36 = vmul.f32 %v9877_v54, %v3902_v17  ;;  %v10099_v58 = vmul.f32 %v12395_v59, %v10054_v12  ;;  %v10102_v21 = vmul.f32 %v12387_v41, %v3896_v34  ;;  %v4010_v2 = vsel %vm12399_vm10, %v12398_v1, %v4002_v30  ;;  %5331 = vperm.xlu1 %7199, %v6785_v42   ;;  %v4000_v8 = vpop.permute.xlu0 %3999  ;;  %v12400_v41 = vld [vmem:[#allocation51_spill] sm:$0xff]  ;;  %v12401_v34 = vld [vmem:[#allocation50_spill] sm:$0xff]  ;;  %vm12413_vm9 = vmmov %vm12406_vm1 }
 0x672   :  { %v10109_v45 = vrot.slane %v9785_v18, %v7589_v11  ;;  %v3959_v17 = vadd.f32 %v3951_v27, %v3848_v62  ;;  %v3962_v60 = vadd.f32 %v3954_v55, %v3851_v26  ;;  %v4401_v31 = vsel %vm12402_vm11, %v12401_v34, %v12400_v41  ;;  %v12403_v18 = vld [vmem:[#allocation103_spill] sm:$0xff]  ;;  %v12407_v62 = vld [vmem:[#allocation10_spill] sm:$0xff]  ;;  %vm12422_vm11 = vmmov %vm12406_vm1 }
 0x673   :  { %12393 = vst [vmem:[#allocation94_spill] sm:$0xff] %v10093_v36  ;;  %12396 = vst [vmem:[#allocation27_spill] sm:$0xff] %v10099_v58  ;;  %v3947_v14 = vmul.f32 %v9218_v16, %v10093_v36  ;;  %v3950_v1 = vmul.f32 %v9218_v16, %v10102_v21  ;;  %v10122_v29 = vmul.f32 %v12403_v18, %v4010_v2  ;;  %v4006_v54 = vpop.permute.xlu1 %4005  ;;  %v12409_v16 = vld [vmem:[#allocation89_spill] sm:$0xff]  ;;  %v12412_v28 = vld [vmem:[#allocation30_spill] sm:$0xff]  ;;  %vm12421_vm10 = vcmp.lt.s32.totalorder %v7583_v10, 111 }
 0x674   :  { %12397 = vst [vmem:[#allocation35_spill] sm:$0xff] %v10102_v21  ;;  %v4009_v27 = vsel %vm12406_vm1, %v12405_v51, %v4000_v8  ;;  %v10129_v26 = vmul.f32 %v12407_v62, %v10078_v5  ;;  %5769 = vrot.lane.b32.xlu0 %v9290_v44, %s12394_s0  ;;  %v10138_v2 = vrot.slane %v12409_v16, %v12262_v9  ;;  %v12416_v21 = vld [vmem:[#allocation104_spill] sm:$0xff] }
 0x675   :  { %12404 = vst [vmem:[#allocation6_spill] sm:$0xff] %v10122_v29  ;;  %v3955_v42 = vadd.f32 %v3947_v14, %v3844_v33  ;;  %v10132_v55 = vmul.f32 %v12403_v18, %v4009_v27  ;;  %v3958_v19 = vadd.f32 %v3950_v1, %v3847_v63  ;;  %v4064_v51 = vmul.f32 %v12410_v47, %v10122_v29  ;;  %v6805_v33 = vld [vmem:[%s11843_s12 + $0x180] sm:$0xff]  ;;  %v12414_v27 = vld [vmem:[#allocation9_spill] sm:$0xff] }
 0x676   :  { %v4008_v22 = vsel %vm12411_vm12, %v4002_v30, %v4006_v54  ;;  %v4014_v14 = vsel %vm12413_vm9, %v4006_v54, %v12412_v28  ;;  %v10151_v18 = vmul.f32 %v12389_v39, %v4401_v31  ;;  %v12418_v30 = vld [vmem:[#allocation21_spill] sm:$0xff]  ;;  %v4004_v28 = vpop.permute.xlu0 %4003  ;;  %v12419_v54 = vld [vmem:[#allocation54_spill] sm:$0xff]  ;;  %vm12427_vm12 = vcmp.lt.s32.totalorder %v7583_v10, 127  ;;  %vm12432_vm9 = vmmov %vm12421_vm10 }
 0x677   :  { %12408 = vst [vmem:[#allocation51_spill] sm:$0xff] %v10132_v55  ;;  %v4060_v63 = vmul.f32 %v12414_v27, %v10132_v55  ;;  %v10156_v1 = vmul.f32 %v9899_v7, %v4014_v14  ;;  %v10159_v29 = vmul.f32 %v12416_v21, %v4008_v22  ;;  %5352 = vrot.lane.b32.xlu1 %v12418_v30, %s7342_s24  ;;  %v12423_v55 = vld [vmem:[#allocation32_spill] sm:$0xff]  ;;  %v4170_v34 = vpop.permute.xlu1 %4169 }
 0x678   :  { %v4513_v36 = vsel %vm12421_vm10, %v12420_v6, %v12419_v54  ;;  %v4072_v31 = vadd.f32 %v4064_v51, %v3961_v4  ;;  %v4007_v39 = vsel %vm12422_vm11, %v4000_v8, %v4004_v28  ;;  %v4013_v14 = vsel %vm12406_vm1, %v4004_v28, %v12423_v55  ;;  %5907 = vperm.xlu0 %7198, %v6805_v33   ;;  %v12426_v8 = vld [vmem:[#allocation46_spill] sm:$0xff]  ;;  %vm12434_vm10 = vmmov %vm12427_vm12 }
 0x679   :  { %12415 = vst [vmem:[#allocation103_spill] sm:$0xff] %v10156_v1  ;;  %12417 = vst [vmem:[#allocation33_spill] sm:$0xff] %v10159_v29  ;;  %v4068_v12 = vadd.f32 %v4060_v63, %v3957_v20  ;;  %v4062_v22 = vmul.f32 %v12410_v47, %v10156_v1  ;;  %v4065_v53 = vmul.f32 %v12410_v47, %v10159_v29  ;;  %v12428_v47 = vld [vmem:[#allocation95_spill] sm:$0xff] }
 0x67a   :  { %v10177_v58 = vmul.f32 %v9899_v7, %v4013_v14  ;;  %v10180_v4 = vmul.f32 %v12416_v21, %v4007_v39  ;;  %v4178_v51 = vsel %vm12427_vm12, %v12426_v8, %v4170_v34  ;;  %v10187_v20 = vrot.slane %v12409_v16, %v7599_v15  ;;  %v4168_v28 = vpop.permute.xlu0 %4167  ;;  %v12430_v39 = vld [vmem:[#allocation55_spill] sm:$0xff]  ;;  %v12431_v14 = vld [vmem:[#allocation53_spill] sm:$0xff]  ;;  %vm12437_vm11 = vmmov %vm12434_vm10 }
 0x67b   :  { %v10191_v55 = vrot.slane %v12409_v16, %v7589_v11  ;;  %v10194_v7 = vmul.f32 %v12428_v47, %v4513_v36  ;;  %v4070_v63 = vadd.f32 %v4062_v22, %v3959_v17  ;;  %v4073_v33 = vadd.f32 %v4065_v53, %v3962_v60  ;;  %5356 = vrot.lane.b32.xlu1 %v9285_v24, %s7342_s24  ;;  %v12433_v53 = vld [vmem:[#allocation47_spill] sm:$0xff]  ;;  %v12435_v17 = vld [vmem:[#allocation92_spill] sm:$0xff]  ;;  %vm12439_vm1 = vmmov %vm12434_vm10 }
 0x67c   :  { %12424 = vst [vmem:[#allocation10_spill] sm:$0xff] %v10177_v58  ;;  %12425 = vst [vmem:[#allocation89_spill] sm:$0xff] %v10180_v4  ;;  %v4058_v21 = vmul.f32 %v12414_v27, %v10177_v58  ;;  %v10204_v8 = vsel %vm12432_vm9, %v12431_v14, %v12430_v39  ;;  %v4061_v16 = vmul.f32 %v12414_v27, %v10180_v4  ;;  %v12436_v58 = vld [vmem:[#allocation96_spill] sm:$0xff]  ;;  %v4174_v14 = vpop.permute.xlu1 %4173  ;;  %5848 = vrot.lane.b32.xlu0 %v9280_v3, %s12174_s21 }
 0x67d   :  { %12429 = vst [vmem:[#allocation8_spill] sm:$0xff] %v10194_v7  ;;  %v10209_v36 = vmul.f32 %v9917_v35, %v4178_v51  ;;  %v4177_v60 = vsel %vm12434_vm10, %v12433_v53, %v4168_v28  ;;  %v4127_v22 = vadd.f32 %v12435_v17, %v4070_v63  ;;  %v4129_v6 = vadd.f32 %v12436_v58, %v4072_v31  ;;  %v12438_v53 = vld [vmem:[#allocation34_spill] sm:$0xff]  ;;  %v12440_v63 = vld [vmem:[#allocation93_spill] sm:$0xff]  ;;  %vm12443_vm12 = vmmov %vm12439_vm1 }
 0x67e   :  { %v4066_v29 = vadd.f32 %v4058_v21, %v3955_v42  ;;  %v10216_v1 = vmul.f32 %v9917_v35, %v4177_v60  ;;  %v4069_v27 = vadd.f32 %v4061_v16, %v3958_v19  ;;  %v4176_v39 = vsel %vm12437_vm11, %v4170_v34, %v4174_v14  ;;  %v4172_v19 = vpop.permute.xlu0 %4171  ;;  %v12442_v16 = vld [vmem:[#allocation97_spill] sm:$0xff]  ;;  %vm12445_vm9 = vmmov %vm12439_vm1 }
 0x67f   :  { %v4231_v51 = vmul.f32 %v9228_v23, %v10209_v36  ;;  %v4182_v42 = vsel %vm12439_vm1, %v4174_v14, %v12438_v53  ;;  %v4238_v35 = vadd.f32 %v9910_v0, %v4127_v22  ;;  %v10233_v31 = vmul.f32 %v9932_v25, %v4176_v39  ;;  %5360 = vrot.lane.b32.xlu1 %v9476_v57, %s7342_s24  ;;  %v12444_v22 = vld [vmem:[#allocation5_spill] sm:$0xff] }
 0x680   :  { %v4123_v21 = vadd.f32 %v12440_v63, %v4066_v29  ;;  %v4227_v58 = vmul.f32 %v9230_v37, %v10216_v1  ;;  %v4130_v60 = vadd.f32 %v12442_v16, %v4073_v33  ;;  %v10240_v14 = vmul.f32 %v9942_v43, %v4182_v42  ;;  %5852 = vrot.lane.b32.xlu0 %v9290_v44, %s12174_s21  ;;  %v5969_v42 = vld [vmem:[%s11848_s11] sm:$0xff] }
 0x681   :  { %12441 = vst [vmem:[#allocation30_spill] sm:$0xff] %v10233_v31  ;;  %v4239_v34 = vadd.f32 %v4231_v51, %v9906_v56  ;;  %v4175_v0 = vsel %vm12443_vm12, %v4168_v28, %v4172_v19  ;;  %v4232_v17 = vmul.f32 %v9228_v23, %v10233_v31  ;;  %v4181_v56 = vsel %vm12445_vm9, %v4172_v19, %v12444_v22  ;;  %v4281_v51 = vpop.permute.xlu1 %4280  ;;  %v12449_v19 = vld [vmem:[#allocation107_spill] sm:$0xff] }
 0x682   :  { %v10245_v29 = vadd.f32 %v9936_v50, %v4123_v21  ;;  %v4235_v39 = vadd.f32 %v4227_v58, %v9920_v49  ;;  %v4233_v33 = vmul.f32 %v9228_v23, %v10240_v14  ;;  %v10258_v28 = vmul.f32 %v9932_v25, %v4175_v0  ;;  %v12446_v49 = vld [vmem:[#allocation49_spill] sm:$0xff]  ;;  %v12448_v21 = vld [vmem:[#allocation98_spill] sm:$0xff]  ;;  %v4279_v23 = vpop.permute.xlu0 %4278  ;;  %v12450_v0 = vld [vmem:[#allocation99_spill] sm:$0xff] }
 0x683   :  { %v10261_v50 = vmul.f32 %v9942_v43, %v4181_v56  ;;  %vm12447_vm10 = vcmp.lt.s32.totalorder %v7583_v10, 113  ;;  %v4240_v63 = vadd.f32 %v4232_v17, %v4129_v6  ;;  %v4125_v58 = vadd.f32 %v12448_v21, %v4068_v12  ;;  %5364 = vrot.lane.b32.xlu1 %v9502_v52, %s7342_s24  ;;  %v6788_v12 = vld [vmem:[%s11843_s12 + $0x128] sm:$0xff]  ;;  %v12451_v17 = vld [vmem:[#allocation11_spill] sm:$0xff] }
 0x684   :  { %v4289_v53 = vsel %vm12447_vm10, %v12446_v49, %v4281_v51  ;;  %v4349_v25 = vadd.f32 %v10038_v38, %v4238_v35  ;;  %v4241_v43 = vadd.f32 %v4233_v33, %v4130_v60  ;;  %v4126_v22 = vadd.f32 %v12450_v0, %v4069_v27  ;;  %vm12452_vm11 = vmmov %vm12447_vm10  ;;  %5973 = vperm.xlu0 %7198, %v5969_v42  }
 0x685   :  { %v10271_v16 = vmul.f32 %v12449_v19, %v4289_v53  ;;  %v4228_v56 = vmul.f32 %v9230_v37, %v10258_v28  ;;  %v4229_v6 = vmul.f32 %v9230_v37, %v10261_v50  ;;  %v4563_v49 = vmul.f32 %v12451_v17, %v10194_v7  ;;  %v4285_v27 = vpop.permute.xlu1 %4284  ;;  %vm12453_vm1 = vmmov %vm12447_vm10  ;;  %v12454_v7 = vld [vmem:[#allocation48_spill] sm:$0xff] }
 0x686   :  { %v4288_v38 = vsel %vm12452_vm11, %v9604_v61, %v4279_v23  ;;  %v4460_v35 = vadd.f32 %v10129_v26, %v4349_v25  ;;  %v4287_v21 = vsel %vm12453_vm1, %v4281_v51, %v4285_v27  ;;  %vm12455_vm12 = vmmov %vm12453_vm1  ;;  %v4283_v61 = vpop.permute.xlu0 %4282  ;;  %v10317_v51 = vmul.f32 %v12428_v47, %v10204_v8 }
 0x687   :  { %v4342_v53 = vmul.f32 %v9232_v46, %v10271_v16  ;;  %v4236_v60 = vadd.f32 %v4228_v56, %v4125_v58  ;;  %v4237_v37 = vadd.f32 %v4229_v6, %v4126_v22  ;;  %v10293_v33 = vmul.f32 %v12449_v19, %v4288_v38  ;;  %5414 = vperm.xlu1 %7199, %v6788_v12   ;;  %vm12456_vm9 = vmmov %vm12453_vm1  ;;  %v12459_v56 = vld [vmem:[#allocation12_spill] sm:$0xff] }
 0x688   :  { %v4293_v4 = vsel %vm12455_vm12, %v4285_v27, %v12454_v7  ;;  %v10301_v31 = vmul.f32 %v10075_v40, %v4287_v21  ;;  %v10303_v42 = vadd.f32 %v4563_v49, %v4460_v35  ;;  %vm12457_vm10 = vmmov %vm12453_vm1  ;;  %vm12460_vm11 = vcmp.lt.s32.totalorder %v7583_v10, 112 }
 0x689   :  { %v4350_v0 = vadd.f32 %v4342_v53, %v4239_v34  ;;  %v4338_v26 = vmul.f32 %v12395_v59, %v10293_v33  ;;  %v10308_v58 = vmul.f32 %v10109_v45, %v4293_v4  ;;  %v4286_v34 = vsel %vm12456_vm9, %v4279_v23, %v4283_v61  ;;  %v4392_v22 = vpop.permute.xlu1 %4391  ;;  %v12458_v23 = vld [vmem:[#allocation29_spill] sm:$0xff]  ;;  %vm12461_vm1 = vmmov %vm12460_vm11 }
 0x68a   :  { %v4292_v7 = vsel %vm12457_vm10, %v4283_v61, %v9596_v13  ;;  %v4343_v19 = vmul.f32 %v9232_v46, %v10301_v31  ;;  %v10322_v25 = vmul.f32 %v10075_v40, %v4286_v34  ;;  %4611 = vrot.lane.b32.xlu0 %v12458_v23, %s7353_s16  ;;  %v4448_v13 = vmul.f32 %v12459_v56, %v10151_v18  ;;  %vm12465_vm12 = vmmov %vm12461_vm1 }
 0x68b   :  { %v10325_v4 = vmul.f32 %v10109_v45, %v4292_v7  ;;  %v4346_v6 = vadd.f32 %v4338_v26, %v4235_v39  ;;  %v4344_v47 = vmul.f32 %v9232_v46, %v10308_v58  ;;  %v4400_v8 = vsel %vm12460_vm11, %v9614_v48, %v4392_v22  ;;  %5435 = vrot.lane.b32.xlu1 %v12418_v30, %s7341_s27  ;;  %v4390_v39 = vpop.permute.xlu0 %4389  ;;  %vm12466_vm9 = vmmov %vm12461_vm1 }
 0x68c   :  { %v7127_v40 = vpack.c.bf16 %v10078_v5, %v10151_v18  ;;  %v4351_v45 = vadd.f32 %v4343_v19, %v4240_v63  ;;  %v4339_v12 = vmul.f32 %v12395_v59, %v10322_v25  ;;  %v4432_v46 = vmul.f32 %v10138_v2, %v4400_v8  ;;  %v12462_v5 = vld [vmem:[#allocation90_spill] sm:$0xff]  ;;  %v12463_v63 = vld [vmem:[#allocation13_spill] sm:$0xff]  ;;  %vm12467_vm10 = vmmov %vm12461_vm1 }
 0x68d   :  { %v4340_v49 = vmul.f32 %v12395_v59, %v10325_v4  ;;  %v4352_v53 = vadd.f32 %v4344_v47, %v4241_v43  ;;  %v4399_v48 = vsel %vm12461_vm1, %v12400_v41, %v4390_v39  ;;  %v10350_v18 = vrot.slane %v12462_v5, %v12262_v9  ;;  %v4396_v21 = vpop.permute.xlu1 %4395  ;;  %v12464_v43 = vld [vmem:[#allocation25_spill] sm:$0xff]  ;;  %vm12469_vm11 = vmmov %vm12461_vm1 }
 0x68e   :  { %v4559_v38 = vmul.f32 %v12463_v63, %v10317_v51  ;;  %v4347_v27 = vadd.f32 %v4339_v12, %v4236_v60  ;;  %v4428_v35 = vmul.f32 %v10138_v2, %v4399_v48  ;;  %4615 = vrot.lane.b32.xlu0 %v12464_v43, %s7353_s16  ;;  %v4453_v61 = vmul.f32 %v12407_v62, %v4432_v46 }
 0x68f   :  { %v4348_v59 = vadd.f32 %v4340_v49, %v4237_v37  ;;  %v4398_v41 = vsel %vm12465_vm12, %v4392_v22, %v4396_v21  ;;  %v4404_v26 = vsel %vm12466_vm9, %v4396_v21, %v9606_v32  ;;  %v10365_v34 = vrot.slane %v12462_v5, %v7599_v15  ;;  %5439 = vrot.lane.b32.xlu1 %v9285_v24, %s7341_s27  ;;  %v4394_v7 = vpop.permute.xlu0 %4393  ;;  %v12468_v32 = vld [vmem:[#allocation50_spill] sm:$0xff] }
 0x690   :  { %v4449_v60 = vmul.f32 %v12459_v56, %v4428_v35  ;;  %v4433_v2 = vmul.f32 %v10187_v20, %v4398_v41  ;;  %v4434_v37 = vmul.f32 %v10191_v55, %v4404_v26  ;;  %v7128_v19 = vpack.c.bf16 %v4432_v46, %v4428_v35 }
 0x691   :  { %v4461_v22 = vadd.f32 %v4453_v61, %v4350_v0  ;;  %v4397_v47 = vsel %vm12467_vm10, %v4390_v39, %v4394_v7  ;;  %v4403_v8 = vsel %vm12469_vm11, %v4394_v7, %v12468_v32  ;;  %v10379_v12 = vrot.slane %v12462_v5, %v7589_v11  ;;  %v4503_v0 = vpop.permute.xlu1 %4502  ;;  %v12471_v5 = vld [vmem:[#allocation27_spill] sm:$0xff] }
 0x692   :  { %v10381_v49 = vadd.f32 %v4449_v60, %v4346_v6  ;;  %v4454_v48 = vmul.f32 %v12407_v62, %v4433_v2  ;;  %v4455_v21 = vmul.f32 %v12407_v62, %v4434_v37  ;;  %v4429_v46 = vmul.f32 %v10187_v20, %v4397_v47  ;;  %4694 = vrot.lane.b32.xlu0 %v12458_v23, %s7352_s25  ;;  %v12481_v47 = vld [vmem:[#allocation100_spill] sm:$0xff] }
 0x693   :  { %v4430_v39 = vmul.f32 %v10191_v55, %v4403_v8  ;;  %vm12470_vm1 = vcmp.lt.s32.totalorder %v7583_v10, 111  ;;  %6173 = vmatprep.subr.bf16.mxu0 %v7128_v19  ;;  %v7124_v6 = vpack.c.bf16 %v10271_v16, %v10293_v33  ;;  %v4345_v61 = vadd.f32 %v12471_v5, %v10245_v29  ;;  %5443 = vrot.lane.b32.xlu1 %v9476_v57, %s7341_s27  ;;  %v12480_v19 = vld [vmem:[#allocation101_spill] sm:$0xff] }
 0x694   :  { %v4511_v35 = vsel %vm12470_vm1, %v12419_v54, %v4503_v0  ;;  %v4462_v62 = vadd.f32 %v4454_v48, %v4351_v45  ;;  %v4463_v41 = vadd.f32 %v4455_v21, %v4352_v53  ;;  %v4450_v20 = vmul.f32 %v12459_v56, %v4429_v46  ;;  %6174 = vmatpush1.bf16.msra.mxu0 %v7127_v40  ;;  %vm12472_vm12 = vmmov %vm12470_vm1  ;;  %v12473_v53 = vld [vmem:[#allocation52_spill] sm:$0xff] }
 0x695   :  { %v7120_v26 = vpack.c.bf16 %v10209_v36, %v10216_v1  ;;  %v4451_v55 = vmul.f32 %v12459_v56, %v4430_v39  ;;  %v7129_v60 = vpack.c.bf16 %v4433_v2, %v4429_v46  ;;  %v10401_v54 = vmul.f32 %v10350_v18, %v4511_v35  ;;  %6175 = vmatprep.subr.bf16.mxu0 %v7124_v6  ;;  %v4507_v29 = vpop.permute.xlu1 %4506  ;;  %vm12474_vm9 = vmmov %vm12470_vm1  ;;  %v10458_v35 = vpop.permute.xlu0 %5271  ;;  %v12483_v6 = vld [vmem:[#allocation30_spill] sm:$0xff] }
 0x696   :  { %v10405_v16 = vadd.f32 %v4450_v20, %v4347_v27  ;;  %4698 = vrot.lane.b32.xlu0 %v12464_v43, %s7352_s25  ;;  %v7130_v33 = vpack.c.bf16 %v4434_v37, %v4430_v39  ;;  %v7126_v1 = vpack.c.bf16 %v10308_v58, %v10325_v4  ;;  %v4456_v36 = vadd.f32 %v4448_v13, %v4345_v61  ;;  %v12475_v58 = vld [vmem:[#allocation108_spill] sm:$0xff]  ;;  %v12476_v4 = vld [vmem:[#allocation121_spill] sm:$0xff]  ;;  %vm12546_vm10 = vmmov %vm12470_vm1 }
 0x697   :  { %v10411_v56 = vadd.f32 %v4451_v55, %v4348_v59  ;;  %v4564_v40 = vmul.f32 %v12451_v17, %v10401_v54  ;;  %v4509_v45 = vsel %vm12472_vm12, %v4503_v0, %v4507_v29  ;;  %v4515_v27 = vsel %vm12474_vm9, %v4507_v29, %v12473_v53  ;;  %5447 = vrot.lane.b32.xlu1 %v9502_v52, %s7341_s27  ;;  %v12489_v55 = vld [vmem:[#allocation26_spill] sm:$0xff]  ;;  %vm12549_vm11 = vmmov %vm12470_vm1 }
 0x698   :  { %v10421_v2 = vmul.f32 %v10365_v34, %v4509_v45  ;;  %v10424_v37 = vmul.f32 %v10379_v12, %v4515_v27  ;;  %6216 = vmatprep.subr.bf16.mxu1 %v7130_v33  ;;  %v12477_v13 = vpack.c.bf16 %v12475_v58, %v12476_v4  ;;  %v10429_v59 = vadd.f32 %v4559_v38, %v4456_v36  ;;  %v6791_v38 = vld [vmem:[%s11843_s12 + $0x138] sm:$0xff]  ;;  %v12491_v33 = vld [vmem:[#allocation89_spill] sm:$0xff]  ;;  %v12494_v45 = vld [vmem:[#allocation94_spill] sm:$0xff] }
 0x699   :  { %v10431_v7 = vadd.f32 %v4564_v40, %v4461_v22  ;;  %6217 = vmatpush1.bf16.msra.mxu1 %v7129_v60  ;;  %v7119_v32 = vpack.c.bf16 %v12481_v47, %v12480_v19  ;;  %v10441_v21 = vpop.permute.xlu1 %4613  ;;  %v7125_v22 = vpack.c.bf16 %v10301_v31, %v10322_v25  ;;  %v7122_v39 = vpack.c.bf16 %v10240_v14, %v10261_v50  ;;  %v12485_v14 = vld [vmem:[#allocation31_spill] sm:$0xff]  ;;  %v12490_v60 = vld [vmem:[#allocation28_spill] sm:$0xff]  ;;  %v12495_v53 = vld [vmem:[#allocation122_spill] sm:$0xff] }
 0x69a   :  { %6176 = vmatpush1.bf16.msra.mxu0 %v12477_v13  ;;  %12478 = vst [vmem:[#allocation9_spill] sm:$0xff] %v10429_v59  ;;  %v4565_v8 = vmul.f32 %v12451_v17, %v10421_v2  ;;  %v4566_v48 = vmul.f32 %v12451_v17, %v10424_v37  ;;  %6218 = vmatprep.subr.bf16.mxu1 %v7126_v1  ;;  %12482 = vst [vmem:[#allocation21_spill] sm:$0xff] %v10458_v35  ;;  %v12492_v1 = vld [vmem:[#allocation33_spill] sm:$0xff]  ;;  %v10497_v4 = vld [vmem:[%s11837_s1 + $0x24] sm:$0xf]  ;;  %vm12630_vm12 = vcmp.lt.s32.totalorder %v7583_v10, 98 }
 0x69b   :  { %12479 = vst [vmem:[#allocation104_spill] sm:$0xff] %v10431_v7  ;;  %6177 = vmatprep.subr.bf16.mxu0 %v7120_v26  ;;  %4777 = vrot.lane.b32.xlu0 %v12458_v23, %s7350_s18  ;;  %v7116_v17 = vpack.c.bf16 %v9285_v24, %v9290_v44  ;;  %v7115_v25 = vpack.c.bf16 %v12418_v30, %v9280_v3  ;;  %v12484_v44 = vld [vmem:[#allocation7_spill] sm:$0xff]  ;;  %v12487_v3 = vld [vmem:[#allocation10_spill] sm:$0xff]  ;;  %v12531_v35 = vld [vmem:[#allocation109_spill] sm:$0xff] }
 0x69c   :  { %v10450_v46 = vadd.f32 %v4565_v8, %v4462_v62  ;;  %v10452_v0 = vadd.f32 %v4566_v48, %v4463_v41  ;;  %5497 = vperm.xlu1 %7199, %v6791_v38   ;;  %v7121_v5 = vpack.c.bf16 %v12483_v6, %v10258_v28  ;;  %v7112_v50 = vpack.c.bf16 %v12485_v14, %v12484_v44  ;;  %v12488_v41 = vld [vmem:[#allocation103_spill] sm:$0xff]  ;;  %v12497_v19 = vld [vmem:[#allocation6_spill] sm:$0xff]  ;;  %v12499_v8 = vld [vmem:[#allocation45_spill] sm:$0xff] }
 0x69d   :  { %6219 = vmatpush1.bf16.msra.mxu1 %v7125_v22  ;;  %v10460_v31 = vpop.permute.xlu1 %4617  ;;  %v7118_v61 = vpack.c.bf16 %v9502_v52, %v12464_v43  ;;  %v7111_v20 = vpack.c.bf16 %v12488_v41, %v12487_v3  ;;  %v7117_v26 = vpack.c.bf16 %v9476_v57, %v12458_v23  ;;  %v7108_v29 = vpack.c.bf16 %v12490_v60, %v12489_v55  ;;  %v12496_v13 = vld [vmem:[#allocation51_spill] sm:$0xff]  ;;  %v12500_v48 = vld [vmem:[#allocation44_spill] sm:$0xff]  ;;  %v12504_v44 = vld [vmem:[#allocation58_spill] sm:$0xff] }
 0x69e   :  { %6178 = vmatpush1.bf16.msra.mxu0 %v7119_v32  ;;  %6220 = vmatprep.subr.bf16.mxu1 %v7122_v39  ;;  %v10474_v62 = vpop.permute.xlu0 %5326  ;;  %v7114_v36 = vpack.c.bf16 %v12492_v1, %v12491_v33  ;;  %v7107_v27 = vpack.c.bf16 %v12495_v53, %v12494_v45  ;;  %v7113_v47 = vpack.c.bf16 %v12497_v19, %v12496_v13  ;;  %v12501_v22 = vld [vmem:[#allocation35_spill] sm:$0xff]  ;;  %v12510_v60 = vld [vmem:[#allocation4_spill] sm:$0xff]  ;;  %v12517_v19 = vld [vmem:[#allocation62_spill] sm:$0xff] }
 0x69f   :  { %6179 = vmatprep.subr.bf16.mxu0 %v7116_v17  ;;  %4781 = vrot.lane.b32.xlu0 %v12464_v43, %s7350_s18  ;;  %12486 = vst [vmem:[#allocation54_spill] sm:$0xff] %v10474_v62  ;;  %v10505_v32 = vrot.slane %v10497_v4, %v7599_v15  ;;  %v7104_v38 = vpack.c.bf16 %v12500_v48, %v12499_v8  ;;  %v12502_v17 = vld [vmem:[#allocation102_spill] sm:$0xff]  ;;  %v12507_v3 = vld [vmem:[#allocation23_spill] sm:$0xff]  ;;  %v12514_v45 = vld [vmem:[#allocation120_spill] sm:$0xff] }
 0x6a0   :  { %5518 = vrot.lane.b32.xlu1 %v12418_v30, %s12325_s22  ;;  %v7110_v39 = vpack.c.bf16 %v12502_v17, %v12501_v22  ;;  %v4622_v14 = vsel %vm773_vm0, %v12504_v44, %v10441_v21  ;;  %v12515_v53 = vld [vmem:[#allocation119_spill] sm:$0xff]  ;;  %v10549_v13 = vrot.slane %v10497_v4, %v7589_v11  ;;  %vm12632_vm9 = vmmov %vm12630_vm12 }
 0x6a1   :  { %6221 = vmatpush1.bf16.msra.mxu1 %v7121_v5  ;;  %v10478_v28 = vpop.permute.xlu1 %4696  ;;  %12498 = vst [vmem:[#allocation46_spill] sm:$0xff] %v10505_v32  ;;  %v10516_v5 = vld [vmem:[%s11837_s1 + $0x28] sm:$0xf]  ;;  %v4655_v48 = vmul.f32 %v10505_v32, %v4622_v14 }
 0x6a2   :  { %6180 = vmatpush1.bf16.msra.mxu0 %v7115_v25  ;;  %6222 = vmatprep.subr.bf16.mxu1 %v7118_v61  ;;  %v10490_v40 = vpop.permute.xlu0 %5350  ;;  %v12503_v25 = vld [vmem:[#allocation8_spill] sm:$0xff]  ;;  %v10536_v33 = vrot.slane %v10516_v5, %v7599_v15  ;;  %12516 = vst [vmem:[#allocation34_spill] sm:$0xff] %v10549_v13  ;;  %v10557_v8 = vrot.slane %v10516_v5, %v12510_v60 }
 0x6a3   :  { %6181 = vmatprep.subr.bf16.mxu0 %v7112_v50  ;;  %4860 = vrot.lane.b32.xlu0 %v12458_v23, %s7349_s20  ;;  %12493 = vst [vmem:[#allocation32_spill] sm:$0xff] %v10490_v40  ;;  %v12506_v61 = vld [vmem:[#allocation24_spill] sm:$0xff]  ;;  %v6794_v40 = vld [vmem:[%s11843_s12 + $0x148] sm:$0xff] }
 0x6a4   :  { %5522 = vrot.lane.b32.xlu1 %v9285_v24, %s12325_s22  ;;  %v7100_v41 = vpack.c.bf16 %v12507_v3, %v12506_v61  ;;  %12512 = vst [vmem:[#allocation92_spill] sm:$0xff] %v10536_v33  ;;  %12518 = vst [vmem:[#allocation93_spill] sm:$0xff] %v10557_v8  ;;  %v12522_v61 = vld [vmem:[#allocation116_spill] sm:$0xff] }
 0x6a5   :  { %6223 = vmatpush1.bf16.msra.mxu1 %v7117_v26  ;;  %v4701_v58 = vpop.permute.xlu1 %4700  ;;  %v12509_v26 = vld [vmem:[#allocation115_spill] sm:$0xff] }
 0x6a6   :  { %6182 = vmatpush1.bf16.msra.mxu0 %v7111_v20  ;;  %6224 = vmatprep.subr.bf16.mxu1 %v7114_v36  ;;  %v10524_v50 = vpop.permute.xlu0 %5354  ;;  %v12508_v20 = vld [vmem:[#allocation117_spill] sm:$0xff] }
 0x6a7   :  { %6183 = vmatprep.subr.bf16.mxu0 %v7108_v29  ;;  %4864 = vrot.lane.b32.xlu0 %v12464_v43, %s7349_s20  ;;  %12505 = vst [vmem:[#allocation95_spill] sm:$0xff] %v10524_v50  ;;  %v7103_v55 = vpack.c.bf16 %v12509_v26, %v12508_v20  ;;  %v10532_v29 = vrot.slane %v10497_v4, %v12510_v60  ;;  %v10543_v36 = vld [vmem:[%s11837_s1 + $0x2c] sm:$0xf]  ;;  %v12524_v26 = vld [vmem:[#allocation66_spill] sm:$0xff]  ;;  %v12530_v50 = vld [vmem:[#allocation111_spill] sm:$0xff] }
 0x6a8   :  { %5526 = vrot.lane.b32.xlu1 %v9476_v57, %s12325_s22  ;;  %12513 = vst [vmem:[#allocation96_spill] sm:$0xff] %v10543_v36  ;;  %v10568_v17 = vrot.slane %v10543_v36, %v7599_v15  ;;  %v10574_v20 = vrot.slane %v10516_v5, %v7589_v11  ;;  %v7105_v59 = vpack.c.bf16 %v12531_v35, %v12530_v50  ;;  %v12534_v35 = vld [vmem:[#allocation114_spill] sm:$0xff]  ;;  %v12535_v50 = vld [vmem:[#allocation112_spill] sm:$0xff] }
 0x6a9   :  { %6225 = vmatpush1.bf16.msra.mxu1 %v7113_v47  ;;  %12511 = vst [vmem:[#allocation47_spill] sm:$0xff] %v10532_v29  ;;  %v10538_v1 = vpop.permute.xlu1 %4779  ;;  %v4705_v47 = vsel %vm857_vm7, %v12517_v19, %v10478_v28  ;;  %v7102_v32 = vpack.c.bf16 %v12535_v50, %v12534_v35 }
 0x6aa   :  { %6184 = vmatpush1.bf16.msra.mxu0 %v7107_v27  ;;  %6226 = vmatprep.subr.bf16.mxu1 %v7110_v39  ;;  %v7109_v27 = vpack.c.bf16 %v12515_v53, %v12514_v45  ;;  %12520 = vst [vmem:[#allocation97_spill] sm:$0xff] %v10568_v17  ;;  %v12521_v39 = vld [vmem:[#allocation118_spill] sm:$0xff]  ;;  %12523 = vst [vmem:[#allocation5_spill] sm:$0xff] %v10574_v20  ;;  %v4788_v14 = vsel %vm941_vm6, %v12524_v26, %v10538_v1  ;;  %v10582_v45 = vpop.permute.xlu0 %5409 }
 0x6ab   :  { %6185 = vmatprep.subr.bf16.mxu0 %v7104_v38  ;;  %4943 = vrot.lane.b32.xlu0 %v12458_v23, %s7348_s15  ;;  %v12519_v38 = vld [vmem:[#allocation56_spill] sm:$0xff]  ;;  %v7106_v3 = vpack.c.bf16 %v12522_v61, %v12521_v39  ;;  %12525 = vst [vmem:[#allocation49_spill] sm:$0xff] %v10582_v45  ;;  %v10591_v53 = vld [vmem:[%s11837_s1 + $0x30] sm:$0xf]  ;;  %v12527_v39 = vld [vmem:[#allocation113_spill] sm:$0xff]  ;;  %v4738_v62 = vmul.f32 %v10536_v33, %v4705_v47 }
 0x6ac   :  { %v4626_v22 = vsel %vm773_vm0, %v10460_v31, %v12519_v38  ;;  %5530 = vrot.lane.b32.xlu1 %v9502_v52, %s12325_s22  ;;  %12526 = vst [vmem:[#allocation98_spill] sm:$0xff] %v10591_v53  ;;  %v12528_v61 = vld [vmem:[#allocation110_spill] sm:$0xff]  ;;  %v10614_v47 = vrot.slane %v10591_v53, %v7599_v15  ;;  %v4821_v33 = vmul.f32 %v10568_v17, %v4788_v14  ;;  %v12539_v17 = vld [vmem:[#allocation36_spill] sm:$0xff] }
 0x6ad   :  { %6227 = vmatpush1.bf16.msra.mxu1 %v7109_v27  ;;  %v7099_v6 = vpack.c.bf16 %v12528_v61, %v12527_v39  ;;  %v10598_v27 = vrot.slane %v10543_v36, %v7589_v11  ;;  %v4784_v45 = vpop.permute.xlu1 %4783  ;;  %v4620_v39 = vsel %vm773_vm0, %v10441_v21, %v10460_v31  ;;  %v10622_v21 = vrot.slane %v10591_v53, %v12510_v60  ;;  %v10627_v31 = vld [vmem:[%s11837_s1 + $0x34] sm:$0xf] }
 0x6ae   :  { %6186 = vmatpush1.bf16.msra.mxu0 %v7103_v55  ;;  %v10586_v55 = vrot.slane %v10543_v36, %v12510_v60  ;;  %6228 = vmatprep.subr.bf16.mxu1 %v7106_v3  ;;  %12532 = vst [vmem:[#allocation99_spill] sm:$0xff] %v10614_v47  ;;  %v12533_v3 = vld [vmem:[#allocation14_spill] sm:$0xff]  ;;  %12536 = vst [vmem:[#allocation11_spill] sm:$0xff] %v10627_v31  ;;  %v10635_v14 = vpop.permute.xlu0 %5433  ;;  %v10639_v35 = vrot.slane %v10591_v53, %v7589_v11  ;;  %v12544_v36 = vld [vmem:[#allocation64_spill] sm:$0xff] }
 0x6af   :  { %6187 = vmatprep.subr.bf16.mxu0 %v7100_v41  ;;  %12529 = vst [vmem:[#allocation107_spill] sm:$0xff] %v10598_v27  ;;  %v4653_v41 = vmul.f32 %v10532_v29, %v4626_v22  ;;  %4947 = vrot.lane.b32.xlu0 %v12464_v43, %s7348_s15  ;;  %v4676_v61 = vmul.f32 %v12533_v3, %v4655_v48  ;;  %v12537_v48 = vld [vmem:[#allocation60_spill] sm:$0xff]  ;;  %12538 = vst [vmem:[#allocation48_spill] sm:$0xff] %v10635_v14  ;;  %v12542_v26 = vld [vmem:[#allocation70_spill] sm:$0xff] }
 0x6b0   :  { %v4703_v22 = vsel %vm857_vm7, %v10478_v28, %v4701_v58  ;;  %5580 = vperm.xlu1 %7199, %v6794_v40   ;;  %v4656_v50 = vmul.f32 %v10549_v13, %v4620_v39  ;;  %v4759_v29 = vmul.f32 %v12539_v17, %v4738_v62  ;;  %v10645_v28 = vrot.slane %v10627_v31, %v7599_v15  ;;  %v12540_v40 = vld [vmem:[#allocation106_spill] sm:$0xff]  ;;  %v12543_v13 = vld [vmem:[#allocation37_spill] sm:$0xff] }
 0x6b1   :  { %6229 = vmatpush1.bf16.msra.mxu1 %v7105_v59  ;;  %v4863_v7 = vpop.permute.xlu1 %4862  ;;  %v10649_v59 = vrot.slane %v10627_v31, %v12510_v60  ;;  %v4674_v53 = vmul.f32 %v12533_v3, %v4653_v41  ;;  %v10661_v62 = vrot.slane %v10627_v31, %v7589_v11 }
 0x6b2   :  { %6188 = vmatpush1.bf16.msra.mxu0 %v7099_v6  ;;  %v4709_v6 = vsel %vm857_vm7, %v4701_v58, %v12537_v48  ;;  %6230 = vmatprep.subr.bf16.mxu1 %v7102_v32  ;;  %v12541_v58 = vld [vmem:[#allocation105_spill] sm:$0xff]  ;;  %v4871_v39 = vsel %vm1025_vm5, %v12542_v26, %v4863_v7  ;;  %v10666_v32 = vld [vmem:[%s11837_s1 + $0x38] sm:$0xf]  ;;  %v4842_v26 = vmul.f32 %v12543_v13, %v4821_v33  ;;  %v4501_v19 = vpop.permute.xlu0 %4500 }
 0x6b3   :  { %v7101_v14 = vpack.c.bf16 %v12541_v58, %v12540_v40  ;;  %5026 = vrot.lane.b32.xlu0 %v12458_v23, %s7347_s30  ;;  %v4684_v40 = vadd.f32 %v4676_v61, %v10450_v46  ;;  %v4736_v41 = vmul.f32 %v10557_v8, %v4709_v6  ;;  %v4739_v58 = vmul.f32 %v10574_v20, %v4703_v22  ;;  %v12545_v6 = vld [vmem:[#allocation55_spill] sm:$0xff] }
 0x6b4   :  { %v4792_v48 = vsel %vm941_vm6, %v4784_v45, %v12544_v36  ;;  %v4904_v31 = vmul.f32 %v10614_v47, %v4871_v39  ;;  %5601 = vrot.lane.b32.xlu1 %v12418_v30, %s12332_s8  ;;  %v10680_v46 = vrot.slane %v10666_v32, %v7599_v15  ;;  %v4677_v61 = vmul.f32 %v12533_v3, %v4656_v50  ;;  %v12547_v36 = vld [vmem:[#allocation68_spill] sm:$0xff] }
 0x6b5   :  { %6231 = vmatpush1.bf16.msra.mxu1 %v7101_v14  ;;  %v4767_v22 = vadd.f32 %v4759_v29, %v4684_v40  ;;  %v4786_v33 = vsel %vm941_vm6, %v10538_v1, %v4784_v45  ;;  %v4510_v39 = vsel %vm12546_vm10, %v12545_v6, %v4501_v19  ;;  %v4867_v14 = vpop.permute.xlu1 %4866  ;;  %v4682_v47 = vadd.f32 %v4674_v53, %v10303_v42  ;;  %vm12638_vm10 = vmmov %vm12632_vm9 }
 0x6b6   :  { %v4539_v20 = vmul.f32 %v10350_v18, %v4510_v39  ;;  %v4869_v8 = vsel %vm1025_vm5, %v4863_v7, %v4867_v14  ;;  %v4875_v29 = vsel %vm1025_vm5, %v4867_v14, %v12547_v36  ;;  %v4757_v1 = vmul.f32 %v12539_v17, %v4736_v41  ;;  %v12548_v18 = vld [vmem:[#allocation15_spill] sm:$0xff]  ;;  %v4505_v6 = vpop.permute.xlu0 %4504 }
 0x6b7   :  { %5030 = vrot.lane.b32.xlu0 %v12464_v43, %s7347_s30  ;;  %v4760_v45 = vmul.f32 %v12539_v17, %v4739_v58  ;;  %v4850_v50 = vadd.f32 %v4842_v26, %v4767_v22  ;;  %v4819_v40 = vmul.f32 %v10586_v55, %v4792_v48  ;;  %v4822_v42 = vmul.f32 %v10598_v27, %v4786_v33  ;;  %v12550_v48 = vld [vmem:[#allocation53_spill] sm:$0xff] }
 0x6b8   :  { %v4925_v53 = vmul.f32 %v12548_v18, %v4904_v31  ;;  %v4560_v7 = vmul.f32 %v12463_v63, %v4539_v20  ;;  %5605 = vrot.lane.b32.xlu1 %v9285_v24, %s12332_s8  ;;  %v7132_v39 = vpack.c.bf16 %v10401_v54, %v4539_v20  ;;  %v4902_v14 = vmul.f32 %v10622_v21, %v4875_v29  ;;  %v12552_v54 = vld [vmem:[#allocation74_spill] sm:$0xff] }
 0x6b9   :  { %v4905_v41 = vmul.f32 %v10639_v35, %v4869_v8  ;;  %v4508_v26 = vsel %vm12549_vm11, %v4501_v19, %v4505_v6  ;;  %v4514_v58 = vsel %vm12470_vm1, %v4505_v6, %v12550_v48  ;;  %v4946_v31 = vpop.permute.xlu1 %4945  ;;  %v4685_v19 = vadd.f32 %v4677_v61, %v10452_v0  ;;  %v7208_v0 = vld [vmem:[%s11847_s10] ss:$8 sps:$4 sm:$0xff]   ;;  %vm12639_vm11 = vmmov %vm12632_vm9 }
 0x6ba   :  { %v10715_v22 = vadd.f32 %v4560_v7, %v10381_v49  ;;  %v4540_v33 = vmul.f32 %v10365_v34, %v4508_v26  ;;  %v4541_v27 = vmul.f32 %v10379_v12, %v4514_v58  ;;  %v4954_v20 = vsel %vm1109_vm4, %v12552_v54, %v4946_v31  ;;  %6203 = vmatprep.subr.bf16.mxu0 %v7132_v39  ;;  %v10732_v26 = vpop.permute.xlu0 %5437 }
 0x6bb   :  { %5109 = vrot.lane.b32.xlu0 %v12458_v23, %s7346_s17  ;;  %v4765_v8 = vadd.f32 %v4757_v1, %v4682_v47  ;;  %v4840_v29 = vmul.f32 %v12543_v13, %v4819_v40  ;;  %v4987_v6 = vmul.f32 %v10645_v28, %v4954_v20  ;;  %v4843_v49 = vmul.f32 %v12543_v13, %v4822_v42  ;;  %v12554_v1 = vld [vmem:[#allocation16_spill] sm:$0xff] }
 0x6bc   :  { %12551 = vst [vmem:[#allocation29_spill] sm:$0xff] %v10715_v22  ;;  %v4933_v34 = vadd.f32 %v4925_v53, %v4850_v50  ;;  %v4561_v12 = vmul.f32 %v12463_v63, %v4540_v33  ;;  %v4562_v7 = vmul.f32 %v12463_v63, %v4541_v27  ;;  %5609 = vrot.lane.b32.xlu1 %v9476_v57, %s12332_s8  ;;  %12553 = vst [vmem:[#allocation12_spill] sm:$0xff] %v10732_v26  ;;  %v12581_v26 = vld [vmem:[#allocation98_spill] sm:$0xff] }
 0x6bd   :  { %v4923_v47 = vmul.f32 %v12548_v18, %v4902_v14  ;;  %v7133_v61 = vpack.c.bf16 %v10421_v2, %v4540_v33  ;;  %v5008_v40 = vmul.f32 %v12554_v1, %v4987_v6  ;;  %v12555_v50 = vpack.c.bf16 %v12503_v25, %v10317_v51  ;;  %v4950_v63 = vpop.permute.xlu1 %4949  ;;  %v12556_v25 = vld [vmem:[#allocation72_spill] sm:$0xff]  ;;  %v12583_v22 = vld [vmem:[#allocation70_spill] sm:$0xff] }
 0x6be   :  { %v7134_v42 = vpack.c.bf16 %v10424_v37, %v4541_v27  ;;  %v4768_v53 = vadd.f32 %v4760_v45, %v4685_v19  ;;  %v4926_v39 = vmul.f32 %v12548_v18, %v4905_v41  ;;  %v10746_v48 = vadd.f32 %v4561_v12, %v10405_v16 }
 0x6bf   :  { %6204 = vmatpush2.bf16.msra.mxu0 %v12555_v50  ;;  %v10749_v58 = vadd.f32 %v4562_v7, %v10411_v56  ;;  %5113 = vrot.lane.b32.xlu0 %v12464_v43, %s7346_s17  ;;  %v4848_v2 = vadd.f32 %v4840_v29, %v4765_v8  ;;  %v5016_v14 = vadd.f32 %v5008_v40, %v4933_v34  ;;  %v10762_v56 = vpop.permute.xlu0 %5492  ;;  %v12558_v29 = vld [vmem:[#allocation78_spill] sm:$0xff]  ;;  %v12561_v40 = vld [vmem:[#allocation19_spill] sm:$0xff] }
 0x6c0   :  { %v4952_v51 = vsel %vm1109_vm4, %v4946_v31, %v4950_v63  ;;  %v4958_v37 = vsel %vm1109_vm4, %v4950_v63, %v12556_v25  ;;  %6246 = vmatprep.subr.bf16.mxu1 %v7134_v42  ;;  %v4851_v27 = vadd.f32 %v4843_v49, %v4768_v53  ;;  %5613 = vrot.lane.b32.xlu1 %v9502_v52, %s12332_s8  ;;  %v6797_v31 = vld [vmem:[%s11843_s12 + $0x158] sm:$0xff] }
 0x6c1   :  { %v4985_v16 = vmul.f32 %v10649_v59, %v4958_v37  ;;  %v4988_v45 = vmul.f32 %v10661_v62, %v4952_v51  ;;  %12557 = vst [vmem:[#allocation90_spill] sm:$0xff] %v10762_v56  ;;  %v4931_v41 = vadd.f32 %v4923_v47, %v4848_v2  ;;  %6247 = vmatpush2.bf16.msra.mxu1 %v7133_v61  ;;  %v5029_v33 = vpop.permute.xlu1 %5028  ;;  %v10789_v42 = vld [vmem:[%s11837_s1 + $0x3c] sm:$0xf] }
 0x6c2   :  { %6206 = vmatmul.mubr.bf16.vlgmr.msra.gmra.mxu0 %v7208_v0  ;;  %v4934_v20 = vadd.f32 %v4926_v39, %v4851_v27  ;;  %v5037_v6 = vsel %vm1193_vm3, %v12558_v29, %v5029_v33  ;;  %v10777_v34 = vrot.slane %v10666_v32, %v12510_v60  ;;  %v10781_v12 = vrot.slane %v10666_v32, %v7589_v11  ;;  %v12562_v39 = vld [vmem:[#allocation76_spill] sm:$0xff] }
 0x6c3   :  { %v5006_v19 = vmul.f32 %v12554_v1, %v4985_v16  ;;  %v5009_v8 = vmul.f32 %v12554_v1, %v4988_v45  ;;  %5192 = vrot.lane.b32.xlu0 %v12458_v23, %s12173_s4  ;;  %v5070_v49 = vmul.f32 %v10680_v46, %v5037_v6  ;;  %v10783_v61 = vpop.permute.xlu0 %5516  ;;  %v10802_v27 = vrot.slane %v10789_v42, %v7599_v15 }
 0x6c4   :  { %12559 = vst [vmem:[#allocation13_spill] sm:$0xff] %v10777_v34  ;;  %6249 = vmatmul.mubr.bf16.vlgmr.msra.gmra.mxu1 %v7208_v0  ;;  %5663 = vperm.xlu1 %7199, %v6797_v31   ;;  %12560 = vst [vmem:[#allocation25_spill] sm:$0xff] %v10783_v61  ;;  %v10806_v16 = vrot.slane %v10497_v4, %v12262_v9  ;;  %v12579_v61 = vld [vmem:[#allocation86_spill] sm:$0xff] }
 0x6c5   :  { %v5014_v7 = vadd.f32 %v5006_v19, %v4931_v41  ;;  %v5017_v47 = vadd.f32 %v5009_v8, %v4934_v20  ;;  %v5091_v50 = vmul.f32 %v12561_v40, %v5070_v49  ;;  %v5033_v63 = vpop.permute.xlu1 %5032  ;;  %12563 = vst [vmem:[#allocation50_spill] sm:$0xff] %v10802_v27  ;;  %v12565_v20 = vld [vmem:[#allocation82_spill] sm:$0xff]  ;;  %v10825_v19 = vrot.slane %v10789_v42, %v12510_v60 }
 0x6c6   :  { %v5035_v53 = vsel %vm1193_vm3, %v5029_v33, %v5033_v63  ;;  %v5041_v2 = vsel %vm1193_vm3, %v5033_v63, %v12562_v39 }
 0x6c7   :  { %5196 = vrot.lane.b32.xlu0 %v12464_v43, %s12173_s4  ;;  %v5099_v0 = vadd.f32 %v5091_v50, %v5016_v14  ;;  %v5068_v51 = vmul.f32 %v10777_v34, %v5041_v2  ;;  %v5071_v37 = vmul.f32 %v10781_v12, %v5035_v53  ;;  %v10810_v45 = vpop.permute.xlu0 %5520  ;;  %v4624_v14 = vsel %vm773_vm0, %v12519_v38, %v12504_v44  ;;  %v12569_v53 = vld [vmem:[#allocation62_spill] sm:$0xff]  ;;  %v12571_v2 = vld [vmem:[#allocation43_spill] sm:$0xff] }
 0x6c8   :  { %5684 = vrot.lane.b32.xlu1 %v12418_v30, %s12358_s7  ;;  %12564 = vst [vmem:[#allocation27_spill] sm:$0xff] %v10810_v45  ;;  %12566 = vst [vmem:[#allocation52_spill] sm:$0xff] %v10825_v19  ;;  %v10830_v38 = vrot.slane %v10789_v42, %v7589_v11  ;;  %v4654_v49 = vmul.f32 %v10806_v16, %v4624_v14  ;;  %v10835_v50 = vrot.slane %v10516_v5, %v12262_v9  ;;  %v10849_v14 = vld [vmem:[%s11837_s1 + $0x40] sm:$0xf] }
 0x6c9   :  { %v5089_v41 = vmul.f32 %v12561_v40, %v5068_v51  ;;  %v5092_v33 = vmul.f32 %v12561_v40, %v5071_v37  ;;  %v5112_v31 = vpop.permute.xlu1 %5111  ;;  %v10896_v45 = vrot.slane %v10849_v14, %v7589_v11 }
 0x6ca   :  { %v5120_v4 = vsel %vm1277_vm2, %v12565_v20, %v5112_v31  ;;  %12567 = vst [vmem:[#allocation108_spill] sm:$0xff] %v10830_v38 }
 0x6cb   :  { %5275 = vrot.lane.b32.xlu0 %v12458_v23, %s12172_s29  ;;  %v5097_v8 = vadd.f32 %v5089_v41, %v5014_v7  ;;  %v5100_v6 = vadd.f32 %v5092_v33, %v5017_v47  ;;  %v5153_v44 = vmul.f32 %v10802_v27, %v5120_v4  ;;  %v10839_v63 = vpop.permute.xlu0 %5575  ;;  %v12570_v7 = vld [vmem:[#allocation60_spill] sm:$0xff]  ;;  %12580 = vst [vmem:[#allocation30_spill] sm:$0xff] %v10896_v45 }
 0x6cc   :  { %5688 = vrot.lane.b32.xlu1 %v9285_v24, %s12358_s7  ;;  %12568 = vst [vmem:[#allocation121_spill] sm:$0xff] %v10839_v63  ;;  %v4707_v47 = vsel %vm857_vm7, %v12570_v7, %v12569_v53  ;;  %v12572_v41 = vld [vmem:[#allocation80_spill] sm:$0xff]  ;;  %v10862_v7 = vrot.slane %v10849_v14, %v7599_v15  ;;  %v4675_v63 = vmul.f32 %v12533_v3, %v4654_v49 }
 0x6cd   :  { %v5174_v51 = vmul.f32 %v12571_v2, %v5153_v44  ;;  %v5116_v37 = vpop.permute.xlu1 %5115  ;;  %v12574_v27 = vld [vmem:[#allocation96_spill] sm:$0xff] }
 0x6ce   :  { %v5118_v5 = vsel %vm1277_vm2, %v5112_v31, %v5116_v37  ;;  %v5124_v33 = vsel %vm1277_vm2, %v5116_v37, %v12572_v41  ;;  %12573 = vst [vmem:[#allocation101_spill] sm:$0xff] %v10862_v7  ;;  %v4737_v31 = vmul.f32 %v10835_v50, %v4707_v47  ;;  %v10868_v56 = vrot.slane %v12574_v27, %v12262_v9  ;;  %v12577_v37 = vld [vmem:[#allocation64_spill] sm:$0xff] }
 0x6cf   :  { %5279 = vrot.lane.b32.xlu0 %v12464_v43, %s12172_s29  ;;  %v5182_v4 = vadd.f32 %v5174_v51, %v5099_v0  ;;  %v5151_v53 = vmul.f32 %v10825_v19, %v5124_v33  ;;  %v5154_v44 = vmul.f32 %v10830_v38, %v5118_v5  ;;  %v10872_v0 = vpop.permute.xlu0 %5599  ;;  %v12576_v51 = vld [vmem:[#allocation66_spill] sm:$0xff]  ;;  %v6799_v27 = vld [vmem:[%s11843_s12 + $0x160] sm:$0xff]  ;;  %v10902_v19 = vrot.slane %v12581_v26, %v12262_v9 }
 0x6d0   :  { %5692 = vrot.lane.b32.xlu1 %v9476_v57, %s12358_s7  ;;  %12575 = vst [vmem:[#allocation100_spill] sm:$0xff] %v10872_v0  ;;  %v4790_v5 = vsel %vm941_vm6, %v12577_v37, %v12576_v51  ;;  %v12578_v47 = vld [vmem:[#allocation104_spill] sm:$0xff]  ;;  %v10891_v51 = vrot.slane %v10849_v14, %v12510_v60 }
 0x6d1   :  { %v5172_v33 = vmul.f32 %v12571_v2, %v5151_v53  ;;  %v5175_v3 = vmul.f32 %v12571_v2, %v5154_v44  ;;  %v5195_v49 = vpop.permute.xlu1 %5194  ;;  %v4683_v38 = vadd.f32 %v4675_v63, %v12578_v47  ;;  %v4758_v63 = vmul.f32 %v12539_v17, %v4737_v31  ;;  %v12585_v31 = vld [vmem:[#allocation84_spill] sm:$0xff] }
 0x6d2   :  { %v5203_v0 = vsel %vm1361_vm8, %v12579_v61, %v5195_v49  ;;  %v4820_v47 = vmul.f32 %v10868_v56, %v4790_v5 }
 0x6d3   :  { %5358 = vrot.lane.b32.xlu0 %v12458_v23, %s7342_s24  ;;  %v5180_v53 = vadd.f32 %v5172_v33, %v5097_v8  ;;  %v5183_v44 = vadd.f32 %v5175_v3, %v5100_v6  ;;  %v5236_v37 = vmul.f32 %v10862_v7, %v5203_v0  ;;  %v10904_v34 = vpop.permute.xlu0 %5603  ;;  %v4873_v8 = vsel %vm1025_vm5, %v12547_v36, %v12583_v22  ;;  %v12584_v6 = vld [vmem:[#allocation20_spill] sm:$0xff] }
 0x6d4   :  { %5741 = vperm.xlu1 %7199, %v6799_v27   ;;  %12582 = vst [vmem:[#allocation7_spill] sm:$0xff] %v10904_v34  ;;  %v4766_v3 = vadd.f32 %v4758_v63, %v4683_v38  ;;  %v4841_v22 = vmul.f32 %v12543_v13, %v4820_v47  ;;  %v4903_v38 = vmul.f32 %v10902_v19, %v4873_v8  ;;  %v6803_v8 = vld [vmem:[%s11843_s12 + $0x178] sm:$0xff] }
 0x6d5   :  { %v5257_v0 = vmul.f32 %v12584_v6, %v5236_v37  ;;  %v5199_v33 = vpop.permute.xlu1 %5198  ;;  %v12586_v37 = vld [vmem:[#allocation11_spill] sm:$0xff] }
 0x6d6   :  { %v5201_v17 = vsel %vm1361_vm8, %v5195_v49, %v5199_v33  ;;  %v5207_v26 = vsel %vm1361_vm8, %v5199_v33, %v12585_v31  ;;  %v10926_v49 = vrot.slane %v12586_v37, %v12262_v9  ;;  %v4849_v33 = vadd.f32 %v4841_v22, %v4766_v3 }
 0x6d7   :  { %5362 = vrot.lane.b32.xlu0 %v12464_v43, %s7342_s24  ;;  %v10918_v5 = vadd.f32 %v5257_v0, %v5182_v4  ;;  %v5234_v27 = vmul.f32 %v10891_v51, %v5207_v26  ;;  %v5237_v36 = vmul.f32 %v10896_v45, %v5201_v17  ;;  %v10930_v63 = vpop.permute.xlu0 %5658  ;;  %v4956_v4 = vsel %vm1109_vm4, %v12556_v25, %v12552_v54 }
 0x6d8   :  { %5696 = vrot.lane.b32.xlu1 %v9502_v52, %s12358_s7  ;;  %12587 = vst [vmem:[#allocation31_spill] sm:$0xff] %v10930_v63  ;;  %v4924_v37 = vmul.f32 %v12548_v18, %v4903_v38  ;;  %v4986_v45 = vmul.f32 %v10926_v49, %v4956_v4  ;;  %v10947_v54 = vrot.slane %v10666_v32, %v12262_v9 }
 0x6d9   :  { %v5255_v0 = vmul.f32 %v12584_v6, %v5234_v27  ;;  %v5258_v13 = vmul.f32 %v12584_v6, %v5237_v36  ;;  %v5274_v47 = vpop.permute.xlu1 %5273  ;;  %v5039_v3 = vsel %vm1193_vm3, %v12562_v39, %v12558_v29  ;;  %v5122_v39 = vsel %vm1277_vm2, %v12572_v41, %v12565_v20 }
 0x6da   :  { %v4932_v36 = vadd.f32 %v4924_v37, %v4849_v33  ;;  %v5007_v18 = vmul.f32 %v12554_v1, %v4986_v45  ;;  %v5069_v32 = vmul.f32 %v10947_v54, %v5039_v3  ;;  %v10981_v4 = vrot.slane %v10849_v14, %v12262_v9  ;;  %v6783_v14 = vld [vmem:[%s11837_s1 + $0x44] sm:$0xf] }
 0x6db   :  { %5441 = vrot.lane.b32.xlu0 %v12458_v23, %s7341_s27  ;;  %v5263_v17 = vadd.f32 %v5255_v0, %v5180_v53  ;;  %v5266_v26 = vadd.f32 %v5258_v13, %v5183_v44  ;;  %v10949_v25 = vpop.permute.xlu0 %5682  ;;  %v10963_v44 = vrot.slane %v10789_v42, %v12262_v9  ;;  %v5205_v41 = vsel %vm1361_vm8, %v12585_v31, %v12579_v61 }
 0x6dc   :  { %5829 = vperm.xlu1 %7199, %v6803_v8   ;;  %12588 = vst [vmem:[#allocation10_spill] sm:$0xff] %v10949_v25  ;;  %v5015_v45 = vadd.f32 %v5007_v18, %v4932_v36  ;;  %v5090_v42 = vmul.f32 %v12561_v40, %v5069_v32  ;;  %v5235_v13 = vmul.f32 %v10981_v4, %v5205_v41 }
 0x6dd   :  { %v5278_v27 = vpop.permute.xlu1 %5277  ;;  %v5152_v38 = vmul.f32 %v10963_v44, %v5122_v39  ;;  %v11003_v33 = vrot.slane %v6783_v14, %v12262_v9  ;;  %v11006_v61 = vrot.slane %v6783_v14, %v7599_v15  ;;  %v11009_v31 = vrot.slane %v6783_v14, %v7589_v11 }
 0x6de   :  { %v5286_v53 = vsel %vm1445_vm15, %v5274_v47, %v5278_v27  ;;  %v5098_v40 = vadd.f32 %v5090_v42, %v5015_v45  ;;  %v11020_v36 = vrot.slane %v6783_v14, %v12510_v60  ;;  %v5256_v18 = vmul.f32 %v12584_v6, %v5235_v13  ;;  %v6806_v42 = vld [vmem:[%s11843_s12 + $0x188] sm:$0xff] }
 0x6df   :  { %5445 = vrot.lane.b32.xlu0 %v12464_v43, %s7341_s27  ;;  %v10967_v29 = vpop.permute.xlu0 %5686  ;;  %v5173_v0 = vmul.f32 %v12571_v2, %v5152_v38  ;;  %12592 = vst [vmem:[#allocation89_spill] sm:$0xff] %v11003_v33  ;;  %12593 = vst [vmem:[#allocation33_spill] sm:$0xff] %v11006_v61  ;;  %v12595_v2 = vld [vmem:[#allocation88_spill] sm:$0xff]  ;;  %v5318_v39 = vmul.f32 %v11003_v33, %v5286_v53  ;;  %v12620_v33 = vld [vmem:[#allocation5_spill] sm:$0xff] }
 0x6e0   :  { %5767 = vrot.lane.b32.xlu1 %v12418_v30, %s12394_s0  ;;  %12589 = vst [vmem:[#allocation103_spill] sm:$0xff] %v10967_v29  ;;  %12594 = vst [vmem:[#allocation94_spill] sm:$0xff] %v11009_v31  ;;  %v5288_v37 = vsel %vm1445_vm15, %v12595_v2, %v5274_v47 }
 0x6e1   :  { %v5282_v22 = vpop.permute.xlu1 %5281  ;;  %v5317_v47 = vmul.f32 %v11020_v36, %v5288_v37 }
 0x6e2   :  { %v5284_v1 = vsel %vm1445_vm15, %v5278_v27, %v5282_v22  ;;  %v5290_v3 = vsel %vm1445_vm15, %v5282_v22, %v12595_v2  ;;  %v5181_v27 = vadd.f32 %v5173_v0, %v5098_v40 }
 0x6e3   :  { %5524 = vrot.lane.b32.xlu0 %v12458_v23, %s12325_s22  ;;  %v10985_v20 = vpop.permute.xlu0 %5746  ;;  %v5319_v22 = vmul.f32 %v11006_v61, %v5284_v1  ;;  %v5320_v45 = vmul.f32 %v11009_v31, %v5290_v3 }
 0x6e4   :  { %5771 = vrot.lane.b32.xlu1 %v9285_v24, %s12394_s0  ;;  %12590 = vst [vmem:[#allocation26_spill] sm:$0xff] %v10985_v20  ;;  %v5264_v6 = vadd.f32 %v5256_v18, %v5181_v27 }
 0x6e7   :  { %5528 = vrot.lane.b32.xlu0 %v12464_v43, %s12325_s22  ;;  %v11000_v8 = vpop.permute.xlu0 %5824 }
 0x6e8   :  { %5775 = vrot.lane.b32.xlu1 %v9476_v57, %s12394_s0  ;;  %12591 = vst [vmem:[#allocation28_spill] sm:$0xff] %v11000_v8 }
 0x6eb   :  { %5607 = vrot.lane.b32.xlu0 %v12458_v23, %s12332_s8  ;;  %v11025_v32 = vpop.permute.xlu0 %5765 }
 0x6ec   :  { %5779 = vrot.lane.b32.xlu1 %v9502_v52, %s12394_s0  ;;  %12596 = vst [vmem:[#allocation122_spill] sm:$0xff] %v11025_v32  ;;  %v5332_v38 = vpop.permute.xlu1 %5331 }
 0x6ed   :  { %v5338_v41 = vmul.f32 %v5332_v38, %v5317_v47  ;;  %v5339_v40 = vmul.f32 %v5332_v38, %v5318_v39  ;;  %v5340_v0 = vmul.f32 %v5332_v38, %v5319_v22  ;;  %v5341_v13 = vmul.f32 %v5332_v38, %v5320_v45 }
 0x6ef   :  { %5611 = vrot.lane.b32.xlu0 %v12464_v43, %s12332_s8  ;;  %v11036_v14 = vpop.permute.xlu0 %5769  ;;  %v5346_v53 = vadd.f32 %v5338_v41, %v5263_v17  ;;  %v5347_v1 = vadd.f32 %v5339_v40, %v5264_v6  ;;  %v5348_v2 = vadd.f32 %v5340_v0, %v10918_v5  ;;  %v5349_v37 = vadd.f32 %v5341_v13, %v5266_v26 }
 0x6f0   :  { %5912 = vperm.xlu1 %7199, %v6806_v42   ;;  %12597 = vst [vmem:[#allocation51_spill] sm:$0xff] %v11036_v14  ;;  %v5353_v3 = vpop.permute.xlu1 %5352  ;;  %v12624_v14 = vld [vmem:[#allocation40_spill] sm:$0xff] }
 0x6f3   :  { %5690 = vrot.lane.b32.xlu0 %v12458_v23, %s12358_s7  ;;  %v11043_v27 = vpop.permute.xlu0 %5907 }
 0x6f4   :  { %5850 = vrot.lane.b32.xlu1 %v12418_v30, %s12174_s21  ;;  %12598 = vst [vmem:[#allocation6_spill] sm:$0xff] %v11043_v27  ;;  %v5357_v18 = vpop.permute.xlu1 %5356  ;;  %v6786_v30 = vld [vmem:[%s11837_s1 + $0x48] sm:$0xf]  ;;  %v12611_v27 = vld [vmem:[#allocation63_spill] sm:$0xff] }
 0x6f5   :  { %v5371_v17 = vsel %vm1529_vm14, %v5353_v3, %v5357_v18  ;;  %v11068_v22 = vrot.slane %v6786_v30, %v7589_v11  ;;  %v11071_v45 = vrot.slane %v6786_v30, %v12262_v9  ;;  %v11076_v6 = vrot.slane %v6786_v30, %v12510_v60 }
 0x6f7   :  { %5694 = vrot.lane.b32.xlu0 %v12464_v43, %s12358_s7  ;;  %v11051_v5 = vpop.permute.xlu0 %5848  ;;  %12602 = vst [vmem:[#allocation102_spill] sm:$0xff] %v11068_v22  ;;  %12603 = vst [vmem:[#allocation8_spill] sm:$0xff] %v11071_v45  ;;  %v5400_v13 = vmul.f32 %v11076_v6, %v5371_v17 }
 0x6f8   :  { %5854 = vrot.lane.b32.xlu1 %v9285_v24, %s12174_s21  ;;  %12599 = vst [vmem:[#allocation45_spill] sm:$0xff] %v11051_v5  ;;  %v5361_v26 = vpop.permute.xlu1 %5360  ;;  %v11065_v24 = vrot.slane %v6786_v30, %v7599_v15 }
 0x6f9   :  { %v5369_v47 = vsel %vm1529_vm14, %v5357_v18, %v5361_v26 }
 0x6fa   :  { %12601 = vst [vmem:[#allocation35_spill] sm:$0xff] %v11065_v24  ;;  %v5401_v18 = vmul.f32 %v11071_v45, %v5369_v47  ;;  %v12612_v45 = vld [vmem:[#allocation9_spill] sm:$0xff] }
 0x6fb   :  { %5773 = vrot.lane.b32.xlu0 %v12458_v23, %s12394_s0  ;;  %v11062_v39 = vpop.permute.xlu0 %5852 }
 0x6fc   :  { %5858 = vrot.lane.b32.xlu1 %v9476_v57, %s12174_s21  ;;  %12600 = vst [vmem:[#allocation44_spill] sm:$0xff] %v11062_v39  ;;  %v5365_v42 = vpop.permute.xlu1 %5364 }
 0x6fd   :  { %v5367_v57 = vsel %vm1529_vm14, %v5361_v26, %v5365_v42  ;;  %v5373_v38 = vsel %vm1529_vm14, %v5365_v42, %v5353_v3  ;;  %v5970_v26 = vld [vmem:[%s11848_s11 + $0x8] sm:$0xff] }
 0x6fe   :  { %v5402_v41 = vmul.f32 %v11065_v24, %v5367_v57  ;;  %v5403_v40 = vmul.f32 %v11068_v22, %v5373_v38  ;;  %v6316_v24 = vld [vmem:[%s11849_s13 + $0x8] sm:$0xff] }
 0x6ff   :  { %5777 = vrot.lane.b32.xlu0 %v12464_v43, %s12394_s0  ;;  %v11086_v0 = vpop.permute.xlu0 %5973 }
 0x700   :  { %5862 = vrot.lane.b32.xlu1 %v9502_v52, %s12174_s21  ;;  %12604 = vst [vmem:[#allocation58_spill] sm:$0xff] %v11086_v0 }
 0x702   :  { %v5415_v3 = vpop.permute.xlu1 %5414 }
 0x703   :  { %5856 = vrot.lane.b32.xlu0 %v12458_v23, %s12174_s21  ;;  %v5421_v30 = vmul.f32 %v5415_v3, %v5400_v13  ;;  %v5422_v42 = vmul.f32 %v5415_v3, %v5401_v18  ;;  %v5423_v57 = vmul.f32 %v5415_v3, %v5402_v41  ;;  %v5424_v38 = vmul.f32 %v5415_v3, %v5403_v40  ;;  %v4612_v52 = vpop.permute.xlu0 %4611  ;;  %v12605_v23 = vld [vmem:[#allocation59_spill] sm:$0xff]  ;;  %v12608_v3 = vld [vmem:[#allocation57_spill] sm:$0xff] }
 0x704   :  { %5978 = vperm.xlu1 %7199, %v5970_v26   ;;  %v4621_v13 = vsel %vm773_vm0, %v12605_v23, %v4612_v52 }
 0x705   :  { %v11095_v22 = vadd.f32 %v5421_v30, %v5346_v53  ;;  %v11097_v0 = vadd.f32 %v5422_v42, %v5347_v1  ;;  %v11099_v17 = vadd.f32 %v5423_v57, %v5348_v2  ;;  %v11101_v47 = vadd.f32 %v5424_v38, %v5349_v37  ;;  %v12606_v53 = vld [vmem:[#allocation46_spill] sm:$0xff]  ;;  %v6315_v1 = vld [vmem:[%s11849_s13] sm:$0xff]  ;;  %v12609_v42 = vld [vmem:[#allocation47_spill] sm:$0xff] }
 0x706   :  { %v5436_v41 = vpop.permute.xlu1 %5435  ;;  %v4651_v40 = vmul.f32 %v12606_v53, %v4621_v13  ;;  %v12607_v37 = vld [vmem:[#allocation38_spill] sm:$0xff] }
 0x707   :  { %5860 = vrot.lane.b32.xlu0 %v12464_v43, %s12174_s21  ;;  %v4616_v2 = vpop.permute.xlu0 %4615  ;;  %v12610_v57 = vld [vmem:[#allocation34_spill] sm:$0xff] }
 0x708   :  { %6324 = vperm.xlu1 %7199, %v6316_v24   ;;  %v4672_v18 = vmul.f32 %v12607_v37, %v4651_v40  ;;  %v4619_v26 = vsel %vm773_vm0, %v4612_v52, %v4616_v2  ;;  %v4625_v30 = vsel %vm773_vm0, %v4616_v2, %v12608_v3 }
 0x709   :  { %v4649_v43 = vmul.f32 %v12609_v42, %v4625_v30  ;;  %v4652_v38 = vmul.f32 %v12610_v57, %v4619_v26 }
 0x70a   :  { %v5440_v13 = vpop.permute.xlu1 %5439  ;;  %v4680_v53 = vadd.f32 %v4672_v18, %v10746_v48  ;;  %v6789_v48 = vld [vmem:[%s11837_s1 + $0x4c] sm:$0xf] }
 0x70b   :  { %6319 = vperm.xlu0 %7198, %v6315_v1   ;;  %v5454_v24 = vsel %vm1613_vm13, %v5436_v41, %v5440_v13  ;;  %v4670_v40 = vmul.f32 %v12607_v37, %v4649_v43  ;;  %v4673_v20 = vmul.f32 %v12607_v37, %v4652_v38  ;;  %v4695_v52 = vpop.permute.xlu0 %4694  ;;  %v12613_v1 = vld [vmem:[#allocation92_spill] sm:$0xff]  ;;  %v12614_v43 = vld [vmem:[#allocation39_spill] sm:$0xff]  ;;  %v11141_v61 = vrot.slane %v6789_v48, %v7599_v15 }
 0x70c   :  { %v4704_v2 = vsel %vm857_vm7, %v12611_v27, %v4695_v52  ;;  %v11157_v5 = vrot.slane %v6789_v48, %v12510_v60 }
 0x70d   :  { %v4678_v30 = vadd.f32 %v4670_v40, %v12612_v45  ;;  %v4681_v26 = vadd.f32 %v4673_v20, %v10749_v58  ;;  %v4734_v42 = vmul.f32 %v12613_v1, %v4704_v2  ;;  %12615 = vst [vmem:[#allocation24_spill] sm:$0xff] %v11141_v61  ;;  %v12616_v58 = vld [vmem:[#allocation61_spill] sm:$0xff]  ;;  %v11149_v40 = vrot.slane %v6789_v48, %v7589_v11 }
 0x70e   :  { %v5444_v57 = vpop.permute.xlu1 %5443  ;;  %v11152_v1 = vrot.slane %v6789_v48, %v12262_v9  ;;  %12621 = vst [vmem:[#allocation115_spill] sm:$0xff] %v11157_v5 }
 0x70f   :  { %v5452_v18 = vsel %vm1613_vm13, %v5440_v13, %v5444_v57  ;;  %v4755_v38 = vmul.f32 %v12614_v43, %v4734_v42  ;;  %v4699_v31 = vpop.permute.xlu0 %4698  ;;  %12617 = vst [vmem:[#allocation23_spill] sm:$0xff] %v11149_v40  ;;  %v12619_v13 = vld [vmem:[#allocation93_spill] sm:$0xff] }
 0x710   :  { %v4702_v45 = vsel %vm857_vm7, %v4695_v52, %v4699_v31  ;;  %v4708_v20 = vsel %vm857_vm7, %v4699_v31, %v12616_v58  ;;  %12618 = vst [vmem:[#allocation117_spill] sm:$0xff] %v11152_v1 }
 0x711   :  { %v4763_v2 = vadd.f32 %v4755_v38, %v4680_v53  ;;  %v4732_v42 = vmul.f32 %v12619_v13, %v4708_v20  ;;  %v4735_v8 = vmul.f32 %v12620_v33, %v4702_v45  ;;  %v5483_v20 = vmul.f32 %v11157_v5, %v5454_v24  ;;  %v12622_v45 = vld [vmem:[#allocation67_spill] sm:$0xff] }
 0x712   :  { %v5448_v7 = vpop.permute.xlu1 %5447 }
 0x713   :  { %v5450_v52 = vsel %vm1613_vm13, %v5444_v57, %v5448_v7  ;;  %v5456_v31 = vsel %vm1613_vm13, %v5448_v7, %v5436_v41  ;;  %v4753_v39 = vmul.f32 %v12614_v43, %v4732_v42  ;;  %v4756_v53 = vmul.f32 %v12614_v43, %v4735_v8  ;;  %v4778_v63 = vpop.permute.xlu0 %4777  ;;  %v12623_v7 = vld [vmem:[#allocation97_spill] sm:$0xff] }
 0x714   :  { %v5485_v38 = vmul.f32 %v11141_v61, %v5450_v52  ;;  %v5486_v33 = vmul.f32 %v11149_v40, %v5456_v31  ;;  %v4787_v48 = vsel %vm941_vm6, %v12622_v45, %v4778_v63  ;;  %v5484_v57 = vmul.f32 %v11152_v1, %v5452_v18  ;;  %v12625_v40 = vld [vmem:[#allocation65_spill] sm:$0xff] }
 0x715   :  { %v4761_v13 = vadd.f32 %v4753_v39, %v4678_v30  ;;  %v4764_v32 = vadd.f32 %v4756_v53, %v4681_v26  ;;  %v4817_v41 = vmul.f32 %v12623_v7, %v4787_v48 }
 0x717   :  { %v5498_v42 = vpop.permute.xlu1 %5497  ;;  %v4838_v8 = vmul.f32 %v12624_v14, %v4817_v41  ;;  %v4782_v29 = vpop.permute.xlu0 %4781 }
 0x718   :  { %v5504_v25 = vmul.f32 %v5498_v42, %v5483_v20  ;;  %v5505_v52 = vmul.f32 %v5498_v42, %v5484_v57  ;;  %v5506_v61 = vmul.f32 %v5498_v42, %v5485_v38  ;;  %v5507_v24 = vmul.f32 %v5498_v42, %v5486_v33  ;;  %v12626_v20 = vld [vmem:[#allocation107_spill] sm:$0xff] }
 0x719   :  { %v4785_v31 = vsel %vm941_vm6, %v4778_v63, %v4782_v29  ;;  %v4791_v34 = vsel %vm941_vm6, %v4782_v29, %v12625_v40  ;;  %v4846_v18 = vadd.f32 %v4838_v8, %v4763_v2  ;;  %v12627_v29 = vld [vmem:[#allocation71_spill] sm:$0xff]  ;;  %v12631_v8 = vld [vmem:[#allocation69_spill] sm:$0xff] }
 0x71a   :  { %v5512_v39 = vadd.f32 %v5504_v25, %v11095_v22  ;;  %v5513_v30 = vadd.f32 %v5505_v52, %v11097_v0  ;;  %v5514_v26 = vadd.f32 %v5506_v61, %v11099_v17  ;;  %v5515_v53 = vadd.f32 %v5507_v24, %v11101_v47  ;;  %v12628_v22 = vld [vmem:[#allocation99_spill] sm:$0xff]  ;;  %v12629_v47 = vld [vmem:[#allocation17_spill] sm:$0xff]  ;;  %v6792_v24 = vld [vmem:[%s11837_s1 + $0x50] sm:$0xf] }
 0x71b   :  { %v4815_v38 = vmul.f32 %v10586_v55, %v4791_v34  ;;  %v4818_v33 = vmul.f32 %v12626_v20, %v4785_v31  ;;  %v5519_v48 = vpop.permute.xlu1 %5518  ;;  %v4861_v57 = vpop.permute.xlu0 %4860 }
 0x71c   :  { %v4870_v25 = vsel %vm1025_vm5, %v12627_v29, %v4861_v57 }
 0x71d   :  { %v4836_v63 = vmul.f32 %v12624_v14, %v4815_v38  ;;  %v4839_v7 = vmul.f32 %v12624_v14, %v4818_v33  ;;  %v4900_v0 = vmul.f32 %v12628_v22, %v4870_v25  ;;  %v12634_v25 = vld [vmem:[#allocation75_spill] sm:$0xff] }
 0x71f   :  { %v4844_v2 = vadd.f32 %v4836_v63, %v4761_v13  ;;  %v4847_v61 = vadd.f32 %v4839_v7, %v4764_v32  ;;  %v5523_v17 = vpop.permute.xlu1 %5522  ;;  %v4921_v41 = vmul.f32 %v12629_v47, %v4900_v0  ;;  %v4865_v34 = vpop.permute.xlu0 %4864  ;;  %v11209_v7 = vrot.slane %v6792_v24, %v12510_v60 }
 0x720   :  { %v5537_v55 = vsel %vm12630_vm12, %v5519_v48, %v5523_v17  ;;  %v4868_v42 = vsel %vm1025_vm5, %v4861_v57, %v4865_v34  ;;  %v4874_v52 = vsel %vm1025_vm5, %v4865_v34, %v12631_v8  ;;  %vm12694_vm12 = vcmp.lt.s32.totalorder %v7583_v10, 94 }
 0x721   :  { %v4929_v13 = vadd.f32 %v4921_v41, %v4846_v18  ;;  %v4898_v32 = vmul.f32 %v10622_v21, %v4874_v52  ;;  %v4901_v31 = vmul.f32 %v10639_v35, %v4868_v42  ;;  %12633 = vst [vmem:[#allocation4_spill] sm:$0xff] %v11209_v7  ;;  %v11215_v21 = vrot.slane %v6792_v24, %v7599_v15  ;;  %v12637_v52 = vld [vmem:[#allocation18_spill] sm:$0xff] }
 0x722   :  { %v11218_v35 = vrot.slane %v6792_v24, %v7589_v11  ;;  %v11221_v41 = vrot.slane %v6792_v24, %v12262_v9  ;;  %v5566_v42 = vmul.f32 %v11209_v7, %v5537_v55  ;;  %v12641_v7 = vld [vmem:[#allocation79_spill] sm:$0xff] }
 0x723   :  { %v5527_v38 = vpop.permute.xlu1 %5526  ;;  %v4919_v20 = vmul.f32 %v12629_v47, %v4898_v32  ;;  %v4922_v33 = vmul.f32 %v12629_v47, %v4901_v31  ;;  %v4944_v63 = vpop.permute.xlu0 %4943  ;;  %12635 = vst [vmem:[#allocation120_spill] sm:$0xff] %v11215_v21 }
 0x724   :  { %v5535_v57 = vsel %vm12632_vm9, %v5523_v17, %v5527_v38  ;;  %v4953_v18 = vsel %vm1109_vm4, %v12634_v25, %v4944_v63  ;;  %12636 = vst [vmem:[#allocation119_spill] sm:$0xff] %v11218_v35 }
 0x725   :  { %v4927_v22 = vadd.f32 %v4919_v20, %v4844_v2  ;;  %v4930_v0 = vadd.f32 %v4922_v33, %v4847_v61  ;;  %v4983_v17 = vmul.f32 %v10645_v28, %v4953_v18  ;;  %v12640_v28 = vld [vmem:[#allocation73_spill] sm:$0xff]  ;;  %v5567_v20 = vmul.f32 %v11221_v41, %v5535_v57 }
 0x727   :  { %v5531_v34 = vpop.permute.xlu1 %5530  ;;  %v5004_v32 = vmul.f32 %v12637_v52, %v4983_v17  ;;  %v4948_v5 = vpop.permute.xlu0 %4947 }
 0x728   :  { %v5533_v31 = vsel %vm12638_vm10, %v5527_v38, %v5531_v34  ;;  %v5539_v1 = vsel %vm12639_vm11, %v5531_v34, %v5519_v48  ;;  %v4951_v24 = vsel %vm1109_vm4, %v4944_v63, %v4948_v5  ;;  %v4957_v55 = vsel %vm1109_vm4, %v4948_v5, %v12640_v28 }
 0x729   :  { %v5568_v2 = vmul.f32 %v11215_v21, %v5533_v31  ;;  %v5569_v61 = vmul.f32 %v11218_v35, %v5539_v1  ;;  %v5012_v33 = vadd.f32 %v5004_v32, %v4929_v13  ;;  %v4981_v38 = vmul.f32 %v10649_v59, %v4957_v55 }
 0x72a   :  { %v4984_v18 = vmul.f32 %v10661_v62, %v4951_v24 }
 0x72b   :  { %v5581_v48 = vpop.permute.xlu1 %5580  ;;  %v5002_v17 = vmul.f32 %v12637_v52, %v4981_v38  ;;  %v5027_v35 = vpop.permute.xlu0 %5026 }
 0x72c   :  { %v5005_v34 = vmul.f32 %v12637_v52, %v4984_v18  ;;  %v5587_v1 = vmul.f32 %v5581_v48, %v5566_v42  ;;  %v5588_v31 = vmul.f32 %v5581_v48, %v5567_v20  ;;  %v5589_v63 = vmul.f32 %v5581_v48, %v5568_v2 }
 0x72d   :  { %v5590_v21 = vmul.f32 %v5581_v48, %v5569_v61  ;;  %v5036_v5 = vsel %vm1193_vm3, %v12641_v7, %v5027_v35  ;;  %v11245_v57 = vadd.f32 %v5002_v17, %v4927_v22  ;;  %v4623_v42 = vsel %vm773_vm0, %v12608_v3, %v12605_v23  ;;  %v12642_v61 = vld [vmem:[#allocation41_spill] sm:$0xff] }
 0x72e   :  { %v5013_v13 = vadd.f32 %v5005_v34, %v4930_v0  ;;  %v5595_v59 = vadd.f32 %v5587_v1, %v5512_v39  ;;  %v5596_v32 = vadd.f32 %v5588_v31, %v5513_v30  ;;  %v5597_v62 = vadd.f32 %v5589_v63, %v5514_v26  ;;  %v12645_v48 = vld [vmem:[#allocation29_spill] sm:$0xff] }
 0x72f   :  { %v5598_v24 = vadd.f32 %v5590_v21, %v5515_v53  ;;  %v5066_v55 = vmul.f32 %v10680_v46, %v5036_v5  ;;  %v5602_v38 = vpop.permute.xlu1 %5601  ;;  %v5031_v2 = vpop.permute.xlu0 %5030  ;;  %v4650_v39 = vmul.f32 %v10806_v16, %v4623_v42  ;;  %v4706_v46 = vsel %vm857_vm7, %v12616_v58, %v12611_v27  ;;  %v6795_v27 = vld [vmem:[%s11837_s1 + $0x54] sm:$0xf] }
 0x730   :  { %v5034_v22 = vsel %vm1193_vm3, %v5027_v35, %v5031_v2  ;;  %vm12643_vm0 = vcmp.lt.s32.totalorder %v7583_v10, 97  ;;  %v4733_v16 = vmul.f32 %v10835_v50, %v4706_v46  ;;  %v11288_v50 = vrot.slane %v6795_v27, %v7589_v11 }
 0x731   :  { %v5087_v20 = vmul.f32 %v12642_v61, %v5066_v55  ;;  %v5067_v0 = vmul.f32 %v10781_v12, %v5034_v22  ;;  %v4671_v12 = vmul.f32 %v12607_v37, %v4650_v39  ;;  %vm12644_vm7 = vmmov %vm12643_vm0  ;;  %v11285_v37 = vrot.slane %v6795_v27, %v7599_v15  ;;  %v12651_v39 = vld [vmem:[#allocation77_spill] sm:$0xff] }
 0x732   :  { %12647 = vst [vmem:[#allocation118_spill] sm:$0xff] %v11288_v50  ;;  %v11291_v34 = vrot.slane %v6795_v27, %v12262_v9  ;;  %v4872_v31 = vsel %vm1025_vm5, %v12631_v8, %v12627_v29  ;;  %v11300_v63 = vrot.slane %v6795_v27, %v12510_v60  ;;  %vm12650_vm1 = vmmov %vm12643_vm0  ;;  %vm12683_vm5 = vcmp.lt.s32.totalorder %v7583_v10, 96 }
 0x733   :  { %v11257_v30 = vadd.f32 %v5087_v20, %v5012_v33  ;;  %v5606_v26 = vpop.permute.xlu1 %5605  ;;  %v5088_v23 = vmul.f32 %v12642_v61, %v5067_v0  ;;  %v11266_v53 = vpop.permute.xlu0 %5109  ;;  %v4789_v33 = vsel %vm941_vm6, %v12625_v40, %v12622_v45  ;;  %v4679_v17 = vadd.f32 %v4671_v12, %v12645_v48  ;;  %12646 = vst [vmem:[#allocation56_spill] sm:$0xff] %v11285_v37  ;;  %vm12649_vm6 = vmmov %vm12643_vm0 }
 0x734   :  { %v5620_v3 = vsel %vm12643_vm0, %v5602_v38, %v5606_v26  ;;  %12648 = vst [vmem:[#allocation116_spill] sm:$0xff] %v11291_v34  ;;  %v4754_v40 = vmul.f32 %v12614_v43, %v4733_v16  ;;  %v4816_v45 = vmul.f32 %v10868_v56, %v4789_v33  ;;  %v4899_v22 = vmul.f32 %v10902_v19, %v4872_v31  ;;  %vm12710_vm10 = vmmov %vm12683_vm5 }
 0x735   :  { %v11268_v21 = vadd.f32 %v5088_v23, %v5013_v13  ;;  %v5649_v20 = vmul.f32 %v11300_v63, %v5620_v3  ;;  %v4955_v3 = vsel %vm1109_vm4, %v12640_v28, %v12634_v25  ;;  %vm12675_vm4 = vmmov %vm12643_vm0 }
 0x736   :  { %v4762_v43 = vadd.f32 %v4754_v40, %v4679_v17  ;;  %v4837_v8 = vmul.f32 %v12624_v14, %v4816_v45  ;;  %v12652_v14 = vld [vmem:[#allocation81_spill] sm:$0xff]  ;;  %v4920_v25 = vmul.f32 %v12629_v47, %v4899_v22  ;;  %v4982_v28 = vmul.f32 %v10926_v49, %v4955_v3  ;;  %v12663_v3 = vld [vmem:[#allocation87_spill] sm:$0xff] }
 0x737   :  { %v5610_v35 = vpop.permute.xlu1 %5609  ;;  %v11281_v18 = vpop.permute.xlu0 %5113  ;;  %v12656_v45 = vld [vmem:[#allocation85_spill] sm:$0xff] }
 0x738   :  { %v5618_v58 = vsel %vm12644_vm7, %v5606_v26, %v5610_v35  ;;  %v4845_v16 = vadd.f32 %v4837_v8, %v4762_v43  ;;  %v5123_v19 = vsel %vm1277_vm2, %v11281_v18, %v12652_v14 }
 0x739   :  { %v5650_v29 = vmul.f32 %v11291_v34, %v5618_v58  ;;  %v12654_v58 = vld [vmem:[#allocation13_spill] sm:$0xff] }
 0x73a   :  { %v4928_v31 = vadd.f32 %v4920_v25, %v4845_v16 }
 0x73b   :  { %v5614_v1 = vpop.permute.xlu1 %5613  ;;  %v11306_v55 = vpop.permute.xlu0 %5192 }
 0x73c   :  { %v5616_v5 = vsel %vm12649_vm6, %v5610_v35, %v5614_v1  ;;  %v5622_v13 = vsel %vm12650_vm1, %v5614_v1, %v5602_v38  ;;  %v5040_v38 = vsel %vm1193_vm3, %v5031_v2, %v12651_v39  ;;  %vm12726_vm6 = vmmov %vm12650_vm1 }
 0x73d   :  { %v5651_v56 = vmul.f32 %v11285_v37, %v5616_v5  ;;  %v5652_v42 = vmul.f32 %v11288_v50, %v5622_v13  ;;  %v5064_v48 = vmul.f32 %v12654_v58, %v5040_v38  ;;  %v5003_v13 = vmul.f32 %v12637_v52, %v4982_v28  ;;  %v12661_v38 = vld [vmem:[#allocation21_spill] sm:$0xff] }
 0x73f   :  { %v5664_v0 = vpop.permute.xlu1 %5663  ;;  %v11317_v12 = vpop.permute.xlu0 %5196  ;;  %v5085_v5 = vmul.f32 %v12642_v61, %v5064_v48  ;;  %v5011_v8 = vadd.f32 %v5003_v13, %v4928_v31 }
 0x740   :  { %v5670_v26 = vmul.f32 %v5664_v0, %v5649_v20  ;;  %v5671_v46 = vmul.f32 %v5664_v0, %v5650_v29  ;;  %v5672_v23 = vmul.f32 %v5664_v0, %v5651_v56  ;;  %v5673_v35 = vmul.f32 %v5664_v0, %v5652_v42  ;;  %v12658_v42 = vld [vmem:[#allocation83_spill] sm:$0xff]  ;;  %v12659_v20 = vld [vmem:[#allocation42_spill] sm:$0xff] }
 0x741   :  { %v5093_v22 = vadd.f32 %v5085_v5, %v11245_v57  ;;  %v12660_v0 = vld [vmem:[#allocation22_spill] sm:$0xff]  ;;  %v5204_v57 = vsel %vm1361_vm8, %v12656_v45, %v12663_v3 }
 0x742   :  { %v11327_v33 = vadd.f32 %v5670_v26, %v5595_v59  ;;  %v11329_v2 = vadd.f32 %v5671_v46, %v5596_v32  ;;  %v11331_v27 = vadd.f32 %v5672_v23, %v5597_v62  ;;  %v11334_v17 = vadd.f32 %v5673_v35, %v5598_v24  ;;  %v12657_v62 = vld [vmem:[#allocation52_spill] sm:$0xff]  ;;  %v12662_v26 = vld [vmem:[#allocation91_spill] sm:$0xff] }
 0x743   :  { %v11336_v40 = vpop.permute.xlu1 %5684  ;;  %v5206_v59 = vsel %vm1361_vm8, %v11317_v12, %v12656_v45  ;;  %v11344_v1 = vpop.permute.xlu0 %5275  ;;  %v5038_v32 = vsel %vm1193_vm3, %v12651_v39, %v12641_v7  ;;  %v5147_v24 = vmul.f32 %v12657_v62, %v5123_v19  ;;  %v5121_v7 = vsel %vm1277_vm2, %v12652_v14, %v12658_v42  ;;  %v12664_v35 = vld [vmem:[#allocation95_spill] sm:$0xff]  ;;  %v12665_v14 = vld [vmem:[#allocation32_spill] sm:$0xff]  ;;  %vm12670_vm3 = vmmov %vm12632_vm9 }
 0x744   :  { %12653 = vst [vmem:[#allocation113_spill] sm:$0xff] %v11331_v27  ;;  %12655 = vst [vmem:[#allocation110_spill] sm:$0xff] %v11334_v17  ;;  %v5230_v47 = vmul.f32 %v10891_v51, %v5206_v59  ;;  %v5065_v43 = vmul.f32 %v10947_v54, %v5038_v32  ;;  %v5148_v54 = vmul.f32 %v10963_v44, %v5121_v7  ;;  %v12666_v19 = vld [vmem:[#allocation12_spill] sm:$0xff]  ;;  %v12668_v62 = vld [vmem:[#allocation27_spill] sm:$0xff] }
 0x745   :  { %v5168_v29 = vmul.f32 %v12659_v20, %v5147_v24  ;;  %v5287_v46 = vsel %vm1445_vm15, %v12662_v26, %v12661_v38  ;;  %v12667_v44 = vld [vmem:[#allocation48_spill] sm:$0xff]  ;;  %v5231_v45 = vmul.f32 %v10981_v4, %v5204_v57  ;;  %v12669_v24 = vld [vmem:[#allocation25_spill] sm:$0xff]  ;;  %v12672_v7 = vld [vmem:[#allocation115_spill] sm:$0xff]  ;;  %v5119_v57 = vsel %vm1277_vm2, %v12658_v42, %v11266_v53 }
 0x746   :  { %v5251_v51 = vmul.f32 %v12660_v0, %v5230_v47  ;;  %v5086_v52 = vmul.f32 %v12642_v61, %v5065_v43  ;;  %v5370_v61 = vsel %vm1529_vm14, %v12665_v14, %v12664_v35  ;;  %v5453_v58 = vsel %vm1613_vm13, %v12667_v44, %v12666_v19  ;;  %v12671_v47 = vld [vmem:[#allocation54_spill] sm:$0xff]  ;;  %v6798_v4 = vld [vmem:[%s11837_s1 + $0x58] sm:$0xf]  ;;  %vm12698_vm9 = vmmov %vm12683_vm5 }
 0x747   :  { %v11353_v49 = vpop.permute.xlu1 %5688  ;;  %v11357_v56 = vpop.permute.xlu0 %5279  ;;  %v5176_v16 = vadd.f32 %v5168_v29, %v5093_v22  ;;  %v5313_v25 = vmul.f32 %v11020_v36, %v5287_v46  ;;  %v5169_v32 = vmul.f32 %v12659_v20, %v5148_v54  ;;  %v5536_v31 = vsel %vm12670_vm3, %v12669_v24, %v12668_v62  ;;  %v12673_v29 = vld [vmem:[#allocation7_spill] sm:$0xff]  ;;  %v12676_v54 = vld [vmem:[#allocation4_spill] sm:$0xff]  ;;  %v12687_v27 = vld [vmem:[#allocation122_spill] sm:$0xff] }
 0x748   :  { %v5094_v48 = vadd.f32 %v5086_v52, %v5011_v8  ;;  %v5396_v43 = vmul.f32 %v11076_v6, %v5370_v61  ;;  %v5479_v36 = vmul.f32 %v12672_v7, %v5453_v58  ;;  %v12674_v8 = vld [vmem:[#allocation100_spill] sm:$0xff]  ;;  %v5562_v46 = vmul.f32 %v12676_v54, %v5536_v31  ;;  %v12679_v54 = vld [vmem:[#allocation90_spill] sm:$0xff]  ;;  %v12686_v17 = vld [vmem:[#allocation51_spill] sm:$0xff] }
 0x749   :  { %v5259_v28 = vadd.f32 %v5251_v51, %v5176_v16  ;;  %v5334_v13 = vmul.f32 %v12671_v47, %v5313_v25  ;;  %v5619_v22 = vsel %vm12675_vm4, %v12674_v8, %v12673_v29  ;;  %v6801_v51 = vld [vmem:[%s11837_s1 + $0x5c] sm:$0xf]  ;;  %v11415_v52 = vld [vmem:[%s11837_s1 + $0x60] sm:$0xf]  ;;  %v5252_v58 = vmul.f32 %v12660_v0, %v5231_v45  ;;  %v12682_v45 = vld [vmem:[#allocation10_spill] sm:$0xff] }
 0x74a   :  { %v5177_v6 = vadd.f32 %v5169_v32, %v5094_v48  ;;  %v5645_v25 = vmul.f32 %v11300_v63, %v5619_v22  ;;  %v5711_v7 = vrot.slane %v6798_v4, %v12510_v60  ;;  %v11428_v50 = vrot.slane %v6801_v51, %v12510_v60  ;;  %v12678_v32 = vld [vmem:[#allocation49_spill] sm:$0xff]  ;;  %v12684_v22 = vld [vmem:[#allocation50_spill] sm:$0xff]  ;;  %vm12718_vm11 = vmmov %vm12670_vm3 }
 0x74b   :  { %v11366_v39 = vpop.permute.xlu1 %5692  ;;  %v11374_v23 = vpop.permute.xlu0 %5358  ;;  %v5342_v16 = vadd.f32 %v5334_v13, %v5259_v28  ;;  %v5417_v31 = vmul.f32 %v12678_v32, %v5396_v43  ;;  %v5500_v37 = vmul.f32 %v12679_v54, %v5479_v36  ;;  %v11436_v42 = vrot.slane %v11415_v52, %v12510_v60  ;;  %v12681_v28 = vld [vmem:[#allocation103_spill] sm:$0xff]  ;;  %v12685_v60 = vld [vmem:[#allocation121_spill] sm:$0xff]  ;;  %vm12720_vm0 = vmmov %vm12670_vm3 }
 0x74c   :  { %12677 = vst [vmem:[#allocation111_spill] sm:$0xff] %v11428_v50  ;;  %v5117_v63 = vsel %vm1277_vm2, %v11266_v53, %v11281_v18  ;;  %v5702_v13 = vsel %vm12683_vm5, %v12682_v45, %v12681_v28  ;;  %v5149_v8 = vmul.f32 %v12684_v22, %v5119_v57  ;;  %v5202_v43 = vsel %vm1361_vm8, %v12663_v3, %v11306_v55  ;;  %v12690_v57 = vld [vmem:[#allocation31_spill] sm:$0xff]  ;;  %v12691_v28 = vld [vmem:[#allocation108_spill] sm:$0xff] }
 0x74d   :  { %12680 = vst [vmem:[#allocation109_spill] sm:$0xff] %v11436_v42  ;;  %v11451_v36 = vadd.f32 %v5252_v58, %v5177_v6  ;;  %v5583_v34 = vmul.f32 %v12685_v60, %v5562_v46  ;;  %vm12688_vm2 = vcmp.lt.s32.totalorder %v7583_v10, 95  ;;  %v5425_v18 = vadd.f32 %v5417_v31, %v5342_v16  ;;  %v12692_v60 = vld [vmem:[#allocation44_spill] sm:$0xff]  ;;  %v12695_v31 = vld [vmem:[#allocation101_spill] sm:$0xff] }
 0x74e   :  { %v5785_v53 = vsel %vm12688_vm2, %v12687_v27, %v12686_v17  ;;  %v11459_v29 = vrot.slane %v6798_v4, %v12262_v9  ;;  %v5666_v22 = vmul.f32 %v12690_v57, %v5645_v25  ;;  %v5150_v54 = vmul.f32 %v12691_v28, %v5117_v63  ;;  %v12693_v27 = vld [vmem:[#allocation45_spill] sm:$0xff]  ;;  %vm12722_vm7 = vmmov %vm12688_vm2 }
 0x74f   :  { %v11389_v59 = vpop.permute.xlu1 %5741  ;;  %v11397_v5 = vpop.permute.xlu0 %5362  ;;  %v11466_v3 = vrot.slane %v6798_v4, %v7599_v15  ;;  %v11469_v6 = vrot.slane %v6798_v4, %v7589_v11  ;;  %v5728_v58 = vmul.f32 %v5711_v7, %v5702_v13  ;;  %v5868_v16 = vsel %vm12694_vm12, %v12693_v27, %v12692_v60  ;;  %v12700_v60 = vld [vmem:[#allocation30_spill] sm:$0xff]  ;;  %v12704_v57 = vld [vmem:[#allocation33_spill] sm:$0xff]  ;;  %vm12727_vm1 = vmmov %vm12688_vm2 }
 0x750   :  { %v5232_v17 = vmul.f32 %v12695_v31, %v5202_v43  ;;  %v5811_v25 = vmul.f32 %v11428_v50, %v5785_v53  ;;  %v5170_v63 = vmul.f32 %v12659_v20, %v5149_v8  ;;  %v5200_v4 = vsel %vm1361_vm8, %v11306_v55, %v11317_v12  ;;  %vm12701_vm8 = vmmov %vm12683_vm5 }
 0x751   :  { %v11486_v28 = vrot.slane %v6801_v51, %v7599_v15  ;;  %v5508_v13 = vadd.f32 %v5500_v37, %v5425_v18  ;;  %v5285_v43 = vsel %vm1445_vm15, %v12661_v38, %v11344_v1  ;;  %v5703_v53 = vsel %vm12698_vm9, %v11336_v40, %v11353_v49 }
 0x752   :  { %v5283_v8 = vsel %vm1445_vm15, %v11344_v1, %v11357_v56  ;;  %v5894_v12 = vmul.f32 %v11436_v42, %v5868_v16  ;;  %v5171_v37 = vmul.f32 %v12659_v20, %v5150_v54  ;;  %v5289_v38 = vsel %vm1445_vm15, %v11357_v56, %v12662_v26  ;;  %v12702_v56 = vld [vmem:[#allocation28_spill] sm:$0xff]  ;;  %v12703_v54 = vld [vmem:[#allocation89_spill] sm:$0xff]  ;;  %vm12709_vm15 = vmmov %vm12683_vm5 }
 0x753   :  { %v11422_v61 = vpop.permute.xlu1 %5696  ;;  %v11430_v48 = vpop.permute.xlu0 %5441  ;;  %12697 = vst [vmem:[#allocation112_spill] sm:$0xff] %v11486_v28  ;;  %v11511_v31 = vrot.slane %v6801_v51, %v7589_v11  ;;  %v5253_v27 = vmul.f32 %v12660_v0, %v5232_v17  ;;  %v5233_v1 = vmul.f32 %v12700_v60, %v5200_v4  ;;  %v5701_v16 = vsel %vm12701_vm8, %v11353_v49, %v11366_v39  ;;  %v12705_v60 = vld [vmem:[#allocation94_spill] sm:$0xff]  ;;  %vm12739_vm5 = vmmov %vm12675_vm4 }
 0x754   :  { %v5368_v20 = vsel %vm1529_vm14, %v12664_v35, %v11374_v23  ;;  %v5832_v26 = vmul.f32 %v12702_v56, %v5811_v25  ;;  %v5314_v42 = vmul.f32 %v12703_v54, %v5285_v43  ;;  %v5178_v17 = vadd.f32 %v5170_v63, %v11257_v30  ;;  %v12706_v35 = vld [vmem:[#allocation8_spill] sm:$0xff] }
 0x755   :  { %12699 = vst [vmem:[#allocation36_spill] sm:$0xff] %v11511_v31  ;;  %v5315_v31 = vmul.f32 %v12704_v57, %v5283_v8  ;;  %v5316_v4 = vmul.f32 %v12705_v60, %v5289_v38  ;;  %v5591_v28 = vadd.f32 %v5583_v34, %v5508_v13  ;;  %v11530_v49 = vrot.slane %v11415_v52, %v12262_v9  ;;  %v12707_v57 = vld [vmem:[#allocation6_spill] sm:$0xff] }
 0x756   :  { %v5733_v50 = vmul.f32 %v11459_v29, %v5701_v16  ;;  %v5397_v24 = vmul.f32 %v12706_v35, %v5368_v20  ;;  %v11540_v30 = vrot.slane %v11415_v52, %v7589_v11  ;;  %v11543_v34 = vmul.f32 %v12707_v57, %v5894_v12 }
 0x757   :  { %v11461_v45 = vpop.permute.xlu1 %5829  ;;  %v5446_v46 = vpop.permute.xlu0 %5445  ;;  %v5179_v63 = vadd.f32 %v5171_v37, %v11268_v21  ;;  %v5254_v13 = vmul.f32 %v12660_v0, %v5233_v1  ;;  %v5335_v43 = vmul.f32 %v12671_v47, %v5314_v42  ;;  %v5336_v38 = vmul.f32 %v12671_v47, %v5315_v31 }
 0x758   :  { %12689 = vst [vmem:[#allocation14_spill] sm:$0xff] %v11461_v45  ;;  %v11477_v45 = vrot.slane %v6801_v51, %v12262_v9  ;;  %v5732_v51 = vmul.f32 %v5711_v7, %v5703_v53  ;;  %v11536_v7 = vrot.slane %v11415_v52, %v7599_v15  ;;  %v5261_v9 = vadd.f32 %v5253_v27, %v5178_v17  ;;  %v12708_v53 = vld [vmem:[#allocation26_spill] sm:$0xff] }
 0x759   :  { %v5366_v11 = vsel %vm1529_vm14, %v11374_v23, %v11397_v5  ;;  %v5337_v15 = vmul.f32 %v12671_v47, %v5316_v4  ;;  %v5674_v52 = vadd.f32 %v5666_v22, %v5591_v28  ;;  %v5749_v12 = vmul.f32 %v11389_v59, %v5728_v58  ;;  %v12711_v58 = vld [vmem:[#allocation35_spill] sm:$0xff] }
 0x75a   :  { %12696 = vst [vmem:[#allocation114_spill] sm:$0xff] %v11477_v45  ;;  %v5753_v8 = vmul.f32 %v12708_v53, %v5732_v51  ;;  %v5372_v21 = vsel %vm1529_vm14, %v11397_v5, %v12665_v14  ;;  %v5754_v0 = vmul.f32 %v12708_v53, %v5733_v50  ;;  %v5418_v42 = vmul.f32 %v12678_v32, %v5397_v24  ;;  %vm12713_vm14 = vmmov %vm12670_vm3 }
 0x75b   :  { %v11500_v55 = vpop.permute.xlu1 %5767  ;;  %v11508_v18 = vpop.permute.xlu0 %5524  ;;  %v5699_v23 = vsel %vm12709_vm15, %v11366_v39, %v11422_v61  ;;  %v5705_v47 = vsel %vm12710_vm10, %v11422_v61, %v11336_v40  ;;  %v5398_v28 = vmul.f32 %v12711_v58, %v5366_v11  ;;  %v5451_v50 = vsel %vm1613_vm13, %v12666_v19, %v11430_v48  ;;  %v12712_v61 = vld [vmem:[#allocation102_spill] sm:$0xff]  ;;  %v12725_v58 = vld [vmem:[#allocation7_spill] sm:$0xff]  ;;  %vm12733_vm3 = vmmov %vm12727_vm1 }
 0x75c   :  { %v5449_v14 = vsel %vm1613_vm13, %v11430_v48, %v5446_v46  ;;  %v5455_v39 = vsel %vm1613_vm13, %v5446_v46, %v12667_v44  ;;  %v5262_v24 = vadd.f32 %v5254_v13, %v5179_v63  ;;  %v5343_v5 = vadd.f32 %v5335_v43, %v11451_v36  ;;  %v12714_v46 = vld [vmem:[#allocation117_spill] sm:$0xff]  ;;  %v12715_v36 = vld [vmem:[#allocation24_spill] sm:$0xff]  ;;  %vm12717_vm13 = vmmov %vm12688_vm2 }
 0x75d   :  { %v11583_v40 = vadd.f32 %v5753_v8, %v11327_v33  ;;  %v5399_v37 = vmul.f32 %v12712_v61, %v5372_v21  ;;  %v5757_v31 = vadd.f32 %v5749_v12, %v5674_v52  ;;  %v5734_v1 = vmul.f32 %v11466_v3, %v5699_v23  ;;  %v12716_v33 = vld [vmem:[#allocation23_spill] sm:$0xff]  ;;  %v12724_v23 = vld [vmem:[#allocation120_spill] sm:$0xff]  ;;  %v12730_v61 = vld [vmem:[#allocation113_spill] sm:$0xff] }
 0x75e   :  { %v5735_v19 = vmul.f32 %v11469_v6, %v5705_v47  ;;  %v5534_v48 = vsel %vm12713_vm14, %v12668_v62, %v11508_v18  ;;  %v5344_v44 = vadd.f32 %v5336_v38, %v5261_v9  ;;  %v5480_v20 = vmul.f32 %v12714_v46, %v5451_v50  ;;  %vm12742_vm2 = vmmov %vm12701_vm8 }
 0x75f   :  { %v5772_v45 = vpop.permute.xlu1 %5771  ;;  %v5529_v25 = vpop.permute.xlu0 %5528  ;;  %v5481_v54 = vmul.f32 %v12715_v36, %v5449_v14  ;;  %v5482_v51 = vmul.f32 %v12716_v33, %v5455_v39  ;;  %v5345_v60 = vadd.f32 %v5337_v15, %v5262_v24  ;;  %v5762_v4 = vadd.f32 %v5754_v0, %v11329_v2  ;;  %v12719_v2 = vld [vmem:[#allocation25_spill] sm:$0xff]  ;;  %v12729_v24 = vld [vmem:[#allocation119_spill] sm:$0xff]  ;;  %v12734_v36 = vld [vmem:[#allocation116_spill] sm:$0xff] }
 0x760   :  { %v5426_v35 = vadd.f32 %v5418_v42, %v5343_v5  ;;  %v5419_v63 = vmul.f32 %v12678_v32, %v5398_v28  ;;  %v5420_v13 = vmul.f32 %v12678_v32, %v5399_v37  ;;  %v5563_v43 = vmul.f32 %v11221_v41, %v5534_v48  ;;  %v12721_v41 = vld [vmem:[#allocation90_spill] sm:$0xff]  ;;  %v12723_v42 = vld [vmem:[#allocation111_spill] sm:$0xff]  ;;  %v12728_v14 = vld [vmem:[#allocation121_spill] sm:$0xff] }
 0x761   :  { %v5786_v62 = vsel %vm12717_vm13, %v11500_v55, %v5772_v45  ;;  %v5532_v9 = vsel %vm12718_vm11, %v11508_v18, %v5529_v25  ;;  %v5755_v8 = vmul.f32 %v12708_v53, %v5734_v1  ;;  %v5756_v38 = vmul.f32 %v12708_v53, %v5735_v19  ;;  %v12731_v37 = vld [vmem:[#allocation110_spill] sm:$0xff]  ;;  %vm12743_vm12 = vmmov %vm12742_vm2 }
 0x762   :  { %v5538_v11 = vsel %vm12720_vm0, %v5529_v25, %v12719_v2  ;;  %v11612_v32 = vadd.f32 %v5832_v26, %v5757_v31  ;;  %v5501_v52 = vmul.f32 %v12721_v41, %v5480_v20  ;;  %v5502_v12 = vmul.f32 %v12721_v41, %v5481_v54  ;;  %v12732_v1 = vld [vmem:[#allocation114_spill] sm:$0xff]  ;;  %vm12746_vm9 = vmmov %vm12742_vm2 }
 0x763   :  { %v5776_v27 = vpop.permute.xlu1 %5775  ;;  %v5608_v22 = vpop.permute.xlu0 %5607  ;;  %v5503_v21 = vmul.f32 %v12721_v41, %v5482_v51  ;;  %v5815_v53 = vmul.f32 %v12723_v42, %v5786_v62  ;;  %v5564_v47 = vmul.f32 %v12724_v23, %v5532_v9  ;;  %v5427_v28 = vadd.f32 %v5419_v63, %v5344_v44  ;;  %v12735_v44 = vld [vmem:[#allocation112_spill] sm:$0xff]  ;;  %v12741_v41 = vld [vmem:[#allocation103_spill] sm:$0xff]  ;;  %v12745_v23 = vld [vmem:[#allocation10_spill] sm:$0xff] }
 0x764   :  { %v5784_v18 = vsel %vm12722_vm7, %v5772_v45, %v5776_v27  ;;  %v5617_v25 = vsel %vm12726_vm6, %v12725_v58, %v5608_v22  ;;  %v5428_v50 = vadd.f32 %v5420_v13, %v5345_v60  ;;  %v5584_v39 = vmul.f32 %v12728_v14, %v5563_v43  ;;  %v12736_v13 = vld [vmem:[#allocation14_spill] sm:$0xff]  ;;  %vm12750_vm15 = vmmov %vm12727_vm1 }
 0x765   :  { %v5565_v5 = vmul.f32 %v12729_v24, %v5538_v11  ;;  %v5763_v45 = vadd.f32 %v5755_v8, %v12730_v61  ;;  %v5764_v31 = vadd.f32 %v5756_v38, %v12731_v37  ;;  %v5816_v19 = vmul.f32 %v12732_v1, %v5784_v18  ;;  %v12740_v11 = vld [vmem:[#allocation56_spill] sm:$0xff]  ;;  %v12744_v18 = vld [vmem:[#allocation31_spill] sm:$0xff]  ;;  %vm12753_vm14 = vmmov %vm12727_vm1 }
 0x766   :  { %v5509_v20 = vadd.f32 %v5501_v52, %v5426_v35  ;;  %v5510_v60 = vadd.f32 %v5502_v12, %v5427_v28  ;;  %v5511_v63 = vadd.f32 %v5503_v21, %v5428_v50  ;;  %v5836_v43 = vmul.f32 %v12736_v13, %v5815_v53  ;;  %v12738_v35 = vld [vmem:[#allocation100_spill] sm:$0xff]  ;;  %v12748_v28 = vld [vmem:[#allocation118_spill] sm:$0xff]  ;;  %vm12755_vm13 = vmmov %vm12727_vm1 }
 0x767   :  { %v5780_v16 = vpop.permute.xlu1 %5779  ;;  %v5612_v17 = vpop.permute.xlu0 %5611  ;;  %v5585_v62 = vmul.f32 %v12728_v14, %v5564_v47  ;;  %v5586_v8 = vmul.f32 %v12728_v14, %v5565_v5  ;;  %v5837_v2 = vmul.f32 %v12736_v13, %v5816_v19  ;;  %vm12747_vm8 = vcmp.lt.s32.totalorder %v7583_v10, 94  ;;  %v12749_v14 = vld [vmem:[#allocation51_spill] sm:$0xff] }
 0x768   :  { %v5782_v26 = vsel %vm12727_vm1, %v5776_v27, %v5780_v16  ;;  %v5788_v48 = vsel %vm12733_vm3, %v5780_v16, %v11500_v55  ;;  %v5646_v27 = vmul.f32 %v12734_v36, %v5617_v25  ;;  %v5615_v33 = vsel %vm12675_vm4, %v5608_v22, %v5612_v17  ;;  %v12737_v55 = vld [vmem:[#allocation36_spill] sm:$0xff]  ;;  %vm12752_vm10 = vmmov %vm12747_vm8 }
 0x769   :  { %v5817_v54 = vmul.f32 %v12735_v44, %v5782_v26  ;;  %v5592_v9 = vadd.f32 %v5584_v39, %v5509_v20  ;;  %v5818_v16 = vmul.f32 %v12737_v55, %v5788_v48  ;;  %v5621_v38 = vsel %vm12739_vm5, %v5612_v17, %v12738_v35  ;;  %vm12756_vm11 = vmmov %vm12747_vm8 }
 0x76a   :  { %v5647_v22 = vmul.f32 %v12740_v11, %v5615_v33  ;;  %v5667_v42 = vmul.f32 %v12744_v18, %v5646_v27  ;;  %v5844_v25 = vadd.f32 %v5836_v43, %v11583_v40  ;;  %v5593_v26 = vadd.f32 %v5585_v62, %v5510_v60  ;;  %v12751_v40 = vld [vmem:[#allocation109_spill] sm:$0xff]  ;;  %vm12757_vm0 = vmmov %vm12747_vm8 }
 0x76b   :  { %v11610_v15 = vpop.permute.xlu1 %5912  ;;  %v5691_v0 = vpop.permute.xlu0 %5690  ;;  %v5838_v53 = vmul.f32 %v12736_v13, %v5817_v54  ;;  %v5648_v50 = vmul.f32 %v12748_v28, %v5621_v38  ;;  %v5594_v39 = vadd.f32 %v5586_v8, %v5511_v63  ;;  %v5839_v24 = vmul.f32 %v12736_v13, %v5818_v16  ;;  %v12754_v63 = vld [vmem:[#allocation122_spill] sm:$0xff]  ;;  %vm12759_vm7 = vmmov %vm12757_vm0 }
 0x76c   :  { %v5700_v52 = vsel %vm12742_vm2, %v12741_v41, %v5691_v0  ;;  %v5845_v37 = vadd.f32 %v5837_v2, %v5762_v4  ;;  %v5668_v19 = vmul.f32 %v12744_v18, %v5647_v22  ;;  %v5675_v27 = vadd.f32 %v5667_v42, %v5592_v9  ;;  %vm12761_vm6 = vmmov %vm12757_vm0 }
 0x76d   :  { %v5729_v5 = vmul.f32 %v11459_v29, %v5700_v52  ;;  %v5846_v54 = vadd.f32 %v5838_v53, %v5763_v45  ;;  %v5669_v29 = vmul.f32 %v12744_v18, %v5648_v50  ;;  %v5847_v13 = vadd.f32 %v5839_v24, %v5764_v31  ;;  %v12758_v52 = vld [vmem:[#allocation44_spill] sm:$0xff]  ;;  %vm12763_vm1 = vmmov %vm12757_vm0 }
 0x76e   :  { %v5676_v62 = vadd.f32 %v5668_v19, %v5593_v26 }
 0x76f   :  { %v5851_v46 = vpop.permute.xlu1 %5850  ;;  %v5695_v51 = vpop.permute.xlu0 %5694  ;;  %v5750_v45 = vmul.f32 %v11389_v59, %v5729_v5 }
 0x770   :  { %v5698_v12 = vsel %vm12743_vm12, %v5691_v0, %v5695_v51  ;;  %v5704_v17 = vsel %vm12746_vm9, %v5695_v51, %v12745_v23 }
 0x771   :  { %v5730_v61 = vmul.f32 %v11466_v3, %v5698_v12  ;;  %v5731_v48 = vmul.f32 %v11469_v6, %v5704_v17  ;;  %v5758_v12 = vadd.f32 %v5750_v45, %v5675_v27 }
 0x773   :  { %v5855_v21 = vpop.permute.xlu1 %5854  ;;  %v5774_v58 = vpop.permute.xlu0 %5773  ;;  %v5752_v9 = vmul.f32 %v11389_v59, %v5731_v48 }
 0x774   :  { %v5869_v47 = vsel %vm12747_vm8, %v5851_v46, %v5855_v21  ;;  %v5783_v0 = vsel %vm12750_vm15, %v12749_v14, %v5774_v58 }
 0x775   :  { %v5898_v20 = vmul.f32 %v12751_v40, %v5869_v47  ;;  %v5812_v33 = vmul.f32 %v12732_v1, %v5783_v0  ;;  %v5751_v1 = vmul.f32 %v11389_v59, %v5730_v61 }
 0x777   :  { %v5859_v36 = vpop.permute.xlu1 %5858  ;;  %v5778_v60 = vpop.permute.xlu0 %5777  ;;  %v5919_v8 = vmul.f32 %v11610_v15, %v5898_v20  ;;  %v5833_v38 = vmul.f32 %v12702_v56, %v5812_v33 }
 0x778   :  { %v5867_v51 = vsel %vm12752_vm10, %v5855_v21, %v5859_v36  ;;  %v5781_v4 = vsel %vm12753_vm14, %v5774_v58, %v5778_v60  ;;  %v5787_v6 = vsel %vm12755_vm13, %v5778_v60, %v12754_v63  ;;  %v5759_v21 = vadd.f32 %v5751_v1, %v5676_v62 }
 0x779   :  { %v5899_v3 = vmul.f32 %v11530_v49, %v5867_v51  ;;  %v5813_v43 = vmul.f32 %v12735_v44, %v5781_v4  ;;  %v5814_v16 = vmul.f32 %v12737_v55, %v5787_v6  ;;  %v5677_v44 = vadd.f32 %v5669_v29, %v5594_v39  ;;  %v12760_v39 = vld [vmem:[#allocation58_spill] sm:$0xff] }
 0x77a   :  { %v5841_v58 = vadd.f32 %v5833_v38, %v5758_v12  ;;  %v5927_v14 = vadd.f32 %v5919_v8, %v5844_v25  ;;  %v5923_v38 = vadd.f32 %v11543_v34, %v11612_v32 }
 0x77b   :  { %v5863_v35 = vpop.permute.xlu1 %5862  ;;  %v5920_v2 = vmul.f32 %v11610_v15, %v5899_v3  ;;  %v5857_v22 = vpop.permute.xlu0 %5856  ;;  %v5834_v18 = vmul.f32 %v12702_v56, %v5813_v43  ;;  %v5760_v53 = vadd.f32 %v5752_v9, %v5677_v44  ;;  %v5835_v23 = vmul.f32 %v12702_v56, %v5814_v16  ;;  %v12762_v56 = vld [vmem:[#allocation45_spill] sm:$0xff] }
 0x77c   :  { %v5865_v31 = vsel %vm12756_vm11, %v5859_v36, %v5863_v35  ;;  %v5871_v11 = vsel %vm12757_vm0, %v5863_v35, %v5851_v46  ;;  %v5866_v55 = vsel %vm12759_vm7, %v12758_v52, %v5857_v22 }
 0x77d   :  { %v5900_v41 = vmul.f32 %v11536_v7, %v5865_v31  ;;  %v5901_v59 = vmul.f32 %v11540_v30, %v5871_v11  ;;  %v5895_v42 = vmul.f32 %v11530_v49, %v5866_v55  ;;  %v5928_v0 = vadd.f32 %v5920_v2, %v5845_v37 }
 0x77e   :  { %v5842_v61 = vadd.f32 %v5834_v18, %v5759_v21  ;;  %v5843_v25 = vadd.f32 %v5835_v23, %v5760_v53 }
 0x77f   :  { %v5921_v46 = vmul.f32 %v11610_v15, %v5900_v41  ;;  %v5922_v17 = vmul.f32 %v11610_v15, %v5901_v59  ;;  %v11702_v47 = vpop.permute.xlu1 %5978  ;;  %v5916_v26 = vmul.f32 %v12707_v57, %v5895_v42  ;;  %v5861_v50 = vpop.permute.xlu0 %5860 }
 0x780   :  { %v5864_v49 = vsel %vm12761_vm6, %v5857_v22, %v5861_v50  ;;  %v5870_v5 = vsel %vm12763_vm1, %v5861_v50, %v12762_v56 }
 0x781   :  { %v5929_v15 = vadd.f32 %v5921_v46, %v5846_v54  ;;  %v5896_v48 = vmul.f32 %v11536_v7, %v5864_v49  ;;  %v5897_v40 = vmul.f32 %v11540_v30, %v5870_v5  ;;  %v5930_v20 = vadd.f32 %v5922_v17, %v5847_v13 }
 0x782   :  { %v6207_v28 = vpop.f32.mrf.mxu0  ;;  %v5924_v33 = vadd.f32 %v5916_v26, %v5841_v58 }
 0x783   :  { %v11706_v24 = vadd.f32 %v6207_v28, %v12760_v39  ;;  %v6325_v27 = vpop.permute.xlu1 %6324  ;;  %v5917_v51 = vmul.f32 %v12707_v57, %v5896_v48  ;;  %v5918_v10 = vmul.f32 %v12707_v57, %v5897_v40 }
 0x784   :  { %v6209_v19 = vpop.f32.mrf.mxu0  ;;  %v11721_v54 = vadd.f32 %v6325_v27, %v5927_v14  ;;  %v11723_v60 = vadd.f32 %v6325_v27, %v5928_v0  ;;  %v6250_v29 = vpop.f32.mrf.mxu1  ;;  %v11726_v3 = vadd.f32 %v6325_v27, %v5929_v15  ;;  %v11728_v4 = vadd.f32 %v6325_v27, %v5930_v20 }
 0x785   :  { %v6847_v37 = vmul.f32 -1.442695, %v11706_v24  ;;  %v11717_v36 = vadd.f32 %v6209_v19, %v12760_v39  ;;  %v11736_v57 = vadd.f32 %v6250_v29, %v12760_v39  ;;  %v5925_v11 = vadd.f32 %v5917_v51, %v5842_v61 }
 0x786   :  { %v6211_v7 = vpop.f32.mrf.mxu0  ;;  %v6859_v63 = vmul.f32 -1.442695, %v11721_v54  ;;  %v6860_v6 = vmul.f32 -1.442695, %v11723_v60  ;;  %v6252_v1 = vpop.f32.mrf.mxu1  ;;  %v6861_v43 = vmul.f32 -1.442695, %v11726_v3  ;;  %v5926_v22 = vadd.f32 %v5918_v10, %v5843_v25 }
 0x787   :  { %7257 = vpow2.f32 %v6847_v37  ;;  %v6848_v30 = vmul.f32 -1.442695, %v11717_v36  ;;  %v11733_v13 = vadd.f32 %v6211_v7, %v11702_v47  ;;  %v6862_v62 = vmul.f32 -1.442695, %v11728_v4  ;;  %v6320_v8 = vpop.permute.xlu0 %6319 }
 0x788   :  { %v6213_v45 = vpop.f32.mrf.mxu0  ;;  %v11745_v35 = vadd.f32 %v6252_v1, %v12760_v39  ;;  %v6254_v2 = vpop.f32.mrf.mxu1  ;;  %v6849_v31 = vmul.f32 -1.442695, %v11736_v57  ;;  %v11751_v41 = vadd.f32 %v6320_v8, %v5923_v38  ;;  %v11753_v59 = vadd.f32 %v6320_v8, %v5924_v33 }
 0x789   :  { %7259 = vpow2.f32 %v6848_v30  ;;  %v11741_v9 = vadd.f32 %v6213_v45, %v11702_v47  ;;  %v6851_v16 = vmul.f32 -1.442695, %v11733_v13  ;;  %v11756_v55 = vadd.f32 %v6320_v8, %v5925_v11 }
 0x78a   :  { %7261 = vpow2.f32 %v6859_v63  ;;  %v6850_v52 = vmul.f32 -1.442695, %v11745_v35  ;;  %v11758_v12 = vadd.f32 %v6320_v8, %v5926_v22  ;;  %v6256_v34 = vpop.f32.mrf.mxu1  ;;  %v6855_v32 = vmul.f32 -1.442695, %v11751_v41 }
 0x78b   :  { %7263 = vpow2.f32 %v6860_v6  ;;  %v6852_v44 = vmul.f32 -1.442695, %v11741_v9  ;;  %v11762_v21 = vadd.f32 %v6254_v2, %v11702_v47  ;;  %v6856_v18 = vmul.f32 -1.442695, %v11753_v59 }
 0x78c   :  { %7265 = vpow2.f32 %v6861_v43  ;;  %v6857_v42 = vmul.f32 -1.442695, %v11756_v55  ;;  %v11767_v53 = vadd.f32 %v6256_v34, %v11702_v47  ;;  %v6858_v23 = vmul.f32 -1.442695, %v11758_v12 }
 0x78d   :  { %7267 = vpow2.f32 %v6862_v62  ;;  %v6853_v46 = vmul.f32 -1.442695, %v11762_v21 }
 0x78e   :  { %7269 = vpow2.f32 %v6851_v16  ;;  %v6854_v58 = vmul.f32 -1.442695, %v11767_v53 }
 0x78f   :  { %7271 = vpow2.f32 %v6849_v31 }
 0x790   :  { %7273 = vpow2.f32 %v6852_v44 }
 0x791   :  { %7275 = vpow2.f32 %v6850_v52 }
 0x792   :  { %7277 = vpow2.f32 %v6855_v32 }
 0x793   :  { %7279 = vpow2.f32 %v6856_v18 }
 0x794   :  { %v7258_v17 = vpop.eup %7257  ;;  %7281 = vpow2.f32 %v6857_v42 }
 0x795   :  { %v6283_v26 = vadd.f32 1.0, %v7258_v17  ;;  %7283 = vpow2.f32 %v6858_v23 }
 0x796   :  { %v7260_v28 = vpop.eup %7259  ;;  %7285 = vpow2.f32 %v6853_v46 }
 0x797   :  { %v7262_v50 = vpop.eup %7261  ;;  %7287 = vrcp.f32 %v6283_v26  ;;  %v6284_v14 = vadd.f32 1.0, %v7260_v28 }
 0x798   :  { %v7264_v47 = vpop.eup %7263  ;;  %v6363_v0 = vadd.f32 1.0, %v7262_v50  ;;  %7289 = vpow2.f32 %v6854_v58 }
 0x799   :  { %v7266_v39 = vpop.eup %7265  ;;  %7291 = vrcp.f32 %v6284_v14  ;;  %v6364_v49 = vadd.f32 1.0, %v7264_v47 }
 0x79a   :  { %v7268_v56 = vpop.eup %7267  ;;  %v6365_v5 = vadd.f32 1.0, %v7266_v39  ;;  %7293 = vrcp.f32 %v6363_v0 }
 0x79b   :  { %v7270_v15 = vpop.eup %7269  ;;  %v6366_v61 = vadd.f32 1.0, %v7268_v56  ;;  %7295 = vrcp.f32 %v6364_v49 }
 0x79c   :  { %v7272_v19 = vpop.eup %7271  ;;  %7297 = vrcp.f32 %v6365_v5  ;;  %v6287_v48 = vadd.f32 1.0, %v7270_v15 }
 0x79d   :  { %v7274_v40 = vpop.eup %7273  ;;  %7299 = vrcp.f32 %v6366_v61  ;;  %v6285_v20 = vadd.f32 1.0, %v7272_v19 }
 0x79e   :  { %v7276_v25 = vpop.eup %7275  ;;  %7301 = vrcp.f32 %v6287_v48  ;;  %v6288_v37 = vadd.f32 1.0, %v7274_v40 }
 0x79f   :  { %v7278_v27 = vpop.eup %7277  ;;  %7303 = vrcp.f32 %v6285_v20  ;;  %v6286_v33 = vadd.f32 1.0, %v7276_v25 }
 0x7a0   :  { %v7280_v51 = vpop.eup %7279  ;;  %7305 = vrcp.f32 %v6288_v37  ;;  %v6359_v10 = vadd.f32 1.0, %v7278_v27 }
 0x7a1   :  { %v7282_v7 = vpop.eup %7281  ;;  %7307 = vrcp.f32 %v6286_v33  ;;  %v6360_v29 = vadd.f32 1.0, %v7280_v51 }
 0x7a2   :  { %v7284_v30 = vpop.eup %7283  ;;  %v6361_v63 = vadd.f32 1.0, %v7282_v7  ;;  %7309 = vrcp.f32 %v6359_v10 }
 0x7a3   :  { %v7286_v6 = vpop.eup %7285  ;;  %v6362_v45 = vadd.f32 1.0, %v7284_v30  ;;  %7311 = vrcp.f32 %v6360_v29 }
 0x7a4   :  { %v7288_v1 = vpop.eup %7287  ;;  %7313 = vrcp.f32 %v6361_v63  ;;  %v6289_v43 = vadd.f32 1.0, %v7286_v6 }
 0x7a5   :  { %v7290_v62 = vpop.eup %7289  ;;  %v6307_v8 = vmul.f32 %v7288_v1, %v11706_v24  ;;  %7315 = vrcp.f32 %v6362_v45 }
 0x7a6   :  { %v7292_v16 = vpop.eup %7291  ;;  %7317 = vrcp.f32 %v6289_v43  ;;  %v6290_v38 = vadd.f32 1.0, %v7290_v62 }
 0x7a7   :  { %v7294_v2 = vpop.eup %7293  ;;  %6391 = vst [vmem:[%s11850_s14] sm:$0xff] %v6307_v8  ;;  %v6308_v31 = vmul.f32 %v7292_v16, %v11717_v36 }
 0x7a8   :  { %v7296_v11 = vpop.eup %7295  ;;  %v6387_v22 = vmul.f32 %v7294_v2, %v11721_v54  ;;  %7319 = vrcp.f32 %v6290_v38 }
 0x7a9   :  { %v7298_v44 = vpop.eup %7297  ;;  %6392 = vst [vmem:[%s11850_s14 + $0x8] sm:$0xff] %v6308_v31  ;;  %v6388_v24 = vmul.f32 %v7296_v11, %v11723_v60 }
 0x7aa   :  { %v7300_v52 = vpop.eup %7299  ;;  %v6389_v34 = vmul.f32 %v7298_v44, %v11726_v3  ;;  %6403 = vst [vmem:[%s11850_s14 + $0x60] sm:$0xff] %v6387_v22 }
 0x7ab   :  { %v7302_v32 = vpop.eup %7301  ;;  %v6390_v36 = vmul.f32 %v7300_v52, %v11728_v4  ;;  %6404 = vst [vmem:[%s11850_s14 + $0x68] sm:$0xff] %v6388_v24 }
 0x7ac   :  { %v7304_v54 = vpop.eup %7303  ;;  %6405 = vst [vmem:[%s11850_s14 + $0x70] sm:$0xff] %v6389_v34  ;;  %v6311_v60 = vmul.f32 %v7302_v32, %v11733_v13 }
 0x7ad   :  { %v7306_v18 = vpop.eup %7305  ;;  %6406 = vst [vmem:[%s11850_s14 + $0x78] sm:$0xff] %v6390_v36  ;;  %v6309_v3 = vmul.f32 %v7304_v54, %v11736_v57 }
 0x7ae   :  { %v7308_v42 = vpop.eup %7307  ;;  %6395 = vst [vmem:[%s11850_s14 + $0x20] sm:$0xff] %v6311_v60  ;;  %v6312_v4 = vmul.f32 %v7306_v18, %v11741_v9 }
 0x7af   :  { %v7310_v23 = vpop.eup %7309  ;;  %6393 = vst [vmem:[%s11850_s14 + $0x10] sm:$0xff] %v6309_v3  ;;  %v6310_v13 = vmul.f32 %v7308_v42, %v11745_v35 }
 0x7b0   :  { %v7312_v46 = vpop.eup %7311  ;;  %6396 = vst [vmem:[%s11850_s14 + $0x28] sm:$0xff] %v6312_v4  ;;  %v6383_v57 = vmul.f32 %v7310_v23, %v11751_v41 }
 0x7b1   :  { %v7314_v17 = vpop.eup %7313  ;;  %6394 = vst [vmem:[%s11850_s14 + $0x18] sm:$0xff] %v6310_v13  ;;  %v6384_v9 = vmul.f32 %v7312_v46, %v11753_v59 }
 0x7b2   :  { %v7316_v58 = vpop.eup %7315  ;;  %v6385_v26 = vmul.f32 %v7314_v17, %v11756_v55  ;;  %6399 = vst [vmem:[%s11850_s14 + $0x40] sm:$0xff] %v6383_v57 }
 0x7b3   :  { %v7318_v35 = vpop.eup %7317  ;;  %v6386_v28 = vmul.f32 %v7316_v58, %v11758_v12  ;;  %6400 = vst [vmem:[%s11850_s14 + $0x48] sm:$0xff] %v6384_v9 }
 0x7b4   :  { %6401 = vst [vmem:[%s11850_s14 + $0x50] sm:$0xff] %v6385_v26  ;;  %v6313_v41 = vmul.f32 %v7318_v35, %v11762_v21 }
 0x7b5   :  { %v7320_v59 = vpop.eup %7319  ;;  %6402 = vst [vmem:[%s11850_s14 + $0x58] sm:$0xff] %v6386_v28 }
 0x7b6   :  { %6397 = vst [vmem:[%s11850_s14 + $0x30] sm:$0xff] %v6313_v41  ;;  %v6314_v55 = vmul.f32 %v7320_v59, %v11767_v53 }
 0x7b8   :  { %6398 = vst [vmem:[%s11850_s14 + $0x38] sm:$0xff] %v6314_v55 }

</bundles_post_ra>
